<compile_context>
chip_gen: v7x
topology: tpu7x:2x2x1
jax: 0.10.0
libtpu: 0.0.40
codegen_flags: <defaults>
</compile_context>

<pallas_src>
import functools
import math

import jax
import jax.numpy as jnp
from jax import lax
from jax.experimental import pallas as pl
from jax.experimental.pallas import tpu as pltpu


# --------------------------------------------------------------------------
# GroupNorm helpers (run inside the kernel; no in-kernel reshapes).
# --------------------------------------------------------------------------
def _group_norm_rows(y, onehot_cg, onehot_gc, gamma, beta, *, inv_group_size, eps):
    """GroupNorm over the channel (last) axis of a (rows, C) tile."""
    r = y.shape[0]
    grp = jnp.dot(jnp.concatenate([y, y * y], axis=0), onehot_cg,
                  preferred_element_type=jnp.float32)                 # (2R, G)
    mean = grp[:r] * inv_group_size
    ex2 = grp[r:] * inv_group_size
    var = jnp.maximum(ex2 - mean * mean, 0.0)                         # clamp >= 0
    inv_std = lax.rsqrt(var + eps)                                    # EUP
    sc = jnp.dot(jnp.concatenate([inv_std, mean * inv_std], axis=0), onehot_gc,
                 preferred_element_type=jnp.float32)                  # (2R, C)
    return (y * sc[:r] - sc[r:]) * gamma + beta


def _group_norm_cols(y, onehot_gc, onehot_cg, gamma_col, beta_col, *, inv_group_size, eps):
    """GroupNorm over the channel (first / sublane) axis of a (C, cols) tile."""
    n = y.shape[1]
    grp = jnp.dot(onehot_gc, jnp.concatenate([y, y * y], axis=1),
                  preferred_element_type=jnp.float32)                 # (G, 2N)
    mean = grp[:, :n] * inv_group_size
    ex2 = grp[:, n:] * inv_group_size
    var = jnp.maximum(ex2 - mean * mean, 0.0)
    inv_std = lax.rsqrt(var + eps)
    sc = jnp.dot(onehot_cg, jnp.concatenate([inv_std, mean * inv_std], axis=1),
                 preferred_element_type=jnp.float32)                  # (C, 2N)
    return (y * sc[:, :n] - sc[:, n:]) * gamma_col + beta_col


# --------------------------------------------------------------------------
# Fused NetVLADLoupe kernel: assignment -> vlad -> norms -> hidden -> gating.
# --------------------------------------------------------------------------
def _netvlad_kernel(x_ref, cwt_ref, cw2t_ref, oh1_gk_ref, oh1_kg_ref, gn1g_ref, gn1b_ref,
                    hwp_ref, gw_ref, oh2_og_ref, oh2_go_ref, bn2g_ref, bn2b_ref,
                    gngg_ref, gngb_ref, o_ref,
                    *, tile_b, n_clusters, inv_gsz1, inv_gsz2, eps):
    cwt = cwt_ref[...]        # (K, F)  cluster weights, pre-transposed
    cw2t = cw2t_ref[...]      # (K, F)  cluster weights 2, pre-transposed
    oh1_gk = oh1_gk_ref[...]  # (G1, K)
    oh1_kg = oh1_kg_ref[...]  # (K, G1)
    gn1_g = gn1g_ref[...]     # (K, 1)
    gn1_b = gn1b_ref[...]     # (K, 1)

    rows = []
    inv_gs = []
    for t in range(tile_b):   # static unroll; per-element chains are independent
        xf = x_ref[t]                                                  # (F, N) native layout
        # soft assignment, kept (K, N): matmul -> GroupNorm(4, K) -> softmax over K
        act = jnp.dot(cwt, xf, preferred_element_type=jnp.float32)     # (K, N)
        act = _group_norm_cols(act, oh1_gk, oh1_kg, gn1_g, gn1_b,
                               inv_group_size=inv_gsz1, eps=eps)
        act = jnp.exp(act - jnp.max(act, axis=0, keepdims=True))
        act = act * pl.reciprocal(jnp.sum(act, axis=0, keepdims=True), approx=False)

        a_col = jnp.sum(act, axis=1, keepdims=True)                    # (K, 1)
        # vlad (K, F) = act @ x[b]^T  (A @ B^T contraction over samples) - a * Wc2^T
        vlad = lax.dot_general(act, xf, (((1,), (1,)), ((), ())),
                               preferred_element_type=jnp.float32)     # (K, F)
        vlad = vlad - a_col * cw2t
        # intra-normalization over the feature (lane) axis
        vlad = vlad * lax.rsqrt(
            jnp.maximum(jnp.sum(vlad * vlad, axis=1, keepdims=True), 1e-24))
        # global L2 of the flattened descriptor; scalar, applied after hidden matmul
        gsq = jnp.sum(jnp.sum(vlad * vlad, axis=1, keepdims=True),
                      axis=0, keepdims=True)                           # (1, 1)
        inv_gs.append(lax.rsqrt(jnp.maximum(gsq, 1e-24)))
        # flatten (K, F) -> (1, K*F) in k*F+f order (hidden weights permuted to match)
        rows.append(jnp.concatenate([vlad[k:k + 1, :] for k in range(n_clusters)],
                                    axis=1))

    v_flat = jnp.concatenate(rows, axis=0)                             # (TB, K*F)
    inv_g = jnp.concatenate(inv_gs, axis=0)                            # (TB, 1)

    oh2_og = oh2_og_ref[...]
    oh2_go = oh2_go_ref[...]

    hidden = jnp.dot(v_flat, hwp_ref[...], preferred_element_type=jnp.float32) * inv_g
    hidden = _group_norm_rows(hidden, oh2_og, oh2_go, bn2g_ref[...], bn2b_ref[...],
                              inv_group_size=inv_gsz2, eps=eps)
    gates = jnp.dot(hidden, gw_ref[...], preferred_element_type=jnp.float32)
    gates = _group_norm_rows(gates, oh2_og, oh2_go, gngg_ref[...], gngb_ref[...],
                             inv_group_size=inv_gsz2, eps=eps)
    o_ref[...] = (hidden * jax.nn.sigmoid(gates)).astype(o_ref.dtype)


# --------------------------------------------------------------------------
# Wrapper
# --------------------------------------------------------------------------
def _group_onehot(num_channels, num_groups):
    gsz = num_channels // num_groups
    ch = jnp.arange(num_channels)
    return (ch[:, None] // gsz == jnp.arange(num_groups)[None, :]).astype(jnp.float32)


def _num_tensorcores():
    """Best-effort TensorCore count per device (2 on v7x / megacore parts)."""
    try:
        dev = jax.devices()[0]
        if dev.platform != "tpu":
            return 1
        kind = str(getattr(dev, "device_kind", "")).lower()
        return 2 if any(tag in kind for tag in ("v7", "v5p", "v4")) else 1
    except Exception:
        return 1


def _pick_tile_b(batch, requested, num_cores):
    tb = max(1, min(requested, batch))
    while batch % tb:                     # largest divisor of batch <= requested
        tb -= 1
    if num_cores > 1 and tb == batch and batch % 2 == 0:
        tb = batch // 2                   # give each TensorCore a grid step
        while batch % tb:
            tb -= 1
    # Layout rule: the (tb, O) output block needs tb % 8 == 0 unless tb == batch.
    if tb != batch and tb % 8 != 0:
        tb = batch
    return tb


def netvlad_loupe(x, cluster_w, cluster_w2, hidden_w, gating_w,
                  gn1_gamma, gn1_beta, bn2_gamma, bn2_beta, gng_gamma, gng_beta,
                  *, cluster_groups=4, out_groups=8, eps=1e-5, tile_b=32):
    B, F, N = x.shape
    K = cluster_w.shape[1]
    O = hidden_w.shape[1]
    KF = K * F
    assert cluster_w.shape == (F, K)
    assert cluster_w2.shape[-2:] == (F, K)
    assert hidden_w.shape == (KF, O)
    assert gating_w.shape == (O, O)
    assert K % cluster_groups == 0 and O % out_groups == 0

    x = x.astype(jnp.float32)
    cwt = cluster_w.T.astype(jnp.float32)                                # (K, F)
    cw2t = cluster_w2.reshape(F, K).T.astype(jnp.float32)                # (K, F)
    # hidden1 weights: permute rows from PyTorch's f*K+k order to our k*F+f order.
    hwp = hidden_w.reshape(F, K, O).transpose(1, 0, 2).reshape(KF, O).astype(jnp.float32)
    gw = gating_w.astype(jnp.float32)

    oh1_kg = _group_onehot(K, cluster_groups)                            # (K, G1)
    oh2_og = _group_onehot(O, out_groups)                                # (O, G2)

    gn1_g = gn1_gamma.reshape(K, 1).astype(jnp.float32)
    gn1_b = gn1_beta.reshape(K, 1).astype(jnp.float32)
    bn2_g = bn2_gamma.reshape(1, O).astype(jnp.float32)
    bn2_b = bn2_beta.reshape(1, O).astype(jnp.float32)
    gng_g = gng_gamma.reshape(1, O).astype(jnp.float32)
    gng_b = gng_beta.reshape(1, O).astype(jnp.float32)

    tb = _pick_tile_b(B, tile_b, _num_tensorcores())

    # VMEM footprint estimate (double-buffered tiles + resident weights) + headroom;
    # do NOT claim full physical VMEM (v7x only has 64 MiB per TensorCore).
    est = 4 * (2 * tb * F * N + 2 * tb * O
               + 2 * (KF * O + O * O + 2 * K * F + 2 * K * cluster_groups
                      + 2 * K + 2 * O * out_groups + 4 * O))
    vmem_limit = int(min(max(est + (4 << 20), 8 << 20), 48 << 20))

    kernel = functools.partial(
        _netvlad_kernel,
        tile_b=tb, n_clusters=K,
        inv_gsz1=float(cluster_groups) / float(K),
        inv_gsz2=float(out_groups) / float(O),
        eps=float(eps))

    const = lambda i: (0, 0)
    return pl.pallas_call(
        kernel,
        out_shape=jax.ShapeDtypeStruct((B, O), jnp.float32),
        grid_spec=pltpu.PrefetchScalarGridSpec(
            num_scalar_prefetch=0,
            grid=(B // tb,),
            in_specs=[
                pl.BlockSpec((tb, F, N), lambda i: (i, 0, 0)),   # x, native (B, F, N)
                pl.BlockSpec((K, F), const),                     # cluster weights^T
                pl.BlockSpec((K, F), const),                     # cluster weights2^T
                pl.BlockSpec((cluster_groups, K), const),        # GN(4) one-hot (G, K)
                pl.BlockSpec((K, cluster_groups), const),        # GN(4) one-hot (K, G)
                pl.BlockSpec((K, 1), const),                     # GN(4) gamma
                pl.BlockSpec((K, 1), const),                     # GN(4) beta
                pl.BlockSpec((KF, O), const),                    # hidden weights (permuted)
                pl.BlockSpec((O, O), const),                     # gating weights
                pl.BlockSpec((O, out_groups), const),            # GN(8) one-hot (O, G)
                pl.BlockSpec((out_groups, O), const),            # GN(8) one-hot (G, O)
                pl.BlockSpec((1, O), const),                     # bn2 gamma
                pl.BlockSpec((1, O), const),                     # bn2 beta
                pl.BlockSpec((1, O), const),                     # gating GN gamma
                pl.BlockSpec((1, O), const),                     # gating GN beta
            ],
            out_specs=pl.BlockSpec((tb, O), lambda i: (i, 0)),
        ),
        compiler_params=pltpu.CompilerParams(
            dimension_semantics=("parallel",),
            vmem_limit_bytes=vmem_limit),
    )(x, cwt, cw2t, oh1_kg.T, oh1_kg, gn1_g, gn1_b, hwp, gw,
      oh2_og, oh2_og.T, bn2_g, bn2_b, gng_g, gng_b)


# --------------------------------------------------------------------------
# Pure-JAX reference (mirrors the PyTorch forward exactly).
# --------------------------------------------------------------------------
def _group_norm_ref(y, num_groups, gamma, beta, eps=1e-5):
    r, c = y.shape
    yg = y.reshape(r, num_groups, c // num_groups)
    mean = yg.mean(axis=-1, keepdims=True)
    var = yg.var(axis=-1, keepdims=True)
    yn = ((yg - mean) / jnp.sqrt(var + eps)).reshape(r, c)
    return yn * gamma[None, :] + beta[None, :]


def _reference(x, cluster_w, cluster_w2, hidden_w, gating_w,
               gn1_gamma, gn1_beta, bn2_gamma, bn2_beta, gng_gamma, gng_beta,
               eps=1e-5):
    B, F, N = x.shape
    K = cluster_w.shape[1]
    xt = jnp.transpose(x, (0, 2, 1))                                  # (B, N, F)
    act = jnp.matmul(xt, cluster_w)                                   # (B, N, K)
    act = _group_norm_ref(act.reshape(-1, K), 4, gn1_gamma, gn1_beta, eps)
    act = jax.nn.softmax(act.reshape(B, N, K), axis=-1)
    a = jnp.sum(act, axis=1, keepdims=True) * cluster_w2              # (B, F, K)
    vlad = jnp.matmul(jnp.transpose(act, (0, 2, 1)), xt)              # (B, K, F)
    vlad = jnp.transpose(vlad, (0, 2, 1)) - a                         # (B, F, K)
    vlad = vlad / jnp.maximum(
        jnp.sqrt(jnp.sum(vlad * vlad, axis=1, keepdims=True)), 1e-12)
    vlad = vlad.reshape(B, K * F)
    vlad = vlad / jnp.maximum(
        jnp.sqrt(jnp.sum(vlad * vlad, axis=1, keepdims=True)), 1e-12)
    hidden = _group_norm_ref(jnp.matmul(vlad, hidden_w), 8, bn2_gamma, bn2_beta, eps)
    gates = _group_norm_ref(jnp.matmul(hidden, gating_w), 8, gng_gamma, gng_beta, eps)
    return hidden * jax.nn.sigmoid(gates)


if __name__ == "__main__":
    # Small but lane-friendly shapes: feature_size / output_dim multiples of 128.
    B, F, N, K, O = 16, 128, 32, 16, 128   # batch, feature, max_samples, clusters, out

    key = jax.random.PRNGKey(0)
    ks = jax.random.split(key, 10)
    x = jax.random.normal(ks[0], (B, F, N), dtype=jnp.float32)
    cluster_w = jax.random.normal(ks[1], (F, K), dtype=jnp.float32) / math.sqrt(F)
    cluster_w2 = jax.random.normal(ks[2], (1, F, K), dtype=jnp.float32) / math.sqrt(F)
    hidden_w = jax.random.normal(ks[3], (K * F, O), dtype=jnp.float32) / math.sqrt(F)
    gating_w = jax.random.normal(ks[4], (O, O), dtype=jnp.float32) / math.sqrt(O)
    gn1_gamma = 1.0 + 0.1 * jax.random.normal(ks[5], (K,), dtype=jnp.float32)
    gn1_beta = 0.1 * jax.random.normal(ks[6], (K,), dtype=jnp.float32)
    bn2_gamma = 1.0 + 0.1 * jax.random.normal(ks[7], (O,), dtype=jnp.float32)
    bn2_beta = 0.1 * jax.random.normal(ks[8], (O,), dtype=jnp.float32)
    gng_gamma = jnp.ones((O,), dtype=jnp.float32)
    gng_beta = jnp.zeros((O,), dtype=jnp.float32)

    out = netvlad_loupe(x, cluster_w, cluster_w2, hidden_w, gating_w,
                        gn1_gamma, gn1_beta, bn2_gamma, bn2_beta,
                        gng_gamma, gng_beta)
    out = jax.block_until_ready(out)

    ref = _reference(x, cluster_w, cluster_w2, hidden_w, gating_w,
                     gn1_gamma, gn1_beta, bn2_gamma, bn2_beta,
                     gng_gamma, gng_beta)

    assert out.shape == (B, O)
    assert bool(jnp.all(jnp.isfinite(out)))
    assert jnp.allclose(out, ref, atol=2e-3, rtol=2e-3), "mismatch vs reference"

    print("KERNEL_OK")
</pallas_src>

<mosaic_0001>
module attributes {stable_mosaic.version = 11 : i64} {
  func.func @_netvlad_kernel(%arg0: i32, %arg1: memref<16x128x32xf32, #tpu.memory_space<vmem>>, %arg2: memref<16x128xf32, #tpu.memory_space<vmem>>, %arg3: memref<16x128xf32, #tpu.memory_space<vmem>>, %arg4: memref<4x16xf32, #tpu.memory_space<vmem>>, %arg5: memref<16x4xf32, #tpu.memory_space<vmem>>, %arg6: memref<16x1xf32, #tpu.memory_space<vmem>>, %arg7: memref<16x1xf32, #tpu.memory_space<vmem>>, %arg8: memref<2048x128xf32, #tpu.memory_space<vmem>>, %arg9: memref<128x128xf32, #tpu.memory_space<vmem>>, %arg10: memref<128x8xf32, #tpu.memory_space<vmem>>, %arg11: memref<8x128xf32, #tpu.memory_space<vmem>>, %arg12: memref<1x128xf32, #tpu.memory_space<vmem>>, %arg13: memref<1x128xf32, #tpu.memory_space<vmem>>, %arg14: memref<1x128xf32, #tpu.memory_space<vmem>>, %arg15: memref<1x128xf32, #tpu.memory_space<vmem>>, %arg16: memref<16x128xf32, #tpu.memory_space<vmem>>) attributes {dimension_semantics = [#tpu.dimension_semantics<parallel>], iteration_bounds = array<i64: 1>, scalar_prefetch = 0 : i64, scratch_operands = 0 : i64, tpu.core_type = #tpu.core_type<tc>, window_params = [{transform_indices = @transform_0, window_bounds = array<i64: 16, 128, 32>}, {pipeline_mode = #tpu.pipeline_mode<synchronous>, transform_indices = @transform_1, window_bounds = array<i64: 16, 128>}, {pipeline_mode = #tpu.pipeline_mode<synchronous>, transform_indices = @transform_2, window_bounds = array<i64: 16, 128>}, {pipeline_mode = #tpu.pipeline_mode<synchronous>, transform_indices = @transform_3, window_bounds = array<i64: 4, 16>}, {pipeline_mode = #tpu.pipeline_mode<synchronous>, transform_indices = @transform_4, window_bounds = array<i64: 16, 4>}, {pipeline_mode = #tpu.pipeline_mode<synchronous>, transform_indices = @transform_5, window_bounds = array<i64: 16, 1>}, {pipeline_mode = #tpu.pipeline_mode<synchronous>, transform_indices = @transform_6, window_bounds = array<i64: 16, 1>}, {pipeline_mode = #tpu.pipeline_mode<synchronous>, transform_indices = @transform_7, window_bounds = array<i64: 2048, 128>}, {pipeline_mode = #tpu.pipeline_mode<synchronous>, transform_indices = @transform_8, window_bounds = array<i64: 128, 128>}, {pipeline_mode = #tpu.pipeline_mode<synchronous>, transform_indices = @transform_9, window_bounds = array<i64: 128, 8>}, {pipeline_mode = #tpu.pipeline_mode<synchronous>, transform_indices = @transform_10, window_bounds = array<i64: 8, 128>}, {pipeline_mode = #tpu.pipeline_mode<synchronous>, transform_indices = @transform_11, window_bounds = array<i64: 1, 128>}, {pipeline_mode = #tpu.pipeline_mode<synchronous>, transform_indices = @transform_12, window_bounds = array<i64: 1, 128>}, {pipeline_mode = #tpu.pipeline_mode<synchronous>, transform_indices = @transform_13, window_bounds = array<i64: 1, 128>}, {pipeline_mode = #tpu.pipeline_mode<synchronous>, transform_indices = @transform_14, window_bounds = array<i64: 1, 128>}, {transform_indices = @transform_15, window_bounds = array<i64: 16, 128>}]} {
    %c0 = arith.constant 0 : index
    %c0_0 = arith.constant 0 : index
    %0 = vector.load %arg2[%c0, %c0_0] : memref<16x128xf32, #tpu.memory_space<vmem>>, vector<16x128xf32>
    %c0_1 = arith.constant 0 : index
    %c0_2 = arith.constant 0 : index
    %1 = vector.load %arg3[%c0_1, %c0_2] : memref<16x128xf32, #tpu.memory_space<vmem>>, vector<16x128xf32>
    %c0_3 = arith.constant 0 : index
    %c0_4 = arith.constant 0 : index
    %2 = vector.load %arg4[%c0_3, %c0_4] : memref<4x16xf32, #tpu.memory_space<vmem>>, vector<4x16xf32>
    %c0_5 = arith.constant 0 : index
    %c0_6 = arith.constant 0 : index
    %3 = vector.load %arg5[%c0_5, %c0_6] : memref<16x4xf32, #tpu.memory_space<vmem>>, vector<16x4xf32>
    %c0_7 = arith.constant 0 : index
    %c0_8 = arith.constant 0 : index
    %4 = vector.load %arg6[%c0_7, %c0_8] : memref<16x1xf32, #tpu.memory_space<vmem>>, vector<16x1xf32>
    %c0_9 = arith.constant 0 : index
    %c0_10 = arith.constant 0 : index
    %5 = vector.load %arg7[%c0_9, %c0_10] : memref<16x1xf32, #tpu.memory_space<vmem>>, vector<16x1xf32>
    %c0_11 = arith.constant 0 : index
    %c0_12 = arith.constant 0 : index
    %c0_13 = arith.constant 0 : index
    %6 = vector.load %arg1[%c0_11, %c0_12, %c0_13] : memref<16x128x32xf32, #tpu.memory_space<vmem>>, vector<1x128x32xf32>
    %7 = vector.shape_cast %6 : vector<1x128x32xf32> to vector<128x32xf32>
    %cst = arith.constant dense<0.000000e+00> : vector<16x32xf32>
    %8 = tpu.matmul %0, %7, %cst {dimension_numbers = #tpu.dot_dimension_numbers<[1], [0], [0], [1], [0, 0, 1, 1], [], []>} : vector<16x128xf32>, vector<128x32xf32>, vector<16x32xf32> -> vector<16x32xf32>
    %9 = arith.mulf %8, %8 : vector<16x32xf32>
    %10 = tpu.concatenate %8, %9 in 1 : vector<16x32xf32>, vector<16x32xf32> -> vector<16x64xf32>
    %cst_14 = arith.constant dense<0.000000e+00> : vector<4x64xf32>
    %11 = tpu.matmul %2, %10, %cst_14 {dimension_numbers = #tpu.dot_dimension_numbers<[1], [0], [0], [1], [0, 0, 1, 1], [], []>} : vector<4x16xf32>, vector<16x64xf32>, vector<4x64xf32> -> vector<4x64xf32>
    %12 = vector.extract_strided_slice %11 {offsets = [0, 0], sizes = [4, 32], strides = [1, 1]} : vector<4x64xf32> to vector<4x32xf32>
    %cst_15 = arith.constant 2.500000e-01 : f32
    %13 = vector.broadcast %cst_15 : f32 to vector<4x32xf32>
    %14 = arith.mulf %12, %13 : vector<4x32xf32>
    %15 = vector.extract_strided_slice %11 {offsets = [0, 32], sizes = [4, 32], strides = [1, 1]} : vector<4x64xf32> to vector<4x32xf32>
    %cst_16 = arith.constant 2.500000e-01 : f32
    %16 = vector.broadcast %cst_16 : f32 to vector<4x32xf32>
    %17 = arith.mulf %15, %16 : vector<4x32xf32>
    %18 = arith.mulf %14, %14 : vector<4x32xf32>
    %19 = arith.subf %17, %18 : vector<4x32xf32>
    %cst_17 = arith.constant 0.000000e+00 : f32
    %20 = vector.broadcast %cst_17 : f32 to vector<4x32xf32>
    %21 = arith.maximumf %19, %20 : vector<4x32xf32>
    %cst_18 = arith.constant 9.99999974E-6 : f32
    %22 = vector.broadcast %cst_18 : f32 to vector<4x32xf32>
    %23 = arith.addf %21, %22 : vector<4x32xf32>
    %24 = math.rsqrt %23 : vector<4x32xf32>
    %25 = arith.mulf %14, %24 : vector<4x32xf32>
    %26 = tpu.concatenate %24, %25 in 1 : vector<4x32xf32>, vector<4x32xf32> -> vector<4x64xf32>
    %cst_19 = arith.constant dense<0.000000e+00> : vector<16x64xf32>
    %27 = tpu.matmul %3, %26, %cst_19 {dimension_numbers = #tpu.dot_dimension_numbers<[1], [0], [0], [1], [0, 0, 1, 1], [], []>} : vector<16x4xf32>, vector<4x64xf32>, vector<16x64xf32> -> vector<16x64xf32>
    %28 = vector.extract_strided_slice %27 {offsets = [0, 0], sizes = [16, 32], strides = [1, 1]} : vector<16x64xf32> to vector<16x32xf32>
    %29 = arith.mulf %8, %28 : vector<16x32xf32>
    %30 = vector.extract_strided_slice %27 {offsets = [0, 32], sizes = [16, 32], strides = [1, 1]} : vector<16x64xf32> to vector<16x32xf32>
    %31 = arith.subf %29, %30 : vector<16x32xf32>
    %32 = vector.broadcast %4 : vector<16x1xf32> to vector<16x32xf32>
    %33 = arith.mulf %31, %32 : vector<16x32xf32>
    %34 = vector.broadcast %5 : vector<16x1xf32> to vector<16x32xf32>
    %35 = arith.addf %33, %34 : vector<16x32xf32>
    %cst_20 = arith.constant dense<0xFF800000> : vector<32xf32>
    %36 = vector.multi_reduction <maximumf>, %35, %cst_20 [0] : vector<16x32xf32> to vector<32xf32>
    %37 = vector.shape_cast %36 : vector<32xf32> to vector<1x32xf32>
    %38 = vector.broadcast %37 : vector<1x32xf32> to vector<16x32xf32>
    %39 = arith.subf %35, %38 : vector<16x32xf32>
    %40 = math.exp %39 : vector<16x32xf32>
    %cst_21 = arith.constant dense<0.000000e+00> : vector<32xf32>
    %41 = vector.multi_reduction <add>, %40, %cst_21 [0] : vector<16x32xf32> to vector<32xf32>
    %42 = vector.shape_cast %41 : vector<32xf32> to vector<1x32xf32>
    %43 = tpu.reciprocal %42 : vector<1x32xf32> -> vector<1x32xf32>
    %44 = vector.broadcast %43 : vector<1x32xf32> to vector<16x32xf32>
    %45 = arith.mulf %40, %44 : vector<16x32xf32>
    %cst_22 = arith.constant dense<0.000000e+00> : vector<16xf32>
    %46 = vector.multi_reduction <add>, %45, %cst_22 [1] : vector<16x32xf32> to vector<16xf32>
    %47 = vector.shape_cast %46 : vector<16xf32> to vector<16x1xf32>
    %cst_23 = arith.constant dense<0.000000e+00> : vector<16x128xf32>
    %48 = tpu.matmul %45, %7, %cst_23 {dimension_numbers = #tpu.dot_dimension_numbers<[1], [1], [0], [0], [0, 0, 1, 0], [], []>} : vector<16x32xf32>, vector<128x32xf32>, vector<16x128xf32> -> vector<16x128xf32>
    %49 = vector.broadcast %47 : vector<16x1xf32> to vector<16x128xf32>
    %50 = arith.mulf %49, %1 : vector<16x128xf32>
    %51 = arith.subf %48, %50 : vector<16x128xf32>
    %52 = arith.mulf %51, %51 : vector<16x128xf32>
    %cst_24 = arith.constant dense<0.000000e+00> : vector<16xf32>
    %53 = vector.multi_reduction <add>, %52, %cst_24 [1] : vector<16x128xf32> to vector<16xf32>
    %54 = vector.shape_cast %53 : vector<16xf32> to vector<16x1xf32>
    %cst_25 = arith.constant 1.000000e-24 : f32
    %55 = vector.broadcast %cst_25 : f32 to vector<16x1xf32>
    %56 = arith.maximumf %54, %55 : vector<16x1xf32>
    %57 = math.rsqrt %56 : vector<16x1xf32>
    %58 = vector.broadcast %57 : vector<16x1xf32> to vector<16x128xf32>
    %59 = arith.mulf %51, %58 : vector<16x128xf32>
    %60 = arith.mulf %59, %59 : vector<16x128xf32>
    %cst_26 = arith.constant dense<0.000000e+00> : vector<16xf32>
    %61 = vector.multi_reduction <add>, %60, %cst_26 [1] : vector<16x128xf32> to vector<16xf32>
    %62 = vector.shape_cast %61 : vector<16xf32> to vector<16x1xf32>
    %cst_27 = arith.constant dense<0.000000e+00> : vector<1xf32>
    %63 = vector.multi_reduction <add>, %62, %cst_27 [0] : vector<16x1xf32> to vector<1xf32>
    %64 = vector.shape_cast %63 : vector<1xf32> to vector<1x1xf32>
    %cst_28 = arith.constant 1.000000e-24 : f32
    %65 = vector.broadcast %cst_28 : f32 to vector<1x1xf32>
    %66 = arith.maximumf %64, %65 : vector<1x1xf32>
    %67 = math.rsqrt %66 : vector<1x1xf32>
    %68 = vector.extract_strided_slice %59 {offsets = [0, 0], sizes = [1, 128], strides = [1, 1]} : vector<16x128xf32> to vector<1x128xf32>
    %69 = vector.extract_strided_slice %59 {offsets = [1, 0], sizes = [1, 128], strides = [1, 1]} : vector<16x128xf32> to vector<1x128xf32>
    %70 = vector.extract_strided_slice %59 {offsets = [2, 0], sizes = [1, 128], strides = [1, 1]} : vector<16x128xf32> to vector<1x128xf32>
    %71 = vector.extract_strided_slice %59 {offsets = [3, 0], sizes = [1, 128], strides = [1, 1]} : vector<16x128xf32> to vector<1x128xf32>
    %72 = vector.extract_strided_slice %59 {offsets = [4, 0], sizes = [1, 128], strides = [1, 1]} : vector<16x128xf32> to vector<1x128xf32>
    %73 = vector.extract_strided_slice %59 {offsets = [5, 0], sizes = [1, 128], strides = [1, 1]} : vector<16x128xf32> to vector<1x128xf32>
    %74 = vector.extract_strided_slice %59 {offsets = [6, 0], sizes = [1, 128], strides = [1, 1]} : vector<16x128xf32> to vector<1x128xf32>
    %75 = vector.extract_strided_slice %59 {offsets = [7, 0], sizes = [1, 128], strides = [1, 1]} : vector<16x128xf32> to vector<1x128xf32>
    %76 = vector.extract_strided_slice %59 {offsets = [8, 0], sizes = [1, 128], strides = [1, 1]} : vector<16x128xf32> to vector<1x128xf32>
    %77 = vector.extract_strided_slice %59 {offsets = [9, 0], sizes = [1, 128], strides = [1, 1]} : vector<16x128xf32> to vector<1x128xf32>
    %78 = vector.extract_strided_slice %59 {offsets = [10, 0], sizes = [1, 128], strides = [1, 1]} : vector<16x128xf32> to vector<1x128xf32>
    %79 = vector.extract_strided_slice %59 {offsets = [11, 0], sizes = [1, 128], strides = [1, 1]} : vector<16x128xf32> to vector<1x128xf32>
    %80 = vector.extract_strided_slice %59 {offsets = [12, 0], sizes = [1, 128], strides = [1, 1]} : vector<16x128xf32> to vector<1x128xf32>
    %81 = vector.extract_strided_slice %59 {offsets = [13, 0], sizes = [1, 128], strides = [1, 1]} : vector<16x128xf32> to vector<1x128xf32>
    %82 = vector.extract_strided_slice %59 {offsets = [14, 0], sizes = [1, 128], strides = [1, 1]} : vector<16x128xf32> to vector<1x128xf32>
    %83 = vector.extract_strided_slice %59 {offsets = [15, 0], sizes = [1, 128], strides = [1, 1]} : vector<16x128xf32> to vector<1x128xf32>
    %84 = tpu.concatenate %68, %69, %70, %71, %72, %73, %74, %75, %76, %77, %78, %79, %80, %81, %82, %83 in 1 : vector<1x128xf32>, vector<1x128xf32>, vector<1x128xf32>, vector<1x128xf32>, vector<1x128xf32>, vector<1x128xf32>, vector<1x128xf32>, vector<1x128xf32>, vector<1x128xf32>, vector<1x128xf32>, vector<1x128xf32>, vector<1x128xf32>, vector<1x128xf32>, vector<1x128xf32>, vector<1x128xf32>, vector<1x128xf32> -> vector<1x2048xf32>
    %c1 = arith.constant 1 : index
    %c0_29 = arith.constant 0 : index
    %c0_30 = arith.constant 0 : index
    %85 = vector.load %arg1[%c1, %c0_29, %c0_30] : memref<16x128x32xf32, #tpu.memory_space<vmem>>, vector<1x128x32xf32>
    %86 = vector.shape_cast %85 : vector<1x128x32xf32> to vector<128x32xf32>
    %cst_31 = arith.constant dense<0.000000e+00> : vector<16x32xf32>
    %87 = tpu.matmul %0, %86, %cst_31 {dimension_numbers = #tpu.dot_dimension_numbers<[1], [0], [0], [1], [0, 0, 1, 1], [], []>} : vector<16x128xf32>, vector<128x32xf32>, vector<16x32xf32> -> vector<16x32xf32>
    %88 = arith.mulf %87, %87 : vector<16x32xf32>
    %89 = tpu.concatenate %87, %88 in 1 : vector<16x32xf32>, vector<16x32xf32> -> vector<16x64xf32>
    %cst_32 = arith.constant dense<0.000000e+00> : vector<4x64xf32>
    %90 = tpu.matmul %2, %89, %cst_32 {dimension_numbers = #tpu.dot_dimension_numbers<[1], [0], [0], [1], [0, 0, 1, 1], [], []>} : vector<4x16xf32>, vector<16x64xf32>, vector<4x64xf32> -> vector<4x64xf32>
    %91 = vector.extract_strided_slice %90 {offsets = [0, 0], sizes = [4, 32], strides = [1, 1]} : vector<4x64xf32> to vector<4x32xf32>
    %cst_33 = arith.constant 2.500000e-01 : f32
    %92 = vector.broadcast %cst_33 : f32 to vector<4x32xf32>
    %93 = arith.mulf %91, %92 : vector<4x32xf32>
    %94 = vector.extract_strided_slice %90 {offsets = [0, 32], sizes = [4, 32], strides = [1, 1]} : vector<4x64xf32> to vector<4x32xf32>
    %cst_34 = arith.constant 2.500000e-01 : f32
    %95 = vector.broadcast %cst_34 : f32 to vector<4x32xf32>
    %96 = arith.mulf %94, %95 : vector<4x32xf32>
    %97 = arith.mulf %93, %93 : vector<4x32xf32>
    %98 = arith.subf %96, %97 : vector<4x32xf32>
    %cst_35 = arith.constant 0.000000e+00 : f32
    %99 = vector.broadcast %cst_35 : f32 to vector<4x32xf32>
    %100 = arith.maximumf %98, %99 : vector<4x32xf32>
    %cst_36 = arith.constant 9.99999974E-6 : f32
    %101 = vector.broadcast %cst_36 : f32 to vector<4x32xf32>
    %102 = arith.addf %100, %101 : vector<4x32xf32>
    %103 = math.rsqrt %102 : vector<4x32xf32>
    %104 = arith.mulf %93, %103 : vector<4x32xf32>
    %105 = tpu.concatenate %103, %104 in 1 : vector<4x32xf32>, vector<4x32xf32> -> vector<4x64xf32>
    %cst_37 = arith.constant dense<0.000000e+00> : vector<16x64xf32>
    %106 = tpu.matmul %3, %105, %cst_37 {dimension_numbers = #tpu.dot_dimension_numbers<[1], [0], [0], [1], [0, 0, 1, 1], [], []>} : vector<16x4xf32>, vector<4x64xf32>, vector<16x64xf32> -> vector<16x64xf32>
    %107 = vector.extract_strided_slice %106 {offsets = [0, 0], sizes = [16, 32], strides = [1, 1]} : vector<16x64xf32> to vector<16x32xf32>
    %108 = arith.mulf %87, %107 : vector<16x32xf32>
    %109 = vector.extract_strided_slice %106 {offsets = [0, 32], sizes = [16, 32], strides = [1, 1]} : vector<16x64xf32> to vector<16x32xf32>
    %110 = arith.subf %108, %109 : vector<16x32xf32>
    %111 = vector.broadcast %4 : vector<16x1xf32> to vector<16x32xf32>
    %112 = arith.mulf %110, %111 : vector<16x32xf32>
    %113 = vector.broadcast %5 : vector<16x1xf32> to vector<16x32xf32>
    %114 = arith.addf %112, %113 : vector<16x32xf32>
    %cst_38 = arith.constant dense<0xFF800000> : vector<32xf32>
    %115 = vector.multi_reduction <maximumf>, %114, %cst_38 [0] : vector<16x32xf32> to vector<32xf32>
    %116 = vector.shape_cast %115 : vector<32xf32> to vector<1x32xf32>
    %117 = vector.broadcast %116 : vector<1x32xf32> to vector<16x32xf32>
    %118 = arith.subf %114, %117 : vector<16x32xf32>
    %119 = math.exp %118 : vector<16x32xf32>
    %cst_39 = arith.constant dense<0.000000e+00> : vector<32xf32>
    %120 = vector.multi_reduction <add>, %119, %cst_39 [0] : vector<16x32xf32> to vector<32xf32>
    %121 = vector.shape_cast %120 : vector<32xf32> to vector<1x32xf32>
    %122 = tpu.reciprocal %121 : vector<1x32xf32> -> vector<1x32xf32>
    %123 = vector.broadcast %122 : vector<1x32xf32> to vector<16x32xf32>
    %124 = arith.mulf %119, %123 : vector<16x32xf32>
    %cst_40 = arith.constant dense<0.000000e+00> : vector<16xf32>
    %125 = vector.multi_reduction <add>, %124, %cst_40 [1] : vector<16x32xf32> to vector<16xf32>
    %126 = vector.shape_cast %125 : vector<16xf32> to vector<16x1xf32>
    %cst_41 = arith.constant dense<0.000000e+00> : vector<16x128xf32>
    %127 = tpu.matmul %124, %86, %cst_41 {dimension_numbers = #tpu.dot_dimension_numbers<[1], [1], [0], [0], [0, 0, 1, 0], [], []>} : vector<16x32xf32>, vector<128x32xf32>, vector<16x128xf32> -> vector<16x128xf32>
    %128 = vector.broadcast %126 : vector<16x1xf32> to vector<16x128xf32>
    %129 = arith.mulf %128, %1 : vector<16x128xf32>
    %130 = arith.subf %127, %129 : vector<16x128xf32>
    %131 = arith.mulf %130, %130 : vector<16x128xf32>
    %cst_42 = arith.constant dense<0.000000e+00> : vector<16xf32>
    %132 = vector.multi_reduction <add>, %131, %cst_42 [1] : vector<16x128xf32> to vector<16xf32>
    %133 = vector.shape_cast %132 : vector<16xf32> to vector<16x1xf32>
    %cst_43 = arith.constant 1.000000e-24 : f32
    %134 = vector.broadcast %cst_43 : f32 to vector<16x1xf32>
    %135 = arith.maximumf %133, %134 : vector<16x1xf32>
    %136 = math.rsqrt %135 : vector<16x1xf32>
    %137 = vector.broadcast %136 : vector<16x1xf32> to vector<16x128xf32>
    %138 = arith.mulf %130, %137 : vector<16x128xf32>
    %139 = arith.mulf %138, %138 : vector<16x128xf32>
    %cst_44 = arith.constant dense<0.000000e+00> : vector<16xf32>
    %140 = vector.multi_reduction <add>, %139, %cst_44 [1] : vector<16x128xf32> to vector<16xf32>
    %141 = vector.shape_cast %140 : vector<16xf32> to vector<16x1xf32>
    %cst_45 = arith.constant dense<0.000000e+00> : vector<1xf32>
    %142 = vector.multi_reduction <add>, %141, %cst_45 [0] : vector<16x1xf32> to vector<1xf32>
    %143 = vector.shape_cast %142 : vector<1xf32> to vector<1x1xf32>
    %cst_46 = arith.constant 1.000000e-24 : f32
    %144 = vector.broadcast %cst_46 : f32 to vector<1x1xf32>
    %145 = arith.maximumf %143, %144 : vector<1x1xf32>
    %146 = math.rsqrt %145 : vector<1x1xf32>
    %147 = vector.extract_strided_slice %138 {offsets = [0, 0], sizes = [1, 128], strides = [1, 1]} : vector<16x128xf32> to vector<1x128xf32>
    %148 = vector.extract_strided_slice %138 {offsets = [1, 0], sizes = [1, 128], strides = [1, 1]} : vector<16x128xf32> to vector<1x128xf32>
    %149 = vector.extract_strided_slice %138 {offsets = [2, 0], sizes = [1, 128], strides = [1, 1]} : vector<16x128xf32> to vector<1x128xf32>
    %150 = vector.extract_strided_slice %138 {offsets = [3, 0], sizes = [1, 128], strides = [1, 1]} : vector<16x128xf32> to vector<1x128xf32>
    %151 = vector.extract_strided_slice %138 {offsets = [4, 0], sizes = [1, 128], strides = [1, 1]} : vector<16x128xf32> to vector<1x128xf32>
    %152 = vector.extract_strided_slice %138 {offsets = [5, 0], sizes = [1, 128], strides = [1, 1]} : vector<16x128xf32> to vector<1x128xf32>
    %153 = vector.extract_strided_slice %138 {offsets = [6, 0], sizes = [1, 128], strides = [1, 1]} : vector<16x128xf32> to vector<1x128xf32>
    %154 = vector.extract_strided_slice %138 {offsets = [7, 0], sizes = [1, 128], strides = [1, 1]} : vector<16x128xf32> to vector<1x128xf32>
    %155 = vector.extract_strided_slice %138 {offsets = [8, 0], sizes = [1, 128], strides = [1, 1]} : vector<16x128xf32> to vector<1x128xf32>
    %156 = vector.extract_strided_slice %138 {offsets = [9, 0], sizes = [1, 128], strides = [1, 1]} : vector<16x128xf32> to vector<1x128xf32>
    %157 = vector.extract_strided_slice %138 {offsets = [10, 0], sizes = [1, 128], strides = [1, 1]} : vector<16x128xf32> to vector<1x128xf32>
    %158 = vector.extract_strided_slice %138 {offsets = [11, 0], sizes = [1, 128], strides = [1, 1]} : vector<16x128xf32> to vector<1x128xf32>
    %159 = vector.extract_strided_slice %138 {offsets = [12, 0], sizes = [1, 128], strides = [1, 1]} : vector<16x128xf32> to vector<1x128xf32>
    %160 = vector.extract_strided_slice %138 {offsets = [13, 0], sizes = [1, 128], strides = [1, 1]} : vector<16x128xf32> to vector<1x128xf32>
    %161 = vector.extract_strided_slice %138 {offsets = [14, 0], sizes = [1, 128], strides = [1, 1]} : vector<16x128xf32> to vector<1x128xf32>
    %162 = vector.extract_strided_slice %138 {offsets = [15, 0], sizes = [1, 128], strides = [1, 1]} : vector<16x128xf32> to vector<1x128xf32>
    %163 = tpu.concatenate %147, %148, %149, %150, %151, %152, %153, %154, %155, %156, %157, %158, %159, %160, %161, %162 in 1 : vector<1x128xf32>, vector<1x128xf32>, vector<1x128xf32>, vector<1x128xf32>, vector<1x128xf32>, vector<1x128xf32>, vector<1x128xf32>, vector<1x128xf32>, vector<1x128xf32>, vector<1x128xf32>, vector<1x128xf32>, vector<1x128xf32>, vector<1x128xf32>, vector<1x128xf32>, vector<1x128xf32>, vector<1x128xf32> -> vector<1x2048xf32>
    %c2 = arith.constant 2 : index
    %c0_47 = arith.constant 0 : index
    %c0_48 = arith.constant 0 : index
    %164 = vector.load %arg1[%c2, %c0_47, %c0_48] : memref<16x128x32xf32, #tpu.memory_space<vmem>>, vector<1x128x32xf32>
    %165 = vector.shape_cast %164 : vector<1x128x32xf32> to vector<128x32xf32>
    %cst_49 = arith.constant dense<0.000000e+00> : vector<16x32xf32>
    %166 = tpu.matmul %0, %165, %cst_49 {dimension_numbers = #tpu.dot_dimension_numbers<[1], [0], [0], [1], [0, 0, 1, 1], [], []>} : vector<16x128xf32>, vector<128x32xf32>, vector<16x32xf32> -> vector<16x32xf32>
    %167 = arith.mulf %166, %166 : vector<16x32xf32>
    %168 = tpu.concatenate %166, %167 in 1 : vector<16x32xf32>, vector<16x32xf32> -> vector<16x64xf32>
    %cst_50 = arith.constant dense<0.000000e+00> : vector<4x64xf32>
    %169 = tpu.matmul %2, %168, %cst_50 {dimension_numbers = #tpu.dot_dimension_numbers<[1], [0], [0], [1], [0, 0, 1, 1], [], []>} : vector<4x16xf32>, vector<16x64xf32>, vector<4x64xf32> -> vector<4x64xf32>
    %170 = vector.extract_strided_slice %169 {offsets = [0, 0], sizes = [4, 32], strides = [1, 1]} : vector<4x64xf32> to vector<4x32xf32>
    %cst_51 = arith.constant 2.500000e-01 : f32
    %171 = vector.broadcast %cst_51 : f32 to vector<4x32xf32>
    %172 = arith.mulf %170, %171 : vector<4x32xf32>
    %173 = vector.extract_strided_slice %169 {offsets = [0, 32], sizes = [4, 32], strides = [1, 1]} : vector<4x64xf32> to vector<4x32xf32>
    %cst_52 = arith.constant 2.500000e-01 : f32
    %174 = vector.broadcast %cst_52 : f32 to vector<4x32xf32>
    %175 = arith.mulf %173, %174 : vector<4x32xf32>
    %176 = arith.mulf %172, %172 : vector<4x32xf32>
    %177 = arith.subf %175, %176 : vector<4x32xf32>
    %cst_53 = arith.constant 0.000000e+00 : f32
    %178 = vector.broadcast %cst_53 : f32 to vector<4x32xf32>
    %179 = arith.maximumf %177, %178 : vector<4x32xf32>
    %cst_54 = arith.constant 9.99999974E-6 : f32
    %180 = vector.broadcast %cst_54 : f32 to vector<4x32xf32>
    %181 = arith.addf %179, %180 : vector<4x32xf32>
    %182 = math.rsqrt %181 : vector<4x32xf32>
    %183 = arith.mulf %172, %182 : vector<4x32xf32>
    %184 = tpu.concatenate %182, %183 in 1 : vector<4x32xf32>, vector<4x32xf32> -> vector<4x64xf32>
    %cst_55 = arith.constant dense<0.000000e+00> : vector<16x64xf32>
    %185 = tpu.matmul %3, %184, %cst_55 {dimension_numbers = #tpu.dot_dimension_numbers<[1], [0], [0], [1], [0, 0, 1, 1], [], []>} : vector<16x4xf32>, vector<4x64xf32>, vector<16x64xf32> -> vector<16x64xf32>
    %186 = vector.extract_strided_slice %185 {offsets = [0, 0], sizes = [16, 32], strides = [1, 1]} : vector<16x64xf32> to vector<16x32xf32>
    %187 = arith.mulf %166, %186 : vector<16x32xf32>
    %188 = vector.extract_strided_slice %185 {offsets = [0, 32], sizes = [16, 32], strides = [1, 1]} : vector<16x64xf32> to vector<16x32xf32>
    %189 = arith.subf %187, %188 : vector<16x32xf32>
    %190 = vector.broadcast %4 : vector<16x1xf32> to vector<16x32xf32>
    %191 = arith.mulf %189, %190 : vector<16x32xf32>
    %192 = vector.broadcast %5 : vector<16x1xf32> to vector<16x32xf32>
    %193 = arith.addf %191, %192 : vector<16x32xf32>
    %cst_56 = arith.constant dense<0xFF800000> : vector<32xf32>
    %194 = vector.multi_reduction <maximumf>, %193, %cst_56 [0] : vector<16x32xf32> to vector<32xf32>
    %195 = vector.shape_cast %194 : vector<32xf32> to vector<1x32xf32>
    %196 = vector.broadcast %195 : vector<1x32xf32> to vector<16x32xf32>
    %197 = arith.subf %193, %196 : vector<16x32xf32>
    %198 = math.exp %197 : vector<16x32xf32>
    %cst_57 = arith.constant dense<0.000000e+00> : vector<32xf32>
    %199 = vector.multi_reduction <add>, %198, %cst_57 [0] : vector<16x32xf32> to vector<32xf32>
    %200 = vector.shape_cast %199 : vector<32xf32> to vector<1x32xf32>
    %201 = tpu.reciprocal %200 : vector<1x32xf32> -> vector<1x32xf32>
    %202 = vector.broadcast %201 : vector<1x32xf32> to vector<16x32xf32>
    %203 = arith.mulf %198, %202 : vector<16x32xf32>
    %cst_58 = arith.constant dense<0.000000e+00> : vector<16xf32>
    %204 = vector.multi_reduction <add>, %203, %cst_58 [1] : vector<16x32xf32> to vector<16xf32>
    %205 = vector.shape_cast %204 : vector<16xf32> to vector<16x1xf32>
    %cst_59 = arith.constant dense<0.000000e+00> : vector<16x128xf32>
    %206 = tpu.matmul %203, %165, %cst_59 {dimension_numbers = #tpu.dot_dimension_numbers<[1], [1], [0], [0], [0, 0, 1, 0], [], []>} : vector<16x32xf32>, vector<128x32xf32>, vector<16x128xf32> -> vector<16x128xf32>
    %207 = vector.broadcast %205 : vector<16x1xf32> to vector<16x128xf32>
    %208 = arith.mulf %207, %1 : vector<16x128xf32>
    %209 = arith.subf %206, %208 : vector<16x128xf32>
    %210 = arith.mulf %209, %209 : vector<16x128xf32>
    %cst_60 = arith.constant dense<0.000000e+00> : vector<16xf32>
    %211 = vector.multi_reduction <add>, %210, %cst_60 [1] : vector<16x128xf32> to vector<16xf32>
    %212 = vector.shape_cast %211 : vector<16xf32> to vector<16x1xf32>
    %cst_61 = arith.constant 1.000000e-24 : f32
    %213 = vector.broadcast %cst_61 : f32 to vector<16x1xf32>
    %214 = arith.maximumf %212, %213 : vector<16x1xf32>
    %215 = math.rsqrt %214 : vector<16x1xf32>
    %216 = vector.broadcast %215 : vector<16x1xf32> to vector<16x128xf32>
    %217 = arith.mulf %209, %216 : vector<16x128xf32>
    %218 = arith.mulf %217, %217 : vector<16x128xf32>
    %cst_62 = arith.constant dense<0.000000e+00> : vector<16xf32>
    %219 = vector.multi_reduction <add>, %218, %cst_62 [1] : vector<16x128xf32> to vector<16xf32>
    %220 = vector.shape_cast %219 : vector<16xf32> to vector<16x1xf32>
    %cst_63 = arith.constant dense<0.000000e+00> : vector<1xf32>
    %221 = vector.multi_reduction <add>, %220, %cst_63 [0] : vector<16x1xf32> to vector<1xf32>
    %222 = vector.shape_cast %221 : vector<1xf32> to vector<1x1xf32>
    %cst_64 = arith.constant 1.000000e-24 : f32
    %223 = vector.broadcast %cst_64 : f32 to vector<1x1xf32>
    %224 = arith.maximumf %222, %223 : vector<1x1xf32>
    %225 = math.rsqrt %224 : vector<1x1xf32>
    %226 = vector.extract_strided_slice %217 {offsets = [0, 0], sizes = [1, 128], strides = [1, 1]} : vector<16x128xf32> to vector<1x128xf32>
    %227 = vector.extract_strided_slice %217 {offsets = [1, 0], sizes = [1, 128], strides = [1, 1]} : vector<16x128xf32> to vector<1x128xf32>
    %228 = vector.extract_strided_slice %217 {offsets = [2, 0], sizes = [1, 128], strides = [1, 1]} : vector<16x128xf32> to vector<1x128xf32>
    %229 = vector.extract_strided_slice %217 {offsets = [3, 0], sizes = [1, 128], strides = [1, 1]} : vector<16x128xf32> to vector<1x128xf32>
    %230 = vector.extract_strided_slice %217 {offsets = [4, 0], sizes = [1, 128], strides = [1, 1]} : vector<16x128xf32> to vector<1x128xf32>
    %231 = vector.extract_strided_slice %217 {offsets = [5, 0], sizes = [1, 128], strides = [1, 1]} : vector<16x128xf32> to vector<1x128xf32>
    %232 = vector.extract_strided_slice %217 {offsets = [6, 0], sizes = [1, 128], strides = [1, 1]} : vector<16x128xf32> to vector<1x128xf32>
    %233 = vector.extract_strided_slice %217 {offsets = [7, 0], sizes = [1, 128], strides = [1, 1]} : vector<16x128xf32> to vector<1x128xf32>
    %234 = vector.extract_strided_slice %217 {offsets = [8, 0], sizes = [1, 128], strides = [1, 1]} : vector<16x128xf32> to vector<1x128xf32>
    %235 = vector.extract_strided_slice %217 {offsets = [9, 0], sizes = [1, 128], strides = [1, 1]} : vector<16x128xf32> to vector<1x128xf32>
    %236 = vector.extract_strided_slice %217 {offsets = [10, 0], sizes = [1, 128], strides = [1, 1]} : vector<16x128xf32> to vector<1x128xf32>
    %237 = vector.extract_strided_slice %217 {offsets = [11, 0], sizes = [1, 128], strides = [1, 1]} : vector<16x128xf32> to vector<1x128xf32>
    %238 = vector.extract_strided_slice %217 {offsets = [12, 0], sizes = [1, 128], strides = [1, 1]} : vector<16x128xf32> to vector<1x128xf32>
    %239 = vector.extract_strided_slice %217 {offsets = [13, 0], sizes = [1, 128], strides = [1, 1]} : vector<16x128xf32> to vector<1x128xf32>
    %240 = vector.extract_strided_slice %217 {offsets = [14, 0], sizes = [1, 128], strides = [1, 1]} : vector<16x128xf32> to vector<1x128xf32>
    %241 = vector.extract_strided_slice %217 {offsets = [15, 0], sizes = [1, 128], strides = [1, 1]} : vector<16x128xf32> to vector<1x128xf32>
    %242 = tpu.concatenate %226, %227, %228, %229, %230, %231, %232, %233, %234, %235, %236, %237, %238, %239, %240, %241 in 1 : vector<1x128xf32>, vector<1x128xf32>, vector<1x128xf32>, vector<1x128xf32>, vector<1x128xf32>, vector<1x128xf32>, vector<1x128xf32>, vector<1x128xf32>, vector<1x128xf32>, vector<1x128xf32>, vector<1x128xf32>, vector<1x128xf32>, vector<1x128xf32>, vector<1x128xf32>, vector<1x128xf32>, vector<1x128xf32> -> vector<1x2048xf32>
    %c3 = arith.constant 3 : index
    %c0_65 = arith.constant 0 : index
    %c0_66 = arith.constant 0 : index
    %243 = vector.load %arg1[%c3, %c0_65, %c0_66] : memref<16x128x32xf32, #tpu.memory_space<vmem>>, vector<1x128x32xf32>
    %244 = vector.shape_cast %243 : vector<1x128x32xf32> to vector<128x32xf32>
    %cst_67 = arith.constant dense<0.000000e+00> : vector<16x32xf32>
    %245 = tpu.matmul %0, %244, %cst_67 {dimension_numbers = #tpu.dot_dimension_numbers<[1], [0], [0], [1], [0, 0, 1, 1], [], []>} : vector<16x128xf32>, vector<128x32xf32>, vector<16x32xf32> -> vector<16x32xf32>
    %246 = arith.mulf %245, %245 : vector<16x32xf32>
    %247 = tpu.concatenate %245, %246 in 1 : vector<16x32xf32>, vector<16x32xf32> -> vector<16x64xf32>
    %cst_68 = arith.constant dense<0.000000e+00> : vector<4x64xf32>
    %248 = tpu.matmul %2, %247, %cst_68 {dimension_numbers = #tpu.dot_dimension_numbers<[1], [0], [0], [1], [0, 0, 1, 1], [], []>} : vector<4x16xf32>, vector<16x64xf32>, vector<4x64xf32> -> vector<4x64xf32>
    %249 = vector.extract_strided_slice %248 {offsets = [0, 0], sizes = [4, 32], strides = [1, 1]} : vector<4x64xf32> to vector<4x32xf32>
    %cst_69 = arith.constant 2.500000e-01 : f32
    %250 = vector.broadcast %cst_69 : f32 to vector<4x32xf32>
    %251 = arith.mulf %249, %250 : vector<4x32xf32>
    %252 = vector.extract_strided_slice %248 {offsets = [0, 32], sizes = [4, 32], strides = [1, 1]} : vector<4x64xf32> to vector<4x32xf32>
    %cst_70 = arith.constant 2.500000e-01 : f32
    %253 = vector.broadcast %cst_70 : f32 to vector<4x32xf32>
    %254 = arith.mulf %252, %253 : vector<4x32xf32>
    %255 = arith.mulf %251, %251 : vector<4x32xf32>
    %256 = arith.subf %254, %255 : vector<4x32xf32>
    %cst_71 = arith.constant 0.000000e+00 : f32
    %257 = vector.broadcast %cst_71 : f32 to vector<4x32xf32>
    %258 = arith.maximumf %256, %257 : vector<4x32xf32>
    %cst_72 = arith.constant 9.99999974E-6 : f32
    %259 = vector.broadcast %cst_72 : f32 to vector<4x32xf32>
    %260 = arith.addf %258, %259 : vector<4x32xf32>
    %261 = math.rsqrt %260 : vector<4x32xf32>
    %262 = arith.mulf %251, %261 : vector<4x32xf32>
    %263 = tpu.concatenate %261, %262 in 1 : vector<4x32xf32>, vector<4x32xf32> -> vector<4x64xf32>
    %cst_73 = arith.constant dense<0.000000e+00> : vector<16x64xf32>
    %264 = tpu.matmul %3, %263, %cst_73 {dimension_numbers = #tpu.dot_dimension_numbers<[1], [0], [0], [1], [0, 0, 1, 1], [], []>} : vector<16x4xf32>, vector<4x64xf32>, vector<16x64xf32> -> vector<16x64xf32>
    %265 = vector.extract_strided_slice %264 {offsets = [0, 0], sizes = [16, 32], strides = [1, 1]} : vector<16x64xf32> to vector<16x32xf32>
    %266 = arith.mulf %245, %265 : vector<16x32xf32>
    %267 = vector.extract_strided_slice %264 {offsets = [0, 32], sizes = [16, 32], strides = [1, 1]} : vector<16x64xf32> to vector<16x32xf32>
    %268 = arith.subf %266, %267 : vector<16x32xf32>
    %269 = vector.broadcast %4 : vector<16x1xf32> to vector<16x32xf32>
    %270 = arith.mulf %268, %269 : vector<16x32xf32>
    %271 = vector.broadcast %5 : vector<16x1xf32> to vector<16x32xf32>
    %272 = arith.addf %270, %271 : vector<16x32xf32>
    %cst_74 = arith.constant dense<0xFF800000> : vector<32xf32>
    %273 = vector.multi_reduction <maximumf>, %272, %cst_74 [0] : vector<16x32xf32> to vector<32xf32>
    %274 = vector.shape_cast %273 : vector<32xf32> to vector<1x32xf32>
    %275 = vector.broadcast %274 : vector<1x32xf32> to vector<16x32xf32>
    %276 = arith.subf %272, %275 : vector<16x32xf32>
    %277 = math.exp %276 : vector<16x32xf32>
    %cst_75 = arith.constant dense<0.000000e+00> : vector<32xf32>
    %278 = vector.multi_reduction <add>, %277, %cst_75 [0] : vector<16x32xf32> to vector<32xf32>
    %279 = vector.shape_cast %278 : vector<32xf32> to vector<1x32xf32>
    %280 = tpu.reciprocal %279 : vector<1x32xf32> -> vector<1x32xf32>
    %281 = vector.broadcast %280 : vector<1x32xf32> to vector<16x32xf32>
    %282 = arith.mulf %277, %281 : vector<16x32xf32>
    %cst_76 = arith.constant dense<0.000000e+00> : vector<16xf32>
    %283 = vector.multi_reduction <add>, %282, %cst_76 [1] : vector<16x32xf32> to vector<16xf32>
    %284 = vector.shape_cast %283 : vector<16xf32> to vector<16x1xf32>
    %cst_77 = arith.constant dense<0.000000e+00> : vector<16x128xf32>
    %285 = tpu.matmul %282, %244, %cst_77 {dimension_numbers = #tpu.dot_dimension_numbers<[1], [1], [0], [0], [0, 0, 1, 0], [], []>} : vector<16x32xf32>, vector<128x32xf32>, vector<16x128xf32> -> vector<16x128xf32>
    %286 = vector.broadcast %284 : vector<16x1xf32> to vector<16x128xf32>
    %287 = arith.mulf %286, %1 : vector<16x128xf32>
    %288 = arith.subf %285, %287 : vector<16x128xf32>
    %289 = arith.mulf %288, %288 : vector<16x128xf32>
    %cst_78 = arith.constant dense<0.000000e+00> : vector<16xf32>
    %290 = vector.multi_reduction <add>, %289, %cst_78 [1] : vector<16x128xf32> to vector<16xf32>
    %291 = vector.shape_cast %290 : vector<16xf32> to vector<16x1xf32>
    %cst_79 = arith.constant 1.000000e-24 : f32
    %292 = vector.broadcast %cst_79 : f32 to vector<16x1xf32>
    %293 = arith.maximumf %291, %292 : vector<16x1xf32>
    %294 = math.rsqrt %293 : vector<16x1xf32>
    %295 = vector.broadcast %294 : vector<16x1xf32> to vector<16x128xf32>
    %296 = arith.mulf %288, %295 : vector<16x128xf32>
    %297 = arith.mulf %296, %296 : vector<16x128xf32>
    %cst_80 = arith.constant dense<0.000000e+00> : vector<16xf32>
    %298 = vector.multi_reduction <add>, %297, %cst_80 [1] : vector<16x128xf32> to vector<16xf32>
    %299 = vector.shape_cast %298 : vector<16xf32> to vector<16x1xf32>
    %cst_81 = arith.constant dense<0.000000e+00> : vector<1xf32>
    %300 = vector.multi_reduction <add>, %299, %cst_81 [0] : vector<16x1xf32> to vector<1xf32>
    %301 = vector.shape_cast %300 : vector<1xf32> to vector<1x1xf32>
    %cst_82 = arith.constant 1.000000e-24 : f32
    %302 = vector.broadcast %cst_82 : f32 to vector<1x1xf32>
    %303 = arith.maximumf %301, %302 : vector<1x1xf32>
    %304 = math.rsqrt %303 : vector<1x1xf32>
    %305 = vector.extract_strided_slice %296 {offsets = [0, 0], sizes = [1, 128], strides = [1, 1]} : vector<16x128xf32> to vector<1x128xf32>
    %306 = vector.extract_strided_slice %296 {offsets = [1, 0], sizes = [1, 128], strides = [1, 1]} : vector<16x128xf32> to vector<1x128xf32>
    %307 = vector.extract_strided_slice %296 {offsets = [2, 0], sizes = [1, 128], strides = [1, 1]} : vector<16x128xf32> to vector<1x128xf32>
    %308 = vector.extract_strided_slice %296 {offsets = [3, 0], sizes = [1, 128], strides = [1, 1]} : vector<16x128xf32> to vector<1x128xf32>
    %309 = vector.extract_strided_slice %296 {offsets = [4, 0], sizes = [1, 128], strides = [1, 1]} : vector<16x128xf32> to vector<1x128xf32>
    %310 = vector.extract_strided_slice %296 {offsets = [5, 0], sizes = [1, 128], strides = [1, 1]} : vector<16x128xf32> to vector<1x128xf32>
    %311 = vector.extract_strided_slice %296 {offsets = [6, 0], sizes = [1, 128], strides = [1, 1]} : vector<16x128xf32> to vector<1x128xf32>
    %312 = vector.extract_strided_slice %296 {offsets = [7, 0], sizes = [1, 128], strides = [1, 1]} : vector<16x128xf32> to vector<1x128xf32>
    %313 = vector.extract_strided_slice %296 {offsets = [8, 0], sizes = [1, 128], strides = [1, 1]} : vector<16x128xf32> to vector<1x128xf32>
    %314 = vector.extract_strided_slice %296 {offsets = [9, 0], sizes = [1, 128], strides = [1, 1]} : vector<16x128xf32> to vector<1x128xf32>
    %315 = vector.extract_strided_slice %296 {offsets = [10, 0], sizes = [1, 128], strides = [1, 1]} : vector<16x128xf32> to vector<1x128xf32>
    %316 = vector.extract_strided_slice %296 {offsets = [11, 0], sizes = [1, 128], strides = [1, 1]} : vector<16x128xf32> to vector<1x128xf32>
    %317 = vector.extract_strided_slice %296 {offsets = [12, 0], sizes = [1, 128], strides = [1, 1]} : vector<16x128xf32> to vector<1x128xf32>
    %318 = vector.extract_strided_slice %296 {offsets = [13, 0], sizes = [1, 128], strides = [1, 1]} : vector<16x128xf32> to vector<1x128xf32>
    %319 = vector.extract_strided_slice %296 {offsets = [14, 0], sizes = [1, 128], strides = [1, 1]} : vector<16x128xf32> to vector<1x128xf32>
    %320 = vector.extract_strided_slice %296 {offsets = [15, 0], sizes = [1, 128], strides = [1, 1]} : vector<16x128xf32> to vector<1x128xf32>
    %321 = tpu.concatenate %305, %306, %307, %308, %309, %310, %311, %312, %313, %314, %315, %316, %317, %318, %319, %320 in 1 : vector<1x128xf32>, vector<1x128xf32>, vector<1x128xf32>, vector<1x128xf32>, vector<1x128xf32>, vector<1x128xf32>, vector<1x128xf32>, vector<1x128xf32>, vector<1x128xf32>, vector<1x128xf32>, vector<1x128xf32>, vector<1x128xf32>, vector<1x128xf32>, vector<1x128xf32>, vector<1x128xf32>, vector<1x128xf32> -> vector<1x2048xf32>
    %c4 = arith.constant 4 : index
    %c0_83 = arith.constant 0 : index
    %c0_84 = arith.constant 0 : index
    %322 = vector.load %arg1[%c4, %c0_83, %c0_84] : memref<16x128x32xf32, #tpu.memory_space<vmem>>, vector<1x128x32xf32>
    %323 = vector.shape_cast %322 : vector<1x128x32xf32> to vector<128x32xf32>
    %cst_85 = arith.constant dense<0.000000e+00> : vector<16x32xf32>
    %324 = tpu.matmul %0, %323, %cst_85 {dimension_numbers = #tpu.dot_dimension_numbers<[1], [0], [0], [1], [0, 0, 1, 1], [], []>} : vector<16x128xf32>, vector<128x32xf32>, vector<16x32xf32> -> vector<16x32xf32>
    %325 = arith.mulf %324, %324 : vector<16x32xf32>
    %326 = tpu.concatenate %324, %325 in 1 : vector<16x32xf32>, vector<16x32xf32> -> vector<16x64xf32>
    %cst_86 = arith.constant dense<0.000000e+00> : vector<4x64xf32>
    %327 = tpu.matmul %2, %326, %cst_86 {dimension_numbers = #tpu.dot_dimension_numbers<[1], [0], [0], [1], [0, 0, 1, 1], [], []>} : vector<4x16xf32>, vector<16x64xf32>, vector<4x64xf32> -> vector<4x64xf32>
    %328 = vector.extract_strided_slice %327 {offsets = [0, 0], sizes = [4, 32], strides = [1, 1]} : vector<4x64xf32> to vector<4x32xf32>
    %cst_87 = arith.constant 2.500000e-01 : f32
    %329 = vector.broadcast %cst_87 : f32 to vector<4x32xf32>
    %330 = arith.mulf %328, %329 : vector<4x32xf32>
    %331 = vector.extract_strided_slice %327 {offsets = [0, 32], sizes = [4, 32], strides = [1, 1]} : vector<4x64xf32> to vector<4x32xf32>
    %cst_88 = arith.constant 2.500000e-01 : f32
    %332 = vector.broadcast %cst_88 : f32 to vector<4x32xf32>
    %333 = arith.mulf %331, %332 : vector<4x32xf32>
    %334 = arith.mulf %330, %330 : vector<4x32xf32>
    %335 = arith.subf %333, %334 : vector<4x32xf32>
    %cst_89 = arith.constant 0.000000e+00 : f32
    %336 = vector.broadcast %cst_89 : f32 to vector<4x32xf32>
    %337 = arith.maximumf %335, %336 : vector<4x32xf32>
    %cst_90 = arith.constant 9.99999974E-6 : f32
    %338 = vector.broadcast %cst_90 : f32 to vector<4x32xf32>
    %339 = arith.addf %337, %338 : vector<4x32xf32>
    %340 = math.rsqrt %339 : vector<4x32xf32>
    %341 = arith.mulf %330, %340 : vector<4x32xf32>
    %342 = tpu.concatenate %340, %341 in 1 : vector<4x32xf32>, vector<4x32xf32> -> vector<4x64xf32>
    %cst_91 = arith.constant dense<0.000000e+00> : vector<16x64xf32>
    %343 = tpu.matmul %3, %342, %cst_91 {dimension_numbers = #tpu.dot_dimension_numbers<[1], [0], [0], [1], [0, 0, 1, 1], [], []>} : vector<16x4xf32>, vector<4x64xf32>, vector<16x64xf32> -> vector<16x64xf32>
    %344 = vector.extract_strided_slice %343 {offsets = [0, 0], sizes = [16, 32], strides = [1, 1]} : vector<16x64xf32> to vector<16x32xf32>
    %345 = arith.mulf %324, %344 : vector<16x32xf32>
    %346 = vector.extract_strided_slice %343 {offsets = [0, 32], sizes = [16, 32], strides = [1, 1]} : vector<16x64xf32> to vector<16x32xf32>
    %347 = arith.subf %345, %346 : vector<16x32xf32>
    %348 = vector.broadcast %4 : vector<16x1xf32> to vector<16x32xf32>
    %349 = arith.mulf %347, %348 : vector<16x32xf32>
    %350 = vector.broadcast %5 : vector<16x1xf32> to vector<16x32xf32>
    %351 = arith.addf %349, %350 : vector<16x32xf32>
    %cst_92 = arith.constant dense<0xFF800000> : vector<32xf32>
    %352 = vector.multi_reduction <maximumf>, %351, %cst_92 [0] : vector<16x32xf32> to vector<32xf32>
    %353 = vector.shape_cast %352 : vector<32xf32> to vector<1x32xf32>
    %354 = vector.broadcast %353 : vector<1x32xf32> to vector<16x32xf32>
    %355 = arith.subf %351, %354 : vector<16x32xf32>
    %356 = math.exp %355 : vector<16x32xf32>
    %cst_93 = arith.constant dense<0.000000e+00> : vector<32xf32>
    %357 = vector.multi_reduction <add>, %356, %cst_93 [0] : vector<16x32xf32> to vector<32xf32>
    %358 = vector.shape_cast %357 : vector<32xf32> to vector<1x32xf32>
    %359 = tpu.reciprocal %358 : vector<1x32xf32> -> vector<1x32xf32>
    %360 = vector.broadcast %359 : vector<1x32xf32> to vector<16x32xf32>
    %361 = arith.mulf %356, %360 : vector<16x32xf32>
    %cst_94 = arith.constant dense<0.000000e+00> : vector<16xf32>
    %362 = vector.multi_reduction <add>, %361, %cst_94 [1] : vector<16x32xf32> to vector<16xf32>
    %363 = vector.shape_cast %362 : vector<16xf32> to vector<16x1xf32>
    %cst_95 = arith.constant dense<0.000000e+00> : vector<16x128xf32>
    %364 = tpu.matmul %361, %323, %cst_95 {dimension_numbers = #tpu.dot_dimension_numbers<[1], [1], [0], [0], [0, 0, 1, 0], [], []>} : vector<16x32xf32>, vector<128x32xf32>, vector<16x128xf32> -> vector<16x128xf32>
    %365 = vector.broadcast %363 : vector<16x1xf32> to vector<16x128xf32>
    %366 = arith.mulf %365, %1 : vector<16x128xf32>
    %367 = arith.subf %364, %366 : vector<16x128xf32>
    %368 = arith.mulf %367, %367 : vector<16x128xf32>
    %cst_96 = arith.constant dense<0.000000e+00> : vector<16xf32>
    %369 = vector.multi_reduction <add>, %368, %cst_96 [1] : vector<16x128xf32> to vector<16xf32>
    %370 = vector.shape_cast %369 : vector<16xf32> to vector<16x1xf32>
    %cst_97 = arith.constant 1.000000e-24 : f32
    %371 = vector.broadcast %cst_97 : f32 to vector<16x1xf32>
    %372 = arith.maximumf %370, %371 : vector<16x1xf32>
    %373 = math.rsqrt %372 : vector<16x1xf32>
    %374 = vector.broadcast %373 : vector<16x1xf32> to vector<16x128xf32>
    %375 = arith.mulf %367, %374 : vector<16x128xf32>
    %376 = arith.mulf %375, %375 : vector<16x128xf32>
    %cst_98 = arith.constant dense<0.000000e+00> : vector<16xf32>
    %377 = vector.multi_reduction <add>, %376, %cst_98 [1] : vector<16x128xf32> to vector<16xf32>
    %378 = vector.shape_cast %377 : vector<16xf32> to vector<16x1xf32>
    %cst_99 = arith.constant dense<0.000000e+00> : vector<1xf32>
    %379 = vector.multi_reduction <add>, %378, %cst_99 [0] : vector<16x1xf32> to vector<1xf32>
    %380 = vector.shape_cast %379 : vector<1xf32> to vector<1x1xf32>
    %cst_100 = arith.constant 1.000000e-24 : f32
    %381 = vector.broadcast %cst_100 : f32 to vector<1x1xf32>
    %382 = arith.maximumf %380, %381 : vector<1x1xf32>
    %383 = math.rsqrt %382 : vector<1x1xf32>
    %384 = vector.extract_strided_slice %375 {offsets = [0, 0], sizes = [1, 128], strides = [1, 1]} : vector<16x128xf32> to vector<1x128xf32>
    %385 = vector.extract_strided_slice %375 {offsets = [1, 0], sizes = [1, 128], strides = [1, 1]} : vector<16x128xf32> to vector<1x128xf32>
    %386 = vector.extract_strided_slice %375 {offsets = [2, 0], sizes = [1, 128], strides = [1, 1]} : vector<16x128xf32> to vector<1x128xf32>
    %387 = vector.extract_strided_slice %375 {offsets = [3, 0], sizes = [1, 128], strides = [1, 1]} : vector<16x128xf32> to vector<1x128xf32>
    %388 = vector.extract_strided_slice %375 {offsets = [4, 0], sizes = [1, 128], strides = [1, 1]} : vector<16x128xf32> to vector<1x128xf32>
    %389 = vector.extract_strided_slice %375 {offsets = [5, 0], sizes = [1, 128], strides = [1, 1]} : vector<16x128xf32> to vector<1x128xf32>
    %390 = vector.extract_strided_slice %375 {offsets = [6, 0], sizes = [1, 128], strides = [1, 1]} : vector<16x128xf32> to vector<1x128xf32>
    %391 = vector.extract_strided_slice %375 {offsets = [7, 0], sizes = [1, 128], strides = [1, 1]} : vector<16x128xf32> to vector<1x128xf32>
    %392 = vector.extract_strided_slice %375 {offsets = [8, 0], sizes = [1, 128], strides = [1, 1]} : vector<16x128xf32> to vector<1x128xf32>
    %393 = vector.extract_strided_slice %375 {offsets = [9, 0], sizes = [1, 128], strides = [1, 1]} : vector<16x128xf32> to vector<1x128xf32>
    %394 = vector.extract_strided_slice %375 {offsets = [10, 0], sizes = [1, 128], strides = [1, 1]} : vector<16x128xf32> to vector<1x128xf32>
    %395 = vector.extract_strided_slice %375 {offsets = [11, 0], sizes = [1, 128], strides = [1, 1]} : vector<16x128xf32> to vector<1x128xf32>
    %396 = vector.extract_strided_slice %375 {offsets = [12, 0], sizes = [1, 128], strides = [1, 1]} : vector<16x128xf32> to vector<1x128xf32>
    %397 = vector.extract_strided_slice %375 {offsets = [13, 0], sizes = [1, 128], strides = [1, 1]} : vector<16x128xf32> to vector<1x128xf32>
    %398 = vector.extract_strided_slice %375 {offsets = [14, 0], sizes = [1, 128], strides = [1, 1]} : vector<16x128xf32> to vector<1x128xf32>
    %399 = vector.extract_strided_slice %375 {offsets = [15, 0], sizes = [1, 128], strides = [1, 1]} : vector<16x128xf32> to vector<1x128xf32>
    %400 = tpu.concatenate %384, %385, %386, %387, %388, %389, %390, %391, %392, %393, %394, %395, %396, %397, %398, %399 in 1 : vector<1x128xf32>, vector<1x128xf32>, vector<1x128xf32>, vector<1x128xf32>, vector<1x128xf32>, vector<1x128xf32>, vector<1x128xf32>, vector<1x128xf32>, vector<1x128xf32>, vector<1x128xf32>, vector<1x128xf32>, vector<1x128xf32>, vector<1x128xf32>, vector<1x128xf32>, vector<1x128xf32>, vector<1x128xf32> -> vector<1x2048xf32>
    %c5 = arith.constant 5 : index
    %c0_101 = arith.constant 0 : index
    %c0_102 = arith.constant 0 : index
    %401 = vector.load %arg1[%c5, %c0_101, %c0_102] : memref<16x128x32xf32, #tpu.memory_space<vmem>>, vector<1x128x32xf32>
    %402 = vector.shape_cast %401 : vector<1x128x32xf32> to vector<128x32xf32>
    %cst_103 = arith.constant dense<0.000000e+00> : vector<16x32xf32>
    %403 = tpu.matmul %0, %402, %cst_103 {dimension_numbers = #tpu.dot_dimension_numbers<[1], [0], [0], [1], [0, 0, 1, 1], [], []>} : vector<16x128xf32>, vector<128x32xf32>, vector<16x32xf32> -> vector<16x32xf32>
    %404 = arith.mulf %403, %403 : vector<16x32xf32>
    %405 = tpu.concatenate %403, %404 in 1 : vector<16x32xf32>, vector<16x32xf32> -> vector<16x64xf32>
    %cst_104 = arith.constant dense<0.000000e+00> : vector<4x64xf32>
    %406 = tpu.matmul %2, %405, %cst_104 {dimension_numbers = #tpu.dot_dimension_numbers<[1], [0], [0], [1], [0, 0, 1, 1], [], []>} : vector<4x16xf32>, vector<16x64xf32>, vector<4x64xf32> -> vector<4x64xf32>
    %407 = vector.extract_strided_slice %406 {offsets = [0, 0], sizes = [4, 32], strides = [1, 1]} : vector<4x64xf32> to vector<4x32xf32>
    %cst_105 = arith.constant 2.500000e-01 : f32
    %408 = vector.broadcast %cst_105 : f32 to vector<4x32xf32>
    %409 = arith.mulf %407, %408 : vector<4x32xf32>
    %410 = vector.extract_strided_slice %406 {offsets = [0, 32], sizes = [4, 32], strides = [1, 1]} : vector<4x64xf32> to vector<4x32xf32>
    %cst_106 = arith.constant 2.500000e-01 : f32
    %411 = vector.broadcast %cst_106 : f32 to vector<4x32xf32>
    %412 = arith.mulf %410, %411 : vector<4x32xf32>
    %413 = arith.mulf %409, %409 : vector<4x32xf32>
    %414 = arith.subf %412, %413 : vector<4x32xf32>
    %cst_107 = arith.constant 0.000000e+00 : f32
    %415 = vector.broadcast %cst_107 : f32 to vector<4x32xf32>
    %416 = arith.maximumf %414, %415 : vector<4x32xf32>
    %cst_108 = arith.constant 9.99999974E-6 : f32
    %417 = vector.broadcast %cst_108 : f32 to vector<4x32xf32>
    %418 = arith.addf %416, %417 : vector<4x32xf32>
    %419 = math.rsqrt %418 : vector<4x32xf32>
    %420 = arith.mulf %409, %419 : vector<4x32xf32>
    %421 = tpu.concatenate %419, %420 in 1 : vector<4x32xf32>, vector<4x32xf32> -> vector<4x64xf32>
    %cst_109 = arith.constant dense<0.000000e+00> : vector<16x64xf32>
    %422 = tpu.matmul %3, %421, %cst_109 {dimension_numbers = #tpu.dot_dimension_numbers<[1], [0], [0], [1], [0, 0, 1, 1], [], []>} : vector<16x4xf32>, vector<4x64xf32>, vector<16x64xf32> -> vector<16x64xf32>
    %423 = vector.extract_strided_slice %422 {offsets = [0, 0], sizes = [16, 32], strides = [1, 1]} : vector<16x64xf32> to vector<16x32xf32>
    %424 = arith.mulf %403, %423 : vector<16x32xf32>
    %425 = vector.extract_strided_slice %422 {offsets = [0, 32], sizes = [16, 32], strides = [1, 1]} : vector<16x64xf32> to vector<16x32xf32>
    %426 = arith.subf %424, %425 : vector<16x32xf32>
    %427 = vector.broadcast %4 : vector<16x1xf32> to vector<16x32xf32>
    %428 = arith.mulf %426, %427 : vector<16x32xf32>
    %429 = vector.broadcast %5 : vector<16x1xf32> to vector<16x32xf32>
    %430 = arith.addf %428, %429 : vector<16x32xf32>
    %cst_110 = arith.constant dense<0xFF800000> : vector<32xf32>
    %431 = vector.multi_reduction <maximumf>, %430, %cst_110 [0] : vector<16x32xf32> to vector<32xf32>
    %432 = vector.shape_cast %431 : vector<32xf32> to vector<1x32xf32>
    %433 = vector.broadcast %432 : vector<1x32xf32> to vector<16x32xf32>
    %434 = arith.subf %430, %433 : vector<16x32xf32>
    %435 = math.exp %434 : vector<16x32xf32>
    %cst_111 = arith.constant dense<0.000000e+00> : vector<32xf32>
    %436 = vector.multi_reduction <add>, %435, %cst_111 [0] : vector<16x32xf32> to vector<32xf32>
    %437 = vector.shape_cast %436 : vector<32xf32> to vector<1x32xf32>
    %438 = tpu.reciprocal %437 : vector<1x32xf32> -> vector<1x32xf32>
    %439 = vector.broadcast %438 : vector<1x32xf32> to vector<16x32xf32>
    %440 = arith.mulf %435, %439 : vector<16x32xf32>
    %cst_112 = arith.constant dense<0.000000e+00> : vector<16xf32>
    %441 = vector.multi_reduction <add>, %440, %cst_112 [1] : vector<16x32xf32> to vector<16xf32>
    %442 = vector.shape_cast %441 : vector<16xf32> to vector<16x1xf32>
    %cst_113 = arith.constant dense<0.000000e+00> : vector<16x128xf32>
    %443 = tpu.matmul %440, %402, %cst_113 {dimension_numbers = #tpu.dot_dimension_numbers<[1], [1], [0], [0], [0, 0, 1, 0], [], []>} : vector<16x32xf32>, vector<128x32xf32>, vector<16x128xf32> -> vector<16x128xf32>
    %444 = vector.broadcast %442 : vector<16x1xf32> to vector<16x128xf32>
    %445 = arith.mulf %444, %1 : vector<16x128xf32>
    %446 = arith.subf %443, %445 : vector<16x128xf32>
    %447 = arith.mulf %446, %446 : vector<16x128xf32>
    %cst_114 = arith.constant dense<0.000000e+00> : vector<16xf32>
    %448 = vector.multi_reduction <add>, %447, %cst_114 [1] : vector<16x128xf32> to vector<16xf32>
    %449 = vector.shape_cast %448 : vector<16xf32> to vector<16x1xf32>
    %cst_115 = arith.constant 1.000000e-24 : f32
    %450 = vector.broadcast %cst_115 : f32 to vector<16x1xf32>
    %451 = arith.maximumf %449, %450 : vector<16x1xf32>
    %452 = math.rsqrt %451 : vector<16x1xf32>
    %453 = vector.broadcast %452 : vector<16x1xf32> to vector<16x128xf32>
    %454 = arith.mulf %446, %453 : vector<16x128xf32>
    %455 = arith.mulf %454, %454 : vector<16x128xf32>
    %cst_116 = arith.constant dense<0.000000e+00> : vector<16xf32>
    %456 = vector.multi_reduction <add>, %455, %cst_116 [1] : vector<16x128xf32> to vector<16xf32>
    %457 = vector.shape_cast %456 : vector<16xf32> to vector<16x1xf32>
    %cst_117 = arith.constant dense<0.000000e+00> : vector<1xf32>
    %458 = vector.multi_reduction <add>, %457, %cst_117 [0] : vector<16x1xf32> to vector<1xf32>
    %459 = vector.shape_cast %458 : vector<1xf32> to vector<1x1xf32>
    %cst_118 = arith.constant 1.000000e-24 : f32
    %460 = vector.broadcast %cst_118 : f32 to vector<1x1xf32>
    %461 = arith.maximumf %459, %460 : vector<1x1xf32>
    %462 = math.rsqrt %461 : vector<1x1xf32>
    %463 = vector.extract_strided_slice %454 {offsets = [0, 0], sizes = [1, 128], strides = [1, 1]} : vector<16x128xf32> to vector<1x128xf32>
    %464 = vector.extract_strided_slice %454 {offsets = [1, 0], sizes = [1, 128], strides = [1, 1]} : vector<16x128xf32> to vector<1x128xf32>
    %465 = vector.extract_strided_slice %454 {offsets = [2, 0], sizes = [1, 128], strides = [1, 1]} : vector<16x128xf32> to vector<1x128xf32>
    %466 = vector.extract_strided_slice %454 {offsets = [3, 0], sizes = [1, 128], strides = [1, 1]} : vector<16x128xf32> to vector<1x128xf32>
    %467 = vector.extract_strided_slice %454 {offsets = [4, 0], sizes = [1, 128], strides = [1, 1]} : vector<16x128xf32> to vector<1x128xf32>
    %468 = vector.extract_strided_slice %454 {offsets = [5, 0], sizes = [1, 128], strides = [1, 1]} : vector<16x128xf32> to vector<1x128xf32>
    %469 = vector.extract_strided_slice %454 {offsets = [6, 0], sizes = [1, 128], strides = [1, 1]} : vector<16x128xf32> to vector<1x128xf32>
    %470 = vector.extract_strided_slice %454 {offsets = [7, 0], sizes = [1, 128], strides = [1, 1]} : vector<16x128xf32> to vector<1x128xf32>
    %471 = vector.extract_strided_slice %454 {offsets = [8, 0], sizes = [1, 128], strides = [1, 1]} : vector<16x128xf32> to vector<1x128xf32>
    %472 = vector.extract_strided_slice %454 {offsets = [9, 0], sizes = [1, 128], strides = [1, 1]} : vector<16x128xf32> to vector<1x128xf32>
    %473 = vector.extract_strided_slice %454 {offsets = [10, 0], sizes = [1, 128], strides = [1, 1]} : vector<16x128xf32> to vector<1x128xf32>
    %474 = vector.extract_strided_slice %454 {offsets = [11, 0], sizes = [1, 128], strides = [1, 1]} : vector<16x128xf32> to vector<1x128xf32>
    %475 = vector.extract_strided_slice %454 {offsets = [12, 0], sizes = [1, 128], strides = [1, 1]} : vector<16x128xf32> to vector<1x128xf32>
    %476 = vector.extract_strided_slice %454 {offsets = [13, 0], sizes = [1, 128], strides = [1, 1]} : vector<16x128xf32> to vector<1x128xf32>
    %477 = vector.extract_strided_slice %454 {offsets = [14, 0], sizes = [1, 128], strides = [1, 1]} : vector<16x128xf32> to vector<1x128xf32>
    %478 = vector.extract_strided_slice %454 {offsets = [15, 0], sizes = [1, 128], strides = [1, 1]} : vector<16x128xf32> to vector<1x128xf32>
    %479 = tpu.concatenate %463, %464, %465, %466, %467, %468, %469, %470, %471, %472, %473, %474, %475, %476, %477, %478 in 1 : vector<1x128xf32>, vector<1x128xf32>, vector<1x128xf32>, vector<1x128xf32>, vector<1x128xf32>, vector<1x128xf32>, vector<1x128xf32>, vector<1x128xf32>, vector<1x128xf32>, vector<1x128xf32>, vector<1x128xf32>, vector<1x128xf32>, vector<1x128xf32>, vector<1x128xf32>, vector<1x128xf32>, vector<1x128xf32> -> vector<1x2048xf32>
    %c6 = arith.constant 6 : index
    %c0_119 = arith.constant 0 : index
    %c0_120 = arith.constant 0 : index
    %480 = vector.load %arg1[%c6, %c0_119, %c0_120] : memref<16x128x32xf32, #tpu.memory_space<vmem>>, vector<1x128x32xf32>
    %481 = vector.shape_cast %480 : vector<1x128x32xf32> to vector<128x32xf32>
    %cst_121 = arith.constant dense<0.000000e+00> : vector<16x32xf32>
    %482 = tpu.matmul %0, %481, %cst_121 {dimension_numbers = #tpu.dot_dimension_numbers<[1], [0], [0], [1], [0, 0, 1, 1], [], []>} : vector<16x128xf32>, vector<128x32xf32>, vector<16x32xf32> -> vector<16x32xf32>
    %483 = arith.mulf %482, %482 : vector<16x32xf32>
    %484 = tpu.concatenate %482, %483 in 1 : vector<16x32xf32>, vector<16x32xf32> -> vector<16x64xf32>
    %cst_122 = arith.constant dense<0.000000e+00> : vector<4x64xf32>
    %485 = tpu.matmul %2, %484, %cst_122 {dimension_numbers = #tpu.dot_dimension_numbers<[1], [0], [0], [1], [0, 0, 1, 1], [], []>} : vector<4x16xf32>, vector<16x64xf32>, vector<4x64xf32> -> vector<4x64xf32>
    %486 = vector.extract_strided_slice %485 {offsets = [0, 0], sizes = [4, 32], strides = [1, 1]} : vector<4x64xf32> to vector<4x32xf32>
    %cst_123 = arith.constant 2.500000e-01 : f32
    %487 = vector.broadcast %cst_123 : f32 to vector<4x32xf32>
    %488 = arith.mulf %486, %487 : vector<4x32xf32>
    %489 = vector.extract_strided_slice %485 {offsets = [0, 32], sizes = [4, 32], strides = [1, 1]} : vector<4x64xf32> to vector<4x32xf32>
    %cst_124 = arith.constant 2.500000e-01 : f32
    %490 = vector.broadcast %cst_124 : f32 to vector<4x32xf32>
    %491 = arith.mulf %489, %490 : vector<4x32xf32>
    %492 = arith.mulf %488, %488 : vector<4x32xf32>
    %493 = arith.subf %491, %492 : vector<4x32xf32>
    %cst_125 = arith.constant 0.000000e+00 : f32
    %494 = vector.broadcast %cst_125 : f32 to vector<4x32xf32>
    %495 = arith.maximumf %493, %494 : vector<4x32xf32>
    %cst_126 = arith.constant 9.99999974E-6 : f32
    %496 = vector.broadcast %cst_126 : f32 to vector<4x32xf32>
    %497 = arith.addf %495, %496 : vector<4x32xf32>
    %498 = math.rsqrt %497 : vector<4x32xf32>
    %499 = arith.mulf %488, %498 : vector<4x32xf32>
    %500 = tpu.concatenate %498, %499 in 1 : vector<4x32xf32>, vector<4x32xf32> -> vector<4x64xf32>
    %cst_127 = arith.constant dense<0.000000e+00> : vector<16x64xf32>
    %501 = tpu.matmul %3, %500, %cst_127 {dimension_numbers = #tpu.dot_dimension_numbers<[1], [0], [0], [1], [0, 0, 1, 1], [], []>} : vector<16x4xf32>, vector<4x64xf32>, vector<16x64xf32> -> vector<16x64xf32>
    %502 = vector.extract_strided_slice %501 {offsets = [0, 0], sizes = [16, 32], strides = [1, 1]} : vector<16x64xf32> to vector<16x32xf32>
    %503 = arith.mulf %482, %502 : vector<16x32xf32>
    %504 = vector.extract_strided_slice %501 {offsets = [0, 32], sizes = [16, 32], strides = [1, 1]} : vector<16x64xf32> to vector<16x32xf32>
    %505 = arith.subf %503, %504 : vector<16x32xf32>
    %506 = vector.broadcast %4 : vector<16x1xf32> to vector<16x32xf32>
    %507 = arith.mulf %505, %506 : vector<16x32xf32>
    %508 = vector.broadcast %5 : vector<16x1xf32> to vector<16x32xf32>
    %509 = arith.addf %507, %508 : vector<16x32xf32>
    %cst_128 = arith.constant dense<0xFF800000> : vector<32xf32>
    %510 = vector.multi_reduction <maximumf>, %509, %cst_128 [0] : vector<16x32xf32> to vector<32xf32>
    %511 = vector.shape_cast %510 : vector<32xf32> to vector<1x32xf32>
    %512 = vector.broadcast %511 : vector<1x32xf32> to vector<16x32xf32>
    %513 = arith.subf %509, %512 : vector<16x32xf32>
    %514 = math.exp %513 : vector<16x32xf32>
    %cst_129 = arith.constant dense<0.000000e+00> : vector<32xf32>
    %515 = vector.multi_reduction <add>, %514, %cst_129 [0] : vector<16x32xf32> to vector<32xf32>
    %516 = vector.shape_cast %515 : vector<32xf32> to vector<1x32xf32>
    %517 = tpu.reciprocal %516 : vector<1x32xf32> -> vector<1x32xf32>
    %518 = vector.broadcast %517 : vector<1x32xf32> to vector<16x32xf32>
    %519 = arith.mulf %514, %518 : vector<16x32xf32>
    %cst_130 = arith.constant dense<0.000000e+00> : vector<16xf32>
    %520 = vector.multi_reduction <add>, %519, %cst_130 [1] : vector<16x32xf32> to vector<16xf32>
    %521 = vector.shape_cast %520 : vector<16xf32> to vector<16x1xf32>
    %cst_131 = arith.constant dense<0.000000e+00> : vector<16x128xf32>
    %522 = tpu.matmul %519, %481, %cst_131 {dimension_numbers = #tpu.dot_dimension_numbers<[1], [1], [0], [0], [0, 0, 1, 0], [], []>} : vector<16x32xf32>, vector<128x32xf32>, vector<16x128xf32> -> vector<16x128xf32>
    %523 = vector.broadcast %521 : vector<16x1xf32> to vector<16x128xf32>
    %524 = arith.mulf %523, %1 : vector<16x128xf32>
    %525 = arith.subf %522, %524 : vector<16x128xf32>
    %526 = arith.mulf %525, %525 : vector<16x128xf32>
    %cst_132 = arith.constant dense<0.000000e+00> : vector<16xf32>
    %527 = vector.multi_reduction <add>, %526, %cst_132 [1] : vector<16x128xf32> to vector<16xf32>
    %528 = vector.shape_cast %527 : vector<16xf32> to vector<16x1xf32>
    %cst_133 = arith.constant 1.000000e-24 : f32
    %529 = vector.broadcast %cst_133 : f32 to vector<16x1xf32>
    %530 = arith.maximumf %528, %529 : vector<16x1xf32>
    %531 = math.rsqrt %530 : vector<16x1xf32>
    %532 = vector.broadcast %531 : vector<16x1xf32> to vector<16x128xf32>
    %533 = arith.mulf %525, %532 : vector<16x128xf32>
    %534 = arith.mulf %533, %533 : vector<16x128xf32>
    %cst_134 = arith.constant dense<0.000000e+00> : vector<16xf32>
    %535 = vector.multi_reduction <add>, %534, %cst_134 [1] : vector<16x128xf32> to vector<16xf32>
    %536 = vector.shape_cast %535 : vector<16xf32> to vector<16x1xf32>
    %cst_135 = arith.constant dense<0.000000e+00> : vector<1xf32>
    %537 = vector.multi_reduction <add>, %536, %cst_135 [0] : vector<16x1xf32> to vector<1xf32>
    %538 = vector.shape_cast %537 : vector<1xf32> to vector<1x1xf32>
    %cst_136 = arith.constant 1.000000e-24 : f32
    %539 = vector.broadcast %cst_136 : f32 to vector<1x1xf32>
    %540 = arith.maximumf %538, %539 : vector<1x1xf32>
    %541 = math.rsqrt %540 : vector<1x1xf32>
    %542 = vector.extract_strided_slice %533 {offsets = [0, 0], sizes = [1, 128], strides = [1, 1]} : vector<16x128xf32> to vector<1x128xf32>
    %543 = vector.extract_strided_slice %533 {offsets = [1, 0], sizes = [1, 128], strides = [1, 1]} : vector<16x128xf32> to vector<1x128xf32>
    %544 = vector.extract_strided_slice %533 {offsets = [2, 0], sizes = [1, 128], strides = [1, 1]} : vector<16x128xf32> to vector<1x128xf32>
    %545 = vector.extract_strided_slice %533 {offsets = [3, 0], sizes = [1, 128], strides = [1, 1]} : vector<16x128xf32> to vector<1x128xf32>
    %546 = vector.extract_strided_slice %533 {offsets = [4, 0], sizes = [1, 128], strides = [1, 1]} : vector<16x128xf32> to vector<1x128xf32>
    %547 = vector.extract_strided_slice %533 {offsets = [5, 0], sizes = [1, 128], strides = [1, 1]} : vector<16x128xf32> to vector<1x128xf32>
    %548 = vector.extract_strided_slice %533 {offsets = [6, 0], sizes = [1, 128], strides = [1, 1]} : vector<16x128xf32> to vector<1x128xf32>
    %549 = vector.extract_strided_slice %533 {offsets = [7, 0], sizes = [1, 128], strides = [1, 1]} : vector<16x128xf32> to vector<1x128xf32>
    %550 = vector.extract_strided_slice %533 {offsets = [8, 0], sizes = [1, 128], strides = [1, 1]} : vector<16x128xf32> to vector<1x128xf32>
    %551 = vector.extract_strided_slice %533 {offsets = [9, 0], sizes = [1, 128], strides = [1, 1]} : vector<16x128xf32> to vector<1x128xf32>
    %552 = vector.extract_strided_slice %533 {offsets = [10, 0], sizes = [1, 128], strides = [1, 1]} : vector<16x128xf32> to vector<1x128xf32>
    %553 = vector.extract_strided_slice %533 {offsets = [11, 0], sizes = [1, 128], strides = [1, 1]} : vector<16x128xf32> to vector<1x128xf32>
    %554 = vector.extract_strided_slice %533 {offsets = [12, 0], sizes = [1, 128], strides = [1, 1]} : vector<16x128xf32> to vector<1x128xf32>
    %555 = vector.extract_strided_slice %533 {offsets = [13, 0], sizes = [1, 128], strides = [1, 1]} : vector<16x128xf32> to vector<1x128xf32>
    %556 = vector.extract_strided_slice %533 {offsets = [14, 0], sizes = [1, 128], strides = [1, 1]} : vector<16x128xf32> to vector<1x128xf32>
    %557 = vector.extract_strided_slice %533 {offsets = [15, 0], sizes = [1, 128], strides = [1, 1]} : vector<16x128xf32> to vector<1x128xf32>
    %558 = tpu.concatenate %542, %543, %544, %545, %546, %547, %548, %549, %550, %551, %552, %553, %554, %555, %556, %557 in 1 : vector<1x128xf32>, vector<1x128xf32>, vector<1x128xf32>, vector<1x128xf32>, vector<1x128xf32>, vector<1x128xf32>, vector<1x128xf32>, vector<1x128xf32>, vector<1x128xf32>, vector<1x128xf32>, vector<1x128xf32>, vector<1x128xf32>, vector<1x128xf32>, vector<1x128xf32>, vector<1x128xf32>, vector<1x128xf32> -> vector<1x2048xf32>
    %c7 = arith.constant 7 : index
    %c0_137 = arith.constant 0 : index
    %c0_138 = arith.constant 0 : index
    %559 = vector.load %arg1[%c7, %c0_137, %c0_138] : memref<16x128x32xf32, #tpu.memory_space<vmem>>, vector<1x128x32xf32>
    %560 = vector.shape_cast %559 : vector<1x128x32xf32> to vector<128x32xf32>
    %cst_139 = arith.constant dense<0.000000e+00> : vector<16x32xf32>
    %561 = tpu.matmul %0, %560, %cst_139 {dimension_numbers = #tpu.dot_dimension_numbers<[1], [0], [0], [1], [0, 0, 1, 1], [], []>} : vector<16x128xf32>, vector<128x32xf32>, vector<16x32xf32> -> vector<16x32xf32>
    %562 = arith.mulf %561, %561 : vector<16x32xf32>
    %563 = tpu.concatenate %561, %562 in 1 : vector<16x32xf32>, vector<16x32xf32> -> vector<16x64xf32>
    %cst_140 = arith.constant dense<0.000000e+00> : vector<4x64xf32>
    %564 = tpu.matmul %2, %563, %cst_140 {dimension_numbers = #tpu.dot_dimension_numbers<[1], [0], [0], [1], [0, 0, 1, 1], [], []>} : vector<4x16xf32>, vector<16x64xf32>, vector<4x64xf32> -> vector<4x64xf32>
    %565 = vector.extract_strided_slice %564 {offsets = [0, 0], sizes = [4, 32], strides = [1, 1]} : vector<4x64xf32> to vector<4x32xf32>
    %cst_141 = arith.constant 2.500000e-01 : f32
    %566 = vector.broadcast %cst_141 : f32 to vector<4x32xf32>
    %567 = arith.mulf %565, %566 : vector<4x32xf32>
    %568 = vector.extract_strided_slice %564 {offsets = [0, 32], sizes = [4, 32], strides = [1, 1]} : vector<4x64xf32> to vector<4x32xf32>
    %cst_142 = arith.constant 2.500000e-01 : f32
    %569 = vector.broadcast %cst_142 : f32 to vector<4x32xf32>
    %570 = arith.mulf %568, %569 : vector<4x32xf32>
    %571 = arith.mulf %567, %567 : vector<4x32xf32>
    %572 = arith.subf %570, %571 : vector<4x32xf32>
    %cst_143 = arith.constant 0.000000e+00 : f32
    %573 = vector.broadcast %cst_143 : f32 to vector<4x32xf32>
    %574 = arith.maximumf %572, %573 : vector<4x32xf32>
    %cst_144 = arith.constant 9.99999974E-6 : f32
    %575 = vector.broadcast %cst_144 : f32 to vector<4x32xf32>
    %576 = arith.addf %574, %575 : vector<4x32xf32>
    %577 = math.rsqrt %576 : vector<4x32xf32>
    %578 = arith.mulf %567, %577 : vector<4x32xf32>
    %579 = tpu.concatenate %577, %578 in 1 : vector<4x32xf32>, vector<4x32xf32> -> vector<4x64xf32>
    %cst_145 = arith.constant dense<0.000000e+00> : vector<16x64xf32>
    %580 = tpu.matmul %3, %579, %cst_145 {dimension_numbers = #tpu.dot_dimension_numbers<[1], [0], [0], [1], [0, 0, 1, 1], [], []>} : vector<16x4xf32>, vector<4x64xf32>, vector<16x64xf32> -> vector<16x64xf32>
    %581 = vector.extract_strided_slice %580 {offsets = [0, 0], sizes = [16, 32], strides = [1, 1]} : vector<16x64xf32> to vector<16x32xf32>
    %582 = arith.mulf %561, %581 : vector<16x32xf32>
    %583 = vector.extract_strided_slice %580 {offsets = [0, 32], sizes = [16, 32], strides = [1, 1]} : vector<16x64xf32> to vector<16x32xf32>
    %584 = arith.subf %582, %583 : vector<16x32xf32>
    %585 = vector.broadcast %4 : vector<16x1xf32> to vector<16x32xf32>
    %586 = arith.mulf %584, %585 : vector<16x32xf32>
    %587 = vector.broadcast %5 : vector<16x1xf32> to vector<16x32xf32>
    %588 = arith.addf %586, %587 : vector<16x32xf32>
    %cst_146 = arith.constant dense<0xFF800000> : vector<32xf32>
    %589 = vector.multi_reduction <maximumf>, %588, %cst_146 [0] : vector<16x32xf32> to vector<32xf32>
    %590 = vector.shape_cast %589 : vector<32xf32> to vector<1x32xf32>
    %591 = vector.broadcast %590 : vector<1x32xf32> to vector<16x32xf32>
    %592 = arith.subf %588, %591 : vector<16x32xf32>
    %593 = math.exp %592 : vector<16x32xf32>
    %cst_147 = arith.constant dense<0.000000e+00> : vector<32xf32>
    %594 = vector.multi_reduction <add>, %593, %cst_147 [0] : vector<16x32xf32> to vector<32xf32>
    %595 = vector.shape_cast %594 : vector<32xf32> to vector<1x32xf32>
    %596 = tpu.reciprocal %595 : vector<1x32xf32> -> vector<1x32xf32>
    %597 = vector.broadcast %596 : vector<1x32xf32> to vector<16x32xf32>
    %598 = arith.mulf %593, %597 : vector<16x32xf32>
    %cst_148 = arith.constant dense<0.000000e+00> : vector<16xf32>
    %599 = vector.multi_reduction <add>, %598, %cst_148 [1] : vector<16x32xf32> to vector<16xf32>
    %600 = vector.shape_cast %599 : vector<16xf32> to vector<16x1xf32>
    %cst_149 = arith.constant dense<0.000000e+00> : vector<16x128xf32>
    %601 = tpu.matmul %598, %560, %cst_149 {dimension_numbers = #tpu.dot_dimension_numbers<[1], [1], [0], [0], [0, 0, 1, 0], [], []>} : vector<16x32xf32>, vector<128x32xf32>, vector<16x128xf32> -> vector<16x128xf32>
    %602 = vector.broadcast %600 : vector<16x1xf32> to vector<16x128xf32>
    %603 = arith.mulf %602, %1 : vector<16x128xf32>
    %604 = arith.subf %601, %603 : vector<16x128xf32>
    %605 = arith.mulf %604, %604 : vector<16x128xf32>
    %cst_150 = arith.constant dense<0.000000e+00> : vector<16xf32>
    %606 = vector.multi_reduction <add>, %605, %cst_150 [1] : vector<16x128xf32> to vector<16xf32>
    %607 = vector.shape_cast %606 : vector<16xf32> to vector<16x1xf32>
    %cst_151 = arith.constant 1.000000e-24 : f32
    %608 = vector.broadcast %cst_151 : f32 to vector<16x1xf32>
    %609 = arith.maximumf %607, %608 : vector<16x1xf32>
    %610 = math.rsqrt %609 : vector<16x1xf32>
    %611 = vector.broadcast %610 : vector<16x1xf32> to vector<16x128xf32>
    %612 = arith.mulf %604, %611 : vector<16x128xf32>
    %613 = arith.mulf %612, %612 : vector<16x128xf32>
    %cst_152 = arith.constant dense<0.000000e+00> : vector<16xf32>
    %614 = vector.multi_reduction <add>, %613, %cst_152 [1] : vector<16x128xf32> to vector<16xf32>
    %615 = vector.shape_cast %614 : vector<16xf32> to vector<16x1xf32>
    %cst_153 = arith.constant dense<0.000000e+00> : vector<1xf32>
    %616 = vector.multi_reduction <add>, %615, %cst_153 [0] : vector<16x1xf32> to vector<1xf32>
    %617 = vector.shape_cast %616 : vector<1xf32> to vector<1x1xf32>
    %cst_154 = arith.constant 1.000000e-24 : f32
    %618 = vector.broadcast %cst_154 : f32 to vector<1x1xf32>
    %619 = arith.maximumf %617, %618 : vector<1x1xf32>
    %620 = math.rsqrt %619 : vector<1x1xf32>
    %621 = vector.extract_strided_slice %612 {offsets = [0, 0], sizes = [1, 128], strides = [1, 1]} : vector<16x128xf32> to vector<1x128xf32>
    %622 = vector.extract_strided_slice %612 {offsets = [1, 0], sizes = [1, 128], strides = [1, 1]} : vector<16x128xf32> to vector<1x128xf32>
    %623 = vector.extract_strided_slice %612 {offsets = [2, 0], sizes = [1, 128], strides = [1, 1]} : vector<16x128xf32> to vector<1x128xf32>
    %624 = vector.extract_strided_slice %612 {offsets = [3, 0], sizes = [1, 128], strides = [1, 1]} : vector<16x128xf32> to vector<1x128xf32>
    %625 = vector.extract_strided_slice %612 {offsets = [4, 0], sizes = [1, 128], strides = [1, 1]} : vector<16x128xf32> to vector<1x128xf32>
    %626 = vector.extract_strided_slice %612 {offsets = [5, 0], sizes = [1, 128], strides = [1, 1]} : vector<16x128xf32> to vector<1x128xf32>
    %627 = vector.extract_strided_slice %612 {offsets = [6, 0], sizes = [1, 128], strides = [1, 1]} : vector<16x128xf32> to vector<1x128xf32>
    %628 = vector.extract_strided_slice %612 {offsets = [7, 0], sizes = [1, 128], strides = [1, 1]} : vector<16x128xf32> to vector<1x128xf32>
    %629 = vector.extract_strided_slice %612 {offsets = [8, 0], sizes = [1, 128], strides = [1, 1]} : vector<16x128xf32> to vector<1x128xf32>
    %630 = vector.extract_strided_slice %612 {offsets = [9, 0], sizes = [1, 128], strides = [1, 1]} : vector<16x128xf32> to vector<1x128xf32>
    %631 = vector.extract_strided_slice %612 {offsets = [10, 0], sizes = [1, 128], strides = [1, 1]} : vector<16x128xf32> to vector<1x128xf32>
    %632 = vector.extract_strided_slice %612 {offsets = [11, 0], sizes = [1, 128], strides = [1, 1]} : vector<16x128xf32> to vector<1x128xf32>
    %633 = vector.extract_strided_slice %612 {offsets = [12, 0], sizes = [1, 128], strides = [1, 1]} : vector<16x128xf32> to vector<1x128xf32>
    %634 = vector.extract_strided_slice %612 {offsets = [13, 0], sizes = [1, 128], strides = [1, 1]} : vector<16x128xf32> to vector<1x128xf32>
    %635 = vector.extract_strided_slice %612 {offsets = [14, 0], sizes = [1, 128], strides = [1, 1]} : vector<16x128xf32> to vector<1x128xf32>
    %636 = vector.extract_strided_slice %612 {offsets = [15, 0], sizes = [1, 128], strides = [1, 1]} : vector<16x128xf32> to vector<1x128xf32>
    %637 = tpu.concatenate %621, %622, %623, %624, %625, %626, %627, %628, %629, %630, %631, %632, %633, %634, %635, %636 in 1 : vector<1x128xf32>, vector<1x128xf32>, vector<1x128xf32>, vector<1x128xf32>, vector<1x128xf32>, vector<1x128xf32>, vector<1x128xf32>, vector<1x128xf32>, vector<1x128xf32>, vector<1x128xf32>, vector<1x128xf32>, vector<1x128xf32>, vector<1x128xf32>, vector<1x128xf32>, vector<1x128xf32>, vector<1x128xf32> -> vector<1x2048xf32>
    %c8 = arith.constant 8 : index
    %c0_155 = arith.constant 0 : index
    %c0_156 = arith.constant 0 : index
    %638 = vector.load %arg1[%c8, %c0_155, %c0_156] : memref<16x128x32xf32, #tpu.memory_space<vmem>>, vector<1x128x32xf32>
    %639 = vector.shape_cast %638 : vector<1x128x32xf32> to vector<128x32xf32>
    %cst_157 = arith.constant dense<0.000000e+00> : vector<16x32xf32>
    %640 = tpu.matmul %0, %639, %cst_157 {dimension_numbers = #tpu.dot_dimension_numbers<[1], [0], [0], [1], [0, 0, 1, 1], [], []>} : vector<16x128xf32>, vector<128x32xf32>, vector<16x32xf32> -> vector<16x32xf32>
    %641 = arith.mulf %640, %640 : vector<16x32xf32>
    %642 = tpu.concatenate %640, %641 in 1 : vector<16x32xf32>, vector<16x32xf32> -> vector<16x64xf32>
    %cst_158 = arith.constant dense<0.000000e+00> : vector<4x64xf32>
    %643 = tpu.matmul %2, %642, %cst_158 {dimension_numbers = #tpu.dot_dimension_numbers<[1], [0], [0], [1], [0, 0, 1, 1], [], []>} : vector<4x16xf32>, vector<16x64xf32>, vector<4x64xf32> -> vector<4x64xf32>
    %644 = vector.extract_strided_slice %643 {offsets = [0, 0], sizes = [4, 32], strides = [1, 1]} : vector<4x64xf32> to vector<4x32xf32>
    %cst_159 = arith.constant 2.500000e-01 : f32
    %645 = vector.broadcast %cst_159 : f32 to vector<4x32xf32>
    %646 = arith.mulf %644, %645 : vector<4x32xf32>
    %647 = vector.extract_strided_slice %643 {offsets = [0, 32], sizes = [4, 32], strides = [1, 1]} : vector<4x64xf32> to vector<4x32xf32>
    %cst_160 = arith.constant 2.500000e-01 : f32
    %648 = vector.broadcast %cst_160 : f32 to vector<4x32xf32>
    %649 = arith.mulf %647, %648 : vector<4x32xf32>
    %650 = arith.mulf %646, %646 : vector<4x32xf32>
    %651 = arith.subf %649, %650 : vector<4x32xf32>
    %cst_161 = arith.constant 0.000000e+00 : f32
    %652 = vector.broadcast %cst_161 : f32 to vector<4x32xf32>
    %653 = arith.maximumf %651, %652 : vector<4x32xf32>
    %cst_162 = arith.constant 9.99999974E-6 : f32
    %654 = vector.broadcast %cst_162 : f32 to vector<4x32xf32>
    %655 = arith.addf %653, %654 : vector<4x32xf32>
    %656 = math.rsqrt %655 : vector<4x32xf32>
    %657 = arith.mulf %646, %656 : vector<4x32xf32>
    %658 = tpu.concatenate %656, %657 in 1 : vector<4x32xf32>, vector<4x32xf32> -> vector<4x64xf32>
    %cst_163 = arith.constant dense<0.000000e+00> : vector<16x64xf32>
    %659 = tpu.matmul %3, %658, %cst_163 {dimension_numbers = #tpu.dot_dimension_numbers<[1], [0], [0], [1], [0, 0, 1, 1], [], []>} : vector<16x4xf32>, vector<4x64xf32>, vector<16x64xf32> -> vector<16x64xf32>
    %660 = vector.extract_strided_slice %659 {offsets = [0, 0], sizes = [16, 32], strides = [1, 1]} : vector<16x64xf32> to vector<16x32xf32>
    %661 = arith.mulf %640, %660 : vector<16x32xf32>
    %662 = vector.extract_strided_slice %659 {offsets = [0, 32], sizes = [16, 32], strides = [1, 1]} : vector<16x64xf32> to vector<16x32xf32>
    %663 = arith.subf %661, %662 : vector<16x32xf32>
    %664 = vector.broadcast %4 : vector<16x1xf32> to vector<16x32xf32>
    %665 = arith.mulf %663, %664 : vector<16x32xf32>
    %666 = vector.broadcast %5 : vector<16x1xf32> to vector<16x32xf32>
    %667 = arith.addf %665, %666 : vector<16x32xf32>
    %cst_164 = arith.constant dense<0xFF800000> : vector<32xf32>
    %668 = vector.multi_reduction <maximumf>, %667, %cst_164 [0] : vector<16x32xf32> to vector<32xf32>
    %669 = vector.shape_cast %668 : vector<32xf32> to vector<1x32xf32>
    %670 = vector.broadcast %669 : vector<1x32xf32> to vector<16x32xf32>
    %671 = arith.subf %667, %670 : vector<16x32xf32>
    %672 = math.exp %671 : vector<16x32xf32>
    %cst_165 = arith.constant dense<0.000000e+00> : vector<32xf32>
    %673 = vector.multi_reduction <add>, %672, %cst_165 [0] : vector<16x32xf32> to vector<32xf32>
    %674 = vector.shape_cast %673 : vector<32xf32> to vector<1x32xf32>
    %675 = tpu.reciprocal %674 : vector<1x32xf32> -> vector<1x32xf32>
    %676 = vector.broadcast %675 : vector<1x32xf32> to vector<16x32xf32>
    %677 = arith.mulf %672, %676 : vector<16x32xf32>
    %cst_166 = arith.constant dense<0.000000e+00> : vector<16xf32>
    %678 = vector.multi_reduction <add>, %677, %cst_166 [1] : vector<16x32xf32> to vector<16xf32>
    %679 = vector.shape_cast %678 : vector<16xf32> to vector<16x1xf32>
    %cst_167 = arith.constant dense<0.000000e+00> : vector<16x128xf32>
    %680 = tpu.matmul %677, %639, %cst_167 {dimension_numbers = #tpu.dot_dimension_numbers<[1], [1], [0], [0], [0, 0, 1, 0], [], []>} : vector<16x32xf32>, vector<128x32xf32>, vector<16x128xf32> -> vector<16x128xf32>
    %681 = vector.broadcast %679 : vector<16x1xf32> to vector<16x128xf32>
    %682 = arith.mulf %681, %1 : vector<16x128xf32>
    %683 = arith.subf %680, %682 : vector<16x128xf32>
    %684 = arith.mulf %683, %683 : vector<16x128xf32>
    %cst_168 = arith.constant dense<0.000000e+00> : vector<16xf32>
    %685 = vector.multi_reduction <add>, %684, %cst_168 [1] : vector<16x128xf32> to vector<16xf32>
    %686 = vector.shape_cast %685 : vector<16xf32> to vector<16x1xf32>
    %cst_169 = arith.constant 1.000000e-24 : f32
    %687 = vector.broadcast %cst_169 : f32 to vector<16x1xf32>
    %688 = arith.maximumf %686, %687 : vector<16x1xf32>
    %689 = math.rsqrt %688 : vector<16x1xf32>
    %690 = vector.broadcast %689 : vector<16x1xf32> to vector<16x128xf32>
    %691 = arith.mulf %683, %690 : vector<16x128xf32>
    %692 = arith.mulf %691, %691 : vector<16x128xf32>
    %cst_170 = arith.constant dense<0.000000e+00> : vector<16xf32>
    %693 = vector.multi_reduction <add>, %692, %cst_170 [1] : vector<16x128xf32> to vector<16xf32>
    %694 = vector.shape_cast %693 : vector<16xf32> to vector<16x1xf32>
    %cst_171 = arith.constant dense<0.000000e+00> : vector<1xf32>
    %695 = vector.multi_reduction <add>, %694, %cst_171 [0] : vector<16x1xf32> to vector<1xf32>
    %696 = vector.shape_cast %695 : vector<1xf32> to vector<1x1xf32>
    %cst_172 = arith.constant 1.000000e-24 : f32
    %697 = vector.broadcast %cst_172 : f32 to vector<1x1xf32>
    %698 = arith.maximumf %696, %697 : vector<1x1xf32>
    %699 = math.rsqrt %698 : vector<1x1xf32>
    %700 = vector.extract_strided_slice %691 {offsets = [0, 0], sizes = [1, 128], strides = [1, 1]} : vector<16x128xf32> to vector<1x128xf32>
    %701 = vector.extract_strided_slice %691 {offsets = [1, 0], sizes = [1, 128], strides = [1, 1]} : vector<16x128xf32> to vector<1x128xf32>
    %702 = vector.extract_strided_slice %691 {offsets = [2, 0], sizes = [1, 128], strides = [1, 1]} : vector<16x128xf32> to vector<1x128xf32>
    %703 = vector.extract_strided_slice %691 {offsets = [3, 0], sizes = [1, 128], strides = [1, 1]} : vector<16x128xf32> to vector<1x128xf32>
    %704 = vector.extract_strided_slice %691 {offsets = [4, 0], sizes = [1, 128], strides = [1, 1]} : vector<16x128xf32> to vector<1x128xf32>
    %705 = vector.extract_strided_slice %691 {offsets = [5, 0], sizes = [1, 128], strides = [1, 1]} : vector<16x128xf32> to vector<1x128xf32>
    %706 = vector.extract_strided_slice %691 {offsets = [6, 0], sizes = [1, 128], strides = [1, 1]} : vector<16x128xf32> to vector<1x128xf32>
    %707 = vector.extract_strided_slice %691 {offsets = [7, 0], sizes = [1, 128], strides = [1, 1]} : vector<16x128xf32> to vector<1x128xf32>
    %708 = vector.extract_strided_slice %691 {offsets = [8, 0], sizes = [1, 128], strides = [1, 1]} : vector<16x128xf32> to vector<1x128xf32>
    %709 = vector.extract_strided_slice %691 {offsets = [9, 0], sizes = [1, 128], strides = [1, 1]} : vector<16x128xf32> to vector<1x128xf32>
    %710 = vector.extract_strided_slice %691 {offsets = [10, 0], sizes = [1, 128], strides = [1, 1]} : vector<16x128xf32> to vector<1x128xf32>
    %711 = vector.extract_strided_slice %691 {offsets = [11, 0], sizes = [1, 128], strides = [1, 1]} : vector<16x128xf32> to vector<1x128xf32>
    %712 = vector.extract_strided_slice %691 {offsets = [12, 0], sizes = [1, 128], strides = [1, 1]} : vector<16x128xf32> to vector<1x128xf32>
    %713 = vector.extract_strided_slice %691 {offsets = [13, 0], sizes = [1, 128], strides = [1, 1]} : vector<16x128xf32> to vector<1x128xf32>
    %714 = vector.extract_strided_slice %691 {offsets = [14, 0], sizes = [1, 128], strides = [1, 1]} : vector<16x128xf32> to vector<1x128xf32>
    %715 = vector.extract_strided_slice %691 {offsets = [15, 0], sizes = [1, 128], strides = [1, 1]} : vector<16x128xf32> to vector<1x128xf32>
    %716 = tpu.concatenate %700, %701, %702, %703, %704, %705, %706, %707, %708, %709, %710, %711, %712, %713, %714, %715 in 1 : vector<1x128xf32>, vector<1x128xf32>, vector<1x128xf32>, vector<1x128xf32>, vector<1x128xf32>, vector<1x128xf32>, vector<1x128xf32>, vector<1x128xf32>, vector<1x128xf32>, vector<1x128xf32>, vector<1x128xf32>, vector<1x128xf32>, vector<1x128xf32>, vector<1x128xf32>, vector<1x128xf32>, vector<1x128xf32> -> vector<1x2048xf32>
    %c9 = arith.constant 9 : index
    %c0_173 = arith.constant 0 : index
    %c0_174 = arith.constant 0 : index
    %717 = vector.load %arg1[%c9, %c0_173, %c0_174] : memref<16x128x32xf32, #tpu.memory_space<vmem>>, vector<1x128x32xf32>
    %718 = vector.shape_cast %717 : vector<1x128x32xf32> to vector<128x32xf32>
    %cst_175 = arith.constant dense<0.000000e+00> : vector<16x32xf32>
    %719 = tpu.matmul %0, %718, %cst_175 {dimension_numbers = #tpu.dot_dimension_numbers<[1], [0], [0], [1], [0, 0, 1, 1], [], []>} : vector<16x128xf32>, vector<128x32xf32>, vector<16x32xf32> -> vector<16x32xf32>
    %720 = arith.mulf %719, %719 : vector<16x32xf32>
    %721 = tpu.concatenate %719, %720 in 1 : vector<16x32xf32>, vector<16x32xf32> -> vector<16x64xf32>
    %cst_176 = arith.constant dense<0.000000e+00> : vector<4x64xf32>
    %722 = tpu.matmul %2, %721, %cst_176 {dimension_numbers = #tpu.dot_dimension_numbers<[1], [0], [0], [1], [0, 0, 1, 1], [], []>} : vector<4x16xf32>, vector<16x64xf32>, vector<4x64xf32> -> vector<4x64xf32>
    %723 = vector.extract_strided_slice %722 {offsets = [0, 0], sizes = [4, 32], strides = [1, 1]} : vector<4x64xf32> to vector<4x32xf32>
    %cst_177 = arith.constant 2.500000e-01 : f32
    %724 = vector.broadcast %cst_177 : f32 to vector<4x32xf32>
    %725 = arith.mulf %723, %724 : vector<4x32xf32>
    %726 = vector.extract_strided_slice %722 {offsets = [0, 32], sizes = [4, 32], strides = [1, 1]} : vector<4x64xf32> to vector<4x32xf32>
    %cst_178 = arith.constant 2.500000e-01 : f32
    %727 = vector.broadcast %cst_178 : f32 to vector<4x32xf32>
    %728 = arith.mulf %726, %727 : vector<4x32xf32>
    %729 = arith.mulf %725, %725 : vector<4x32xf32>
    %730 = arith.subf %728, %729 : vector<4x32xf32>
    %cst_179 = arith.constant 0.000000e+00 : f32
    %731 = vector.broadcast %cst_179 : f32 to vector<4x32xf32>
    %732 = arith.maximumf %730, %731 : vector<4x32xf32>
    %cst_180 = arith.constant 9.99999974E-6 : f32
    %733 = vector.broadcast %cst_180 : f32 to vector<4x32xf32>
    %734 = arith.addf %732, %733 : vector<4x32xf32>
    %735 = math.rsqrt %734 : vector<4x32xf32>
    %736 = arith.mulf %725, %735 : vector<4x32xf32>
    %737 = tpu.concatenate %735, %736 in 1 : vector<4x32xf32>, vector<4x32xf32> -> vector<4x64xf32>
    %cst_181 = arith.constant dense<0.000000e+00> : vector<16x64xf32>
    %738 = tpu.matmul %3, %737, %cst_181 {dimension_numbers = #tpu.dot_dimension_numbers<[1], [0], [0], [1], [0, 0, 1, 1], [], []>} : vector<16x4xf32>, vector<4x64xf32>, vector<16x64xf32> -> vector<16x64xf32>
    %739 = vector.extract_strided_slice %738 {offsets = [0, 0], sizes = [16, 32], strides = [1, 1]} : vector<16x64xf32> to vector<16x32xf32>
    %740 = arith.mulf %719, %739 : vector<16x32xf32>
    %741 = vector.extract_strided_slice %738 {offsets = [0, 32], sizes = [16, 32], strides = [1, 1]} : vector<16x64xf32> to vector<16x32xf32>
    %742 = arith.subf %740, %741 : vector<16x32xf32>
    %743 = vector.broadcast %4 : vector<16x1xf32> to vector<16x32xf32>
    %744 = arith.mulf %742, %743 : vector<16x32xf32>
    %745 = vector.broadcast %5 : vector<16x1xf32> to vector<16x32xf32>
    %746 = arith.addf %744, %745 : vector<16x32xf32>
    %cst_182 = arith.constant dense<0xFF800000> : vector<32xf32>
    %747 = vector.multi_reduction <maximumf>, %746, %cst_182 [0] : vector<16x32xf32> to vector<32xf32>
    %748 = vector.shape_cast %747 : vector<32xf32> to vector<1x32xf32>
    %749 = vector.broadcast %748 : vector<1x32xf32> to vector<16x32xf32>
    %750 = arith.subf %746, %749 : vector<16x32xf32>
    %751 = math.exp %750 : vector<16x32xf32>
    %cst_183 = arith.constant dense<0.000000e+00> : vector<32xf32>
    %752 = vector.multi_reduction <add>, %751, %cst_183 [0] : vector<16x32xf32> to vector<32xf32>
    %753 = vector.shape_cast %752 : vector<32xf32> to vector<1x32xf32>
    %754 = tpu.reciprocal %753 : vector<1x32xf32> -> vector<1x32xf32>
    %755 = vector.broadcast %754 : vector<1x32xf32> to vector<16x32xf32>
    %756 = arith.mulf %751, %755 : vector<16x32xf32>
    %cst_184 = arith.constant dense<0.000000e+00> : vector<16xf32>
    %757 = vector.multi_reduction <add>, %756, %cst_184 [1] : vector<16x32xf32> to vector<16xf32>
    %758 = vector.shape_cast %757 : vector<16xf32> to vector<16x1xf32>
    %cst_185 = arith.constant dense<0.000000e+00> : vector<16x128xf32>
    %759 = tpu.matmul %756, %718, %cst_185 {dimension_numbers = #tpu.dot_dimension_numbers<[1], [1], [0], [0], [0, 0, 1, 0], [], []>} : vector<16x32xf32>, vector<128x32xf32>, vector<16x128xf32> -> vector<16x128xf32>
    %760 = vector.broadcast %758 : vector<16x1xf32> to vector<16x128xf32>
    %761 = arith.mulf %760, %1 : vector<16x128xf32>
    %762 = arith.subf %759, %761 : vector<16x128xf32>
    %763 = arith.mulf %762, %762 : vector<16x128xf32>
    %cst_186 = arith.constant dense<0.000000e+00> : vector<16xf32>
    %764 = vector.multi_reduction <add>, %763, %cst_186 [1] : vector<16x128xf32> to vector<16xf32>
    %765 = vector.shape_cast %764 : vector<16xf32> to vector<16x1xf32>
    %cst_187 = arith.constant 1.000000e-24 : f32
    %766 = vector.broadcast %cst_187 : f32 to vector<16x1xf32>
    %767 = arith.maximumf %765, %766 : vector<16x1xf32>
    %768 = math.rsqrt %767 : vector<16x1xf32>
    %769 = vector.broadcast %768 : vector<16x1xf32> to vector<16x128xf32>
    %770 = arith.mulf %762, %769 : vector<16x128xf32>
    %771 = arith.mulf %770, %770 : vector<16x128xf32>
    %cst_188 = arith.constant dense<0.000000e+00> : vector<16xf32>
    %772 = vector.multi_reduction <add>, %771, %cst_188 [1] : vector<16x128xf32> to vector<16xf32>
    %773 = vector.shape_cast %772 : vector<16xf32> to vector<16x1xf32>
    %cst_189 = arith.constant dense<0.000000e+00> : vector<1xf32>
    %774 = vector.multi_reduction <add>, %773, %cst_189 [0] : vector<16x1xf32> to vector<1xf32>
    %775 = vector.shape_cast %774 : vector<1xf32> to vector<1x1xf32>
    %cst_190 = arith.constant 1.000000e-24 : f32
    %776 = vector.broadcast %cst_190 : f32 to vector<1x1xf32>
    %777 = arith.maximumf %775, %776 : vector<1x1xf32>
    %778 = math.rsqrt %777 : vector<1x1xf32>
    %779 = vector.extract_strided_slice %770 {offsets = [0, 0], sizes = [1, 128], strides = [1, 1]} : vector<16x128xf32> to vector<1x128xf32>
    %780 = vector.extract_strided_slice %770 {offsets = [1, 0], sizes = [1, 128], strides = [1, 1]} : vector<16x128xf32> to vector<1x128xf32>
    %781 = vector.extract_strided_slice %770 {offsets = [2, 0], sizes = [1, 128], strides = [1, 1]} : vector<16x128xf32> to vector<1x128xf32>
    %782 = vector.extract_strided_slice %770 {offsets = [3, 0], sizes = [1, 128], strides = [1, 1]} : vector<16x128xf32> to vector<1x128xf32>
    %783 = vector.extract_strided_slice %770 {offsets = [4, 0], sizes = [1, 128], strides = [1, 1]} : vector<16x128xf32> to vector<1x128xf32>
    %784 = vector.extract_strided_slice %770 {offsets = [5, 0], sizes = [1, 128], strides = [1, 1]} : vector<16x128xf32> to vector<1x128xf32>
    %785 = vector.extract_strided_slice %770 {offsets = [6, 0], sizes = [1, 128], strides = [1, 1]} : vector<16x128xf32> to vector<1x128xf32>
    %786 = vector.extract_strided_slice %770 {offsets = [7, 0], sizes = [1, 128], strides = [1, 1]} : vector<16x128xf32> to vector<1x128xf32>
    %787 = vector.extract_strided_slice %770 {offsets = [8, 0], sizes = [1, 128], strides = [1, 1]} : vector<16x128xf32> to vector<1x128xf32>
    %788 = vector.extract_strided_slice %770 {offsets = [9, 0], sizes = [1, 128], strides = [1, 1]} : vector<16x128xf32> to vector<1x128xf32>
    %789 = vector.extract_strided_slice %770 {offsets = [10, 0], sizes = [1, 128], strides = [1, 1]} : vector<16x128xf32> to vector<1x128xf32>
    %790 = vector.extract_strided_slice %770 {offsets = [11, 0], sizes = [1, 128], strides = [1, 1]} : vector<16x128xf32> to vector<1x128xf32>
    %791 = vector.extract_strided_slice %770 {offsets = [12, 0], sizes = [1, 128], strides = [1, 1]} : vector<16x128xf32> to vector<1x128xf32>
    %792 = vector.extract_strided_slice %770 {offsets = [13, 0], sizes = [1, 128], strides = [1, 1]} : vector<16x128xf32> to vector<1x128xf32>
    %793 = vector.extract_strided_slice %770 {offsets = [14, 0], sizes = [1, 128], strides = [1, 1]} : vector<16x128xf32> to vector<1x128xf32>
    %794 = vector.extract_strided_slice %770 {offsets = [15, 0], sizes = [1, 128], strides = [1, 1]} : vector<16x128xf32> to vector<1x128xf32>
    %795 = tpu.concatenate %779, %780, %781, %782, %783, %784, %785, %786, %787, %788, %789, %790, %791, %792, %793, %794 in 1 : vector<1x128xf32>, vector<1x128xf32>, vector<1x128xf32>, vector<1x128xf32>, vector<1x128xf32>, vector<1x128xf32>, vector<1x128xf32>, vector<1x128xf32>, vector<1x128xf32>, vector<1x128xf32>, vector<1x128xf32>, vector<1x128xf32>, vector<1x128xf32>, vector<1x128xf32>, vector<1x128xf32>, vector<1x128xf32> -> vector<1x2048xf32>
    %c10 = arith.constant 10 : index
    %c0_191 = arith.constant 0 : index
    %c0_192 = arith.constant 0 : index
    %796 = vector.load %arg1[%c10, %c0_191, %c0_192] : memref<16x128x32xf32, #tpu.memory_space<vmem>>, vector<1x128x32xf32>
    %797 = vector.shape_cast %796 : vector<1x128x32xf32> to vector<128x32xf32>
    %cst_193 = arith.constant dense<0.000000e+00> : vector<16x32xf32>
    %798 = tpu.matmul %0, %797, %cst_193 {dimension_numbers = #tpu.dot_dimension_numbers<[1], [0], [0], [1], [0, 0, 1, 1], [], []>} : vector<16x128xf32>, vector<128x32xf32>, vector<16x32xf32> -> vector<16x32xf32>
    %799 = arith.mulf %798, %798 : vector<16x32xf32>
    %800 = tpu.concatenate %798, %799 in 1 : vector<16x32xf32>, vector<16x32xf32> -> vector<16x64xf32>
    %cst_194 = arith.constant dense<0.000000e+00> : vector<4x64xf32>
    %801 = tpu.matmul %2, %800, %cst_194 {dimension_numbers = #tpu.dot_dimension_numbers<[1], [0], [0], [1], [0, 0, 1, 1], [], []>} : vector<4x16xf32>, vector<16x64xf32>, vector<4x64xf32> -> vector<4x64xf32>
    %802 = vector.extract_strided_slice %801 {offsets = [0, 0], sizes = [4, 32], strides = [1, 1]} : vector<4x64xf32> to vector<4x32xf32>
    %cst_195 = arith.constant 2.500000e-01 : f32
    %803 = vector.broadcast %cst_195 : f32 to vector<4x32xf32>
    %804 = arith.mulf %802, %803 : vector<4x32xf32>
    %805 = vector.extract_strided_slice %801 {offsets = [0, 32], sizes = [4, 32], strides = [1, 1]} : vector<4x64xf32> to vector<4x32xf32>
    %cst_196 = arith.constant 2.500000e-01 : f32
    %806 = vector.broadcast %cst_196 : f32 to vector<4x32xf32>
    %807 = arith.mulf %805, %806 : vector<4x32xf32>
    %808 = arith.mulf %804, %804 : vector<4x32xf32>
    %809 = arith.subf %807, %808 : vector<4x32xf32>
    %cst_197 = arith.constant 0.000000e+00 : f32
    %810 = vector.broadcast %cst_197 : f32 to vector<4x32xf32>
    %811 = arith.maximumf %809, %810 : vector<4x32xf32>
    %cst_198 = arith.constant 9.99999974E-6 : f32
    %812 = vector.broadcast %cst_198 : f32 to vector<4x32xf32>
    %813 = arith.addf %811, %812 : vector<4x32xf32>
    %814 = math.rsqrt %813 : vector<4x32xf32>
    %815 = arith.mulf %804, %814 : vector<4x32xf32>
    %816 = tpu.concatenate %814, %815 in 1 : vector<4x32xf32>, vector<4x32xf32> -> vector<4x64xf32>
    %cst_199 = arith.constant dense<0.000000e+00> : vector<16x64xf32>
    %817 = tpu.matmul %3, %816, %cst_199 {dimension_numbers = #tpu.dot_dimension_numbers<[1], [0], [0], [1], [0, 0, 1, 1], [], []>} : vector<16x4xf32>, vector<4x64xf32>, vector<16x64xf32> -> vector<16x64xf32>
    %818 = vector.extract_strided_slice %817 {offsets = [0, 0], sizes = [16, 32], strides = [1, 1]} : vector<16x64xf32> to vector<16x32xf32>
    %819 = arith.mulf %798, %818 : vector<16x32xf32>
    %820 = vector.extract_strided_slice %817 {offsets = [0, 32], sizes = [16, 32], strides = [1, 1]} : vector<16x64xf32> to vector<16x32xf32>
    %821 = arith.subf %819, %820 : vector<16x32xf32>
    %822 = vector.broadcast %4 : vector<16x1xf32> to vector<16x32xf32>
    %823 = arith.mulf %821, %822 : vector<16x32xf32>
    %824 = vector.broadcast %5 : vector<16x1xf32> to vector<16x32xf32>
    %825 = arith.addf %823, %824 : vector<16x32xf32>
    %cst_200 = arith.constant dense<0xFF800000> : vector<32xf32>
    %826 = vector.multi_reduction <maximumf>, %825, %cst_200 [0] : vector<16x32xf32> to vector<32xf32>
    %827 = vector.shape_cast %826 : vector<32xf32> to vector<1x32xf32>
    %828 = vector.broadcast %827 : vector<1x32xf32> to vector<16x32xf32>
    %829 = arith.subf %825, %828 : vector<16x32xf32>
    %830 = math.exp %829 : vector<16x32xf32>
    %cst_201 = arith.constant dense<0.000000e+00> : vector<32xf32>
    %831 = vector.multi_reduction <add>, %830, %cst_201 [0] : vector<16x32xf32> to vector<32xf32>
    %832 = vector.shape_cast %831 : vector<32xf32> to vector<1x32xf32>
    %833 = tpu.reciprocal %832 : vector<1x32xf32> -> vector<1x32xf32>
    %834 = vector.broadcast %833 : vector<1x32xf32> to vector<16x32xf32>
    %835 = arith.mulf %830, %834 : vector<16x32xf32>
    %cst_202 = arith.constant dense<0.000000e+00> : vector<16xf32>
    %836 = vector.multi_reduction <add>, %835, %cst_202 [1] : vector<16x32xf32> to vector<16xf32>
    %837 = vector.shape_cast %836 : vector<16xf32> to vector<16x1xf32>
    %cst_203 = arith.constant dense<0.000000e+00> : vector<16x128xf32>
    %838 = tpu.matmul %835, %797, %cst_203 {dimension_numbers = #tpu.dot_dimension_numbers<[1], [1], [0], [0], [0, 0, 1, 0], [], []>} : vector<16x32xf32>, vector<128x32xf32>, vector<16x128xf32> -> vector<16x128xf32>
    %839 = vector.broadcast %837 : vector<16x1xf32> to vector<16x128xf32>
    %840 = arith.mulf %839, %1 : vector<16x128xf32>
    %841 = arith.subf %838, %840 : vector<16x128xf32>
    %842 = arith.mulf %841, %841 : vector<16x128xf32>
    %cst_204 = arith.constant dense<0.000000e+00> : vector<16xf32>
    %843 = vector.multi_reduction <add>, %842, %cst_204 [1] : vector<16x128xf32> to vector<16xf32>
    %844 = vector.shape_cast %843 : vector<16xf32> to vector<16x1xf32>
    %cst_205 = arith.constant 1.000000e-24 : f32
    %845 = vector.broadcast %cst_205 : f32 to vector<16x1xf32>
    %846 = arith.maximumf %844, %845 : vector<16x1xf32>
    %847 = math.rsqrt %846 : vector<16x1xf32>
    %848 = vector.broadcast %847 : vector<16x1xf32> to vector<16x128xf32>
    %849 = arith.mulf %841, %848 : vector<16x128xf32>
    %850 = arith.mulf %849, %849 : vector<16x128xf32>
    %cst_206 = arith.constant dense<0.000000e+00> : vector<16xf32>
    %851 = vector.multi_reduction <add>, %850, %cst_206 [1] : vector<16x128xf32> to vector<16xf32>
    %852 = vector.shape_cast %851 : vector<16xf32> to vector<16x1xf32>
    %cst_207 = arith.constant dense<0.000000e+00> : vector<1xf32>
    %853 = vector.multi_reduction <add>, %852, %cst_207 [0] : vector<16x1xf32> to vector<1xf32>
    %854 = vector.shape_cast %853 : vector<1xf32> to vector<1x1xf32>
    %cst_208 = arith.constant 1.000000e-24 : f32
    %855 = vector.broadcast %cst_208 : f32 to vector<1x1xf32>
    %856 = arith.maximumf %854, %855 : vector<1x1xf32>
    %857 = math.rsqrt %856 : vector<1x1xf32>
    %858 = vector.extract_strided_slice %849 {offsets = [0, 0], sizes = [1, 128], strides = [1, 1]} : vector<16x128xf32> to vector<1x128xf32>
    %859 = vector.extract_strided_slice %849 {offsets = [1, 0], sizes = [1, 128], strides = [1, 1]} : vector<16x128xf32> to vector<1x128xf32>
    %860 = vector.extract_strided_slice %849 {offsets = [2, 0], sizes = [1, 128], strides = [1, 1]} : vector<16x128xf32> to vector<1x128xf32>
    %861 = vector.extract_strided_slice %849 {offsets = [3, 0], sizes = [1, 128], strides = [1, 1]} : vector<16x128xf32> to vector<1x128xf32>
    %862 = vector.extract_strided_slice %849 {offsets = [4, 0], sizes = [1, 128], strides = [1, 1]} : vector<16x128xf32> to vector<1x128xf32>
    %863 = vector.extract_strided_slice %849 {offsets = [5, 0], sizes = [1, 128], strides = [1, 1]} : vector<16x128xf32> to vector<1x128xf32>
    %864 = vector.extract_strided_slice %849 {offsets = [6, 0], sizes = [1, 128], strides = [1, 1]} : vector<16x128xf32> to vector<1x128xf32>
    %865 = vector.extract_strided_slice %849 {offsets = [7, 0], sizes = [1, 128], strides = [1, 1]} : vector<16x128xf32> to vector<1x128xf32>
    %866 = vector.extract_strided_slice %849 {offsets = [8, 0], sizes = [1, 128], strides = [1, 1]} : vector<16x128xf32> to vector<1x128xf32>
    %867 = vector.extract_strided_slice %849 {offsets = [9, 0], sizes = [1, 128], strides = [1, 1]} : vector<16x128xf32> to vector<1x128xf32>
    %868 = vector.extract_strided_slice %849 {offsets = [10, 0], sizes = [1, 128], strides = [1, 1]} : vector<16x128xf32> to vector<1x128xf32>
    %869 = vector.extract_strided_slice %849 {offsets = [11, 0], sizes = [1, 128], strides = [1, 1]} : vector<16x128xf32> to vector<1x128xf32>
    %870 = vector.extract_strided_slice %849 {offsets = [12, 0], sizes = [1, 128], strides = [1, 1]} : vector<16x128xf32> to vector<1x128xf32>
    %871 = vector.extract_strided_slice %849 {offsets = [13, 0], sizes = [1, 128], strides = [1, 1]} : vector<16x128xf32> to vector<1x128xf32>
    %872 = vector.extract_strided_slice %849 {offsets = [14, 0], sizes = [1, 128], strides = [1, 1]} : vector<16x128xf32> to vector<1x128xf32>
    %873 = vector.extract_strided_slice %849 {offsets = [15, 0], sizes = [1, 128], strides = [1, 1]} : vector<16x128xf32> to vector<1x128xf32>
    %874 = tpu.concatenate %858, %859, %860, %861, %862, %863, %864, %865, %866, %867, %868, %869, %870, %871, %872, %873 in 1 : vector<1x128xf32>, vector<1x128xf32>, vector<1x128xf32>, vector<1x128xf32>, vector<1x128xf32>, vector<1x128xf32>, vector<1x128xf32>, vector<1x128xf32>, vector<1x128xf32>, vector<1x128xf32>, vector<1x128xf32>, vector<1x128xf32>, vector<1x128xf32>, vector<1x128xf32>, vector<1x128xf32>, vector<1x128xf32> -> vector<1x2048xf32>
    %c11 = arith.constant 11 : index
    %c0_209 = arith.constant 0 : index
    %c0_210 = arith.constant 0 : index
    %875 = vector.load %arg1[%c11, %c0_209, %c0_210] : memref<16x128x32xf32, #tpu.memory_space<vmem>>, vector<1x128x32xf32>
    %876 = vector.shape_cast %875 : vector<1x128x32xf32> to vector<128x32xf32>
    %cst_211 = arith.constant dense<0.000000e+00> : vector<16x32xf32>
    %877 = tpu.matmul %0, %876, %cst_211 {dimension_numbers = #tpu.dot_dimension_numbers<[1], [0], [0], [1], [0, 0, 1, 1], [], []>} : vector<16x128xf32>, vector<128x32xf32>, vector<16x32xf32> -> vector<16x32xf32>
    %878 = arith.mulf %877, %877 : vector<16x32xf32>
    %879 = tpu.concatenate %877, %878 in 1 : vector<16x32xf32>, vector<16x32xf32> -> vector<16x64xf32>
    %cst_212 = arith.constant dense<0.000000e+00> : vector<4x64xf32>
    %880 = tpu.matmul %2, %879, %cst_212 {dimension_numbers = #tpu.dot_dimension_numbers<[1], [0], [0], [1], [0, 0, 1, 1], [], []>} : vector<4x16xf32>, vector<16x64xf32>, vector<4x64xf32> -> vector<4x64xf32>
    %881 = vector.extract_strided_slice %880 {offsets = [0, 0], sizes = [4, 32], strides = [1, 1]} : vector<4x64xf32> to vector<4x32xf32>
    %cst_213 = arith.constant 2.500000e-01 : f32
    %882 = vector.broadcast %cst_213 : f32 to vector<4x32xf32>
    %883 = arith.mulf %881, %882 : vector<4x32xf32>
    %884 = vector.extract_strided_slice %880 {offsets = [0, 32], sizes = [4, 32], strides = [1, 1]} : vector<4x64xf32> to vector<4x32xf32>
    %cst_214 = arith.constant 2.500000e-01 : f32
    %885 = vector.broadcast %cst_214 : f32 to vector<4x32xf32>
    %886 = arith.mulf %884, %885 : vector<4x32xf32>
    %887 = arith.mulf %883, %883 : vector<4x32xf32>
    %888 = arith.subf %886, %887 : vector<4x32xf32>
    %cst_215 = arith.constant 0.000000e+00 : f32
    %889 = vector.broadcast %cst_215 : f32 to vector<4x32xf32>
    %890 = arith.maximumf %888, %889 : vector<4x32xf32>
    %cst_216 = arith.constant 9.99999974E-6 : f32
    %891 = vector.broadcast %cst_216 : f32 to vector<4x32xf32>
    %892 = arith.addf %890, %891 : vector<4x32xf32>
    %893 = math.rsqrt %892 : vector<4x32xf32>
    %894 = arith.mulf %883, %893 : vector<4x32xf32>
    %895 = tpu.concatenate %893, %894 in 1 : vector<4x32xf32>, vector<4x32xf32> -> vector<4x64xf32>
    %cst_217 = arith.constant dense<0.000000e+00> : vector<16x64xf32>
    %896 = tpu.matmul %3, %895, %cst_217 {dimension_numbers = #tpu.dot_dimension_numbers<[1], [0], [0], [1], [0, 0, 1, 1], [], []>} : vector<16x4xf32>, vector<4x64xf32>, vector<16x64xf32> -> vector<16x64xf32>
    %897 = vector.extract_strided_slice %896 {offsets = [0, 0], sizes = [16, 32], strides = [1, 1]} : vector<16x64xf32> to vector<16x32xf32>
    %898 = arith.mulf %877, %897 : vector<16x32xf32>
    %899 = vector.extract_strided_slice %896 {offsets = [0, 32], sizes = [16, 32], strides = [1, 1]} : vector<16x64xf32> to vector<16x32xf32>
    %900 = arith.subf %898, %899 : vector<16x32xf32>
    %901 = vector.broadcast %4 : vector<16x1xf32> to vector<16x32xf32>
    %902 = arith.mulf %900, %901 : vector<16x32xf32>
    %903 = vector.broadcast %5 : vector<16x1xf32> to vector<16x32xf32>
    %904 = arith.addf %902, %903 : vector<16x32xf32>
    %cst_218 = arith.constant dense<0xFF800000> : vector<32xf32>
    %905 = vector.multi_reduction <maximumf>, %904, %cst_218 [0] : vector<16x32xf32> to vector<32xf32>
    %906 = vector.shape_cast %905 : vector<32xf32> to vector<1x32xf32>
    %907 = vector.broadcast %906 : vector<1x32xf32> to vector<16x32xf32>
    %908 = arith.subf %904, %907 : vector<16x32xf32>
    %909 = math.exp %908 : vector<16x32xf32>
    %cst_219 = arith.constant dense<0.000000e+00> : vector<32xf32>
    %910 = vector.multi_reduction <add>, %909, %cst_219 [0] : vector<16x32xf32> to vector<32xf32>
    %911 = vector.shape_cast %910 : vector<32xf32> to vector<1x32xf32>
    %912 = tpu.reciprocal %911 : vector<1x32xf32> -> vector<1x32xf32>
    %913 = vector.broadcast %912 : vector<1x32xf32> to vector<16x32xf32>
    %914 = arith.mulf %909, %913 : vector<16x32xf32>
    %cst_220 = arith.constant dense<0.000000e+00> : vector<16xf32>
    %915 = vector.multi_reduction <add>, %914, %cst_220 [1] : vector<16x32xf32> to vector<16xf32>
    %916 = vector.shape_cast %915 : vector<16xf32> to vector<16x1xf32>
    %cst_221 = arith.constant dense<0.000000e+00> : vector<16x128xf32>
    %917 = tpu.matmul %914, %876, %cst_221 {dimension_numbers = #tpu.dot_dimension_numbers<[1], [1], [0], [0], [0, 0, 1, 0], [], []>} : vector<16x32xf32>, vector<128x32xf32>, vector<16x128xf32> -> vector<16x128xf32>
    %918 = vector.broadcast %916 : vector<16x1xf32> to vector<16x128xf32>
    %919 = arith.mulf %918, %1 : vector<16x128xf32>
    %920 = arith.subf %917, %919 : vector<16x128xf32>
    %921 = arith.mulf %920, %920 : vector<16x128xf32>
    %cst_222 = arith.constant dense<0.000000e+00> : vector<16xf32>
    %922 = vector.multi_reduction <add>, %921, %cst_222 [1] : vector<16x128xf32> to vector<16xf32>
    %923 = vector.shape_cast %922 : vector<16xf32> to vector<16x1xf32>
    %cst_223 = arith.constant 1.000000e-24 : f32
    %924 = vector.broadcast %cst_223 : f32 to vector<16x1xf32>
    %925 = arith.maximumf %923, %924 : vector<16x1xf32>
    %926 = math.rsqrt %925 : vector<16x1xf32>
    %927 = vector.broadcast %926 : vector<16x1xf32> to vector<16x128xf32>
    %928 = arith.mulf %920, %927 : vector<16x128xf32>
    %929 = arith.mulf %928, %928 : vector<16x128xf32>
    %cst_224 = arith.constant dense<0.000000e+00> : vector<16xf32>
    %930 = vector.multi_reduction <add>, %929, %cst_224 [1] : vector<16x128xf32> to vector<16xf32>
    %931 = vector.shape_cast %930 : vector<16xf32> to vector<16x1xf32>
    %cst_225 = arith.constant dense<0.000000e+00> : vector<1xf32>
    %932 = vector.multi_reduction <add>, %931, %cst_225 [0] : vector<16x1xf32> to vector<1xf32>
    %933 = vector.shape_cast %932 : vector<1xf32> to vector<1x1xf32>
    %cst_226 = arith.constant 1.000000e-24 : f32
    %934 = vector.broadcast %cst_226 : f32 to vector<1x1xf32>
    %935 = arith.maximumf %933, %934 : vector<1x1xf32>
    %936 = math.rsqrt %935 : vector<1x1xf32>
    %937 = vector.extract_strided_slice %928 {offsets = [0, 0], sizes = [1, 128], strides = [1, 1]} : vector<16x128xf32> to vector<1x128xf32>
    %938 = vector.extract_strided_slice %928 {offsets = [1, 0], sizes = [1, 128], strides = [1, 1]} : vector<16x128xf32> to vector<1x128xf32>
    %939 = vector.extract_strided_slice %928 {offsets = [2, 0], sizes = [1, 128], strides = [1, 1]} : vector<16x128xf32> to vector<1x128xf32>
    %940 = vector.extract_strided_slice %928 {offsets = [3, 0], sizes = [1, 128], strides = [1, 1]} : vector<16x128xf32> to vector<1x128xf32>
    %941 = vector.extract_strided_slice %928 {offsets = [4, 0], sizes = [1, 128], strides = [1, 1]} : vector<16x128xf32> to vector<1x128xf32>
    %942 = vector.extract_strided_slice %928 {offsets = [5, 0], sizes = [1, 128], strides = [1, 1]} : vector<16x128xf32> to vector<1x128xf32>
    %943 = vector.extract_strided_slice %928 {offsets = [6, 0], sizes = [1, 128], strides = [1, 1]} : vector<16x128xf32> to vector<1x128xf32>
    %944 = vector.extract_strided_slice %928 {offsets = [7, 0], sizes = [1, 128], strides = [1, 1]} : vector<16x128xf32> to vector<1x128xf32>
    %945 = vector.extract_strided_slice %928 {offsets = [8, 0], sizes = [1, 128], strides = [1, 1]} : vector<16x128xf32> to vector<1x128xf32>
    %946 = vector.extract_strided_slice %928 {offsets = [9, 0], sizes = [1, 128], strides = [1, 1]} : vector<16x128xf32> to vector<1x128xf32>
    %947 = vector.extract_strided_slice %928 {offsets = [10, 0], sizes = [1, 128], strides = [1, 1]} : vector<16x128xf32> to vector<1x128xf32>
    %948 = vector.extract_strided_slice %928 {offsets = [11, 0], sizes = [1, 128], strides = [1, 1]} : vector<16x128xf32> to vector<1x128xf32>
    %949 = vector.extract_strided_slice %928 {offsets = [12, 0], sizes = [1, 128], strides = [1, 1]} : vector<16x128xf32> to vector<1x128xf32>
    %950 = vector.extract_strided_slice %928 {offsets = [13, 0], sizes = [1, 128], strides = [1, 1]} : vector<16x128xf32> to vector<1x128xf32>
    %951 = vector.extract_strided_slice %928 {offsets = [14, 0], sizes = [1, 128], strides = [1, 1]} : vector<16x128xf32> to vector<1x128xf32>
    %952 = vector.extract_strided_slice %928 {offsets = [15, 0], sizes = [1, 128], strides = [1, 1]} : vector<16x128xf32> to vector<1x128xf32>
    %953 = tpu.concatenate %937, %938, %939, %940, %941, %942, %943, %944, %945, %946, %947, %948, %949, %950, %951, %952 in 1 : vector<1x128xf32>, vector<1x128xf32>, vector<1x128xf32>, vector<1x128xf32>, vector<1x128xf32>, vector<1x128xf32>, vector<1x128xf32>, vector<1x128xf32>, vector<1x128xf32>, vector<1x128xf32>, vector<1x128xf32>, vector<1x128xf32>, vector<1x128xf32>, vector<1x128xf32>, vector<1x128xf32>, vector<1x128xf32> -> vector<1x2048xf32>
    %c12 = arith.constant 12 : index
    %c0_227 = arith.constant 0 : index
    %c0_228 = arith.constant 0 : index
    %954 = vector.load %arg1[%c12, %c0_227, %c0_228] : memref<16x128x32xf32, #tpu.memory_space<vmem>>, vector<1x128x32xf32>
    %955 = vector.shape_cast %954 : vector<1x128x32xf32> to vector<128x32xf32>
    %cst_229 = arith.constant dense<0.000000e+00> : vector<16x32xf32>
    %956 = tpu.matmul %0, %955, %cst_229 {dimension_numbers = #tpu.dot_dimension_numbers<[1], [0], [0], [1], [0, 0, 1, 1], [], []>} : vector<16x128xf32>, vector<128x32xf32>, vector<16x32xf32> -> vector<16x32xf32>
    %957 = arith.mulf %956, %956 : vector<16x32xf32>
    %958 = tpu.concatenate %956, %957 in 1 : vector<16x32xf32>, vector<16x32xf32> -> vector<16x64xf32>
    %cst_230 = arith.constant dense<0.000000e+00> : vector<4x64xf32>
    %959 = tpu.matmul %2, %958, %cst_230 {dimension_numbers = #tpu.dot_dimension_numbers<[1], [0], [0], [1], [0, 0, 1, 1], [], []>} : vector<4x16xf32>, vector<16x64xf32>, vector<4x64xf32> -> vector<4x64xf32>
    %960 = vector.extract_strided_slice %959 {offsets = [0, 0], sizes = [4, 32], strides = [1, 1]} : vector<4x64xf32> to vector<4x32xf32>
    %cst_231 = arith.constant 2.500000e-01 : f32
    %961 = vector.broadcast %cst_231 : f32 to vector<4x32xf32>
    %962 = arith.mulf %960, %961 : vector<4x32xf32>
    %963 = vector.extract_strided_slice %959 {offsets = [0, 32], sizes = [4, 32], strides = [1, 1]} : vector<4x64xf32> to vector<4x32xf32>
    %cst_232 = arith.constant 2.500000e-01 : f32
    %964 = vector.broadcast %cst_232 : f32 to vector<4x32xf32>
    %965 = arith.mulf %963, %964 : vector<4x32xf32>
    %966 = arith.mulf %962, %962 : vector<4x32xf32>
    %967 = arith.subf %965, %966 : vector<4x32xf32>
    %cst_233 = arith.constant 0.000000e+00 : f32
    %968 = vector.broadcast %cst_233 : f32 to vector<4x32xf32>
    %969 = arith.maximumf %967, %968 : vector<4x32xf32>
    %cst_234 = arith.constant 9.99999974E-6 : f32
    %970 = vector.broadcast %cst_234 : f32 to vector<4x32xf32>
    %971 = arith.addf %969, %970 : vector<4x32xf32>
    %972 = math.rsqrt %971 : vector<4x32xf32>
    %973 = arith.mulf %962, %972 : vector<4x32xf32>
    %974 = tpu.concatenate %972, %973 in 1 : vector<4x32xf32>, vector<4x32xf32> -> vector<4x64xf32>
    %cst_235 = arith.constant dense<0.000000e+00> : vector<16x64xf32>
    %975 = tpu.matmul %3, %974, %cst_235 {dimension_numbers = #tpu.dot_dimension_numbers<[1], [0], [0], [1], [0, 0, 1, 1], [], []>} : vector<16x4xf32>, vector<4x64xf32>, vector<16x64xf32> -> vector<16x64xf32>
    %976 = vector.extract_strided_slice %975 {offsets = [0, 0], sizes = [16, 32], strides = [1, 1]} : vector<16x64xf32> to vector<16x32xf32>
    %977 = arith.mulf %956, %976 : vector<16x32xf32>
    %978 = vector.extract_strided_slice %975 {offsets = [0, 32], sizes = [16, 32], strides = [1, 1]} : vector<16x64xf32> to vector<16x32xf32>
    %979 = arith.subf %977, %978 : vector<16x32xf32>
    %980 = vector.broadcast %4 : vector<16x1xf32> to vector<16x32xf32>
    %981 = arith.mulf %979, %980 : vector<16x32xf32>
    %982 = vector.broadcast %5 : vector<16x1xf32> to vector<16x32xf32>
    %983 = arith.addf %981, %982 : vector<16x32xf32>
    %cst_236 = arith.constant dense<0xFF800000> : vector<32xf32>
    %984 = vector.multi_reduction <maximumf>, %983, %cst_236 [0] : vector<16x32xf32> to vector<32xf32>
    %985 = vector.shape_cast %984 : vector<32xf32> to vector<1x32xf32>
    %986 = vector.broadcast %985 : vector<1x32xf32> to vector<16x32xf32>
    %987 = arith.subf %983, %986 : vector<16x32xf32>
    %988 = math.exp %987 : vector<16x32xf32>
    %cst_237 = arith.constant dense<0.000000e+00> : vector<32xf32>
    %989 = vector.multi_reduction <add>, %988, %cst_237 [0] : vector<16x32xf32> to vector<32xf32>
    %990 = vector.shape_cast %989 : vector<32xf32> to vector<1x32xf32>
    %991 = tpu.reciprocal %990 : vector<1x32xf32> -> vector<1x32xf32>
    %992 = vector.broadcast %991 : vector<1x32xf32> to vector<16x32xf32>
    %993 = arith.mulf %988, %992 : vector<16x32xf32>
    %cst_238 = arith.constant dense<0.000000e+00> : vector<16xf32>
    %994 = vector.multi_reduction <add>, %993, %cst_238 [1] : vector<16x32xf32> to vector<16xf32>
    %995 = vector.shape_cast %994 : vector<16xf32> to vector<16x1xf32>
    %cst_239 = arith.constant dense<0.000000e+00> : vector<16x128xf32>
    %996 = tpu.matmul %993, %955, %cst_239 {dimension_numbers = #tpu.dot_dimension_numbers<[1], [1], [0], [0], [0, 0, 1, 0], [], []>} : vector<16x32xf32>, vector<128x32xf32>, vector<16x128xf32> -> vector<16x128xf32>
    %997 = vector.broadcast %995 : vector<16x1xf32> to vector<16x128xf32>
    %998 = arith.mulf %997, %1 : vector<16x128xf32>
    %999 = arith.subf %996, %998 : vector<16x128xf32>
    %1000 = arith.mulf %999, %999 : vector<16x128xf32>
    %cst_240 = arith.constant dense<0.000000e+00> : vector<16xf32>
    %1001 = vector.multi_reduction <add>, %1000, %cst_240 [1] : vector<16x128xf32> to vector<16xf32>
    %1002 = vector.shape_cast %1001 : vector<16xf32> to vector<16x1xf32>
    %cst_241 = arith.constant 1.000000e-24 : f32
    %1003 = vector.broadcast %cst_241 : f32 to vector<16x1xf32>
    %1004 = arith.maximumf %1002, %1003 : vector<16x1xf32>
    %1005 = math.rsqrt %1004 : vector<16x1xf32>
    %1006 = vector.broadcast %1005 : vector<16x1xf32> to vector<16x128xf32>
    %1007 = arith.mulf %999, %1006 : vector<16x128xf32>
    %1008 = arith.mulf %1007, %1007 : vector<16x128xf32>
    %cst_242 = arith.constant dense<0.000000e+00> : vector<16xf32>
    %1009 = vector.multi_reduction <add>, %1008, %cst_242 [1] : vector<16x128xf32> to vector<16xf32>
    %1010 = vector.shape_cast %1009 : vector<16xf32> to vector<16x1xf32>
    %cst_243 = arith.constant dense<0.000000e+00> : vector<1xf32>
    %1011 = vector.multi_reduction <add>, %1010, %cst_243 [0] : vector<16x1xf32> to vector<1xf32>
    %1012 = vector.shape_cast %1011 : vector<1xf32> to vector<1x1xf32>
    %cst_244 = arith.constant 1.000000e-24 : f32
    %1013 = vector.broadcast %cst_244 : f32 to vector<1x1xf32>
    %1014 = arith.maximumf %1012, %1013 : vector<1x1xf32>
    %1015 = math.rsqrt %1014 : vector<1x1xf32>
    %1016 = vector.extract_strided_slice %1007 {offsets = [0, 0], sizes = [1, 128], strides = [1, 1]} : vector<16x128xf32> to vector<1x128xf32>
    %1017 = vector.extract_strided_slice %1007 {offsets = [1, 0], sizes = [1, 128], strides = [1, 1]} : vector<16x128xf32> to vector<1x128xf32>
    %1018 = vector.extract_strided_slice %1007 {offsets = [2, 0], sizes = [1, 128], strides = [1, 1]} : vector<16x128xf32> to vector<1x128xf32>
    %1019 = vector.extract_strided_slice %1007 {offsets = [3, 0], sizes = [1, 128], strides = [1, 1]} : vector<16x128xf32> to vector<1x128xf32>
    %1020 = vector.extract_strided_slice %1007 {offsets = [4, 0], sizes = [1, 128], strides = [1, 1]} : vector<16x128xf32> to vector<1x128xf32>
    %1021 = vector.extract_strided_slice %1007 {offsets = [5, 0], sizes = [1, 128], strides = [1, 1]} : vector<16x128xf32> to vector<1x128xf32>
    %1022 = vector.extract_strided_slice %1007 {offsets = [6, 0], sizes = [1, 128], strides = [1, 1]} : vector<16x128xf32> to vector<1x128xf32>
    %1023 = vector.extract_strided_slice %1007 {offsets = [7, 0], sizes = [1, 128], strides = [1, 1]} : vector<16x128xf32> to vector<1x128xf32>
    %1024 = vector.extract_strided_slice %1007 {offsets = [8, 0], sizes = [1, 128], strides = [1, 1]} : vector<16x128xf32> to vector<1x128xf32>
    %1025 = vector.extract_strided_slice %1007 {offsets = [9, 0], sizes = [1, 128], strides = [1, 1]} : vector<16x128xf32> to vector<1x128xf32>
    %1026 = vector.extract_strided_slice %1007 {offsets = [10, 0], sizes = [1, 128], strides = [1, 1]} : vector<16x128xf32> to vector<1x128xf32>
    %1027 = vector.extract_strided_slice %1007 {offsets = [11, 0], sizes = [1, 128], strides = [1, 1]} : vector<16x128xf32> to vector<1x128xf32>
    %1028 = vector.extract_strided_slice %1007 {offsets = [12, 0], sizes = [1, 128], strides = [1, 1]} : vector<16x128xf32> to vector<1x128xf32>
    %1029 = vector.extract_strided_slice %1007 {offsets = [13, 0], sizes = [1, 128], strides = [1, 1]} : vector<16x128xf32> to vector<1x128xf32>
    %1030 = vector.extract_strided_slice %1007 {offsets = [14, 0], sizes = [1, 128], strides = [1, 1]} : vector<16x128xf32> to vector<1x128xf32>
    %1031 = vector.extract_strided_slice %1007 {offsets = [15, 0], sizes = [1, 128], strides = [1, 1]} : vector<16x128xf32> to vector<1x128xf32>
    %1032 = tpu.concatenate %1016, %1017, %1018, %1019, %1020, %1021, %1022, %1023, %1024, %1025, %1026, %1027, %1028, %1029, %1030, %1031 in 1 : vector<1x128xf32>, vector<1x128xf32>, vector<1x128xf32>, vector<1x128xf32>, vector<1x128xf32>, vector<1x128xf32>, vector<1x128xf32>, vector<1x128xf32>, vector<1x128xf32>, vector<1x128xf32>, vector<1x128xf32>, vector<1x128xf32>, vector<1x128xf32>, vector<1x128xf32>, vector<1x128xf32>, vector<1x128xf32> -> vector<1x2048xf32>
    %c13 = arith.constant 13 : index
    %c0_245 = arith.constant 0 : index
    %c0_246 = arith.constant 0 : index
    %1033 = vector.load %arg1[%c13, %c0_245, %c0_246] : memref<16x128x32xf32, #tpu.memory_space<vmem>>, vector<1x128x32xf32>
    %1034 = vector.shape_cast %1033 : vector<1x128x32xf32> to vector<128x32xf32>
    %cst_247 = arith.constant dense<0.000000e+00> : vector<16x32xf32>
    %1035 = tpu.matmul %0, %1034, %cst_247 {dimension_numbers = #tpu.dot_dimension_numbers<[1], [0], [0], [1], [0, 0, 1, 1], [], []>} : vector<16x128xf32>, vector<128x32xf32>, vector<16x32xf32> -> vector<16x32xf32>
    %1036 = arith.mulf %1035, %1035 : vector<16x32xf32>
    %1037 = tpu.concatenate %1035, %1036 in 1 : vector<16x32xf32>, vector<16x32xf32> -> vector<16x64xf32>
    %cst_248 = arith.constant dense<0.000000e+00> : vector<4x64xf32>
    %1038 = tpu.matmul %2, %1037, %cst_248 {dimension_numbers = #tpu.dot_dimension_numbers<[1], [0], [0], [1], [0, 0, 1, 1], [], []>} : vector<4x16xf32>, vector<16x64xf32>, vector<4x64xf32> -> vector<4x64xf32>
    %1039 = vector.extract_strided_slice %1038 {offsets = [0, 0], sizes = [4, 32], strides = [1, 1]} : vector<4x64xf32> to vector<4x32xf32>
    %cst_249 = arith.constant 2.500000e-01 : f32
    %1040 = vector.broadcast %cst_249 : f32 to vector<4x32xf32>
    %1041 = arith.mulf %1039, %1040 : vector<4x32xf32>
    %1042 = vector.extract_strided_slice %1038 {offsets = [0, 32], sizes = [4, 32], strides = [1, 1]} : vector<4x64xf32> to vector<4x32xf32>
    %cst_250 = arith.constant 2.500000e-01 : f32
    %1043 = vector.broadcast %cst_250 : f32 to vector<4x32xf32>
    %1044 = arith.mulf %1042, %1043 : vector<4x32xf32>
    %1045 = arith.mulf %1041, %1041 : vector<4x32xf32>
    %1046 = arith.subf %1044, %1045 : vector<4x32xf32>
    %cst_251 = arith.constant 0.000000e+00 : f32
    %1047 = vector.broadcast %cst_251 : f32 to vector<4x32xf32>
    %1048 = arith.maximumf %1046, %1047 : vector<4x32xf32>
    %cst_252 = arith.constant 9.99999974E-6 : f32
    %1049 = vector.broadcast %cst_252 : f32 to vector<4x32xf32>
    %1050 = arith.addf %1048, %1049 : vector<4x32xf32>
    %1051 = math.rsqrt %1050 : vector<4x32xf32>
    %1052 = arith.mulf %1041, %1051 : vector<4x32xf32>
    %1053 = tpu.concatenate %1051, %1052 in 1 : vector<4x32xf32>, vector<4x32xf32> -> vector<4x64xf32>
    %cst_253 = arith.constant dense<0.000000e+00> : vector<16x64xf32>
    %1054 = tpu.matmul %3, %1053, %cst_253 {dimension_numbers = #tpu.dot_dimension_numbers<[1], [0], [0], [1], [0, 0, 1, 1], [], []>} : vector<16x4xf32>, vector<4x64xf32>, vector<16x64xf32> -> vector<16x64xf32>
    %1055 = vector.extract_strided_slice %1054 {offsets = [0, 0], sizes = [16, 32], strides = [1, 1]} : vector<16x64xf32> to vector<16x32xf32>
    %1056 = arith.mulf %1035, %1055 : vector<16x32xf32>
    %1057 = vector.extract_strided_slice %1054 {offsets = [0, 32], sizes = [16, 32], strides = [1, 1]} : vector<16x64xf32> to vector<16x32xf32>
    %1058 = arith.subf %1056, %1057 : vector<16x32xf32>
    %1059 = vector.broadcast %4 : vector<16x1xf32> to vector<16x32xf32>
    %1060 = arith.mulf %1058, %1059 : vector<16x32xf32>
    %1061 = vector.broadcast %5 : vector<16x1xf32> to vector<16x32xf32>
    %1062 = arith.addf %1060, %1061 : vector<16x32xf32>
    %cst_254 = arith.constant dense<0xFF800000> : vector<32xf32>
    %1063 = vector.multi_reduction <maximumf>, %1062, %cst_254 [0] : vector<16x32xf32> to vector<32xf32>
    %1064 = vector.shape_cast %1063 : vector<32xf32> to vector<1x32xf32>
    %1065 = vector.broadcast %1064 : vector<1x32xf32> to vector<16x32xf32>
    %1066 = arith.subf %1062, %1065 : vector<16x32xf32>
    %1067 = math.exp %1066 : vector<16x32xf32>
    %cst_255 = arith.constant dense<0.000000e+00> : vector<32xf32>
    %1068 = vector.multi_reduction <add>, %1067, %cst_255 [0] : vector<16x32xf32> to vector<32xf32>
    %1069 = vector.shape_cast %1068 : vector<32xf32> to vector<1x32xf32>
    %1070 = tpu.reciprocal %1069 : vector<1x32xf32> -> vector<1x32xf32>
    %1071 = vector.broadcast %1070 : vector<1x32xf32> to vector<16x32xf32>
    %1072 = arith.mulf %1067, %1071 : vector<16x32xf32>
    %cst_256 = arith.constant dense<0.000000e+00> : vector<16xf32>
    %1073 = vector.multi_reduction <add>, %1072, %cst_256 [1] : vector<16x32xf32> to vector<16xf32>
    %1074 = vector.shape_cast %1073 : vector<16xf32> to vector<16x1xf32>
    %cst_257 = arith.constant dense<0.000000e+00> : vector<16x128xf32>
    %1075 = tpu.matmul %1072, %1034, %cst_257 {dimension_numbers = #tpu.dot_dimension_numbers<[1], [1], [0], [0], [0, 0, 1, 0], [], []>} : vector<16x32xf32>, vector<128x32xf32>, vector<16x128xf32> -> vector<16x128xf32>
    %1076 = vector.broadcast %1074 : vector<16x1xf32> to vector<16x128xf32>
    %1077 = arith.mulf %1076, %1 : vector<16x128xf32>
    %1078 = arith.subf %1075, %1077 : vector<16x128xf32>
    %1079 = arith.mulf %1078, %1078 : vector<16x128xf32>
    %cst_258 = arith.constant dense<0.000000e+00> : vector<16xf32>
    %1080 = vector.multi_reduction <add>, %1079, %cst_258 [1] : vector<16x128xf32> to vector<16xf32>
    %1081 = vector.shape_cast %1080 : vector<16xf32> to vector<16x1xf32>
    %cst_259 = arith.constant 1.000000e-24 : f32
    %1082 = vector.broadcast %cst_259 : f32 to vector<16x1xf32>
    %1083 = arith.maximumf %1081, %1082 : vector<16x1xf32>
    %1084 = math.rsqrt %1083 : vector<16x1xf32>
    %1085 = vector.broadcast %1084 : vector<16x1xf32> to vector<16x128xf32>
    %1086 = arith.mulf %1078, %1085 : vector<16x128xf32>
    %1087 = arith.mulf %1086, %1086 : vector<16x128xf32>
    %cst_260 = arith.constant dense<0.000000e+00> : vector<16xf32>
    %1088 = vector.multi_reduction <add>, %1087, %cst_260 [1] : vector<16x128xf32> to vector<16xf32>
    %1089 = vector.shape_cast %1088 : vector<16xf32> to vector<16x1xf32>
    %cst_261 = arith.constant dense<0.000000e+00> : vector<1xf32>
    %1090 = vector.multi_reduction <add>, %1089, %cst_261 [0] : vector<16x1xf32> to vector<1xf32>
    %1091 = vector.shape_cast %1090 : vector<1xf32> to vector<1x1xf32>
    %cst_262 = arith.constant 1.000000e-24 : f32
    %1092 = vector.broadcast %cst_262 : f32 to vector<1x1xf32>
    %1093 = arith.maximumf %1091, %1092 : vector<1x1xf32>
    %1094 = math.rsqrt %1093 : vector<1x1xf32>
    %1095 = vector.extract_strided_slice %1086 {offsets = [0, 0], sizes = [1, 128], strides = [1, 1]} : vector<16x128xf32> to vector<1x128xf32>
    %1096 = vector.extract_strided_slice %1086 {offsets = [1, 0], sizes = [1, 128], strides = [1, 1]} : vector<16x128xf32> to vector<1x128xf32>
    %1097 = vector.extract_strided_slice %1086 {offsets = [2, 0], sizes = [1, 128], strides = [1, 1]} : vector<16x128xf32> to vector<1x128xf32>
    %1098 = vector.extract_strided_slice %1086 {offsets = [3, 0], sizes = [1, 128], strides = [1, 1]} : vector<16x128xf32> to vector<1x128xf32>
    %1099 = vector.extract_strided_slice %1086 {offsets = [4, 0], sizes = [1, 128], strides = [1, 1]} : vector<16x128xf32> to vector<1x128xf32>
    %1100 = vector.extract_strided_slice %1086 {offsets = [5, 0], sizes = [1, 128], strides = [1, 1]} : vector<16x128xf32> to vector<1x128xf32>
    %1101 = vector.extract_strided_slice %1086 {offsets = [6, 0], sizes = [1, 128], strides = [1, 1]} : vector<16x128xf32> to vector<1x128xf32>
    %1102 = vector.extract_strided_slice %1086 {offsets = [7, 0], sizes = [1, 128], strides = [1, 1]} : vector<16x128xf32> to vector<1x128xf32>
    %1103 = vector.extract_strided_slice %1086 {offsets = [8, 0], sizes = [1, 128], strides = [1, 1]} : vector<16x128xf32> to vector<1x128xf32>
    %1104 = vector.extract_strided_slice %1086 {offsets = [9, 0], sizes = [1, 128], strides = [1, 1]} : vector<16x128xf32> to vector<1x128xf32>
    %1105 = vector.extract_strided_slice %1086 {offsets = [10, 0], sizes = [1, 128], strides = [1, 1]} : vector<16x128xf32> to vector<1x128xf32>
    %1106 = vector.extract_strided_slice %1086 {offsets = [11, 0], sizes = [1, 128], strides = [1, 1]} : vector<16x128xf32> to vector<1x128xf32>
    %1107 = vector.extract_strided_slice %1086 {offsets = [12, 0], sizes = [1, 128], strides = [1, 1]} : vector<16x128xf32> to vector<1x128xf32>
    %1108 = vector.extract_strided_slice %1086 {offsets = [13, 0], sizes = [1, 128], strides = [1, 1]} : vector<16x128xf32> to vector<1x128xf32>
    %1109 = vector.extract_strided_slice %1086 {offsets = [14, 0], sizes = [1, 128], strides = [1, 1]} : vector<16x128xf32> to vector<1x128xf32>
    %1110 = vector.extract_strided_slice %1086 {offsets = [15, 0], sizes = [1, 128], strides = [1, 1]} : vector<16x128xf32> to vector<1x128xf32>
    %1111 = tpu.concatenate %1095, %1096, %1097, %1098, %1099, %1100, %1101, %1102, %1103, %1104, %1105, %1106, %1107, %1108, %1109, %1110 in 1 : vector<1x128xf32>, vector<1x128xf32>, vector<1x128xf32>, vector<1x128xf32>, vector<1x128xf32>, vector<1x128xf32>, vector<1x128xf32>, vector<1x128xf32>, vector<1x128xf32>, vector<1x128xf32>, vector<1x128xf32>, vector<1x128xf32>, vector<1x128xf32>, vector<1x128xf32>, vector<1x128xf32>, vector<1x128xf32> -> vector<1x2048xf32>
    %c14 = arith.constant 14 : index
    %c0_263 = arith.constant 0 : index
    %c0_264 = arith.constant 0 : index
    %1112 = vector.load %arg1[%c14, %c0_263, %c0_264] : memref<16x128x32xf32, #tpu.memory_space<vmem>>, vector<1x128x32xf32>
    %1113 = vector.shape_cast %1112 : vector<1x128x32xf32> to vector<128x32xf32>
    %cst_265 = arith.constant dense<0.000000e+00> : vector<16x32xf32>
    %1114 = tpu.matmul %0, %1113, %cst_265 {dimension_numbers = #tpu.dot_dimension_numbers<[1], [0], [0], [1], [0, 0, 1, 1], [], []>} : vector<16x128xf32>, vector<128x32xf32>, vector<16x32xf32> -> vector<16x32xf32>
    %1115 = arith.mulf %1114, %1114 : vector<16x32xf32>
    %1116 = tpu.concatenate %1114, %1115 in 1 : vector<16x32xf32>, vector<16x32xf32> -> vector<16x64xf32>
    %cst_266 = arith.constant dense<0.000000e+00> : vector<4x64xf32>
    %1117 = tpu.matmul %2, %1116, %cst_266 {dimension_numbers = #tpu.dot_dimension_numbers<[1], [0], [0], [1], [0, 0, 1, 1], [], []>} : vector<4x16xf32>, vector<16x64xf32>, vector<4x64xf32> -> vector<4x64xf32>
    %1118 = vector.extract_strided_slice %1117 {offsets = [0, 0], sizes = [4, 32], strides = [1, 1]} : vector<4x64xf32> to vector<4x32xf32>
    %cst_267 = arith.constant 2.500000e-01 : f32
    %1119 = vector.broadcast %cst_267 : f32 to vector<4x32xf32>
    %1120 = arith.mulf %1118, %1119 : vector<4x32xf32>
    %1121 = vector.extract_strided_slice %1117 {offsets = [0, 32], sizes = [4, 32], strides = [1, 1]} : vector<4x64xf32> to vector<4x32xf32>
    %cst_268 = arith.constant 2.500000e-01 : f32
    %1122 = vector.broadcast %cst_268 : f32 to vector<4x32xf32>
    %1123 = arith.mulf %1121, %1122 : vector<4x32xf32>
    %1124 = arith.mulf %1120, %1120 : vector<4x32xf32>
    %1125 = arith.subf %1123, %1124 : vector<4x32xf32>
    %cst_269 = arith.constant 0.000000e+00 : f32
    %1126 = vector.broadcast %cst_269 : f32 to vector<4x32xf32>
    %1127 = arith.maximumf %1125, %1126 : vector<4x32xf32>
    %cst_270 = arith.constant 9.99999974E-6 : f32
    %1128 = vector.broadcast %cst_270 : f32 to vector<4x32xf32>
    %1129 = arith.addf %1127, %1128 : vector<4x32xf32>
    %1130 = math.rsqrt %1129 : vector<4x32xf32>
    %1131 = arith.mulf %1120, %1130 : vector<4x32xf32>
    %1132 = tpu.concatenate %1130, %1131 in 1 : vector<4x32xf32>, vector<4x32xf32> -> vector<4x64xf32>
    %cst_271 = arith.constant dense<0.000000e+00> : vector<16x64xf32>
    %1133 = tpu.matmul %3, %1132, %cst_271 {dimension_numbers = #tpu.dot_dimension_numbers<[1], [0], [0], [1], [0, 0, 1, 1], [], []>} : vector<16x4xf32>, vector<4x64xf32>, vector<16x64xf32> -> vector<16x64xf32>
    %1134 = vector.extract_strided_slice %1133 {offsets = [0, 0], sizes = [16, 32], strides = [1, 1]} : vector<16x64xf32> to vector<16x32xf32>
    %1135 = arith.mulf %1114, %1134 : vector<16x32xf32>
    %1136 = vector.extract_strided_slice %1133 {offsets = [0, 32], sizes = [16, 32], strides = [1, 1]} : vector<16x64xf32> to vector<16x32xf32>
    %1137 = arith.subf %1135, %1136 : vector<16x32xf32>
    %1138 = vector.broadcast %4 : vector<16x1xf32> to vector<16x32xf32>
    %1139 = arith.mulf %1137, %1138 : vector<16x32xf32>
    %1140 = vector.broadcast %5 : vector<16x1xf32> to vector<16x32xf32>
    %1141 = arith.addf %1139, %1140 : vector<16x32xf32>
    %cst_272 = arith.constant dense<0xFF800000> : vector<32xf32>
    %1142 = vector.multi_reduction <maximumf>, %1141, %cst_272 [0] : vector<16x32xf32> to vector<32xf32>
    %1143 = vector.shape_cast %1142 : vector<32xf32> to vector<1x32xf32>
    %1144 = vector.broadcast %1143 : vector<1x32xf32> to vector<16x32xf32>
    %1145 = arith.subf %1141, %1144 : vector<16x32xf32>
    %1146 = math.exp %1145 : vector<16x32xf32>
    %cst_273 = arith.constant dense<0.000000e+00> : vector<32xf32>
    %1147 = vector.multi_reduction <add>, %1146, %cst_273 [0] : vector<16x32xf32> to vector<32xf32>
    %1148 = vector.shape_cast %1147 : vector<32xf32> to vector<1x32xf32>
    %1149 = tpu.reciprocal %1148 : vector<1x32xf32> -> vector<1x32xf32>
    %1150 = vector.broadcast %1149 : vector<1x32xf32> to vector<16x32xf32>
    %1151 = arith.mulf %1146, %1150 : vector<16x32xf32>
    %cst_274 = arith.constant dense<0.000000e+00> : vector<16xf32>
    %1152 = vector.multi_reduction <add>, %1151, %cst_274 [1] : vector<16x32xf32> to vector<16xf32>
    %1153 = vector.shape_cast %1152 : vector<16xf32> to vector<16x1xf32>
    %cst_275 = arith.constant dense<0.000000e+00> : vector<16x128xf32>
    %1154 = tpu.matmul %1151, %1113, %cst_275 {dimension_numbers = #tpu.dot_dimension_numbers<[1], [1], [0], [0], [0, 0, 1, 0], [], []>} : vector<16x32xf32>, vector<128x32xf32>, vector<16x128xf32> -> vector<16x128xf32>
    %1155 = vector.broadcast %1153 : vector<16x1xf32> to vector<16x128xf32>
    %1156 = arith.mulf %1155, %1 : vector<16x128xf32>
    %1157 = arith.subf %1154, %1156 : vector<16x128xf32>
    %1158 = arith.mulf %1157, %1157 : vector<16x128xf32>
    %cst_276 = arith.constant dense<0.000000e+00> : vector<16xf32>
    %1159 = vector.multi_reduction <add>, %1158, %cst_276 [1] : vector<16x128xf32> to vector<16xf32>
    %1160 = vector.shape_cast %1159 : vector<16xf32> to vector<16x1xf32>
    %cst_277 = arith.constant 1.000000e-24 : f32
    %1161 = vector.broadcast %cst_277 : f32 to vector<16x1xf32>
    %1162 = arith.maximumf %1160, %1161 : vector<16x1xf32>
    %1163 = math.rsqrt %1162 : vector<16x1xf32>
    %1164 = vector.broadcast %1163 : vector<16x1xf32> to vector<16x128xf32>
    %1165 = arith.mulf %1157, %1164 : vector<16x128xf32>
    %1166 = arith.mulf %1165, %1165 : vector<16x128xf32>
    %cst_278 = arith.constant dense<0.000000e+00> : vector<16xf32>
    %1167 = vector.multi_reduction <add>, %1166, %cst_278 [1] : vector<16x128xf32> to vector<16xf32>
    %1168 = vector.shape_cast %1167 : vector<16xf32> to vector<16x1xf32>
    %cst_279 = arith.constant dense<0.000000e+00> : vector<1xf32>
    %1169 = vector.multi_reduction <add>, %1168, %cst_279 [0] : vector<16x1xf32> to vector<1xf32>
    %1170 = vector.shape_cast %1169 : vector<1xf32> to vector<1x1xf32>
    %cst_280 = arith.constant 1.000000e-24 : f32
    %1171 = vector.broadcast %cst_280 : f32 to vector<1x1xf32>
    %1172 = arith.maximumf %1170, %1171 : vector<1x1xf32>
    %1173 = math.rsqrt %1172 : vector<1x1xf32>
    %1174 = vector.extract_strided_slice %1165 {offsets = [0, 0], sizes = [1, 128], strides = [1, 1]} : vector<16x128xf32> to vector<1x128xf32>
    %1175 = vector.extract_strided_slice %1165 {offsets = [1, 0], sizes = [1, 128], strides = [1, 1]} : vector<16x128xf32> to vector<1x128xf32>
    %1176 = vector.extract_strided_slice %1165 {offsets = [2, 0], sizes = [1, 128], strides = [1, 1]} : vector<16x128xf32> to vector<1x128xf32>
    %1177 = vector.extract_strided_slice %1165 {offsets = [3, 0], sizes = [1, 128], strides = [1, 1]} : vector<16x128xf32> to vector<1x128xf32>
    %1178 = vector.extract_strided_slice %1165 {offsets = [4, 0], sizes = [1, 128], strides = [1, 1]} : vector<16x128xf32> to vector<1x128xf32>
    %1179 = vector.extract_strided_slice %1165 {offsets = [5, 0], sizes = [1, 128], strides = [1, 1]} : vector<16x128xf32> to vector<1x128xf32>
    %1180 = vector.extract_strided_slice %1165 {offsets = [6, 0], sizes = [1, 128], strides = [1, 1]} : vector<16x128xf32> to vector<1x128xf32>
    %1181 = vector.extract_strided_slice %1165 {offsets = [7, 0], sizes = [1, 128], strides = [1, 1]} : vector<16x128xf32> to vector<1x128xf32>
    %1182 = vector.extract_strided_slice %1165 {offsets = [8, 0], sizes = [1, 128], strides = [1, 1]} : vector<16x128xf32> to vector<1x128xf32>
    %1183 = vector.extract_strided_slice %1165 {offsets = [9, 0], sizes = [1, 128], strides = [1, 1]} : vector<16x128xf32> to vector<1x128xf32>
    %1184 = vector.extract_strided_slice %1165 {offsets = [10, 0], sizes = [1, 128], strides = [1, 1]} : vector<16x128xf32> to vector<1x128xf32>
    %1185 = vector.extract_strided_slice %1165 {offsets = [11, 0], sizes = [1, 128], strides = [1, 1]} : vector<16x128xf32> to vector<1x128xf32>
    %1186 = vector.extract_strided_slice %1165 {offsets = [12, 0], sizes = [1, 128], strides = [1, 1]} : vector<16x128xf32> to vector<1x128xf32>
    %1187 = vector.extract_strided_slice %1165 {offsets = [13, 0], sizes = [1, 128], strides = [1, 1]} : vector<16x128xf32> to vector<1x128xf32>
    %1188 = vector.extract_strided_slice %1165 {offsets = [14, 0], sizes = [1, 128], strides = [1, 1]} : vector<16x128xf32> to vector<1x128xf32>
    %1189 = vector.extract_strided_slice %1165 {offsets = [15, 0], sizes = [1, 128], strides = [1, 1]} : vector<16x128xf32> to vector<1x128xf32>
    %1190 = tpu.concatenate %1174, %1175, %1176, %1177, %1178, %1179, %1180, %1181, %1182, %1183, %1184, %1185, %1186, %1187, %1188, %1189 in 1 : vector<1x128xf32>, vector<1x128xf32>, vector<1x128xf32>, vector<1x128xf32>, vector<1x128xf32>, vector<1x128xf32>, vector<1x128xf32>, vector<1x128xf32>, vector<1x128xf32>, vector<1x128xf32>, vector<1x128xf32>, vector<1x128xf32>, vector<1x128xf32>, vector<1x128xf32>, vector<1x128xf32>, vector<1x128xf32> -> vector<1x2048xf32>
    %c15 = arith.constant 15 : index
    %c0_281 = arith.constant 0 : index
    %c0_282 = arith.constant 0 : index
    %1191 = vector.load %arg1[%c15, %c0_281, %c0_282] : memref<16x128x32xf32, #tpu.memory_space<vmem>>, vector<1x128x32xf32>
    %1192 = vector.shape_cast %1191 : vector<1x128x32xf32> to vector<128x32xf32>
    %cst_283 = arith.constant dense<0.000000e+00> : vector<16x32xf32>
    %1193 = tpu.matmul %0, %1192, %cst_283 {dimension_numbers = #tpu.dot_dimension_numbers<[1], [0], [0], [1], [0, 0, 1, 1], [], []>} : vector<16x128xf32>, vector<128x32xf32>, vector<16x32xf32> -> vector<16x32xf32>
    %1194 = arith.mulf %1193, %1193 : vector<16x32xf32>
    %1195 = tpu.concatenate %1193, %1194 in 1 : vector<16x32xf32>, vector<16x32xf32> -> vector<16x64xf32>
    %cst_284 = arith.constant dense<0.000000e+00> : vector<4x64xf32>
    %1196 = tpu.matmul %2, %1195, %cst_284 {dimension_numbers = #tpu.dot_dimension_numbers<[1], [0], [0], [1], [0, 0, 1, 1], [], []>} : vector<4x16xf32>, vector<16x64xf32>, vector<4x64xf32> -> vector<4x64xf32>
    %1197 = vector.extract_strided_slice %1196 {offsets = [0, 0], sizes = [4, 32], strides = [1, 1]} : vector<4x64xf32> to vector<4x32xf32>
    %cst_285 = arith.constant 2.500000e-01 : f32
    %1198 = vector.broadcast %cst_285 : f32 to vector<4x32xf32>
    %1199 = arith.mulf %1197, %1198 : vector<4x32xf32>
    %1200 = vector.extract_strided_slice %1196 {offsets = [0, 32], sizes = [4, 32], strides = [1, 1]} : vector<4x64xf32> to vector<4x32xf32>
    %cst_286 = arith.constant 2.500000e-01 : f32
    %1201 = vector.broadcast %cst_286 : f32 to vector<4x32xf32>
    %1202 = arith.mulf %1200, %1201 : vector<4x32xf32>
    %1203 = arith.mulf %1199, %1199 : vector<4x32xf32>
    %1204 = arith.subf %1202, %1203 : vector<4x32xf32>
    %cst_287 = arith.constant 0.000000e+00 : f32
    %1205 = vector.broadcast %cst_287 : f32 to vector<4x32xf32>
    %1206 = arith.maximumf %1204, %1205 : vector<4x32xf32>
    %cst_288 = arith.constant 9.99999974E-6 : f32
    %1207 = vector.broadcast %cst_288 : f32 to vector<4x32xf32>
    %1208 = arith.addf %1206, %1207 : vector<4x32xf32>
    %1209 = math.rsqrt %1208 : vector<4x32xf32>
    %1210 = arith.mulf %1199, %1209 : vector<4x32xf32>
    %1211 = tpu.concatenate %1209, %1210 in 1 : vector<4x32xf32>, vector<4x32xf32> -> vector<4x64xf32>
    %cst_289 = arith.constant dense<0.000000e+00> : vector<16x64xf32>
    %1212 = tpu.matmul %3, %1211, %cst_289 {dimension_numbers = #tpu.dot_dimension_numbers<[1], [0], [0], [1], [0, 0, 1, 1], [], []>} : vector<16x4xf32>, vector<4x64xf32>, vector<16x64xf32> -> vector<16x64xf32>
    %1213 = vector.extract_strided_slice %1212 {offsets = [0, 0], sizes = [16, 32], strides = [1, 1]} : vector<16x64xf32> to vector<16x32xf32>
    %1214 = arith.mulf %1193, %1213 : vector<16x32xf32>
    %1215 = vector.extract_strided_slice %1212 {offsets = [0, 32], sizes = [16, 32], strides = [1, 1]} : vector<16x64xf32> to vector<16x32xf32>
    %1216 = arith.subf %1214, %1215 : vector<16x32xf32>
    %1217 = vector.broadcast %4 : vector<16x1xf32> to vector<16x32xf32>
    %1218 = arith.mulf %1216, %1217 : vector<16x32xf32>
    %1219 = vector.broadcast %5 : vector<16x1xf32> to vector<16x32xf32>
    %1220 = arith.addf %1218, %1219 : vector<16x32xf32>
    %cst_290 = arith.constant dense<0xFF800000> : vector<32xf32>
    %1221 = vector.multi_reduction <maximumf>, %1220, %cst_290 [0] : vector<16x32xf32> to vector<32xf32>
    %1222 = vector.shape_cast %1221 : vector<32xf32> to vector<1x32xf32>
    %1223 = vector.broadcast %1222 : vector<1x32xf32> to vector<16x32xf32>
    %1224 = arith.subf %1220, %1223 : vector<16x32xf32>
    %1225 = math.exp %1224 : vector<16x32xf32>
    %cst_291 = arith.constant dense<0.000000e+00> : vector<32xf32>
    %1226 = vector.multi_reduction <add>, %1225, %cst_291 [0] : vector<16x32xf32> to vector<32xf32>
    %1227 = vector.shape_cast %1226 : vector<32xf32> to vector<1x32xf32>
    %1228 = tpu.reciprocal %1227 : vector<1x32xf32> -> vector<1x32xf32>
    %1229 = vector.broadcast %1228 : vector<1x32xf32> to vector<16x32xf32>
    %1230 = arith.mulf %1225, %1229 : vector<16x32xf32>
    %cst_292 = arith.constant dense<0.000000e+00> : vector<16xf32>
    %1231 = vector.multi_reduction <add>, %1230, %cst_292 [1] : vector<16x32xf32> to vector<16xf32>
    %1232 = vector.shape_cast %1231 : vector<16xf32> to vector<16x1xf32>
    %cst_293 = arith.constant dense<0.000000e+00> : vector<16x128xf32>
    %1233 = tpu.matmul %1230, %1192, %cst_293 {dimension_numbers = #tpu.dot_dimension_numbers<[1], [1], [0], [0], [0, 0, 1, 0], [], []>} : vector<16x32xf32>, vector<128x32xf32>, vector<16x128xf32> -> vector<16x128xf32>
    %1234 = vector.broadcast %1232 : vector<16x1xf32> to vector<16x128xf32>
    %1235 = arith.mulf %1234, %1 : vector<16x128xf32>
    %1236 = arith.subf %1233, %1235 : vector<16x128xf32>
    %1237 = arith.mulf %1236, %1236 : vector<16x128xf32>
    %cst_294 = arith.constant dense<0.000000e+00> : vector<16xf32>
    %1238 = vector.multi_reduction <add>, %1237, %cst_294 [1] : vector<16x128xf32> to vector<16xf32>
    %1239 = vector.shape_cast %1238 : vector<16xf32> to vector<16x1xf32>
    %cst_295 = arith.constant 1.000000e-24 : f32
    %1240 = vector.broadcast %cst_295 : f32 to vector<16x1xf32>
    %1241 = arith.maximumf %1239, %1240 : vector<16x1xf32>
    %1242 = math.rsqrt %1241 : vector<16x1xf32>
    %1243 = vector.broadcast %1242 : vector<16x1xf32> to vector<16x128xf32>
    %1244 = arith.mulf %1236, %1243 : vector<16x128xf32>
    %1245 = arith.mulf %1244, %1244 : vector<16x128xf32>
    %cst_296 = arith.constant dense<0.000000e+00> : vector<16xf32>
    %1246 = vector.multi_reduction <add>, %1245, %cst_296 [1] : vector<16x128xf32> to vector<16xf32>
    %1247 = vector.shape_cast %1246 : vector<16xf32> to vector<16x1xf32>
    %cst_297 = arith.constant dense<0.000000e+00> : vector<1xf32>
    %1248 = vector.multi_reduction <add>, %1247, %cst_297 [0] : vector<16x1xf32> to vector<1xf32>
    %1249 = vector.shape_cast %1248 : vector<1xf32> to vector<1x1xf32>
    %cst_298 = arith.constant 1.000000e-24 : f32
    %1250 = vector.broadcast %cst_298 : f32 to vector<1x1xf32>
    %1251 = arith.maximumf %1249, %1250 : vector<1x1xf32>
    %1252 = math.rsqrt %1251 : vector<1x1xf32>
    %1253 = vector.extract_strided_slice %1244 {offsets = [0, 0], sizes = [1, 128], strides = [1, 1]} : vector<16x128xf32> to vector<1x128xf32>
    %1254 = vector.extract_strided_slice %1244 {offsets = [1, 0], sizes = [1, 128], strides = [1, 1]} : vector<16x128xf32> to vector<1x128xf32>
    %1255 = vector.extract_strided_slice %1244 {offsets = [2, 0], sizes = [1, 128], strides = [1, 1]} : vector<16x128xf32> to vector<1x128xf32>
    %1256 = vector.extract_strided_slice %1244 {offsets = [3, 0], sizes = [1, 128], strides = [1, 1]} : vector<16x128xf32> to vector<1x128xf32>
    %1257 = vector.extract_strided_slice %1244 {offsets = [4, 0], sizes = [1, 128], strides = [1, 1]} : vector<16x128xf32> to vector<1x128xf32>
    %1258 = vector.extract_strided_slice %1244 {offsets = [5, 0], sizes = [1, 128], strides = [1, 1]} : vector<16x128xf32> to vector<1x128xf32>
    %1259 = vector.extract_strided_slice %1244 {offsets = [6, 0], sizes = [1, 128], strides = [1, 1]} : vector<16x128xf32> to vector<1x128xf32>
    %1260 = vector.extract_strided_slice %1244 {offsets = [7, 0], sizes = [1, 128], strides = [1, 1]} : vector<16x128xf32> to vector<1x128xf32>
    %1261 = vector.extract_strided_slice %1244 {offsets = [8, 0], sizes = [1, 128], strides = [1, 1]} : vector<16x128xf32> to vector<1x128xf32>
    %1262 = vector.extract_strided_slice %1244 {offsets = [9, 0], sizes = [1, 128], strides = [1, 1]} : vector<16x128xf32> to vector<1x128xf32>
    %1263 = vector.extract_strided_slice %1244 {offsets = [10, 0], sizes = [1, 128], strides = [1, 1]} : vector<16x128xf32> to vector<1x128xf32>
    %1264 = vector.extract_strided_slice %1244 {offsets = [11, 0], sizes = [1, 128], strides = [1, 1]} : vector<16x128xf32> to vector<1x128xf32>
    %1265 = vector.extract_strided_slice %1244 {offsets = [12, 0], sizes = [1, 128], strides = [1, 1]} : vector<16x128xf32> to vector<1x128xf32>
    %1266 = vector.extract_strided_slice %1244 {offsets = [13, 0], sizes = [1, 128], strides = [1, 1]} : vector<16x128xf32> to vector<1x128xf32>
    %1267 = vector.extract_strided_slice %1244 {offsets = [14, 0], sizes = [1, 128], strides = [1, 1]} : vector<16x128xf32> to vector<1x128xf32>
    %1268 = vector.extract_strided_slice %1244 {offsets = [15, 0], sizes = [1, 128], strides = [1, 1]} : vector<16x128xf32> to vector<1x128xf32>
    %1269 = tpu.concatenate %1253, %1254, %1255, %1256, %1257, %1258, %1259, %1260, %1261, %1262, %1263, %1264, %1265, %1266, %1267, %1268 in 1 : vector<1x128xf32>, vector<1x128xf32>, vector<1x128xf32>, vector<1x128xf32>, vector<1x128xf32>, vector<1x128xf32>, vector<1x128xf32>, vector<1x128xf32>, vector<1x128xf32>, vector<1x128xf32>, vector<1x128xf32>, vector<1x128xf32>, vector<1x128xf32>, vector<1x128xf32>, vector<1x128xf32>, vector<1x128xf32> -> vector<1x2048xf32>
    %1270 = tpu.concatenate %84, %163, %242, %321, %400, %479, %558, %637, %716, %795, %874, %953, %1032, %1111, %1190, %1269 in 0 : vector<1x2048xf32>, vector<1x2048xf32>, vector<1x2048xf32>, vector<1x2048xf32>, vector<1x2048xf32>, vector<1x2048xf32>, vector<1x2048xf32>, vector<1x2048xf32>, vector<1x2048xf32>, vector<1x2048xf32>, vector<1x2048xf32>, vector<1x2048xf32>, vector<1x2048xf32>, vector<1x2048xf32>, vector<1x2048xf32>, vector<1x2048xf32> -> vector<16x2048xf32>
    %1271 = tpu.concatenate %67, %146, %225, %304, %383, %462, %541, %620, %699, %778, %857, %936, %1015, %1094, %1173, %1252 in 0 : vector<1x1xf32>, vector<1x1xf32>, vector<1x1xf32>, vector<1x1xf32>, vector<1x1xf32>, vector<1x1xf32>, vector<1x1xf32>, vector<1x1xf32>, vector<1x1xf32>, vector<1x1xf32>, vector<1x1xf32>, vector<1x1xf32>, vector<1x1xf32>, vector<1x1xf32>, vector<1x1xf32>, vector<1x1xf32> -> vector<16x1xf32>
    %c0_299 = arith.constant 0 : index
    %c0_300 = arith.constant 0 : index
    %1272 = vector.load %arg10[%c0_299, %c0_300] : memref<128x8xf32, #tpu.memory_space<vmem>>, vector<128x8xf32>
    %c0_301 = arith.constant 0 : index
    %c0_302 = arith.constant 0 : index
    %1273 = vector.load %arg11[%c0_301, %c0_302] : memref<8x128xf32, #tpu.memory_space<vmem>>, vector<8x128xf32>
    %c0_303 = arith.constant 0 : index
    %c0_304 = arith.constant 0 : index
    %1274 = vector.load %arg8[%c0_303, %c0_304] : memref<2048x128xf32, #tpu.memory_space<vmem>>, vector<2048x128xf32>
    %cst_305 = arith.constant dense<0.000000e+00> : vector<16x128xf32>
    %1275 = tpu.matmul %1270, %1274, %cst_305 {dimension_numbers = #tpu.dot_dimension_numbers<[1], [0], [0], [1], [0, 0, 1, 1], [], []>} : vector<16x2048xf32>, vector<2048x128xf32>, vector<16x128xf32> -> vector<16x128xf32>
    %1276 = vector.broadcast %1271 : vector<16x1xf32> to vector<16x128xf32>
    %1277 = arith.mulf %1275, %1276 : vector<16x128xf32>
    %c0_306 = arith.constant 0 : index
    %c0_307 = arith.constant 0 : index
    %1278 = vector.load %arg12[%c0_306, %c0_307] : memref<1x128xf32, #tpu.memory_space<vmem>>, vector<1x128xf32>
    %c0_308 = arith.constant 0 : index
    %c0_309 = arith.constant 0 : index
    %1279 = vector.load %arg13[%c0_308, %c0_309] : memref<1x128xf32, #tpu.memory_space<vmem>>, vector<1x128xf32>
    %1280 = arith.mulf %1277, %1277 : vector<16x128xf32>
    %1281 = tpu.concatenate %1277, %1280 in 0 : vector<16x128xf32>, vector<16x128xf32> -> vector<32x128xf32>
    %cst_310 = arith.constant dense<0.000000e+00> : vector<32x8xf32>
    %1282 = tpu.matmul %1281, %1272, %cst_310 {dimension_numbers = #tpu.dot_dimension_numbers<[1], [0], [0], [1], [0, 0, 1, 1], [], []>} : vector<32x128xf32>, vector<128x8xf32>, vector<32x8xf32> -> vector<32x8xf32>
    %1283 = vector.extract_strided_slice %1282 {offsets = [0, 0], sizes = [16, 8], strides = [1, 1]} : vector<32x8xf32> to vector<16x8xf32>
    %cst_311 = arith.constant 6.250000e-02 : f32
    %1284 = vector.broadcast %cst_311 : f32 to vector<16x8xf32>
    %1285 = arith.mulf %1283, %1284 : vector<16x8xf32>
    %1286 = vector.extract_strided_slice %1282 {offsets = [16, 0], sizes = [16, 8], strides = [1, 1]} : vector<32x8xf32> to vector<16x8xf32>
    %cst_312 = arith.constant 6.250000e-02 : f32
    %1287 = vector.broadcast %cst_312 : f32 to vector<16x8xf32>
    %1288 = arith.mulf %1286, %1287 : vector<16x8xf32>
    %1289 = arith.mulf %1285, %1285 : vector<16x8xf32>
    %1290 = arith.subf %1288, %1289 : vector<16x8xf32>
    %cst_313 = arith.constant 0.000000e+00 : f32
    %1291 = vector.broadcast %cst_313 : f32 to vector<16x8xf32>
    %1292 = arith.maximumf %1290, %1291 : vector<16x8xf32>
    %cst_314 = arith.constant 9.99999974E-6 : f32
    %1293 = vector.broadcast %cst_314 : f32 to vector<16x8xf32>
    %1294 = arith.addf %1292, %1293 : vector<16x8xf32>
    %1295 = math.rsqrt %1294 : vector<16x8xf32>
    %1296 = arith.mulf %1285, %1295 : vector<16x8xf32>
    %1297 = tpu.concatenate %1295, %1296 in 0 : vector<16x8xf32>, vector<16x8xf32> -> vector<32x8xf32>
    %cst_315 = arith.constant dense<0.000000e+00> : vector<32x128xf32>
    %1298 = tpu.matmul %1297, %1273, %cst_315 {dimension_numbers = #tpu.dot_dimension_numbers<[1], [0], [0], [1], [0, 0, 1, 1], [], []>} : vector<32x8xf32>, vector<8x128xf32>, vector<32x128xf32> -> vector<32x128xf32>
    %1299 = vector.extract_strided_slice %1298 {offsets = [0, 0], sizes = [16, 128], strides = [1, 1]} : vector<32x128xf32> to vector<16x128xf32>
    %1300 = arith.mulf %1277, %1299 : vector<16x128xf32>
    %1301 = vector.extract_strided_slice %1298 {offsets = [16, 0], sizes = [16, 128], strides = [1, 1]} : vector<32x128xf32> to vector<16x128xf32>
    %1302 = arith.subf %1300, %1301 : vector<16x128xf32>
    %1303 = vector.broadcast %1278 : vector<1x128xf32> to vector<16x128xf32>
    %1304 = arith.mulf %1302, %1303 : vector<16x128xf32>
    %1305 = vector.broadcast %1279 : vector<1x128xf32> to vector<16x128xf32>
    %1306 = arith.addf %1304, %1305 : vector<16x128xf32>
    %c0_316 = arith.constant 0 : index
    %c0_317 = arith.constant 0 : index
    %1307 = vector.load %arg9[%c0_316, %c0_317] : memref<128x128xf32, #tpu.memory_space<vmem>>, vector<128x128xf32>
    %cst_318 = arith.constant dense<0.000000e+00> : vector<16x128xf32>
    %1308 = tpu.matmul %1306, %1307, %cst_318 {dimension_numbers = #tpu.dot_dimension_numbers<[1], [0], [0], [1], [0, 0, 1, 1], [], []>} : vector<16x128xf32>, vector<128x128xf32>, vector<16x128xf32> -> vector<16x128xf32>
    %c0_319 = arith.constant 0 : index
    %c0_320 = arith.constant 0 : index
    %1309 = vector.load %arg14[%c0_319, %c0_320] : memref<1x128xf32, #tpu.memory_space<vmem>>, vector<1x128xf32>
    %c0_321 = arith.constant 0 : index
    %c0_322 = arith.constant 0 : index
    %1310 = vector.load %arg15[%c0_321, %c0_322] : memref<1x128xf32, #tpu.memory_space<vmem>>, vector<1x128xf32>
    %1311 = arith.mulf %1308, %1308 : vector<16x128xf32>
    %1312 = tpu.concatenate %1308, %1311 in 0 : vector<16x128xf32>, vector<16x128xf32> -> vector<32x128xf32>
    %cst_323 = arith.constant dense<0.000000e+00> : vector<32x8xf32>
    %1313 = tpu.matmul %1312, %1272, %cst_323 {dimension_numbers = #tpu.dot_dimension_numbers<[1], [0], [0], [1], [0, 0, 1, 1], [], []>} : vector<32x128xf32>, vector<128x8xf32>, vector<32x8xf32> -> vector<32x8xf32>
    %1314 = vector.extract_strided_slice %1313 {offsets = [0, 0], sizes = [16, 8], strides = [1, 1]} : vector<32x8xf32> to vector<16x8xf32>
    %cst_324 = arith.constant 6.250000e-02 : f32
    %1315 = vector.broadcast %cst_324 : f32 to vector<16x8xf32>
    %1316 = arith.mulf %1314, %1315 : vector<16x8xf32>
    %1317 = vector.extract_strided_slice %1313 {offsets = [16, 0], sizes = [16, 8], strides = [1, 1]} : vector<32x8xf32> to vector<16x8xf32>
    %cst_325 = arith.constant 6.250000e-02 : f32
    %1318 = vector.broadcast %cst_325 : f32 to vector<16x8xf32>
    %1319 = arith.mulf %1317, %1318 : vector<16x8xf32>
    %1320 = arith.mulf %1316, %1316 : vector<16x8xf32>
    %1321 = arith.subf %1319, %1320 : vector<16x8xf32>
    %cst_326 = arith.constant 0.000000e+00 : f32
    %1322 = vector.broadcast %cst_326 : f32 to vector<16x8xf32>
    %1323 = arith.maximumf %1321, %1322 : vector<16x8xf32>
    %cst_327 = arith.constant 9.99999974E-6 : f32
    %1324 = vector.broadcast %cst_327 : f32 to vector<16x8xf32>
    %1325 = arith.addf %1323, %1324 : vector<16x8xf32>
    %1326 = math.rsqrt %1325 : vector<16x8xf32>
    %1327 = arith.mulf %1316, %1326 : vector<16x8xf32>
    %1328 = tpu.concatenate %1326, %1327 in 0 : vector<16x8xf32>, vector<16x8xf32> -> vector<32x8xf32>
    %cst_328 = arith.constant dense<0.000000e+00> : vector<32x128xf32>
    %1329 = tpu.matmul %1328, %1273, %cst_328 {dimension_numbers = #tpu.dot_dimension_numbers<[1], [0], [0], [1], [0, 0, 1, 1], [], []>} : vector<32x8xf32>, vector<8x128xf32>, vector<32x128xf32> -> vector<32x128xf32>
    %1330 = vector.extract_strided_slice %1329 {offsets = [0, 0], sizes = [16, 128], strides = [1, 1]} : vector<32x128xf32> to vector<16x128xf32>
    %1331 = arith.mulf %1308, %1330 : vector<16x128xf32>
    %1332 = vector.extract_strided_slice %1329 {offsets = [16, 0], sizes = [16, 128], strides = [1, 1]} : vector<32x128xf32> to vector<16x128xf32>
    %1333 = arith.subf %1331, %1332 : vector<16x128xf32>
    %1334 = vector.broadcast %1309 : vector<1x128xf32> to vector<16x128xf32>
    %1335 = arith.mulf %1333, %1334 : vector<16x128xf32>
    %1336 = vector.broadcast %1310 : vector<1x128xf32> to vector<16x128xf32>
    %1337 = arith.addf %1335, %1336 : vector<16x128xf32>
    %1338 = arith.negf %1337 : vector<16x128xf32>
    %1339 = math.exp %1338 : vector<16x128xf32>
    %cst_329 = arith.constant 1.000000e+00 : f32
    %1340 = vector.broadcast %cst_329 : f32 to vector<16x128xf32>
    %1341 = arith.addf %1340, %1339 : vector<16x128xf32>
    %1342 = arith.divf %1340, %1341 : vector<16x128xf32>
    %1343 = arith.mulf %1306, %1342 : vector<16x128xf32>
    %c0_330 = arith.constant 0 : index
    %c0_331 = arith.constant 0 : index
    %1344 = vector.load %arg16[%c0_330, %c0_331] : memref<16x128xf32, #tpu.memory_space<vmem>>, vector<16x128xf32>
    tpu.vector_store %arg16[%c0_330, %c0_331], %1343 {strides = array<i32>} : memref<16x128xf32, #tpu.memory_space<vmem>>, vector<16x128xf32>,
    return
  }
  func.func @transform_0(%arg0: i32) -> (i32, i32, i32) {
    %c0_i32 = arith.constant 0 : i32
    %c0_i32_0 = arith.constant 0 : i32
    %c0_i32_1 = arith.constant 0 : i32
    return %arg0, %c0_i32, %c0_i32_0 : i32, i32, i32
  }
  func.func @transform_1(%arg0: i32) -> (i32, i32) {
    %c0_i32 = arith.constant 0 : i32
    %c0_i32_0 = arith.constant 0 : i32
    %c0_i32_1 = arith.constant 0 : i32
    return %c0_i32, %c0_i32_0 : i32, i32
  }
  func.func @transform_2(%arg0: i32) -> (i32, i32) {
    %c0_i32 = arith.constant 0 : i32
    %c0_i32_0 = arith.constant 0 : i32
    %c0_i32_1 = arith.constant 0 : i32
    return %c0_i32, %c0_i32_0 : i32, i32
  }
  func.func @transform_3(%arg0: i32) -> (i32, i32) {
    %c0_i32 = arith.constant 0 : i32
    %c0_i32_0 = arith.constant 0 : i32
    %c0_i32_1 = arith.constant 0 : i32
    return %c0_i32, %c0_i32_0 : i32, i32
  }
  func.func @transform_4(%arg0: i32) -> (i32, i32) {
    %c0_i32 = arith.constant 0 : i32
    %c0_i32_0 = arith.constant 0 : i32
    %c0_i32_1 = arith.constant 0 : i32
    return %c0_i32, %c0_i32_0 : i32, i32
  }
  func.func @transform_5(%arg0: i32) -> (i32, i32) {
    %c0_i32 = arith.constant 0 : i32
    %c0_i32_0 = arith.constant 0 : i32
    %c0_i32_1 = arith.constant 0 : i32
    return %c0_i32, %c0_i32_0 : i32, i32
  }
  func.func @transform_6(%arg0: i32) -> (i32, i32) {
    %c0_i32 = arith.constant 0 : i32
    %c0_i32_0 = arith.constant 0 : i32
    %c0_i32_1 = arith.constant 0 : i32
    return %c0_i32, %c0_i32_0 : i32, i32
  }
  func.func @transform_7(%arg0: i32) -> (i32, i32) {
    %c0_i32 = arith.constant 0 : i32
    %c0_i32_0 = arith.constant 0 : i32
    %c0_i32_1 = arith.constant 0 : i32
    return %c0_i32, %c0_i32_0 : i32, i32
  }
  func.func @transform_8(%arg0: i32) -> (i32, i32) {
    %c0_i32 = arith.constant 0 : i32
    %c0_i32_0 = arith.constant 0 : i32
    %c0_i32_1 = arith.constant 0 : i32
    return %c0_i32, %c0_i32_0 : i32, i32
  }
  func.func @transform_9(%arg0: i32) -> (i32, i32) {
    %c0_i32 = arith.constant 0 : i32
    %c0_i32_0 = arith.constant 0 : i32
    %c0_i32_1 = arith.constant 0 : i32
    return %c0_i32, %c0_i32_0 : i32, i32
  }
  func.func @transform_10(%arg0: i32) -> (i32, i32) {
    %c0_i32 = arith.constant 0 : i32
    %c0_i32_0 = arith.constant 0 : i32
    %c0_i32_1 = arith.constant 0 : i32
    return %c0_i32, %c0_i32_0 : i32, i32
  }
  func.func @transform_11(%arg0: i32) -> (i32, i32) {
    %c0_i32 = arith.constant 0 : i32
    %c0_i32_0 = arith.constant 0 : i32
    %c0_i32_1 = arith.constant 0 : i32
    return %c0_i32, %c0_i32_0 : i32, i32
  }
  func.func @transform_12(%arg0: i32) -> (i32, i32) {
    %c0_i32 = arith.constant 0 : i32
    %c0_i32_0 = arith.constant 0 : i32
    %c0_i32_1 = arith.constant 0 : i32
    return %c0_i32, %c0_i32_0 : i32, i32
  }
  func.func @transform_13(%arg0: i32) -> (i32, i32) {
    %c0_i32 = arith.constant 0 : i32
    %c0_i32_0 = arith.constant 0 : i32
    %c0_i32_1 = arith.constant 0 : i32
    return %c0_i32, %c0_i32_0 : i32, i32
  }
  func.func @transform_14(%arg0: i32) -> (i32, i32) {
    %c0_i32 = arith.constant 0 : i32
    %c0_i32_0 = arith.constant 0 : i32
    %c0_i32_1 = arith.constant 0 : i32
    return %c0_i32, %c0_i32_0 : i32, i32
  }
  func.func @transform_15(%arg0: i32) -> (i32, i32) {
    %c0_i32 = arith.constant 0 : i32
    %c0_i32_0 = arith.constant 0 : i32
    return %arg0, %c0_i32 : i32, i32
  }
}

</mosaic_0001>

<bundles_post_ra>
// kernel: tpu_custom_call.1
= control target key start
LH: loop header
LB: loop body
LE: loop exit
PB: predicated region body
PF: predicated region fallthrough
CT: control target
= control target key end

     0   :  { %s20740_s0 = inlined_call_operand.vmem [shape: f32[16,128,32], index: 0, kind: input, shape index: {}]   ;;  %s20741_s1 = inlined_call_operand.vmem [shape: f32[16,128], index: 1, kind: input, shape index: {}]   ;;  %s20742_s2 = inlined_call_operand.vmem [shape: f32[16,128], index: 2, kind: input, shape index: {}]   ;;  %s20743_s3 = inlined_call_operand.vmem [shape: f32[4,16], index: 3, kind: input, shape index: {}]   ;;  %s20744_s4 = inlined_call_operand.vmem [shape: f32[16,4], index: 4, kind: input, shape index: {}]   ;;  %s20745_s5 = inlined_call_operand.vmem [shape: f32[16,1], index: 5, kind: input, shape index: {}]   ;;  %s20746_s6 = inlined_call_operand.vmem [shape: f32[16,1], index: 6, kind: input, shape index: {}]   ;;  %s20747_s7 = inlined_call_operand.vmem [shape: f32[2048,128], index: 7, kind: input, shape index: {}]   ;;  %s20748_s8 = inlined_call_operand.vmem [shape: f32[128,128], index: 8, kind: input, shape index: {}]   ;;  %s20749_s9 = inlined_call_operand.vmem [shape: f32[128,8], index: 9, kind: input, shape index: {}]   ;;  %s20750_s10 = inlined_call_operand.vmem [shape: f32[8,128], index: 10, kind: input, shape index: {}]   ;;  %s20751_s11 = inlined_call_operand.vmem [shape: f32[1,128], index: 11, kind: input, shape index: {}]   ;;  %s20752_s12 = inlined_call_operand.vmem [shape: f32[1,128], index: 12, kind: input, shape index: {}]   ;;  %s20753_s13 = inlined_call_operand.vmem [shape: f32[1,128], index: 13, kind: input, shape index: {}]   ;;  %s20754_s14 = inlined_call_operand.vmem [shape: f32[1,128], index: 14, kind: input, shape index: {}]   ;;  %s20755_s15 = inlined_call_operand.hbm [shape: f32[16,128], index: 15, kind: output, shape index: {}]  }
   0x1   :  { %v62_v0 = vld [vmem:[%s20740_s0] sm:$0xff]  ;;  %v63_v1 = vld [vmem:[%s20740_s0 + $0x8] sm:$0xff]  ;;  %v64_v2 = vld [vmem:[%s20740_s0 + $0x10] sm:$0xff] }
   0x2   :  { %v15596_v3 = vpack.c.bf16 %v63_v1, %v62_v0  ;;  %v65_v4 = vld [vmem:[%s20740_s0 + $0x18] sm:$0xff]  ;;  %v66_v6 = vld [vmem:[%s20740_s0 + $0x20] sm:$0xff]  ;;  %v67_v7 = vld [vmem:[%s20740_s0 + $0x28] sm:$0xff] }
   0x3   :  { %v15601_v5 = vpack.c.bf16 %v65_v4, %v64_v2  ;;  %v15612_v8 = vpack.c.bf16 %v67_v7, %v66_v6  ;;  %v15617_v9 = vld [vmem:[%s20741_s1] sm:$0xff]  ;;  %v68_v10 = vld [vmem:[%s20740_s0 + $0x30] sm:$0xff]  ;;  %v69_v11 = vld [vmem:[%s20740_s0 + $0x38] sm:$0xff] }
   0x4   :  { %13449 = vmatprep.subr.bf16.mxu0 %v15596_v3  ;;  %12041 = vmatprep.mubr.f32.mxu0 %v15617_v9 }
   0x5   :  { %13451 = vmatpush3.bf16.msra.mxu0 %v15596_v3 }
   0x6   :  { %13453 = vmatprep.subr.bf16.mxu0 %v15601_v5 }
   0x7   :  { %20 = vsyncpa [#allocation3], 0  ;;  %v15628_v12 = vpack.c.bf16 %v69_v11, %v68_v10  ;;  %v70_v13 = vld [vmem:[%s20740_s0 + $0x40] sm:$0xff]  ;;  %v71_v14 = vld [vmem:[%s20740_s0 + $0x48] sm:$0xff]  ;;  %v20758_v26 = vmov 0.0|0.0   ;;  %vm15499_vm0 = vmmov 0  }
   0x8   :  { %v15638_v15 = vpack.c.bf16 %v71_v14, %v70_v13  ;;  %v72_v16 = vld [vmem:[%s20740_s0 + $0x50] sm:$0xff]  ;;  %v73_v17 = vld [vmem:[%s20740_s0 + $0x58] sm:$0xff]  ;;  %v74_v19 = vld [vmem:[%s20740_s0 + $0x60] sm:$0xff]  ;;  %13480 = vmatprep.subr.bf16.mxu1 %v20758_v26  ;;  %v20756_v27 = vmov 0.0   ;;  %s15501_s24 = smov 32   ;;  %vm163_vm1 = vcmask 261120  }
   0x9   :  { %13455 = vmatpush3.bf16.msra.mxu0 %v15601_v5  ;;  %v15648_v18 = vpack.c.bf16 %v73_v17, %v72_v16  ;;  %v75_v20 = vld [vmem:[%s20740_s0 + $0x68] sm:$0xff]  ;;  %v76_v22 = vld [vmem:[%s20740_s0 + $0x70] sm:$0xff]  ;;  %v77_v23 = vld [vmem:[%s20740_s0 + $0x78] sm:$0xff]  ;;  %12048 = vmatprep.mubr.msk.f32.mxu1 %vm15499_vm0, %v20756_v27  ;;  %vm166_vm2 = vcmask 130048   ;;  %s15502_s18 = smov 96   ;;  %vm260_vm3 = vcmask 31744  }
   0xa   :  { %13457 = vmatprep.subr.bf16.mxu0 %v15612_v8  ;;  %v15658_v21 = vpack.c.bf16 %v75_v20, %v74_v19  ;;  %v15668_v24 = vpack.c.bf16 %v77_v23, %v76_v22  ;;  %v15676_v25 = vld [vmem:[%s20741_s1 + $0x8] sm:$0xff]  ;;  %v15699_v39 = vld [vmem:[%s20743_s3] sm:$0xf]  ;;  %v10215_v50 = vld [vmem:[%s20740_s0 + $0x90] sm:$0xff]  ;;  %v15503_v17 = vmov 0   ;;  %vm267_vm4 = vcmask 1043456  }
   0xb   :  { %v10213_v48 = vld [vmem:[%s20740_s0 + $0x80] sm:$0xff]  ;;  %v10214_v49 = vld [vmem:[%s20740_s0 + $0x88] sm:$0xff]  ;;  %v10216_v52 = vld [vmem:[%s20740_s0 + $0x98] sm:$0xff]  ;;  %15143 = vset.pattern.permute.xlu1 %v15503_v17  ;;  %15142 = vset.pattern.permute.xlu0 %v15503_v17  ;;  %vm8494_vm6 = vcmask 1040384   ;;  %vm8511_vm7 = vcmask 1041408   ;;  %vm8528_vm8 = vcmask 1042432  }
   0xc   :  { %v15718_v51 = vpack.c.bf16 %v10214_v49, %v10213_v48  ;;  %v15723_v53 = vpack.c.bf16 %v10216_v52, %v10215_v50  ;;  %v10217_v54 = vld [vmem:[%s20740_s0 + $0xa0] sm:$0xff]  ;;  %v10218_v55 = vld [vmem:[%s20740_s0 + $0xa8] sm:$0xff]  ;;  %v10219_v57 = vld [vmem:[%s20740_s0 + $0xb0] sm:$0xff]  ;;  %vm8561_vm9 = vcmask 1044480   ;;  %vm8578_vm10 = vcmask 1045504  }
   0xd   :  { %13459 = vmatpush3.bf16.msra.mxu0 %v15612_v8  ;;  %v15734_v56 = vpack.c.bf16 %v10218_v55, %v10217_v54  ;;  %v10220_v58 = vld [vmem:[%s20740_s0 + $0xb8] sm:$0xff]  ;;  %v10221_v61 = vld [vmem:[%s20740_s0 + $0xc0] sm:$0xff]  ;;  %v10222_v62 = vld [vmem:[%s20740_s0 + $0xc8] sm:$0xff]  ;;  %vm8595_vm11 = vcmask 1046528   ;;  %vm9728_vm12 = vcmask 64512  }
   0xe   :  { %13461 = vmatprep.subr.bf16.mxu0 %v15628_v12  ;;  %v15744_v59 = vpack.c.bf16 %v10220_v58, %v10219_v57  ;;  %v15755_v63 = vpack.c.bf16 %v10222_v62, %v10221_v61  ;;  %v10223_v0 = vld [vmem:[%s20740_s0 + $0xd0] sm:$0xff]  ;;  %v10224_v1 = vld [vmem:[%s20740_s0 + $0xd8] sm:$0xff]  ;;  %v10225_v4 = vld [vmem:[%s20740_s0 + $0xe0] sm:$0xff] }
   0xf   :  { %v15765_v2 = vpack.c.bf16 %v10224_v1, %v10223_v0  ;;  %v10226_v6 = vld [vmem:[%s20740_s0 + $0xe8] sm:$0xff]  ;;  %v10227_v10 = vld [vmem:[%s20740_s0 + $0xf0] sm:$0xff]  ;;  %v10228_v11 = vld [vmem:[%s20740_s0 + $0xf8] sm:$0xff] }
  0x10   :  { %v15775_v7 = vpack.c.bf16 %v10226_v6, %v10225_v4  ;;  %v15785_v13 = vpack.c.bf16 %v10228_v11, %v10227_v10  ;;  %v15794_v14 = vld [vmem:[%s20744_s4] sm:$0xff]  ;;  %v61_v19 = vld [vmem:[%s20746_s6 + $0x8] sm:$0xff]  ;;  %vm15832_vm5 = vmpackc.low %vm163_vm1, %vm163_vm1 }
  0x11   :  { %13463 = vmatpush3.bf16.msra.mxu0 %v15628_v12  ;;  %v58_v16 = vld [vmem:[%s20745_s5] sm:$0xff]  ;;  %v59_v23 = vld [vmem:[%s20745_s5 + $0x8] sm:$0xff] }
  0x12   :  { %13465 = vmatprep.subr.bf16.mxu0 %v15638_v15 }
  0x15   :  { %13467 = vmatpush3.bf16.msra.mxu0 %v15638_v15 }
  0x16   :  { %13469 = vmatprep.subr.bf16.mxu0 %v15648_v18 }
  0x19   :  { %13471 = vmatpush3.bf16.msra.mxu0 %v15648_v18 }
  0x1a   :  { %13473 = vmatprep.subr.bf16.mxu0 %v15658_v21 }
  0x1d   :  { %13475 = vmatpush3.bf16.msra.mxu0 %v15658_v21 }
  0x1e   :  { %13477 = vmatprep.subr.bf16.mxu0 %v15668_v24 }
  0x21   :  { %13479 = vmatpush3.bf16.msra.mxu0 %v15668_v24 }
  0x22   :  { %13532 = vmatprep.subr.bf16.mxu0 %v15718_v51 }
  0x24   :  { %12042 = vmatmul.mubr.f32.vlgmr.msra.gmra.mrb[0].mxu0 %v15676_v25 }
  0x25   :  { %12123 = vmatprep.mubr.f32.mxu0 %v15617_v9  ;;  %13534 = vmatpush3.bf16.msra.mxu0 %v15718_v51 }
  0x26   :  { %13536 = vmatprep.subr.bf16.mxu0 %v15723_v53 }
  0x29   :  { %13538 = vmatpush3.bf16.msra.mxu0 %v15723_v53 }
  0x2a   :  { %13540 = vmatprep.subr.bf16.mxu0 %v15734_v56 }
  0x2d   :  { %13542 = vmatpush3.bf16.msra.mxu0 %v15734_v56 }
  0x2e   :  { %13544 = vmatprep.subr.bf16.mxu0 %v15744_v59 }
  0x31   :  { %13546 = vmatpush3.bf16.msra.mxu0 %v15744_v59 }
  0x32   :  { %13548 = vmatprep.subr.bf16.mxu0 %v15755_v63 }
  0x35   :  { %13550 = vmatpush3.bf16.msra.mxu0 %v15755_v63 }
  0x36   :  { %13552 = vmatprep.subr.bf16.mxu0 %v15765_v2 }
  0x39   :  { %13554 = vmatpush3.bf16.msra.mxu0 %v15765_v2 }
  0x3a   :  { %13556 = vmatprep.subr.bf16.mxu0 %v15775_v7 }
  0x3d   :  { %13558 = vmatpush3.bf16.msra.mxu0 %v15775_v7 }
  0x3e   :  { %13560 = vmatprep.subr.bf16.mxu0 %v15785_v13 }
  0x41   :  { %13562 = vmatpush3.bf16.msra.mxu0 %v15785_v13 }
  0x42   :  { %13568 = vmatprep.subr.msk.bf16.mxu0 %vm15832_vm5, %v15718_v51 }
  0x44   :  { %12124 = vmatmul.mubr.f32.vlgmr.msra.gmra.mrb[2].mxu0 %v15676_v25 }
  0x4a   :  { %13571 = vmatpush3.bf16.xpose.msk.msra.mxu0 %vm15832_vm5, %v15718_v51 }
  0x4b   :  { %13574 = vmatprep.subr.msk.bf16.mxu0 %vm15832_vm5, %v15723_v53 }
  0x52   :  { %13577 = vmatpush3.bf16.xpose.msk.msra.mxu0 %vm15832_vm5, %v15723_v53 }
  0x53   :  { %13580 = vmatprep.subr.msk.bf16.mxu0 %vm15832_vm5, %v15734_v56 }
  0x5a   :  { %13583 = vmatpush3.bf16.xpose.msk.msra.mxu0 %vm15832_vm5, %v15734_v56 }
  0x5b   :  { %13586 = vmatprep.subr.msk.bf16.mxu0 %vm15832_vm5, %v15744_v59 }
  0x62   :  { %13589 = vmatpush3.bf16.xpose.msk.msra.mxu0 %vm15832_vm5, %v15744_v59 }
  0x63   :  { %13592 = vmatprep.subr.msk.bf16.mxu0 %vm15832_vm5, %v15755_v63 }
  0x6a   :  { %13595 = vmatpush3.bf16.xpose.msk.msra.mxu0 %vm15832_vm5, %v15755_v63 }
  0x6b   :  { %13598 = vmatprep.subr.msk.bf16.mxu0 %vm15832_vm5, %v15765_v2 }
  0x72   :  { %13601 = vmatpush3.bf16.xpose.msk.msra.mxu0 %vm15832_vm5, %v15765_v2 }
  0x73   :  { %13604 = vmatprep.subr.msk.bf16.mxu0 %vm15832_vm5, %v15775_v7 }
  0x7a   :  { %13607 = vmatpush3.bf16.xpose.msk.msra.mxu0 %vm15832_vm5, %v15775_v7 }
  0x7b   :  { %13610 = vmatprep.subr.msk.bf16.mxu0 %vm15832_vm5, %v15785_v13 }
  0x82   :  { %13613 = vmatpush3.bf16.xpose.msk.msra.mxu0 %vm15832_vm5, %v15785_v13 }
  0xf7   :  { %v15683_v28 = vpop.f32.mrb[0].mxu0 }
  0xf8   :  { %v15685_v29 = vpop.f32.mrb[1].mxu0  ;;  %v154_v30 = vmul.f32 %v15683_v28, %v15683_v28 }
  0xf9   :  { %v153_v31 = vmul.f32 %v15685_v29, %v15685_v29 }
  0xfb   :  { %v15137_v32 = vpack.i.bf16 %v154_v30, %v153_v31  ;;  %v60_v30 = vld [vmem:[%s20746_s6] sm:$0xff] }
  0xfd   :  { %15138 = vrot.lane.b32.xlu0 %v15137_v32, %s15501_s24 }
 0x16f   :  { %v15139_v33 = vpop.permute.xlu0 %15138 }
 0x170   :  { %v15141_v34 = vunpack.i.h.bf16 %v15139_v33  ;;  %v15140_v35 = vunpack.i.l.bf16 %v15139_v33  ;;  %v15816_v33 = vld [vmem:[%s20744_s4 + $0x8] sm:$0xff] }
 0x172   :  { %v164_v36 = vsel %vm163_vm1, %v15685_v29, %v15140_v35  ;;  %v165_v37 = vsel %vm163_vm1, %v15683_v28, %v15141_v34  ;;  %v15822_v34 = vpop.f32.mrb[2].mxu0 }
 0x173   :  { %v13481_v38 = vpack.c.bf16 %v165_v37, %v164_v36  ;;  %v698_v35 = vmul.f32 %v15822_v34, %v15822_v34  ;;  %v15826_v36 = vpop.f32.mrb[3].mxu0 }
 0x174   :  { %v697_v37 = vmul.f32 %v15826_v36, %v15826_v36 }
 0x175   :  { %13482 = vmatpush3.bf16.msra.mxu1 %v13481_v38 }
 0x176   :  { %v15144_v38 = vpack.i.bf16 %v698_v35, %v697_v37 }
 0x178   :  { %12049 = vmatmul.mubr.msk.f32.vlgmr.msra.gmra.mrb[0].mxu1 %vm166_vm2, %v15699_v39 }
 0x179   :  { %12053 = vmatprep.mubr.msk.f32.mxu1 %vm260_vm3, %v15794_v14 }
 0x24b   :  { %v236_v40 = vpop.f32.mrb[0].mxu1 }
 0x24c   :  { %v15703_v41 = vmul.f32 0.25, %v236_v40  ;;  %v12050_v42 = vpop.f32.mrb[1].mxu1 }
 0x24e   :  { %v241_v43 = vmul.f32 %v15703_v41, %v15703_v41 }
 0x250   :  { %243 = vrot.lane.b32.xlu0 %v241_v43, %s15501_s24 }
 0x254   :  { %360 = vperm.xlu0 %15142, %v58_v16  }
 0x258   :  { %377 = vperm.xlu0 %15142, %v61_v19  }
 0x2c2   :  { %v244_v44 = vpop.permute.xlu0 %243 }
 0x2c3   :  { %v246_v45 = vsub.f32 %v15703_v41, %v244_v44 }
 0x2c5   :  { %v247_v46 = vmax.f32 %v246_v45, 0.0 }
 0x2c7   :  { %v248_v47 = vadd.f32 1e-05, %v247_v46 }
 0x2c9   :  { %15219 = vrsqrt.f32 %v248_v47 }
 0x2d3   :  { %v15220_v60 = vpop.eup %15219 }
 0x2d4   :  { %251 = vrot.lane.b32.xlu1 %v15220_v60, %s15502_s18 }
 0x346   :  { %v252_v20 = vpop.permute.xlu1 %251 }
 0x347   :  { %v254_v22 = vmul.f32 %v252_v20, %v15703_v41 }
 0x349   :  { %256 = vrot.lane.b32.xlu1 %v254_v22, %s15501_s24 }
 0x34d   :  { %365 = vperm.xlu1 %15143, %v59_v23  }
 0x351   :  { %372 = vperm.xlu1 %15143, %v60_v30  }
 0x3bb   :  { %v257_v31 = vpop.permute.xlu1 %256 }
 0x3bc   :  { %v259_v32 = vsel %vm163_vm1, %v252_v20, %v257_v31 }
 0x3bd   :  { %12051 = vmatprep.subr.msk.mxu1 %vm267_vm4, %v259_v32 }
 0x3be   :  { %12052 = vmatpush3.msk.msra.mxu1 %vm267_vm4, %v259_v32 }
 0x3bf   :  { %12054 = vmatmul.mubr.msk.f32.vlgmr.msra.gmra.mrb[2].mxu1 %vm260_vm3, %v15816_v33  ;;  %13485 = vmatprep.subr.msk.bf16.mxu1 %vm15832_vm5, %v15596_v3 }
 0x3c5   :  { %13488 = vmatpush3.bf16.xpose.msk.msra.mxu1 %vm15832_vm5, %v15596_v3 }
 0x3c6   :  { %13491 = vmatprep.subr.msk.bf16.mxu1 %vm15832_vm5, %v15601_v5 }
 0x3cd   :  { %13494 = vmatpush3.bf16.xpose.msk.msra.mxu1 %vm15832_vm5, %v15601_v5 }
 0x3ce   :  { %13497 = vmatprep.subr.msk.bf16.mxu1 %vm15832_vm5, %v15612_v8 }
 0x3d5   :  { %13500 = vmatpush3.bf16.xpose.msk.msra.mxu1 %vm15832_vm5, %v15612_v8  ;;  %v15938_v8 = vpop.permute.xlu0 %360 }
 0x3d6   :  { %13503 = vmatprep.subr.msk.bf16.mxu1 %vm15832_vm5, %v15628_v12 }
 0x3dd   :  { %13506 = vmatpush3.bf16.xpose.msk.msra.mxu1 %vm15832_vm5, %v15628_v12  ;;  %v15940_v12 = vpop.permute.xlu1 %365 }
 0x3de   :  { %13509 = vmatprep.subr.msk.bf16.mxu1 %vm15832_vm5, %v15638_v15 }
 0x3e5   :  { %13512 = vmatpush3.bf16.xpose.msk.msra.mxu1 %vm15832_vm5, %v15638_v15  ;;  %v15942_v15 = vpop.permute.xlu0 %377 }
 0x3e6   :  { %13515 = vmatprep.subr.msk.bf16.mxu1 %vm15832_vm5, %v15648_v18 }
 0x3ed   :  { %13518 = vmatpush3.bf16.xpose.msk.msra.mxu1 %vm15832_vm5, %v15648_v18  ;;  %v15944_v18 = vpop.permute.xlu1 %372 }
 0x3ee   :  { %13521 = vmatprep.subr.msk.bf16.mxu1 %vm15832_vm5, %v15658_v21 }
 0x3f5   :  { %13524 = vmatpush3.bf16.xpose.msk.msra.mxu1 %vm15832_vm5, %v15658_v21 }
 0x3f6   :  { %13527 = vmatprep.subr.msk.bf16.mxu1 %vm15832_vm5, %v15668_v24 }
 0x3fd   :  { %13530 = vmatpush3.bf16.xpose.msk.msra.mxu1 %vm15832_vm5, %v15668_v24 }
 0x3fe   :  { %13563 = vmatprep.subr.bf16.mxu1 %v20758_v26 }
 0x492   :  { %v12055_v3 = vpop.f32.mrb[2].mxu1 }
 0x493   :  { %v347_v41 = vmul.f32 %v12055_v3, %v15683_v28  ;;  %352 = vrot.lane.b32.xlu0 %v12055_v3, %s15502_s18  ;;  %v337_v42 = vpop.f32.mrb[3].mxu1 }
 0x494   :  { %v346_v5 = vmul.f32 %v337_v42, %v15685_v29  ;;  %350 = vrot.lane.b32.xlu1 %v337_v42, %s15502_s18 }
 0x498   :  { %15145 = vrot.lane.b32.xlu1 %v15144_v38, %s15501_s24 }
 0x505   :  { %v353_v21 = vpop.permute.xlu0 %352 }
 0x506   :  { %v357_v28 = vsub.f32 %v347_v41, %v353_v21  ;;  %v351_v29 = vpop.permute.xlu1 %350 }
 0x507   :  { %v356_v43 = vsub.f32 %v346_v5, %v351_v29 }
 0x508   :  { %v369_v24 = vmul.f32 %v15940_v12, %v357_v28 }
 0x509   :  { %v368_v44 = vmul.f32 %v15938_v8, %v356_v43 }
 0x50a   :  { %v381_v45 = vadd.f32 %v15942_v15, %v369_v24  ;;  %v15146_v46 = vpop.permute.xlu1 %15145  ;;  %v10251_v24 = vld [vmem:[%s20740_s0 + $0x100] sm:$0xff] }
 0x50b   :  { %v380_v47 = vadd.f32 %v15944_v18, %v368_v44  ;;  %v15148_v48 = vunpack.i.h.bf16 %v15146_v46  ;;  %v15147_v49 = vunpack.i.l.bf16 %v15146_v46  ;;  %v10252_v44 = vld [vmem:[%s20740_s0 + $0x108] sm:$0xff]  ;;  %v10254_v46 = vld [vmem:[%s20740_s0 + $0x118] sm:$0xff] }
 0x50c   :  { %v383_v50 = vsel %vm163_vm1, %v381_v45, -inf }
 0x50d   :  { %v382_v51 = vsel %vm163_vm1, %v380_v47, -inf  ;;  %v708_v52 = vsel %vm163_vm1, %v15822_v34, %v15148_v48  ;;  %v707_v53 = vsel %vm163_vm1, %v15826_v36, %v15147_v49  ;;  %v15991_v48 = vpack.c.bf16 %v10252_v44, %v10251_v24 }
 0x50e   :  { %v384_v54 = vmax.f32 %v382_v51, %v383_v50  ;;  %v13564_v55 = vpack.c.bf16 %v708_v52, %v707_v53  ;;  %v10255_v51 = vld [vmem:[%s20740_s0 + $0x120] sm:$0xff]  ;;  %v10256_v52 = vld [vmem:[%s20740_s0 + $0x128] sm:$0xff] }
 0x50f   :  { %v16010_v53 = vpack.c.bf16 %v10256_v52, %v10255_v51 }
 0x510   :  { %v385_v56 = vrot.slane %v384_v54, 4 }
 0x512   :  { %v386_v57 = vmax.f32 %v384_v54, %v385_v56  ;;  %v10257_v54 = vld [vmem:[%s20740_s0 + $0x130] sm:$0xff] }
 0x514   :  { %v387_v58 = vrot.slane %v386_v57, 2 }
 0x516   :  { %v388_v59 = vmax.f32 %v386_v57, %v387_v58  ;;  %v10259_v57 = vld [vmem:[%s20740_s0 + $0x140] sm:$0xff]  ;;  %v10260_v58 = vld [vmem:[%s20740_s0 + $0x148] sm:$0xff] }
 0x518   :  { %v389_v60 = vrot.slane %v388_v59, 1 }
 0x51a   :  { %v390_v61 = vmax.f32 %v388_v59, %v389_v60  ;;  %v16030_v59 = vpack.c.bf16 %v10260_v58, %v10259_v57  ;;  %v10261_v60 = vld [vmem:[%s20740_s0 + $0x150] sm:$0xff] }
 0x51c   :  { %v391_v62 = vsub.f32 %v380_v47, %v390_v61  ;;  %v392_v63 = vsub.f32 %v381_v45, %v390_v61  ;;  %v10253_v45 = vld [vmem:[%s20740_s0 + $0x110] sm:$0xff]  ;;  %v10262_v61 = vld [vmem:[%s20740_s0 + $0x158] sm:$0xff] }
 0x51d   :  { %v15995_v50 = vpack.c.bf16 %v10254_v46, %v10253_v45 }
 0x51e   :  { %v393_v0 = vmul.f32 1.442695, %v391_v62  ;;  %v395_v1 = vmul.f32 1.442695, %v392_v63  ;;  %v16040_v62 = vpack.c.bf16 %v10262_v61, %v10261_v60  ;;  %v10263_v63 = vld [vmem:[%s20740_s0 + $0x160] sm:$0xff] }
 0x520   :  { %15221 = vpow2.f32 %v393_v0  ;;  %v10264_v0 = vld [vmem:[%s20740_s0 + $0x168] sm:$0xff] }
 0x521   :  { %15223 = vpow2.f32 %v395_v1  ;;  %v16050_v1 = vpack.c.bf16 %v10264_v0, %v10263_v63 }
 0x52a   :  { %v15222_v2 = vpop.eup %15221 }
 0x52b   :  { %v15224_v4 = vpop.eup %15223  ;;  %v397_v6 = vsel %vm163_vm1, %v15222_v2, 0.0 }
 0x52c   :  { %v398_v7 = vsel %vm163_vm1, %v15224_v4, 0.0 }
 0x52d   :  { %v399_v10 = vadd.f32 %v398_v7, %v397_v6 }
 0x52f   :  { %v400_v11 = vrot.slane %v399_v10, 4 }
 0x531   :  { %v401_v13 = vadd.f32 %v400_v11, %v399_v10 }
 0x533   :  { %v402_v16 = vrot.slane %v401_v13, 2 }
 0x535   :  { %v403_v17 = vadd.f32 %v402_v16, %v401_v13 }
 0x537   :  { %v404_v19 = vrot.slane %v403_v17, 1 }
 0x539   :  { %v405_v20 = vadd.f32 %v404_v19, %v403_v17 }
 0x53b   :  { %15225 = vrcp.f32 %v405_v20 }
 0x545   :  { %v15226_v22 = vpop.eup %15225 }
 0x546   :  { %v15958_v23 = vmul.f32 %v15226_v22, %v15222_v2  ;;  %v15960_v30 = vmul.f32 %v15226_v22, %v15224_v4  ;;  %v10265_v2 = vld [vmem:[%s20740_s0 + $0x170] sm:$0xff]  ;;  %v10266_v4 = vld [vmem:[%s20740_s0 + $0x178] sm:$0xff] }
 0x547   :  { %v16060_v6 = vpack.c.bf16 %v10266_v4, %v10265_v2 }
 0x548   :  { %20783 = vst [vmem:[#allocation5_spill] sm:$0xff] %v15960_v30  ;;  %12088 = vmatprep.mubr.msk.f32.mxu1 %vm163_vm1, %v15958_v23 }
 0x549   :  { %12089 = vmatmul.mubr.msk.f32.vlgmr.msra.gmra.mrb[4].mxu1 %vm163_vm1, %v15960_v30 }
 0x54a   :  { %13565 = vmatpush3.bf16.msra.mxu1 %v13564_v55  ;;  %12130 = vmatprep.mubr.msk.f32.mxu1 %vm15499_vm0, %v20756_v27  ;;  %v10258_v55 = vld [vmem:[%s20740_s0 + $0x138] sm:$0xff] }
 0x54b   :  { %v16020_v56 = vpack.c.bf16 %v10258_v55, %v10257_v54 }
 0x54d   :  { %12131 = vmatmul.mubr.msk.f32.vlgmr.msra.gmra.mrb[6].mxu1 %vm166_vm2, %v15699_v39 }
 0x54e   :  { %12135 = vmatprep.mubr.msk.f32.mxu1 %vm260_vm3, %v15794_v14 }
 0x61c   :  { %v15972_v31 = vpop.f32.mrb[4].mxu1 }
 0x61d   :  { %20784 = vst [vmem:[#allocation6_spill] sm:$0xff] %v15972_v31  ;;  %v15974_v32 = vpop.f32.mrb[5].mxu1 }
 0x620   :  { %v775_v35 = vpop.f32.mrb[6].mxu1 }
 0x621   :  { %v779_v37 = vmul.f32 0.25, %v775_v35  ;;  %v12132_v38 = vpop.f32.mrb[7].mxu1 }
 0x623   :  { %v780_v3 = vmul.f32 %v779_v37, %v779_v37 }
 0x625   :  { %782 = vrot.lane.b32.xlu0 %v780_v3, %s15501_s24 }
 0x697   :  { %v783_v41 = vpop.permute.xlu0 %782 }
 0x698   :  { %v785_v42 = vsub.f32 %v779_v37, %v783_v41 }
 0x69a   :  { %v786_v5 = vmax.f32 %v785_v42, 0.0 }
 0x69c   :  { %v787_v21 = vadd.f32 1e-05, %v786_v5 }
 0x69e   :  { %15227 = vrsqrt.f32 %v787_v21 }
 0x6a8   :  { %v15228_v28 = vpop.eup %15227 }
 0x6a9   :  { %790 = vrot.lane.b32.xlu1 %v15228_v28, %s15502_s18 }
 0x71b   :  { %v791_v29 = vpop.permute.xlu1 %790 }
 0x71c   :  { %v793_v43 = vmul.f32 %v791_v29, %v779_v37 }
 0x71e   :  { %795 = vrot.lane.b32.xlu0 %v793_v43, %s15501_s24 }
 0x790   :  { %v796_v47 = vpop.permute.xlu0 %795 }
 0x791   :  { %v798_v49 = vsel %vm163_vm1, %v791_v29, %v796_v47 }
 0x792   :  { %12133 = vmatprep.subr.msk.mxu1 %vm267_vm4, %v798_v49 }
 0x793   :  { %12134 = vmatpush3.msk.msra.mxu1 %vm267_vm4, %v798_v49 }
 0x794   :  { %12136 = vmatmul.mubr.msk.f32.vlgmr.msra.gmra.mrb[8].mxu1 %vm260_vm3, %v15816_v33  ;;  %13615 = vmatprep.subr.bf16.mxu1 %v15991_v48 }
 0x795   :  { %13617 = vmatpush3.bf16.msra.mxu1 %v15991_v48  ;;  %12205 = vmatprep.mubr.f32.mxu1 %v15617_v9 }
 0x796   :  { %13619 = vmatprep.subr.bf16.mxu1 %v15995_v50 }
 0x799   :  { %13621 = vmatpush3.bf16.msra.mxu1 %v15995_v50 }
 0x79a   :  { %13623 = vmatprep.subr.bf16.mxu1 %v16010_v53 }
 0x79d   :  { %13625 = vmatpush3.bf16.msra.mxu1 %v16010_v53 }
 0x79e   :  { %13627 = vmatprep.subr.bf16.mxu1 %v16020_v56 }
 0x7a1   :  { %13629 = vmatpush3.bf16.msra.mxu1 %v16020_v56 }
 0x7a2   :  { %13631 = vmatprep.subr.bf16.mxu1 %v16030_v59 }
 0x7a5   :  { %13633 = vmatpush3.bf16.msra.mxu1 %v16030_v59 }
 0x7a6   :  { %13635 = vmatprep.subr.bf16.mxu1 %v16040_v62 }
 0x7a9   :  { %13637 = vmatpush3.bf16.msra.mxu1 %v16040_v62 }
 0x7aa   :  { %13639 = vmatprep.subr.bf16.mxu1 %v16050_v1 }
 0x7ad   :  { %13641 = vmatpush3.bf16.msra.mxu1 %v16050_v1 }
 0x7ae   :  { %13643 = vmatprep.subr.bf16.mxu1 %v16060_v6 }
 0x7b1   :  { %13645 = vmatpush3.bf16.msra.mxu1 %v16060_v6 }
 0x7b2   :  { %13646 = vmatprep.subr.bf16.mxu1 %v20758_v26 }
 0x7b4   :  { %12206 = vmatmul.mubr.f32.vlgmr.msra.gmra.mrb[10].mxu1 %v15676_v25 }
 0x7b5   :  { %12212 = vmatprep.mubr.msk.f32.mxu1 %vm15499_vm0, %v20756_v27 }
 0x867   :  { %v12137_v7 = vpop.f32.mrb[8].mxu1 }
 0x868   :  { %v878_v10 = vmul.f32 %v12137_v7, %v15822_v34  ;;  %883 = vrot.lane.b32.xlu0 %v12137_v7, %s15502_s18  ;;  %v868_v11 = vpop.f32.mrb[9].mxu1  ;;  %v10289_v34 = vld [vmem:[%s20740_s0 + $0x180] sm:$0xff] }
 0x869   :  { %v877_v13 = vmul.f32 %v868_v11, %v15826_v36  ;;  %881 = vrot.lane.b32.xlu1 %v868_v11, %s15502_s18  ;;  %v10290_v36 = vld [vmem:[%s20740_s0 + $0x188] sm:$0xff] }
 0x86a   :  { %v16088_v35 = vpack.c.bf16 %v10290_v36, %v10289_v34 }
 0x86c   :  { %13698 = vmatprep.subr.bf16.mxu0 %v16088_v35 }
 0x887   :  { %v16073_v16 = vpop.f32.mrb[10].mxu1 }
 0x888   :  { %v1195_v17 = vmul.f32 %v16073_v16, %v16073_v16  ;;  %v16077_v19 = vpop.f32.mrb[11].mxu1 }
 0x889   :  { %v1194_v20 = vmul.f32 %v16077_v19, %v16077_v19 }
 0x88b   :  { %v15154_v22 = vpack.i.bf16 %v1195_v17, %v1194_v20 }
 0x88d   :  { %15155 = vrot.lane.b32.xlu0 %v15154_v22, %s15501_s24 }
 0x8da   :  { %v884_v37 = vpop.permute.xlu0 %883 }
 0x8db   :  { %v888_v38 = vsub.f32 %v878_v10, %v884_v37  ;;  %v882_v3 = vpop.permute.xlu1 %881 }
 0x8dc   :  { %v887_v41 = vsub.f32 %v877_v13, %v882_v3  ;;  %v10292_v3 = vld [vmem:[%s20740_s0 + $0x198] sm:$0xff] }
 0x8dd   :  { %v890_v42 = vmul.f32 %v888_v38, %v15940_v12  ;;  %v10291_v38 = vld [vmem:[%s20740_s0 + $0x190] sm:$0xff] }
 0x8de   :  { %v889_v5 = vmul.f32 %v887_v41, %v15938_v8 }
 0x8df   :  { %v892_v21 = vadd.f32 %v890_v42, %v15942_v15 }
 0x8e0   :  { %v891_v28 = vadd.f32 %v889_v5, %v15944_v18 }
 0x8e1   :  { %v894_v29 = vsel %vm163_vm1, %v892_v21, -inf }
 0x8e2   :  { %v893_v43 = vsel %vm163_vm1, %v891_v28, -inf }
 0x8e3   :  { %v895_v24 = vmax.f32 %v893_v43, %v894_v29  ;;  %v10294_v29 = vld [vmem:[%s20740_s0 + $0x1a8] sm:$0xff] }
 0x8e5   :  { %v896_v44 = vrot.slane %v895_v24, 4 }
 0x8e7   :  { %v897_v45 = vmax.f32 %v895_v24, %v896_v44  ;;  %v10295_v24 = vld [vmem:[%s20740_s0 + $0x1b0] sm:$0xff]  ;;  %v10296_v44 = vld [vmem:[%s20740_s0 + $0x1b8] sm:$0xff] }
 0x8e9   :  { %v898_v46 = vrot.slane %v897_v45, 2 }
 0x8eb   :  { %v899_v47 = vmax.f32 %v897_v45, %v898_v46  ;;  %v16142_v45 = vpack.c.bf16 %v10296_v44, %v10295_v24  ;;  %v10298_v46 = vld [vmem:[%s20740_s0 + $0x1c8] sm:$0xff] }
 0x8ed   :  { %v900_v49 = vrot.slane %v899_v47, 1 }
 0x8ef   :  { %v901_v51 = vmax.f32 %v899_v47, %v900_v49  ;;  %v10299_v49 = vld [vmem:[%s20740_s0 + $0x1d0] sm:$0xff] }
 0x8f1   :  { %v902_v52 = vsub.f32 %v891_v28, %v901_v51  ;;  %v903_v54 = vsub.f32 %v892_v21, %v901_v51  ;;  %v16117_v21 = vpack.c.bf16 %v10292_v3, %v10291_v38  ;;  %v10293_v28 = vld [vmem:[%s20740_s0 + $0x1a0] sm:$0xff]  ;;  %v10300_v51 = vld [vmem:[%s20740_s0 + $0x1d8] sm:$0xff] }
 0x8f2   :  { %v16132_v43 = vpack.c.bf16 %v10294_v29, %v10293_v28 }
 0x8f3   :  { %v904_v55 = vmul.f32 1.442695, %v902_v52  ;;  %v906_v57 = vmul.f32 1.442695, %v903_v54  ;;  %v16162_v52 = vpack.c.bf16 %v10300_v51, %v10299_v49  ;;  %v10301_v54 = vld [vmem:[%s20740_s0 + $0x1e0] sm:$0xff] }
 0x8f5   :  { %15229 = vpow2.f32 %v904_v55  ;;  %v10302_v55 = vld [vmem:[%s20740_s0 + $0x1e8] sm:$0xff] }
 0x8f6   :  { %15231 = vpow2.f32 %v906_v57  ;;  %v16172_v57 = vpack.c.bf16 %v10302_v55, %v10301_v54 }
 0x8ff   :  { %v15230_v58 = vpop.eup %15229  ;;  %v15156_v60 = vpop.permute.xlu0 %15155 }
 0x900   :  { %v15232_v61 = vpop.eup %15231  ;;  %v908_v63 = vsel %vm163_vm1, %v15230_v58, 0.0  ;;  %v15158_v0 = vunpack.i.h.bf16 %v15156_v60  ;;  %v15157_v2 = vunpack.i.l.bf16 %v15156_v60  ;;  %v10304_v60 = vld [vmem:[%s20740_s0 + $0x1f8] sm:$0xff] }
 0x901   :  { %v909_v4 = vsel %vm163_vm1, %v15232_v61, 0.0 }
 0x902   :  { %v910_v7 = vadd.f32 %v909_v4, %v908_v63  ;;  %v1205_v10 = vsel %vm163_vm1, %v16073_v16, %v15158_v0  ;;  %v1204_v11 = vsel %vm163_vm1, %v16077_v19, %v15157_v2 }
 0x903   :  { %v13647_v13 = vpack.c.bf16 %v1205_v10, %v1204_v11 }
 0x904   :  { %v911_v17 = vrot.slane %v910_v7, 4 }
 0x905   :  { %13648 = vmatpush3.bf16.msra.mxu1 %v13647_v13 }
 0x906   :  { %v912_v20 = vadd.f32 %v911_v17, %v910_v7 }
 0x908   :  { %12213 = vmatmul.mubr.msk.f32.vlgmr.msra.gmra.mrb[12].mxu1 %vm166_vm2, %v15699_v39  ;;  %v913_v22 = vrot.slane %v912_v20, 2 }
 0x909   :  { %12217 = vmatprep.mubr.msk.f32.mxu1 %vm260_vm3, %v15794_v14 }
 0x90a   :  { %v914_v34 = vadd.f32 %v913_v22, %v912_v20 }
 0x90c   :  { %v915_v36 = vrot.slane %v914_v34, 1 }
 0x90e   :  { %v916_v37 = vadd.f32 %v915_v36, %v914_v34 }
 0x910   :  { %15233 = vrcp.f32 %v916_v37 }
 0x91a   :  { %v15234_v41 = vpop.eup %15233 }
 0x91b   :  { %v16113_v42 = vmul.f32 %v15234_v41, %v15230_v58  ;;  %v16115_v5 = vmul.f32 %v15234_v41, %v15232_v61  ;;  %v10303_v58 = vld [vmem:[%s20740_s0 + $0x1f0] sm:$0xff] }
 0x91c   :  { %v16182_v61 = vpack.c.bf16 %v10304_v60, %v10303_v58 }
 0x91d   :  { %20785 = vst [vmem:[#allocation7_spill] sm:$0xff] %v16115_v5  ;;  %12170 = vmatprep.mubr.msk.f32.mxu0 %vm163_vm1, %v16113_v42  ;;  %v920_v40 = vsel %vm163_vm1, %v16113_v42, 0.0 }
 0x91e   :  { %12171 = vmatmul.mubr.msk.f32.vlgmr.msra.gmra.mrb[4].mxu0 %vm163_vm1, %v16115_v5 }
 0x91f   :  { %13700 = vmatpush3.bf16.msra.mxu0 %v16088_v35  ;;  %12287 = vmatprep.mubr.f32.mxu0 %v15617_v9  ;;  %v10297_v9 = vld [vmem:[%s20740_s0 + $0x1c0] sm:$0xff] }
 0x920   :  { %13702 = vmatprep.subr.bf16.mxu0 %v16117_v21  ;;  %v16152_v47 = vpack.c.bf16 %v10298_v46, %v10297_v9 }
 0x923   :  { %13704 = vmatpush3.bf16.msra.mxu0 %v16117_v21 }
 0x924   :  { %13706 = vmatprep.subr.bf16.mxu0 %v16132_v43 }
 0x927   :  { %13708 = vmatpush3.bf16.msra.mxu0 %v16132_v43 }
 0x928   :  { %13710 = vmatprep.subr.bf16.mxu0 %v16142_v45 }
 0x92b   :  { %13712 = vmatpush3.bf16.msra.mxu0 %v16142_v45 }
 0x92c   :  { %13714 = vmatprep.subr.bf16.mxu0 %v16152_v47 }
 0x92f   :  { %13716 = vmatpush3.bf16.msra.mxu0 %v16152_v47 }
 0x930   :  { %13718 = vmatprep.subr.bf16.mxu0 %v16162_v52 }
 0x933   :  { %13720 = vmatpush3.bf16.msra.mxu0 %v16162_v52 }
 0x934   :  { %13722 = vmatprep.subr.bf16.mxu0 %v16172_v57 }
 0x937   :  { %13724 = vmatpush3.bf16.msra.mxu0 %v16172_v57 }
 0x938   :  { %13726 = vmatprep.subr.bf16.mxu0 %v16182_v61 }
 0x93b   :  { %13728 = vmatpush3.bf16.msra.mxu0 %v16182_v61 }
 0x93c   :  { %13729 = vmatprep.subr.bf16.mxu0 %v20758_v26 }
 0x93e   :  { %12288 = vmatmul.mubr.f32.vlgmr.msra.gmra.mrb[6].mxu0 %v15676_v25 }
 0x93f   :  { %12294 = vmatprep.mubr.msk.f32.mxu0 %vm15499_vm0, %v20756_v27 }
 0x9db   :  { %v1272_v63 = vpop.f32.mrb[12].mxu1 }
 0x9dc   :  { %v1276_v0 = vmul.f32 0.25, %v1272_v63  ;;  %v12214_v2 = vpop.f32.mrb[13].mxu1 }
 0x9de   :  { %v1277_v4 = vmul.f32 %v1276_v0, %v1276_v0 }
 0x9e0   :  { %1279 = vrot.lane.b32.xlu0 %v1277_v4, %s15501_s24 }
 0x9f1   :  { %v16192_v7 = vpop.f32.mrb[4].mxu0 }
 0x9f2   :  { %20786 = vst [vmem:[#allocation8_spill] sm:$0xff] %v16192_v7  ;;  %v16194_v10 = vpop.f32.mrb[5].mxu0 }
 0xa11   :  { %v16196_v11 = vpop.f32.mrb[6].mxu0 }
 0xa12   :  { %v1692_v13 = vmul.f32 %v16196_v11, %v16196_v11  ;;  %v16200_v17 = vpop.f32.mrb[7].mxu0 }
 0xa13   :  { %v1691_v25 = vmul.f32 %v16200_v17, %v16200_v17 }
 0xa15   :  { %v15149_v20 = vpack.i.bf16 %v1692_v13, %v1691_v25 }
 0xa17   :  { %15150 = vrot.lane.b32.xlu1 %v15149_v20, %s15501_s24 }
 0xa52   :  { %v1280_v22 = vpop.permute.xlu0 %1279 }
 0xa53   :  { %v1282_v34 = vsub.f32 %v1276_v0, %v1280_v22 }
 0xa55   :  { %v1283_v36 = vmax.f32 %v1282_v34, 0.0 }
 0xa57   :  { %v1284_v37 = vadd.f32 1e-05, %v1283_v36 }
 0xa59   :  { %15235 = vrsqrt.f32 %v1284_v37 }
 0xa63   :  { %v15236_v38 = vpop.eup %15235 }
 0xa64   :  { %1287 = vrot.lane.b32.xlu0 %v15236_v38, %s15502_s18 }
 0xa89   :  { %v15151_v3 = vpop.permute.xlu1 %15150 }
 0xa8a   :  { %v15153_v41 = vunpack.i.h.bf16 %v15151_v3  ;;  %v15152_v28 = vunpack.i.l.bf16 %v15151_v3 }
 0xa8c   :  { %v1702_v29 = vsel %vm163_vm1, %v16196_v11, %v15153_v41  ;;  %v1701_v24 = vsel %vm163_vm1, %v16200_v17, %v15152_v28 }
 0xa8d   :  { %v13730_v44 = vpack.c.bf16 %v1702_v29, %v1701_v24 }
 0xa8f   :  { %13731 = vmatpush3.bf16.msra.mxu0 %v13730_v44 }
 0xa92   :  { %12295 = vmatmul.mubr.msk.f32.vlgmr.msra.gmra.mrb[8].mxu0 %vm166_vm2, %v15699_v39 }
 0xa93   :  { %12299 = vmatprep.mubr.msk.f32.mxu0 %vm260_vm3, %v15794_v14 }
 0xad6   :  { %v1288_v9 = vpop.permute.xlu0 %1287 }
 0xad7   :  { %v1290_v46 = vmul.f32 %v1288_v9, %v1276_v0 }
 0xad9   :  { %1292 = vrot.lane.b32.xlu0 %v1290_v46, %s15501_s24 }
 0xb4b   :  { %v1293_v49 = vpop.permute.xlu0 %1292 }
 0xb4c   :  { %v1295_v51 = vsel %vm163_vm1, %v1288_v9, %v1293_v49 }
 0xb4d   :  { %12215 = vmatprep.subr.msk.mxu1 %vm267_vm4, %v1295_v51 }
 0xb4e   :  { %12216 = vmatpush3.msk.msra.mxu1 %vm267_vm4, %v1295_v51 }
 0xb4f   :  { %12218 = vmatmul.mubr.msk.f32.vlgmr.msra.gmra.mrb[14].mxu1 %vm260_vm3, %v15816_v33  ;;  %13651 = vmatprep.subr.msk.bf16.mxu1 %vm15832_vm5, %v15991_v48 }
 0xb55   :  { %13654 = vmatpush3.bf16.xpose.msk.msra.mxu1 %vm15832_vm5, %v15991_v48 }
 0xb56   :  { %13657 = vmatprep.subr.msk.bf16.mxu1 %vm15832_vm5, %v15995_v50 }
 0xb5d   :  { %13660 = vmatpush3.bf16.xpose.msk.msra.mxu1 %vm15832_vm5, %v15995_v50 }
 0xb5e   :  { %13663 = vmatprep.subr.msk.bf16.mxu1 %vm15832_vm5, %v16010_v53 }
 0xb65   :  { %v1769_v39 = vpop.f32.mrb[8].mxu0  ;;  %13666 = vmatpush3.bf16.xpose.msk.msra.mxu1 %vm15832_vm5, %v16010_v53 }
 0xb66   :  { %v1773_v14 = vmul.f32 0.25, %v1769_v39  ;;  %v12296_v54 = vpop.f32.mrb[9].mxu0  ;;  %13669 = vmatprep.subr.msk.bf16.mxu1 %vm15832_vm5, %v16020_v56 }
 0xb68   :  { %v1774_v48 = vmul.f32 %v1773_v14, %v1773_v14 }
 0xb6a   :  { %1776 = vrot.lane.b32.xlu1 %v1774_v48, %s15501_s24 }
 0xb6d   :  { %13672 = vmatpush3.bf16.xpose.msk.msra.mxu1 %vm15832_vm5, %v16020_v56 }
 0xb6e   :  { %13675 = vmatprep.subr.msk.bf16.mxu1 %vm15832_vm5, %v16030_v59 }
 0xb75   :  { %13678 = vmatpush3.bf16.xpose.msk.msra.mxu1 %vm15832_vm5, %v16030_v59 }
 0xb76   :  { %13681 = vmatprep.subr.msk.bf16.mxu1 %vm15832_vm5, %v16040_v62 }
 0xb7d   :  { %13684 = vmatpush3.bf16.xpose.msk.msra.mxu1 %vm15832_vm5, %v16040_v62 }
 0xb7e   :  { %13687 = vmatprep.subr.msk.bf16.mxu1 %vm15832_vm5, %v16050_v1 }
 0xb85   :  { %13690 = vmatpush3.bf16.xpose.msk.msra.mxu1 %vm15832_vm5, %v16050_v1 }
 0xb86   :  { %13693 = vmatprep.subr.msk.bf16.mxu1 %vm15832_vm5, %v16060_v6 }
 0xb8d   :  { %13696 = vmatpush3.bf16.xpose.msk.msra.mxu1 %vm15832_vm5, %v16060_v6 }
 0xbdc   :  { %v1777_v50 = vpop.permute.xlu1 %1776 }
 0xbdd   :  { %v1779_v53 = vsub.f32 %v1773_v14, %v1777_v50 }
 0xbdf   :  { %v1780_v56 = vmax.f32 %v1779_v53, 0.0 }
 0xbe1   :  { %v1781_v59 = vadd.f32 1e-05, %v1780_v56 }
 0xbe3   :  { %15237 = vrsqrt.f32 %v1781_v59 }
 0xbed   :  { %v15238_v62 = vpop.eup %15237 }
 0xbee   :  { %1784 = vrot.lane.b32.xlu1 %v15238_v62, %s15502_s18 }
 0xc22   :  { %v12219_v55 = vpop.f32.mrb[14].mxu1 }
 0xc23   :  { %v1375_v58 = vmul.f32 %v12219_v55, %v16073_v16  ;;  %v1365_v1 = vpop.f32.mrb[15].mxu1 }
 0xc24   :  { %v1374_v60 = vmul.f32 %v1365_v1, %v16077_v19 }
 0xc60   :  { %v1785_v63 = vpop.permute.xlu1 %1784 }
 0xc61   :  { %v1787_v0 = vmul.f32 %v1785_v63, %v1773_v14 }
 0xc63   :  { %1789 = vrot.lane.b32.xlu1 %v1787_v0, %s15501_s24 }
 0xcd5   :  { %v1790_v2 = vpop.permute.xlu1 %1789 }
 0xcd6   :  { %v1792_v6 = vsel %vm163_vm1, %v1785_v63, %v1790_v2 }
 0xcd7   :  { %12297 = vmatprep.subr.msk.mxu0 %vm267_vm4, %v1792_v6 }
 0xcd8   :  { %12298 = vmatpush3.msk.msra.mxu0 %vm267_vm4, %v1792_v6 }
 0xcd9   :  { %12300 = vmatmul.mubr.msk.f32.vlgmr.msra.gmra.mrb[10].mxu0 %vm260_vm3, %v15816_v33  ;;  %13734 = vmatprep.subr.msk.bf16.mxu0 %vm15832_vm5, %v16088_v35 }
 0xcdf   :  { %13737 = vmatpush3.bf16.xpose.msk.msra.mxu0 %vm15832_vm5, %v16088_v35 }
 0xce0   :  { %13740 = vmatprep.subr.msk.bf16.mxu0 %vm15832_vm5, %v16117_v21 }
 0xce7   :  { %13743 = vmatpush3.bf16.xpose.msk.msra.mxu0 %vm15832_vm5, %v16117_v21  ;;  %v10365_v21 = vld [vmem:[%s20740_s0 + $0x280] sm:$0xff] }
 0xce8   :  { %13746 = vmatprep.subr.msk.bf16.mxu0 %vm15832_vm5, %v16132_v43 }
 0xcef   :  { %13749 = vmatpush3.bf16.xpose.msk.msra.mxu0 %vm15832_vm5, %v16132_v43  ;;  %v10366_v43 = vld [vmem:[%s20740_s0 + $0x288] sm:$0xff] }
 0xcf0   :  { %13752 = vmatprep.subr.msk.bf16.mxu0 %vm15832_vm5, %v16142_v45 }
 0xcf7   :  { %13755 = vmatpush3.bf16.xpose.msk.msra.mxu0 %vm15832_vm5, %v16142_v45  ;;  %v16338_v45 = vpack.c.bf16 %v10366_v43, %v10365_v21 }
 0xcf8   :  { %13758 = vmatprep.subr.msk.bf16.mxu0 %vm15832_vm5, %v16152_v47 }
 0xcff   :  { %13761 = vmatpush3.bf16.xpose.msk.msra.mxu0 %vm15832_vm5, %v16152_v47  ;;  %v10327_v47 = vld [vmem:[%s20740_s0 + $0x200] sm:$0xff] }
 0xd00   :  { %13764 = vmatprep.subr.msk.bf16.mxu0 %vm15832_vm5, %v16162_v52 }
 0xd07   :  { %13767 = vmatpush3.bf16.xpose.msk.msra.mxu0 %vm15832_vm5, %v16162_v52  ;;  %v10328_v52 = vld [vmem:[%s20740_s0 + $0x208] sm:$0xff] }
 0xd08   :  { %13770 = vmatprep.subr.msk.bf16.mxu0 %vm15832_vm5, %v16172_v57 }
 0xd0f   :  { %13773 = vmatpush3.bf16.xpose.msk.msra.mxu0 %vm15832_vm5, %v16172_v57  ;;  %v16347_v57 = vpack.c.bf16 %v10328_v52, %v10327_v47 }
 0xd10   :  { %13776 = vmatprep.subr.msk.bf16.mxu0 %vm15832_vm5, %v16182_v61 }
 0xd11   :  { %13781 = vmatprep.subr.bf16.mxu1 %v16347_v57 }
 0xd17   :  { %13779 = vmatpush3.bf16.xpose.msk.msra.mxu0 %vm15832_vm5, %v16182_v61 }
 0xd18   :  { %13864 = vmatprep.subr.bf16.mxu0 %v16338_v45 }
 0xdac   :  { %v12301_v33 = vpop.f32.mrb[10].mxu0 }
 0xdad   :  { %v1872_v16 = vmul.f32 %v12301_v33, %v16196_v11  ;;  %1877 = vrot.lane.b32.xlu0 %v12301_v33, %s15502_s18  ;;  %v1862_v19 = vpop.f32.mrb[11].mxu0 }
 0xdae   :  { %v1871_v35 = vmul.f32 %v1862_v19, %v16200_v17  ;;  %1875 = vrot.lane.b32.xlu1 %v1862_v19, %s15502_s18 }
 0xdb1   :  { %1380 = vrot.lane.b32.xlu0 %v12219_v55, %s15502_s18 }
 0xdb2   :  { %1378 = vrot.lane.b32.xlu1 %v1365_v1, %s15502_s18 }
 0xe1f   :  { %v1878_v61 = vpop.permute.xlu0 %1877 }
 0xe20   :  { %v1882_v4 = vsub.f32 %v1872_v16, %v1878_v61  ;;  %v1876_v11 = vpop.permute.xlu1 %1875 }
 0xe21   :  { %v1881_v13 = vsub.f32 %v1871_v35, %v1876_v11 }
 0xe22   :  { %v1884_v17 = vmul.f32 %v1882_v4, %v15940_v12 }
 0xe23   :  { %v1883_v25 = vmul.f32 %v1881_v13, %v15938_v8  ;;  %v1381_v20 = vpop.permute.xlu0 %1380 }
 0xe24   :  { %v1886_v22 = vadd.f32 %v1884_v17, %v15942_v15  ;;  %v1385_v34 = vsub.f32 %v1375_v58, %v1381_v20  ;;  %v1379_v36 = vpop.permute.xlu1 %1378 }
 0xe25   :  { %v1885_v37 = vadd.f32 %v1883_v25, %v15944_v18  ;;  %v1384_v38 = vsub.f32 %v1374_v60, %v1379_v36 }
 0xe26   :  { %v1888_v3 = vsel %vm163_vm1, %v1886_v22, -inf  ;;  %v1387_v41 = vmul.f32 %v1385_v34, %v15940_v12 }
 0xe27   :  { %v1887_v28 = vsel %vm163_vm1, %v1885_v37, -inf  ;;  %v1386_v29 = vmul.f32 %v1384_v38, %v15938_v8 }
 0xe28   :  { %v1889_v24 = vmax.f32 %v1887_v28, %v1888_v3  ;;  %v1389_v44 = vadd.f32 %v1387_v41, %v15942_v15 }
 0xe29   :  { %v1388_v9 = vadd.f32 %v1386_v29, %v15944_v18 }
 0xe2a   :  { %v1890_v46 = vrot.slane %v1889_v24, 4  ;;  %v1391_v49 = vsel %vm163_vm1, %v1389_v44, -inf }
 0xe2b   :  { %v1390_v51 = vsel %vm163_vm1, %v1388_v9, -inf }
 0xe2c   :  { %v1891_v39 = vmax.f32 %v1889_v24, %v1890_v46  ;;  %v1392_v14 = vmax.f32 %v1390_v51, %v1391_v49 }
 0xe2e   :  { %v1892_v54 = vrot.slane %v1891_v39, 2  ;;  %v1393_v48 = vrot.slane %v1392_v14, 4 }
 0xe30   :  { %v1893_v50 = vmax.f32 %v1891_v39, %v1892_v54  ;;  %v1394_v53 = vmax.f32 %v1392_v14, %v1393_v48  ;;  %v10329_v14 = vld [vmem:[%s20740_s0 + $0x210] sm:$0xff]  ;;  %v10330_v54 = vld [vmem:[%s20740_s0 + $0x218] sm:$0xff]  ;;  %v10369_v48 = vld [vmem:[%s20740_s0 + $0x2a0] sm:$0xff] }
 0xe32   :  { %v1894_v56 = vrot.slane %v1893_v50, 1  ;;  %v1395_v59 = vrot.slane %v1394_v53, 2 }
 0xe34   :  { %v1895_v62 = vmax.f32 %v1893_v50, %v1894_v56  ;;  %v1396_v55 = vmax.f32 %v1394_v53, %v1395_v59  ;;  %v10370_v50 = vld [vmem:[%s20740_s0 + $0x2a8] sm:$0xff] }
 0xe36   :  { %v1896_v58 = vsub.f32 %v1885_v37, %v1895_v62  ;;  %v1897_v1 = vsub.f32 %v1886_v22, %v1895_v62  ;;  %v1397_v60 = vrot.slane %v1396_v55, 1  ;;  %v16402_v62 = vld [vmem:[%s20741_s1] sm:$0xff] }
 0xe38   :  { %v1898_v63 = vmul.f32 1.442695, %v1896_v58  ;;  %v1900_v0 = vmul.f32 1.442695, %v1897_v1  ;;  %v1398_v2 = vmax.f32 %v1396_v55, %v1397_v60  ;;  %v16406_v55 = vpack.c.bf16 %v10330_v54, %v10329_v14  ;;  %v10331_v1 = vld [vmem:[%s20740_s0 + $0x220] sm:$0xff]  ;;  %v10332_v60 = vld [vmem:[%s20740_s0 + $0x228] sm:$0xff] }
 0xe39   :  { %v16408_v58 = vpack.c.bf16 %v10370_v50, %v10369_v48 }
 0xe3a   :  { %15239 = vpow2.f32 %v1898_v63  ;;  %v1399_v6 = vsub.f32 %v1388_v9, %v1398_v2  ;;  %v1400_v33 = vsub.f32 %v1389_v44, %v1398_v2  ;;  %v10367_v44 = vld [vmem:[%s20740_s0 + $0x290] sm:$0xff]  ;;  %v10368_v9 = vld [vmem:[%s20740_s0 + $0x298] sm:$0xff]  ;;  %v16430_v2 = vpack.c.bf16 %v10332_v60, %v10331_v1 }
 0xe3b   :  { %15241 = vpow2.f32 %v1900_v0  ;;  %v16376_v39 = vpack.c.bf16 %v10368_v9, %v10367_v44  ;;  %v10371_v63 = vld [vmem:[%s20740_s0 + $0x2b0] sm:$0xff]  ;;  %v10372_v0 = vld [vmem:[%s20740_s0 + $0x2b8] sm:$0xff] }
 0xe3c   :  { %v1401_v16 = vmul.f32 1.442695, %v1399_v6  ;;  %v1403_v19 = vmul.f32 1.442695, %v1400_v33  ;;  %v16432_v6 = vpack.c.bf16 %v10372_v0, %v10371_v63  ;;  %v10333_v33 = vld [vmem:[%s20740_s0 + $0x230] sm:$0xff]  ;;  %v10342_v44 = vld [vmem:[%s20740_s0 + $0x278] sm:$0xff] }
 0xe3e   :  { %15243 = vpow2.f32 %v1401_v16  ;;  %v10334_v16 = vld [vmem:[%s20740_s0 + $0x238] sm:$0xff] }
 0xe3f   :  { %15245 = vpow2.f32 %v1403_v19  ;;  %v10373_v19 = vld [vmem:[%s20740_s0 + $0x2c0] sm:$0xff] }
 0xe44   :  { %v15240_v35 = vpop.eup %15239 }
 0xe45   :  { %v15242_v21 = vpop.eup %15241  ;;  %v1902_v43 = vsel %vm163_vm1, %v15240_v35, 0.0 }
 0xe46   :  { %v1903_v47 = vsel %vm163_vm1, %v15242_v21, 0.0 }
 0xe47   :  { %v1904_v52 = vadd.f32 %v1903_v47, %v1902_v43  ;;  %v10335_v47 = vld [vmem:[%s20740_s0 + $0x240] sm:$0xff] }
 0xe48   :  { %v15244_v61 = vpop.eup %15243 }
 0xe49   :  { %v15246_v4 = vpop.eup %15245  ;;  %v1905_v11 = vrot.slane %v1904_v52, 4  ;;  %v1405_v13 = vsel %vm163_vm1, %v15244_v61, 0.0 }
 0xe4a   :  { %v1406_v17 = vsel %vm163_vm1, %v15246_v4, 0.0 }
 0xe4b   :  { %v1906_v25 = vadd.f32 %v1905_v11, %v1904_v52  ;;  %v1407_v20 = vadd.f32 %v1406_v17, %v1405_v13  ;;  %v10336_v52 = vld [vmem:[%s20740_s0 + $0x248] sm:$0xff]  ;;  %v10337_v17 = vld [vmem:[%s20740_s0 + $0x250] sm:$0xff] }
 0xe4c   :  { %v16471_v11 = vpack.c.bf16 %v10336_v52, %v10335_v47 }
 0xe4d   :  { %v1408_v22 = vrot.slane %v1407_v20, 4  ;;  %v1907_v34 = vrot.slane %v1906_v25, 2 }
 0xe4f   :  { %v1409_v36 = vadd.f32 %v1408_v22, %v1407_v20  ;;  %v1908_v37 = vadd.f32 %v1907_v34, %v1906_v25  ;;  %v10338_v25 = vld [vmem:[%s20740_s0 + $0x258] sm:$0xff]  ;;  %v10377_v20 = vld [vmem:[%s20740_s0 + $0x2e0] sm:$0xff]  ;;  %v10378_v22 = vld [vmem:[%s20740_s0 + $0x2e8] sm:$0xff] }
 0xe50   :  { %v16491_v34 = vpack.c.bf16 %v10338_v25, %v10337_v17 }
 0xe51   :  { %v1909_v38 = vrot.slane %v1908_v37, 1  ;;  %v1410_v3 = vrot.slane %v1409_v36, 2 }
 0xe53   :  { %v1910_v41 = vadd.f32 %v1909_v38, %v1908_v37  ;;  %v1411_v28 = vadd.f32 %v1410_v3, %v1409_v36  ;;  %v16493_v36 = vpack.c.bf16 %v10378_v22, %v10377_v20  ;;  %v10339_v37 = vld [vmem:[%s20740_s0 + $0x260] sm:$0xff]  ;;  %v10340_v38 = vld [vmem:[%s20740_s0 + $0x268] sm:$0xff]  ;;  %v10379_v3 = vld [vmem:[%s20740_s0 + $0x2f0] sm:$0xff] }
 0xe55   :  { %15247 = vrcp.f32 %v1910_v41  ;;  %v1412_v29 = vrot.slane %v1411_v28, 1  ;;  %v10380_v41 = vld [vmem:[%s20740_s0 + $0x2f8] sm:$0xff] }
 0xe57   :  { %v1413_v24 = vadd.f32 %v1412_v29, %v1411_v28  ;;  %v16511_v28 = vpack.c.bf16 %v10340_v38, %v10339_v37  ;;  %v16513_v29 = vpack.c.bf16 %v10380_v41, %v10379_v3 }
 0xe59   :  { %15249 = vrcp.f32 %v1413_v24  ;;  %v10341_v24 = vld [vmem:[%s20740_s0 + $0x270] sm:$0xff] }
 0xe5a   :  { %v16525_v9 = vpack.c.bf16 %v10342_v44, %v10341_v24  ;;  %v16581_v44 = vld [vmem:[%s20743_s3] sm:$0xf] }
 0xe5f   :  { %v15248_v46 = vpop.eup %15247 }
 0xe60   :  { %v16372_v49 = vmul.f32 %v15248_v46, %v15240_v35  ;;  %v16374_v51 = vmul.f32 %v15248_v46, %v15242_v21  ;;  %v10374_v35 = vld [vmem:[%s20740_s0 + $0x2c8] sm:$0xff]  ;;  %v16451_v21 = vpack.c.bf16 %v10334_v16, %v10333_v33 }
 0xe61   :  { %v16453_v43 = vpack.c.bf16 %v10374_v35, %v10373_v19  ;;  %v16534_v46 = vld [vmem:[%s20741_s1 + $0x8] sm:$0xff] }
 0xe62   :  { %20787 = vst [vmem:[#allocation9_spill] sm:$0xff] %v16374_v51  ;;  %12334 = vmatprep.mubr.msk.f32.mxu0 %vm163_vm1, %v16372_v49 }
 0xe63   :  { %v15250_v53 = vpop.eup %15249  ;;  %12335 = vmatmul.mubr.msk.f32.vlgmr.msra.gmra.mrb[12].mxu0 %vm163_vm1, %v16374_v51 }
 0xe64   :  { %13866 = vmatpush3.bf16.msra.mxu0 %v16338_v45  ;;  %v16395_v56 = vmul.f32 %v15250_v53, %v15244_v61  ;;  %v16397_v59 = vmul.f32 %v15250_v53, %v15246_v4  ;;  %12451 = vmatprep.mubr.f32.mxu0 %v16402_v62  ;;  %v10375_v61 = vld [vmem:[%s20740_s0 + $0x2d0] sm:$0xff]  ;;  %v10376_v4 = vld [vmem:[%s20740_s0 + $0x2d8] sm:$0xff] }
 0xe65   :  { %13868 = vmatprep.subr.bf16.mxu0 %v16376_v39  ;;  %v16473_v13 = vpack.c.bf16 %v10376_v4, %v10375_v61 }
 0xe66   :  { %20788 = vst [vmem:[#allocation10_spill] sm:$0xff] %v16397_v59  ;;  %12252 = vmatprep.mubr.msk.f32.mxu1 %vm163_vm1, %v16395_v56 }
 0xe67   :  { %12253 = vmatmul.mubr.msk.f32.vlgmr.msra.gmra.mrb[16].mxu1 %vm163_vm1, %v16397_v59 }
 0xe68   :  { %13783 = vmatpush3.bf16.msra.mxu1 %v16347_v57  ;;  %13870 = vmatpush3.bf16.msra.mxu0 %v16376_v39 }
 0xe69   :  { %13785 = vmatprep.subr.bf16.mxu1 %v16406_v55  ;;  %13872 = vmatprep.subr.bf16.mxu0 %v16408_v58 }
 0xe6a   :  { %12369 = vmatprep.mubr.f32.mxu1 %v16402_v62 }
 0xe6c   :  { %13787 = vmatpush3.bf16.msra.mxu1 %v16406_v55  ;;  %13874 = vmatpush3.bf16.msra.mxu0 %v16408_v58 }
 0xe6d   :  { %13789 = vmatprep.subr.bf16.mxu1 %v16430_v2  ;;  %13876 = vmatprep.subr.bf16.mxu0 %v16432_v6 }
 0xe70   :  { %13791 = vmatpush3.bf16.msra.mxu1 %v16430_v2  ;;  %13878 = vmatpush3.bf16.msra.mxu0 %v16432_v6 }
 0xe71   :  { %13793 = vmatprep.subr.bf16.mxu1 %v16451_v21  ;;  %13880 = vmatprep.subr.bf16.mxu0 %v16453_v43 }
 0xe74   :  { %13795 = vmatpush3.bf16.msra.mxu1 %v16451_v21  ;;  %13882 = vmatpush3.bf16.msra.mxu0 %v16453_v43 }
 0xe75   :  { %13797 = vmatprep.subr.bf16.mxu1 %v16471_v11  ;;  %13884 = vmatprep.subr.bf16.mxu0 %v16473_v13 }
 0xe78   :  { %13799 = vmatpush3.bf16.msra.mxu1 %v16471_v11  ;;  %13886 = vmatpush3.bf16.msra.mxu0 %v16473_v13 }
 0xe79   :  { %13801 = vmatprep.subr.bf16.mxu1 %v16491_v34  ;;  %13888 = vmatprep.subr.bf16.mxu0 %v16493_v36 }
 0xe7c   :  { %13803 = vmatpush3.bf16.msra.mxu1 %v16491_v34  ;;  %13890 = vmatpush3.bf16.msra.mxu0 %v16493_v36 }
 0xe7d   :  { %13805 = vmatprep.subr.bf16.mxu1 %v16511_v28  ;;  %13892 = vmatprep.subr.bf16.mxu0 %v16513_v29 }
 0xe80   :  { %13807 = vmatpush3.bf16.msra.mxu1 %v16511_v28  ;;  %13894 = vmatpush3.bf16.msra.mxu0 %v16513_v29 }
 0xe81   :  { %13809 = vmatprep.subr.bf16.mxu1 %v16525_v9  ;;  %13895 = vmatprep.subr.bf16.mxu0 %v20758_v26 }
 0xe83   :  { %12452 = vmatmul.mubr.f32.vlgmr.msra.gmra.mrb[14].mxu0 %v16534_v46 }
 0xe84   :  { %13811 = vmatpush3.bf16.msra.mxu1 %v16525_v9  ;;  %12458 = vmatprep.mubr.msk.f32.mxu0 %vm15499_vm0, %v20756_v27 }
 0xe85   :  { %13812 = vmatprep.subr.bf16.mxu1 %v20758_v26 }
 0xe87   :  { %12370 = vmatmul.mubr.f32.vlgmr.msra.gmra.mrb[18].mxu1 %v16534_v46 }
 0xe88   :  { %12376 = vmatprep.mubr.msk.f32.mxu1 %vm15499_vm0, %v20756_v27 }
 0xf36   :  { %v16544_v14 = vpop.f32.mrb[12].mxu0 }
 0xf37   :  { %20789 = vst [vmem:[#allocation11_spill] sm:$0xff] %v16544_v14  ;;  %v16546_v54 = vpop.f32.mrb[13].mxu0 }
 0xf3a   :  { %v16548_v48 = vpop.f32.mrb[16].mxu1 }
 0xf3b   :  { %20790 = vst [vmem:[#allocation12_spill] sm:$0xff] %v16548_v48  ;;  %v16550_v50 = vpop.f32.mrb[17].mxu1 }
 0xf56   :  { %v16552_v53 = vpop.f32.mrb[14].mxu0 }
 0xf57   :  { %v2686_v1 = vmul.f32 %v16552_v53, %v16552_v53  ;;  %v16556_v60 = vpop.f32.mrb[15].mxu0 }
 0xf58   :  { %v2685_v63 = vmul.f32 %v16556_v60, %v16556_v60 }
 0xf5a   :  { %v16560_v0 = vpop.f32.mrb[18].mxu1  ;;  %v15159_v33 = vpack.i.bf16 %v2686_v1, %v2685_v63  ;;  %v16588_v1 = vld [vmem:[%s20744_s4] sm:$0xff] }
 0xf5b   :  { %v2189_v16 = vmul.f32 %v16560_v0, %v16560_v0  ;;  %v16564_v19 = vpop.f32.mrb[19].mxu1 }
 0xf5c   :  { %v2188_v35 = vmul.f32 %v16564_v19, %v16564_v19  ;;  %15160 = vrot.lane.b32.xlu1 %v15159_v33, %s15501_s24 }
 0xf5e   :  { %v15164_v47 = vpack.i.bf16 %v2189_v16, %v2188_v35 }
 0xf60   :  { %15165 = vrot.lane.b32.xlu0 %v15164_v47, %s15501_s24 }
 0xfce   :  { %v15161_v52 = vpop.permute.xlu1 %15160 }
 0xfcf   :  { %v15163_v61 = vunpack.i.h.bf16 %v15161_v52  ;;  %v15162_v4 = vunpack.i.l.bf16 %v15161_v52 }
 0xfd1   :  { %v2696_v17 = vsel %vm163_vm1, %v16552_v53, %v15163_v61  ;;  %v2695_v25 = vsel %vm163_vm1, %v16556_v60, %v15162_v4 }
 0xfd2   :  { %v15166_v20 = vpop.permute.xlu0 %15165  ;;  %v13896_v22 = vpack.c.bf16 %v2696_v17, %v2695_v25 }
 0xfd3   :  { %v15168_v37 = vunpack.i.h.bf16 %v15166_v20  ;;  %v15167_v38 = vunpack.i.l.bf16 %v15166_v20 }
 0xfd4   :  { %13897 = vmatpush3.bf16.msra.mxu0 %v13896_v22 }
 0xfd5   :  { %v2199_v3 = vsel %vm163_vm1, %v16560_v0, %v15168_v37  ;;  %v2198_v41 = vsel %vm163_vm1, %v16564_v19, %v15167_v38 }
 0xfd6   :  { %v13813_v24 = vpack.c.bf16 %v2199_v3, %v2198_v41 }
 0xfd7   :  { %12459 = vmatmul.mubr.msk.f32.vlgmr.msra.gmra.mrb[16].mxu0 %vm166_vm2, %v16581_v44 }
 0xfd8   :  { %13814 = vmatpush3.bf16.msra.mxu1 %v13813_v24  ;;  %12463 = vmatprep.mubr.msk.f32.mxu0 %vm260_vm3, %v16588_v1 }
 0xfdb   :  { %12377 = vmatmul.mubr.msk.f32.vlgmr.msra.gmra.mrb[20].mxu1 %vm166_vm2, %v16581_v44 }
 0xfdc   :  { %12381 = vmatprep.mubr.msk.f32.mxu1 %vm260_vm3, %v16588_v1 }
0x10aa   :  { %v2763_v63 = vpop.f32.mrb[16].mxu0 }
0x10ab   :  { %v2767_v33 = vmul.f32 0.25, %v2763_v63  ;;  %v12460_v16 = vpop.f32.mrb[17].mxu0 }
0x10ad   :  { %v2768_v35 = vmul.f32 %v2767_v33, %v2767_v33 }
0x10ae   :  { %v2266_v47 = vpop.f32.mrb[20].mxu1 }
0x10af   :  { %v2270_v52 = vmul.f32 0.25, %v2266_v47  ;;  %v12378_v61 = vpop.f32.mrb[21].mxu1  ;;  %2770 = vrot.lane.b32.xlu1 %v2768_v35, %s15501_s24 }
0x10b1   :  { %v2271_v4 = vmul.f32 %v2270_v52, %v2270_v52 }
0x10b3   :  { %2273 = vrot.lane.b32.xlu0 %v2271_v4, %s15501_s24 }
0x1121   :  { %v2771_v17 = vpop.permute.xlu1 %2770 }
0x1122   :  { %v2773_v25 = vsub.f32 %v2767_v33, %v2771_v17 }
0x1124   :  { %v2774_v20 = vmax.f32 %v2773_v25, 0.0 }
0x1125   :  { %v2274_v22 = vpop.permute.xlu0 %2273 }
0x1126   :  { %v2775_v37 = vadd.f32 1e-05, %v2774_v20  ;;  %v2276_v38 = vsub.f32 %v2270_v52, %v2274_v22  ;;  %v16608_v20 = vld [vmem:[%s20744_s4 + $0x8] sm:$0xff] }
0x1128   :  { %15251 = vrsqrt.f32 %v2775_v37  ;;  %v2277_v3 = vmax.f32 %v2276_v38, 0.0 }
0x112a   :  { %v2278_v41 = vadd.f32 1e-05, %v2277_v3 }
0x112c   :  { %15253 = vrsqrt.f32 %v2278_v41 }
0x1132   :  { %v15252_v24 = vpop.eup %15251 }
0x1133   :  { %2778 = vrot.lane.b32.xlu1 %v15252_v24, %s15502_s18 }
0x1136   :  { %v15254_v63 = vpop.eup %15253 }
0x1137   :  { %2281 = vrot.lane.b32.xlu0 %v15254_v63, %s15502_s18 }
0x11a5   :  { %v2779_v16 = vpop.permute.xlu1 %2778 }
0x11a6   :  { %v2781_v35 = vmul.f32 %v2779_v16, %v2767_v33 }
0x11a8   :  { %2783 = vrot.lane.b32.xlu1 %v2781_v35, %s15501_s24 }
0x11a9   :  { %v2282_v47 = vpop.permute.xlu0 %2281 }
0x11aa   :  { %v2284_v61 = vmul.f32 %v2282_v47, %v2270_v52 }
0x11ac   :  { %2286 = vrot.lane.b32.xlu0 %v2284_v61, %s15501_s24 }
0x121a   :  { %v2784_v4 = vpop.permute.xlu1 %2783 }
0x121b   :  { %v2786_v17 = vsel %vm163_vm1, %v2779_v16, %v2784_v4 }
0x121c   :  { %12461 = vmatprep.subr.msk.mxu0 %vm267_vm4, %v2786_v17 }
0x121d   :  { %12462 = vmatpush3.msk.msra.mxu0 %vm267_vm4, %v2786_v17 }
0x121e   :  { %v2287_v25 = vpop.permute.xlu0 %2286  ;;  %12464 = vmatmul.mubr.msk.f32.vlgmr.msra.gmra.mrb[18].mxu0 %vm260_vm3, %v16608_v20  ;;  %13900 = vmatprep.subr.msk.bf16.mxu0 %vm15832_vm5, %v16338_v45 }
0x121f   :  { %v2289_v33 = vsel %vm163_vm1, %v2282_v47, %v2287_v25 }
0x1220   :  { %12379 = vmatprep.subr.msk.mxu1 %vm267_vm4, %v2289_v33 }
0x1221   :  { %12380 = vmatpush3.msk.msra.mxu1 %vm267_vm4, %v2289_v33 }
0x1222   :  { %12382 = vmatmul.mubr.msk.f32.vlgmr.msra.gmra.mrb[22].mxu1 %vm260_vm3, %v16608_v20  ;;  %13817 = vmatprep.subr.msk.bf16.mxu1 %vm15832_vm5, %v16347_v57 }
0x1224   :  { %13903 = vmatpush3.bf16.xpose.msk.msra.mxu0 %vm15832_vm5, %v16338_v45 }
0x1225   :  { %13906 = vmatprep.subr.msk.bf16.mxu0 %vm15832_vm5, %v16376_v39 }
0x1228   :  { %13820 = vmatpush3.bf16.xpose.msk.msra.mxu1 %vm15832_vm5, %v16347_v57 }
0x1229   :  { %13823 = vmatprep.subr.msk.bf16.mxu1 %vm15832_vm5, %v16406_v55 }
0x122c   :  { %13909 = vmatpush3.bf16.xpose.msk.msra.mxu0 %vm15832_vm5, %v16376_v39 }
0x122d   :  { %13912 = vmatprep.subr.msk.bf16.mxu0 %vm15832_vm5, %v16408_v58 }
0x1230   :  { %13826 = vmatpush3.bf16.xpose.msk.msra.mxu1 %vm15832_vm5, %v16406_v55 }
0x1231   :  { %13829 = vmatprep.subr.msk.bf16.mxu1 %vm15832_vm5, %v16430_v2 }
0x1234   :  { %13915 = vmatpush3.bf16.xpose.msk.msra.mxu0 %vm15832_vm5, %v16408_v58 }
0x1235   :  { %13918 = vmatprep.subr.msk.bf16.mxu0 %vm15832_vm5, %v16432_v6 }
0x1238   :  { %13832 = vmatpush3.bf16.xpose.msk.msra.mxu1 %vm15832_vm5, %v16430_v2 }
0x1239   :  { %13835 = vmatprep.subr.msk.bf16.mxu1 %vm15832_vm5, %v16451_v21 }
0x123c   :  { %13921 = vmatpush3.bf16.xpose.msk.msra.mxu0 %vm15832_vm5, %v16432_v6 }
0x123d   :  { %13924 = vmatprep.subr.msk.bf16.mxu0 %vm15832_vm5, %v16453_v43 }
0x1240   :  { %13838 = vmatpush3.bf16.xpose.msk.msra.mxu1 %vm15832_vm5, %v16451_v21 }
0x1241   :  { %13841 = vmatprep.subr.msk.bf16.mxu1 %vm15832_vm5, %v16471_v11 }
0x1244   :  { %13927 = vmatpush3.bf16.xpose.msk.msra.mxu0 %vm15832_vm5, %v16453_v43  ;;  %v10441_v43 = vld [vmem:[%s20740_s0 + $0x380] sm:$0xff] }
0x1245   :  { %13930 = vmatprep.subr.msk.bf16.mxu0 %vm15832_vm5, %v16473_v13 }
0x1248   :  { %13844 = vmatpush3.bf16.xpose.msk.msra.mxu1 %vm15832_vm5, %v16471_v11  ;;  %v10442_v11 = vld [vmem:[%s20740_s0 + $0x388] sm:$0xff] }
0x1249   :  { %13847 = vmatprep.subr.msk.bf16.mxu1 %vm15832_vm5, %v16491_v34 }
0x124c   :  { %13933 = vmatpush3.bf16.xpose.msk.msra.mxu0 %vm15832_vm5, %v16473_v13  ;;  %v16727_v13 = vpack.c.bf16 %v10442_v11, %v10441_v43 }
0x124d   :  { %13936 = vmatprep.subr.msk.bf16.mxu0 %vm15832_vm5, %v16493_v36 }
0x1250   :  { %13850 = vmatpush3.bf16.xpose.msk.msra.mxu1 %vm15832_vm5, %v16491_v34  ;;  %v10403_v34 = vld [vmem:[%s20740_s0 + $0x300] sm:$0xff] }
0x1251   :  { %13853 = vmatprep.subr.msk.bf16.mxu1 %vm15832_vm5, %v16511_v28 }
0x1254   :  { %13939 = vmatpush3.bf16.xpose.msk.msra.mxu0 %vm15832_vm5, %v16493_v36  ;;  %v10404_v36 = vld [vmem:[%s20740_s0 + $0x308] sm:$0xff] }
0x1255   :  { %13942 = vmatprep.subr.msk.bf16.mxu0 %vm15832_vm5, %v16513_v29 }
0x1258   :  { %13856 = vmatpush3.bf16.xpose.msk.msra.mxu1 %vm15832_vm5, %v16511_v28  ;;  %v16736_v28 = vpack.c.bf16 %v10404_v36, %v10403_v34 }
0x1259   :  { %13859 = vmatprep.subr.msk.bf16.mxu1 %vm15832_vm5, %v16525_v9 }
0x125c   :  { %13945 = vmatpush3.bf16.xpose.msk.msra.mxu0 %vm15832_vm5, %v16513_v29 }
0x125d   :  { %14030 = vmatprep.subr.bf16.mxu0 %v16727_v13 }
0x1260   :  { %13862 = vmatpush3.bf16.xpose.msk.msra.mxu1 %vm15832_vm5, %v16525_v9 }
0x1261   :  { %13947 = vmatprep.subr.bf16.mxu1 %v16736_v28 }
0x12f1   :  { %v12465_v45 = vpop.f32.mrb[18].mxu0 }
0x12f2   :  { %v2866_v57 = vmul.f32 %v12465_v45, %v16552_v53  ;;  %2871 = vrot.lane.b32.xlu0 %v12465_v45, %s15502_s18  ;;  %v2856_v39 = vpop.f32.mrb[19].mxu0 }
0x12f3   :  { %v2865_v55 = vmul.f32 %v2856_v39, %v16556_v60  ;;  %2869 = vrot.lane.b32.xlu1 %v2856_v39, %s15502_s18 }
0x12f5   :  { %v12383_v58 = vpop.f32.mrb[22].mxu1 }
0x12f6   :  { %v2369_v2 = vmul.f32 %v12383_v58, %v16560_v0  ;;  %v2359_v6 = vpop.f32.mrb[23].mxu1  ;;  %2374 = vrot.lane.b32.xlu0 %v12383_v58, %s15502_s18 }
0x12f7   :  { %v2368_v21 = vmul.f32 %v2359_v6, %v16564_v19  ;;  %2372 = vrot.lane.b32.xlu1 %v2359_v6, %s15502_s18 }
0x1364   :  { %v2872_v29 = vpop.permute.xlu0 %2871 }
0x1365   :  { %v2876_v9 = vsub.f32 %v2866_v57, %v2872_v29  ;;  %v2870_v53 = vpop.permute.xlu1 %2869 }
0x1366   :  { %v2875_v60 = vsub.f32 %v2865_v55, %v2870_v53 }
0x1367   :  { %v2878_v0 = vmul.f32 %v2876_v9, %v15940_v12 }
0x1368   :  { %v2877_v19 = vmul.f32 %v2875_v60, %v15938_v8  ;;  %v2375_v52 = vpop.permute.xlu0 %2374 }
0x1369   :  { %v2880_v22 = vadd.f32 %v2878_v0, %v15942_v15  ;;  %v2379_v37 = vsub.f32 %v2369_v2, %v2375_v52  ;;  %v2373_v38 = vpop.permute.xlu1 %2372 }
0x136a   :  { %v2879_v3 = vadd.f32 %v2877_v19, %v15944_v18  ;;  %v2378_v41 = vsub.f32 %v2368_v21, %v2373_v38 }
0x136b   :  { %v2882_v24 = vsel %vm163_vm1, %v2880_v22, -inf  ;;  %v2381_v63 = vmul.f32 %v2379_v37, %v15940_v12 }
0x136c   :  { %v2881_v16 = vsel %vm163_vm1, %v2879_v3, -inf  ;;  %v2380_v35 = vmul.f32 %v2378_v41, %v15938_v8 }
0x136d   :  { %v2883_v47 = vmax.f32 %v2881_v16, %v2882_v24  ;;  %v2383_v61 = vadd.f32 %v2381_v63, %v15942_v15 }
0x136e   :  { %v2382_v4 = vadd.f32 %v2380_v35, %v15944_v18 }
0x136f   :  { %v2884_v17 = vrot.slane %v2883_v47, 4  ;;  %v2385_v25 = vsel %vm163_vm1, %v2383_v61, -inf }
0x1370   :  { %v2384_v33 = vsel %vm163_vm1, %v2382_v4, -inf }
0x1371   :  { %v2885_v45 = vmax.f32 %v2883_v47, %v2884_v17  ;;  %v2386_v57 = vmax.f32 %v2384_v33, %v2385_v25 }
0x1373   :  { %v2886_v39 = vrot.slane %v2885_v45, 2  ;;  %v2387_v55 = vrot.slane %v2386_v57, 4 }
0x1375   :  { %v2887_v58 = vmax.f32 %v2885_v45, %v2886_v39  ;;  %v2388_v2 = vmax.f32 %v2386_v57, %v2387_v55 }
0x1377   :  { %v2888_v6 = vrot.slane %v2887_v58, 1  ;;  %v2389_v21 = vrot.slane %v2388_v2, 2 }
0x1379   :  { %v2889_v43 = vmax.f32 %v2887_v58, %v2888_v6  ;;  %v2390_v11 = vmax.f32 %v2388_v2, %v2389_v21 }
0x137b   :  { %v2890_v34 = vsub.f32 %v2879_v3, %v2889_v43  ;;  %v2891_v36 = vsub.f32 %v2880_v22, %v2889_v43  ;;  %v2391_v29 = vrot.slane %v2390_v11, 1  ;;  %v10443_v43 = vld [vmem:[%s20740_s0 + $0x390] sm:$0xff] }
0x137d   :  { %v2892_v9 = vmul.f32 1.442695, %v2890_v34  ;;  %v2894_v53 = vmul.f32 1.442695, %v2891_v36  ;;  %v2392_v60 = vmax.f32 %v2390_v11, %v2391_v29  ;;  %v10444_v11 = vld [vmem:[%s20740_s0 + $0x398] sm:$0xff] }
0x137f   :  { %15255 = vpow2.f32 %v2892_v9  ;;  %v2393_v0 = vsub.f32 %v2382_v4, %v2392_v60  ;;  %v2394_v19 = vsub.f32 %v2383_v61, %v2392_v60  ;;  %v16765_v9 = vpack.c.bf16 %v10444_v11, %v10443_v43  ;;  %v10406_v60 = vld [vmem:[%s20740_s0 + $0x318] sm:$0xff]  ;;  %v10453_v43 = vld [vmem:[%s20740_s0 + $0x3e0] sm:$0xff]  ;;  %v10454_v11 = vld [vmem:[%s20740_s0 + $0x3e8] sm:$0xff] }
0x1380   :  { %15257 = vpow2.f32 %v2894_v53  ;;  %v10405_v53 = vld [vmem:[%s20740_s0 + $0x310] sm:$0xff] }
0x1381   :  { %v2395_v52 = vmul.f32 1.442695, %v2393_v0  ;;  %v2397_v37 = vmul.f32 1.442695, %v2394_v19  ;;  %v10445_v0 = vld [vmem:[%s20740_s0 + $0x3a0] sm:$0xff]  ;;  %v10446_v19 = vld [vmem:[%s20740_s0 + $0x3a8] sm:$0xff] }
0x1383   :  { %15259 = vpow2.f32 %v2395_v52 }
0x1384   :  { %15261 = vpow2.f32 %v2397_v37 }
0x1389   :  { %v15256_v38 = vpop.eup %15255 }
0x138a   :  { %v15258_v41 = vpop.eup %15257  ;;  %v2896_v24 = vsel %vm163_vm1, %v15256_v38, 0.0 }
0x138b   :  { %v2897_v63 = vsel %vm163_vm1, %v15258_v41, 0.0 }
0x138c   :  { %v2898_v3 = vadd.f32 %v2897_v63, %v2896_v24  ;;  %v16792_v24 = vpack.c.bf16 %v10446_v19, %v10445_v0  ;;  %v10407_v63 = vld [vmem:[%s20740_s0 + $0x320] sm:$0xff]  ;;  %v10416_v0 = vld [vmem:[%s20740_s0 + $0x368] sm:$0xff]  ;;  %v10455_v19 = vld [vmem:[%s20740_s0 + $0x3f0] sm:$0xff] }
0x138d   :  { %v15260_v22 = vpop.eup %15259 }
0x138e   :  { %v15262_v16 = vpop.eup %15261  ;;  %v2899_v35 = vrot.slane %v2898_v3, 4  ;;  %v2399_v47 = vsel %vm163_vm1, %v15260_v22, 0.0 }
0x138f   :  { %v2400_v4 = vsel %vm163_vm1, %v15262_v16, 0.0 }
0x1390   :  { %v2900_v61 = vadd.f32 %v2899_v35, %v2898_v3  ;;  %v2401_v17 = vadd.f32 %v2400_v4, %v2399_v47  ;;  %v10408_v3 = vld [vmem:[%s20740_s0 + $0x328] sm:$0xff]  ;;  %v10409_v4 = vld [vmem:[%s20740_s0 + $0x330] sm:$0xff] }
0x1391   :  { %v16814_v35 = vpack.c.bf16 %v10408_v3, %v10407_v63 }
0x1392   :  { %v2402_v25 = vrot.slane %v2401_v17, 4  ;;  %v2901_v33 = vrot.slane %v2900_v61, 2 }
0x1394   :  { %v2403_v45 = vadd.f32 %v2402_v25, %v2401_v17  ;;  %v2902_v57 = vadd.f32 %v2901_v33, %v2900_v61  ;;  %v10410_v61 = vld [vmem:[%s20740_s0 + $0x338] sm:$0xff]  ;;  %v10449_v17 = vld [vmem:[%s20740_s0 + $0x3c0] sm:$0xff]  ;;  %v10450_v25 = vld [vmem:[%s20740_s0 + $0x3c8] sm:$0xff] }
0x1395   :  { %v16835_v33 = vpack.c.bf16 %v10410_v61, %v10409_v4 }
0x1396   :  { %v2903_v39 = vrot.slane %v2902_v57, 1  ;;  %v2404_v55 = vrot.slane %v2403_v45, 2 }
0x1398   :  { %v2904_v58 = vadd.f32 %v2903_v39, %v2902_v57  ;;  %v2405_v2 = vadd.f32 %v2404_v55, %v2403_v45  ;;  %v16837_v45 = vpack.c.bf16 %v10450_v25, %v10449_v17  ;;  %v10411_v57 = vld [vmem:[%s20740_s0 + $0x340] sm:$0xff]  ;;  %v10451_v39 = vld [vmem:[%s20740_s0 + $0x3d0] sm:$0xff]  ;;  %v10452_v55 = vld [vmem:[%s20740_s0 + $0x3d8] sm:$0xff] }
0x139a   :  { %15263 = vrcp.f32 %v2904_v58  ;;  %v2406_v6 = vrot.slane %v2405_v2, 1 }
0x139c   :  { %v2407_v21 = vadd.f32 %v2406_v6, %v2405_v2  ;;  %v16857_v2 = vpack.c.bf16 %v10452_v55, %v10451_v39  ;;  %v10413_v6 = vld [vmem:[%s20740_s0 + $0x350] sm:$0xff] }
0x139e   :  { %15265 = vrcp.f32 %v2407_v21  ;;  %v10414_v21 = vld [vmem:[%s20740_s0 + $0x358] sm:$0xff] }
0x13a4   :  { %v15264_v34 = vpop.eup %15263 }
0x13a5   :  { %v16761_v36 = vmul.f32 %v15264_v34, %v15256_v38  ;;  %v16763_v29 = vmul.f32 %v15264_v34, %v15258_v41  ;;  %v16790_v41 = vpack.c.bf16 %v10406_v60, %v10405_v53  ;;  %v16875_v34 = vpack.c.bf16 %v10414_v21, %v10413_v6  ;;  %v10415_v60 = vld [vmem:[%s20740_s0 + $0x360] sm:$0xff] }
0x13a6   :  { %v16877_v53 = vpack.c.bf16 %v10454_v11, %v10453_v43  ;;  %v16895_v63 = vpack.c.bf16 %v10416_v0, %v10415_v60 }
0x13a7   :  { %20791 = vst [vmem:[#allocation13_spill] sm:$0xff] %v16763_v29  ;;  %12498 = vmatprep.mubr.msk.f32.mxu0 %vm163_vm1, %v16761_v36 }
0x13a8   :  { %v15266_v52 = vpop.eup %15265  ;;  %12499 = vmatmul.mubr.msk.f32.vlgmr.msra.gmra.mrb[20].mxu0 %vm163_vm1, %v16763_v29 }
0x13a9   :  { %14032 = vmatpush3.bf16.msra.mxu0 %v16727_v13  ;;  %v16784_v37 = vmul.f32 %v15266_v52, %v15260_v22  ;;  %v16786_v38 = vmul.f32 %v15266_v52, %v15262_v16  ;;  %12615 = vmatprep.mubr.f32.mxu0 %v16402_v62  ;;  %v10447_v22 = vld [vmem:[%s20740_s0 + $0x3b0] sm:$0xff]  ;;  %v10448_v16 = vld [vmem:[%s20740_s0 + $0x3b8] sm:$0xff] }
0x13aa   :  { %14034 = vmatprep.subr.bf16.mxu0 %v16765_v9  ;;  %v16816_v47 = vpack.c.bf16 %v10448_v16, %v10447_v22  ;;  %v10456_v52 = vld [vmem:[%s20740_s0 + $0x3f8] sm:$0xff]  ;;  %v10417_v22 = vld [vmem:[%s20740_s0 + $0x370] sm:$0xff] }
0x13ab   :  { %20792 = vst [vmem:[#allocation14_spill] sm:$0xff] %v16786_v38  ;;  %12416 = vmatprep.mubr.msk.f32.mxu1 %vm163_vm1, %v16784_v37  ;;  %v16897_v3 = vpack.c.bf16 %v10456_v52, %v10455_v19  ;;  %v10418_v16 = vld [vmem:[%s20740_s0 + $0x378] sm:$0xff] }
0x13ac   :  { %12417 = vmatmul.mubr.msk.f32.vlgmr.msra.gmra.mrb[24].mxu1 %vm163_vm1, %v16786_v38  ;;  %v16909_v4 = vpack.c.bf16 %v10418_v16, %v10417_v22 }
0x13ad   :  { %13949 = vmatpush3.bf16.msra.mxu1 %v16736_v28  ;;  %14036 = vmatpush3.bf16.msra.mxu0 %v16765_v9 }
0x13ae   :  { %13951 = vmatprep.subr.bf16.mxu1 %v16790_v41  ;;  %14038 = vmatprep.subr.bf16.mxu0 %v16792_v24 }
0x13af   :  { %12533 = vmatprep.mubr.f32.mxu1 %v16402_v62  ;;  %v10412_v62 = vld [vmem:[%s20740_s0 + $0x348] sm:$0xff] }
0x13b0   :  { %v16855_v58 = vpack.c.bf16 %v10412_v62, %v10411_v57 }
0x13b1   :  { %13953 = vmatpush3.bf16.msra.mxu1 %v16790_v41  ;;  %14040 = vmatpush3.bf16.msra.mxu0 %v16792_v24 }
0x13b2   :  { %13955 = vmatprep.subr.bf16.mxu1 %v16814_v35  ;;  %14042 = vmatprep.subr.bf16.mxu0 %v16816_v47 }
0x13b5   :  { %13957 = vmatpush3.bf16.msra.mxu1 %v16814_v35  ;;  %14044 = vmatpush3.bf16.msra.mxu0 %v16816_v47 }
0x13b6   :  { %13959 = vmatprep.subr.bf16.mxu1 %v16835_v33  ;;  %14046 = vmatprep.subr.bf16.mxu0 %v16837_v45 }
0x13b9   :  { %13961 = vmatpush3.bf16.msra.mxu1 %v16835_v33  ;;  %14048 = vmatpush3.bf16.msra.mxu0 %v16837_v45 }
0x13ba   :  { %13963 = vmatprep.subr.bf16.mxu1 %v16855_v58  ;;  %14050 = vmatprep.subr.bf16.mxu0 %v16857_v2 }
0x13bd   :  { %13965 = vmatpush3.bf16.msra.mxu1 %v16855_v58  ;;  %14052 = vmatpush3.bf16.msra.mxu0 %v16857_v2 }
0x13be   :  { %13967 = vmatprep.subr.bf16.mxu1 %v16875_v34  ;;  %14054 = vmatprep.subr.bf16.mxu0 %v16877_v53 }
0x13c1   :  { %13969 = vmatpush3.bf16.msra.mxu1 %v16875_v34  ;;  %14056 = vmatpush3.bf16.msra.mxu0 %v16877_v53 }
0x13c2   :  { %13971 = vmatprep.subr.bf16.mxu1 %v16895_v63  ;;  %14058 = vmatprep.subr.bf16.mxu0 %v16897_v3 }
0x13c5   :  { %13973 = vmatpush3.bf16.msra.mxu1 %v16895_v63  ;;  %14060 = vmatpush3.bf16.msra.mxu0 %v16897_v3 }
0x13c6   :  { %13975 = vmatprep.subr.bf16.mxu1 %v16909_v4  ;;  %14061 = vmatprep.subr.bf16.mxu0 %v20758_v26 }
0x13c8   :  { %12616 = vmatmul.mubr.f32.vlgmr.msra.gmra.mrb[22].mxu0 %v16534_v46 }
0x13c9   :  { %13977 = vmatpush3.bf16.msra.mxu1 %v16909_v4  ;;  %12622 = vmatprep.mubr.msk.f32.mxu0 %vm15499_vm0, %v20756_v27 }
0x13ca   :  { %13978 = vmatprep.subr.bf16.mxu1 %v20758_v26 }
0x13cc   :  { %12534 = vmatmul.mubr.f32.vlgmr.msra.gmra.mrb[26].mxu1 %v16534_v46 }
0x13cd   :  { %12540 = vmatprep.mubr.msk.f32.mxu1 %vm15499_vm0, %v20756_v27 }
0x147b   :  { %v16923_v61 = vpop.f32.mrb[20].mxu0 }
0x147c   :  { %20793 = vst [vmem:[#allocation15_spill] sm:$0xff] %v16923_v61  ;;  %v16925_v17 = vpop.f32.mrb[21].mxu0 }
0x147d   :  { %20794 = vst [vmem:[#allocation16_spill] sm:$0xff] %v16925_v17 }
0x147f   :  { %v16927_v25 = vpop.f32.mrb[24].mxu1 }
0x1480   :  { %20795 = vst [vmem:[#allocation17_spill] sm:$0xff] %v16927_v25  ;;  %v16929_v57 = vpop.f32.mrb[25].mxu1 }
0x149b   :  { %v16931_v62 = vpop.f32.mrb[22].mxu0 }
0x149c   :  { %v3680_v39 = vmul.f32 %v16931_v62, %v16931_v62  ;;  %v16935_v55 = vpop.f32.mrb[23].mxu0 }
0x149d   :  { %v3679_v46 = vmul.f32 %v16935_v55, %v16935_v55 }
0x149f   :  { %v16939_v6 = vpop.f32.mrb[26].mxu1  ;;  %v15169_v21 = vpack.i.bf16 %v3680_v39, %v3679_v46 }
0x14a0   :  { %v3183_v43 = vmul.f32 %v16939_v6, %v16939_v6  ;;  %v16943_v11 = vpop.f32.mrb[27].mxu1 }
0x14a1   :  { %v3182_v60 = vmul.f32 %v16943_v11, %v16943_v11  ;;  %15170 = vrot.lane.b32.xlu1 %v15169_v21, %s15501_s24 }
0x14a3   :  { %v15174_v0 = vpack.i.bf16 %v3183_v43, %v3182_v60 }
0x14a5   :  { %15175 = vrot.lane.b32.xlu0 %v15174_v0, %s15501_s24 }
0x1513   :  { %v15171_v19 = vpop.permute.xlu1 %15170 }
0x1514   :  { %v15173_v52 = vunpack.i.h.bf16 %v15171_v19  ;;  %v15172_v22 = vunpack.i.l.bf16 %v15171_v19 }
0x1516   :  { %v3690_v16 = vsel %vm163_vm1, %v16931_v62, %v15173_v52  ;;  %v3689_v39 = vsel %vm163_vm1, %v16935_v55, %v15172_v22 }
0x1517   :  { %v15176_v46 = vpop.permute.xlu0 %15175  ;;  %v14062_v27 = vpack.c.bf16 %v3690_v16, %v3689_v39 }
0x1518   :  { %v15178_v26 = vunpack.i.h.bf16 %v15176_v46  ;;  %v15177_v61 = vunpack.i.l.bf16 %v15176_v46 }
0x1519   :  { %14063 = vmatpush3.bf16.msra.mxu0 %v14062_v27 }
0x151a   :  { %v3193_v21 = vsel %vm163_vm1, %v16939_v6, %v15178_v26  ;;  %v3192_v43 = vsel %vm163_vm1, %v16943_v11, %v15177_v61 }
0x151b   :  { %v13979_v60 = vpack.c.bf16 %v3193_v21, %v3192_v43 }
0x151c   :  { %12623 = vmatmul.mubr.msk.f32.vlgmr.msra.gmra.mrb[24].mxu0 %vm166_vm2, %v16581_v44 }
0x151d   :  { %13980 = vmatpush3.bf16.msra.mxu1 %v13979_v60  ;;  %12627 = vmatprep.mubr.msk.f32.mxu0 %vm260_vm3, %v16588_v1 }
0x1520   :  { %12541 = vmatmul.mubr.msk.f32.vlgmr.msra.gmra.mrb[28].mxu1 %vm166_vm2, %v16581_v44 }
0x1521   :  { %12545 = vmatprep.mubr.msk.f32.mxu1 %vm260_vm3, %v16588_v1 }
0x15ef   :  { %v3757_v27 = vpop.f32.mrb[24].mxu0 }
0x15f0   :  { %v3761_v0 = vmul.f32 0.25, %v3757_v27  ;;  %v12624_v26 = vpop.f32.mrb[25].mxu0 }
0x15f2   :  { %v3762_v19 = vmul.f32 %v3761_v0, %v3761_v0 }
0x15f3   :  { %v3260_v52 = vpop.f32.mrb[28].mxu1 }
0x15f4   :  { %v3264_v61 = vmul.f32 0.25, %v3260_v52  ;;  %v12542_v22 = vpop.f32.mrb[29].mxu1  ;;  %3764 = vrot.lane.b32.xlu1 %v3762_v19, %s15501_s24 }
0x15f6   :  { %v3265_v16 = vmul.f32 %v3264_v61, %v3264_v61 }
0x15f8   :  { %3267 = vrot.lane.b32.xlu0 %v3265_v16, %s15501_s24 }
0x1666   :  { %v3765_v39 = vpop.permute.xlu1 %3764 }
0x1667   :  { %v3767_v46 = vsub.f32 %v3761_v0, %v3765_v39 }
0x1669   :  { %v3768_v21 = vmax.f32 %v3767_v46, 0.0 }
0x166a   :  { %v3268_v43 = vpop.permute.xlu0 %3267 }
0x166b   :  { %v3769_v44 = vadd.f32 1e-05, %v3768_v21  ;;  %v3270_v60 = vsub.f32 %v3264_v61, %v3268_v43 }
0x166d   :  { %15267 = vrsqrt.f32 %v3769_v44  ;;  %v3271_v1 = vmax.f32 %v3270_v60, 0.0 }
0x166f   :  { %v3272_v25 = vadd.f32 1e-05, %v3271_v1 }
0x1671   :  { %15269 = vrsqrt.f32 %v3272_v25 }
0x1677   :  { %v15268_v27 = vpop.eup %15267 }
0x1678   :  { %3772 = vrot.lane.b32.xlu1 %v15268_v27, %s15502_s18 }
0x167b   :  { %v15270_v26 = vpop.eup %15269 }
0x167c   :  { %3275 = vrot.lane.b32.xlu0 %v15270_v26, %s15502_s18 }
0x16ea   :  { %v3773_v19 = vpop.permute.xlu1 %3772 }
0x16eb   :  { %v3775_v52 = vmul.f32 %v3773_v19, %v3761_v0 }
0x16ed   :  { %3777 = vrot.lane.b32.xlu1 %v3775_v52, %s15501_s24 }
0x16ee   :  { %v3276_v22 = vpop.permute.xlu0 %3275 }
0x16ef   :  { %v3278_v16 = vmul.f32 %v3276_v22, %v3264_v61 }
0x16f1   :  { %3280 = vrot.lane.b32.xlu0 %v3278_v16, %s15501_s24 }
0x175f   :  { %v3778_v39 = vpop.permute.xlu1 %3777 }
0x1760   :  { %v3780_v46 = vsel %vm163_vm1, %v3773_v19, %v3778_v39 }
0x1761   :  { %12625 = vmatprep.subr.msk.mxu0 %vm267_vm4, %v3780_v46 }
0x1762   :  { %12626 = vmatpush3.msk.msra.mxu0 %vm267_vm4, %v3780_v46 }
0x1763   :  { %v3281_v25 = vpop.permute.xlu0 %3280  ;;  %12628 = vmatmul.mubr.msk.f32.vlgmr.msra.gmra.mrb[26].mxu0 %vm260_vm3, %v16608_v20  ;;  %14066 = vmatprep.subr.msk.bf16.mxu0 %vm15832_vm5, %v16727_v13 }
0x1764   :  { %v3283_v0 = vsel %vm163_vm1, %v3276_v22, %v3281_v25 }
0x1765   :  { %12543 = vmatprep.subr.msk.mxu1 %vm267_vm4, %v3283_v0 }
0x1766   :  { %12544 = vmatpush3.msk.msra.mxu1 %vm267_vm4, %v3283_v0 }
0x1767   :  { %12546 = vmatmul.mubr.msk.f32.vlgmr.msra.gmra.mrb[30].mxu1 %vm260_vm3, %v16608_v20  ;;  %13983 = vmatprep.subr.msk.bf16.mxu1 %vm15832_vm5, %v16736_v28 }
0x1769   :  { %14069 = vmatpush3.bf16.xpose.msk.msra.mxu0 %vm15832_vm5, %v16727_v13 }
0x176a   :  { %14072 = vmatprep.subr.msk.bf16.mxu0 %vm15832_vm5, %v16765_v9 }
0x176d   :  { %13986 = vmatpush3.bf16.xpose.msk.msra.mxu1 %vm15832_vm5, %v16736_v28 }
0x176e   :  { %13989 = vmatprep.subr.msk.bf16.mxu1 %vm15832_vm5, %v16790_v41 }
0x1771   :  { %14075 = vmatpush3.bf16.xpose.msk.msra.mxu0 %vm15832_vm5, %v16765_v9 }
0x1772   :  { %14078 = vmatprep.subr.msk.bf16.mxu0 %vm15832_vm5, %v16792_v24 }
0x1775   :  { %13992 = vmatpush3.bf16.xpose.msk.msra.mxu1 %vm15832_vm5, %v16790_v41 }
0x1776   :  { %13995 = vmatprep.subr.msk.bf16.mxu1 %vm15832_vm5, %v16814_v35 }
0x1779   :  { %14081 = vmatpush3.bf16.xpose.msk.msra.mxu0 %vm15832_vm5, %v16792_v24 }
0x177a   :  { %14084 = vmatprep.subr.msk.bf16.mxu0 %vm15832_vm5, %v16816_v47 }
0x177d   :  { %13998 = vmatpush3.bf16.xpose.msk.msra.mxu1 %vm15832_vm5, %v16814_v35 }
0x177e   :  { %14001 = vmatprep.subr.msk.bf16.mxu1 %vm15832_vm5, %v16835_v33 }
0x1781   :  { %14087 = vmatpush3.bf16.xpose.msk.msra.mxu0 %vm15832_vm5, %v16816_v47 }
0x1782   :  { %14090 = vmatprep.subr.msk.bf16.mxu0 %vm15832_vm5, %v16837_v45 }
0x1785   :  { %14004 = vmatpush3.bf16.xpose.msk.msra.mxu1 %vm15832_vm5, %v16835_v33  ;;  %v10517_v33 = vld [vmem:[%s20740_s0 + $0x480] sm:$0xff] }
0x1786   :  { %14007 = vmatprep.subr.msk.bf16.mxu1 %vm15832_vm5, %v16855_v58 }
0x1789   :  { %14093 = vmatpush3.bf16.xpose.msk.msra.mxu0 %vm15832_vm5, %v16837_v45  ;;  %v10518_v45 = vld [vmem:[%s20740_s0 + $0x488] sm:$0xff] }
0x178a   :  { %14096 = vmatprep.subr.msk.bf16.mxu0 %vm15832_vm5, %v16857_v2 }
0x178d   :  { %14010 = vmatpush3.bf16.xpose.msk.msra.mxu1 %vm15832_vm5, %v16855_v58  ;;  %v17091_v58 = vpack.c.bf16 %v10518_v45, %v10517_v33 }
0x178e   :  { %14013 = vmatprep.subr.msk.bf16.mxu1 %vm15832_vm5, %v16875_v34 }
0x1791   :  { %14099 = vmatpush3.bf16.xpose.msk.msra.mxu0 %vm15832_vm5, %v16857_v2  ;;  %v10479_v2 = vld [vmem:[%s20740_s0 + $0x400] sm:$0xff] }
0x1792   :  { %14102 = vmatprep.subr.msk.bf16.mxu0 %vm15832_vm5, %v16877_v53 }
0x1795   :  { %14016 = vmatpush3.bf16.xpose.msk.msra.mxu1 %vm15832_vm5, %v16875_v34  ;;  %v10480_v34 = vld [vmem:[%s20740_s0 + $0x408] sm:$0xff] }
0x1796   :  { %14019 = vmatprep.subr.msk.bf16.mxu1 %vm15832_vm5, %v16895_v63 }
0x1799   :  { %14105 = vmatpush3.bf16.xpose.msk.msra.mxu0 %vm15832_vm5, %v16877_v53  ;;  %v17100_v53 = vpack.c.bf16 %v10480_v34, %v10479_v2 }
0x179a   :  { %14108 = vmatprep.subr.msk.bf16.mxu0 %vm15832_vm5, %v16897_v3 }
0x179d   :  { %14022 = vmatpush3.bf16.xpose.msk.msra.mxu1 %vm15832_vm5, %v16895_v63 }
0x179e   :  { %14025 = vmatprep.subr.msk.bf16.mxu1 %vm15832_vm5, %v16909_v4 }
0x17a1   :  { %14111 = vmatpush3.bf16.xpose.msk.msra.mxu0 %vm15832_vm5, %v16897_v3 }
0x17a2   :  { %14196 = vmatprep.subr.bf16.mxu0 %v17091_v58 }
0x17a5   :  { %14028 = vmatpush3.bf16.xpose.msk.msra.mxu1 %vm15832_vm5, %v16909_v4 }
0x17a6   :  { %14113 = vmatprep.subr.bf16.mxu1 %v17100_v53 }
0x1836   :  { %v12629_v20 = vpop.f32.mrb[26].mxu0 }
0x1837   :  { %v3860_v13 = vmul.f32 %v12629_v20, %v16931_v62  ;;  %3865 = vrot.lane.b32.xlu0 %v12629_v20, %s15502_s18  ;;  %v3850_v28 = vpop.f32.mrb[27].mxu0 }
0x1838   :  { %v3859_v9 = vmul.f32 %v3850_v28, %v16935_v55  ;;  %3863 = vrot.lane.b32.xlu1 %v3850_v28, %s15502_s18 }
0x183a   :  { %v12547_v41 = vpop.f32.mrb[30].mxu1 }
0x183b   :  { %v3363_v24 = vmul.f32 %v12547_v41, %v16939_v6  ;;  %v3353_v35 = vpop.f32.mrb[31].mxu1  ;;  %3368 = vrot.lane.b32.xlu0 %v12547_v41, %s15502_s18 }
0x183c   :  { %v3362_v47 = vmul.f32 %v3353_v35, %v16943_v11  ;;  %3366 = vrot.lane.b32.xlu1 %v3353_v35, %s15502_s18 }
0x18a9   :  { %v3866_v63 = vpop.permute.xlu0 %3865 }
0x18aa   :  { %v3870_v3 = vsub.f32 %v3860_v13, %v3866_v63  ;;  %v3864_v4 = vpop.permute.xlu1 %3863 }
0x18ab   :  { %v3869_v62 = vsub.f32 %v3859_v9, %v3864_v4 }
0x18ac   :  { %v3872_v55 = vmul.f32 %v3870_v3, %v15940_v12 }
0x18ad   :  { %v3871_v6 = vmul.f32 %v3869_v62, %v15938_v8  ;;  %v3369_v11 = vpop.permute.xlu0 %3368 }
0x18ae   :  { %v3874_v61 = vadd.f32 %v3872_v55, %v15942_v15  ;;  %v3373_v21 = vsub.f32 %v3363_v24, %v3369_v11  ;;  %v3367_v43 = vpop.permute.xlu1 %3366 }
0x18af   :  { %v3873_v44 = vadd.f32 %v3871_v6, %v15944_v18  ;;  %v3372_v60 = vsub.f32 %v3362_v47, %v3367_v43 }
0x18b0   :  { %v3876_v1 = vsel %vm163_vm1, %v3874_v61, -inf  ;;  %v3375_v27 = vmul.f32 %v3373_v21, %v15940_v12 }
0x18b1   :  { %v3875_v26 = vsel %vm163_vm1, %v3873_v44, -inf  ;;  %v3374_v19 = vmul.f32 %v3372_v60, %v15938_v8 }
0x18b2   :  { %v3877_v52 = vmax.f32 %v3875_v26, %v3876_v1  ;;  %v3377_v22 = vadd.f32 %v3375_v27, %v15942_v15 }
0x18b3   :  { %v3376_v16 = vadd.f32 %v3374_v19, %v15944_v18 }
0x18b4   :  { %v3878_v39 = vrot.slane %v3877_v52, 4  ;;  %v3379_v46 = vsel %vm163_vm1, %v3377_v22, -inf }
0x18b5   :  { %v3378_v25 = vsel %vm163_vm1, %v3376_v16, -inf }
0x18b6   :  { %v3879_v0 = vmax.f32 %v3877_v52, %v3878_v39  ;;  %v3380_v20 = vmax.f32 %v3378_v25, %v3379_v46 }
0x18b8   :  { %v3880_v13 = vrot.slane %v3879_v0, 2  ;;  %v3381_v28 = vrot.slane %v3380_v20, 4 }
0x18ba   :  { %v3881_v9 = vmax.f32 %v3879_v0, %v3880_v13  ;;  %v3382_v41 = vmax.f32 %v3380_v20, %v3381_v28 }
0x18bc   :  { %v3882_v24 = vrot.slane %v3881_v9, 1  ;;  %v3383_v35 = vrot.slane %v3382_v41, 2 }
0x18be   :  { %v3883_v47 = vmax.f32 %v3881_v9, %v3882_v24  ;;  %v3384_v33 = vmax.f32 %v3382_v41, %v3383_v35  ;;  %v10519_v35 = vld [vmem:[%s20740_s0 + $0x490] sm:$0xff] }
0x18c0   :  { %v3884_v45 = vsub.f32 %v3873_v44, %v3883_v47  ;;  %v3885_v2 = vsub.f32 %v3874_v61, %v3883_v47  ;;  %v3385_v34 = vrot.slane %v3384_v33, 1  ;;  %v10520_v47 = vld [vmem:[%s20740_s0 + $0x498] sm:$0xff] }
0x18c2   :  { %v3886_v63 = vmul.f32 1.442695, %v3884_v45  ;;  %v3888_v3 = vmul.f32 1.442695, %v3885_v2  ;;  %v3386_v4 = vmax.f32 %v3384_v33, %v3385_v34  ;;  %v17129_v34 = vpack.c.bf16 %v10520_v47, %v10519_v35  ;;  %v10490_v35 = vld [vmem:[%s20740_s0 + $0x458] sm:$0xff]  ;;  %v10529_v47 = vld [vmem:[%s20740_s0 + $0x4e0] sm:$0xff] }
0x18c4   :  { %15271 = vpow2.f32 %v3886_v63  ;;  %v3387_v62 = vsub.f32 %v3376_v16, %v3386_v4  ;;  %v3388_v55 = vsub.f32 %v3377_v22, %v3386_v4  ;;  %v10481_v63 = vld [vmem:[%s20740_s0 + $0x410] sm:$0xff]  ;;  %v10521_v4 = vld [vmem:[%s20740_s0 + $0x4a0] sm:$0xff] }
0x18c5   :  { %15273 = vpow2.f32 %v3888_v3  ;;  %v10482_v3 = vld [vmem:[%s20740_s0 + $0x418] sm:$0xff] }
0x18c6   :  { %v3389_v6 = vmul.f32 1.442695, %v3387_v62  ;;  %v3391_v11 = vmul.f32 1.442695, %v3388_v55  ;;  %v10522_v62 = vld [vmem:[%s20740_s0 + $0x4a8] sm:$0xff] }
0x18c8   :  { %15275 = vpow2.f32 %v3389_v6 }
0x18c9   :  { %15277 = vpow2.f32 %v3391_v11 }
0x18ce   :  { %v15272_v21 = vpop.eup %15271 }
0x18cf   :  { %v15274_v43 = vpop.eup %15273  ;;  %v3890_v60 = vsel %vm163_vm1, %v15272_v21, 0.0 }
0x18d0   :  { %v3891_v1 = vsel %vm163_vm1, %v15274_v43, 0.0 }
0x18d1   :  { %v3892_v44 = vadd.f32 %v3891_v1, %v3890_v60  ;;  %v17161_v60 = vpack.c.bf16 %v10522_v62, %v10521_v4  ;;  %v10483_v1 = vld [vmem:[%s20740_s0 + $0x420] sm:$0xff]  ;;  %v10492_v62 = vld [vmem:[%s20740_s0 + $0x468] sm:$0xff] }
0x18d2   :  { %v15276_v61 = vpop.eup %15275  ;;  %v10491_v4 = vld [vmem:[%s20740_s0 + $0x460] sm:$0xff] }
0x18d3   :  { %v15278_v27 = vpop.eup %15277  ;;  %v3893_v26 = vrot.slane %v3892_v44, 4  ;;  %v3393_v19 = vsel %vm163_vm1, %v15276_v61, 0.0 }
0x18d4   :  { %v3394_v52 = vsel %vm163_vm1, %v15278_v27, 0.0 }
0x18d5   :  { %v3894_v22 = vadd.f32 %v3893_v26, %v3892_v44  ;;  %v3395_v16 = vadd.f32 %v3394_v52, %v3393_v19  ;;  %v10484_v44 = vld [vmem:[%s20740_s0 + $0x428] sm:$0xff]  ;;  %v10485_v52 = vld [vmem:[%s20740_s0 + $0x430] sm:$0xff] }
0x18d6   :  { %v17183_v26 = vpack.c.bf16 %v10484_v44, %v10483_v1  ;;  %v10532_v1 = vld [vmem:[%s20740_s0 + $0x4f8] sm:$0xff]  ;;  %v17264_v44 = vpack.c.bf16 %v10492_v62, %v10491_v4 }
0x18d7   :  { %v3396_v39 = vrot.slane %v3395_v16, 4  ;;  %v3895_v46 = vrot.slane %v3894_v22, 2 }
0x18d9   :  { %v3397_v25 = vadd.f32 %v3396_v39, %v3395_v16  ;;  %v3896_v0 = vadd.f32 %v3895_v46, %v3894_v22  ;;  %v10486_v22 = vld [vmem:[%s20740_s0 + $0x438] sm:$0xff]  ;;  %v10525_v16 = vld [vmem:[%s20740_s0 + $0x4c0] sm:$0xff]  ;;  %v10526_v39 = vld [vmem:[%s20740_s0 + $0x4c8] sm:$0xff] }
0x18da   :  { %v17204_v46 = vpack.c.bf16 %v10486_v22, %v10485_v52  ;;  %v10494_v52 = vld [vmem:[%s20740_s0 + $0x478] sm:$0xff] }
0x18db   :  { %v3897_v20 = vrot.slane %v3896_v0, 1  ;;  %v3398_v13 = vrot.slane %v3397_v25, 2 }
0x18dd   :  { %v3898_v28 = vadd.f32 %v3897_v20, %v3896_v0  ;;  %v3399_v9 = vadd.f32 %v3398_v13, %v3397_v25  ;;  %v17206_v25 = vpack.c.bf16 %v10526_v39, %v10525_v16  ;;  %v10487_v0 = vld [vmem:[%s20740_s0 + $0x440] sm:$0xff]  ;;  %v10488_v20 = vld [vmem:[%s20740_s0 + $0x448] sm:$0xff]  ;;  %v10527_v13 = vld [vmem:[%s20740_s0 + $0x4d0] sm:$0xff]  ;;  %v20798_v16 = vmov 0.0|0.0  }
0x18de   :  { %v17287_v39 = vld [vmem:[%s20741_s1 + $0x8] sm:$0xff] }
0x18df   :  { %15279 = vrcp.f32 %v3898_v28  ;;  %v3400_v41 = vrot.slane %v3399_v9, 1  ;;  %v10528_v28 = vld [vmem:[%s20740_s0 + $0x4d8] sm:$0xff] }
0x18e1   :  { %v3401_v24 = vadd.f32 %v3400_v41, %v3399_v9  ;;  %v17224_v9 = vpack.c.bf16 %v10488_v20, %v10487_v0  ;;  %v17226_v41 = vpack.c.bf16 %v10528_v28, %v10527_v13  ;;  %v20799_v0 = vmov 0.0  }
0x18e3   :  { %15281 = vrcp.f32 %v3401_v24  ;;  %v10489_v24 = vld [vmem:[%s20740_s0 + $0x450] sm:$0xff] }
0x18e9   :  { %v15280_v33 = vpop.eup %15279 }
0x18ea   :  { %v17125_v45 = vmul.f32 %v15280_v33, %v15272_v21  ;;  %v17127_v2 = vmul.f32 %v15280_v33, %v15274_v43  ;;  %v17155_v21 = vld [vmem:[%s20741_s1] sm:$0xff]  ;;  %v17159_v43 = vpack.c.bf16 %v10482_v3, %v10481_v63  ;;  %v10530_v33 = vld [vmem:[%s20740_s0 + $0x4e8] sm:$0xff]  ;;  %v17244_v63 = vpack.c.bf16 %v10490_v35, %v10489_v24 }
0x18eb   :  { %v17246_v3 = vpack.c.bf16 %v10530_v33, %v10529_v47 }
0x18ec   :  { %20796 = vst [vmem:[#allocation18_spill] sm:$0xff] %v17127_v2  ;;  %12662 = vmatprep.mubr.msk.f32.mxu0 %vm163_vm1, %v17125_v45  ;;  %v3902_v42 = vsel %vm163_vm1, %v17125_v45, 0.0 }
0x18ed   :  { %v15282_v55 = vpop.eup %15281  ;;  %12663 = vmatmul.mubr.msk.f32.vlgmr.msra.gmra.mrb[28].mxu0 %vm163_vm1, %v17127_v2 }
0x18ee   :  { %14198 = vmatpush3.bf16.msra.mxu0 %v17091_v58  ;;  %v17148_v6 = vmul.f32 %v15282_v55, %v15276_v61  ;;  %v17150_v11 = vmul.f32 %v15282_v55, %v15278_v27  ;;  %12779 = vmatprep.mubr.f32.mxu0 %v17155_v21  ;;  %v10523_v61 = vld [vmem:[%s20740_s0 + $0x4b0] sm:$0xff]  ;;  %v10524_v27 = vld [vmem:[%s20740_s0 + $0x4b8] sm:$0xff] }
0x18ef   :  { %14200 = vmatprep.subr.bf16.mxu0 %v17129_v34  ;;  %v17185_v19 = vpack.c.bf16 %v10524_v27, %v10523_v61  ;;  %v10531_v55 = vld [vmem:[%s20740_s0 + $0x4f0] sm:$0xff] }
0x18f0   :  { %20797 = vst [vmem:[#allocation19_spill] sm:$0xff] %v17150_v11  ;;  %12580 = vmatprep.mubr.msk.f32.mxu1 %vm163_vm1, %v17148_v6  ;;  %v17266_v61 = vpack.c.bf16 %v10532_v1, %v10531_v55  ;;  %v10493_v27 = vld [vmem:[%s20740_s0 + $0x470] sm:$0xff] }
0x18f1   :  { %12581 = vmatmul.mubr.msk.f32.vlgmr.msra.gmra.mrb[32].mxu1 %vm163_vm1, %v17150_v11  ;;  %v17278_v22 = vpack.c.bf16 %v10494_v52, %v10493_v27 }
0x18f2   :  { %14115 = vmatpush3.bf16.msra.mxu1 %v17100_v53  ;;  %14202 = vmatpush3.bf16.msra.mxu0 %v17129_v34 }
0x18f3   :  { %14117 = vmatprep.subr.bf16.mxu1 %v17159_v43  ;;  %14204 = vmatprep.subr.bf16.mxu0 %v17161_v60 }
0x18f4   :  { %12697 = vmatprep.mubr.f32.mxu1 %v17155_v21 }
0x18f6   :  { %14119 = vmatpush3.bf16.msra.mxu1 %v17159_v43  ;;  %14206 = vmatpush3.bf16.msra.mxu0 %v17161_v60 }
0x18f7   :  { %14121 = vmatprep.subr.bf16.mxu1 %v17183_v26  ;;  %14208 = vmatprep.subr.bf16.mxu0 %v17185_v19 }
0x18fa   :  { %14123 = vmatpush3.bf16.msra.mxu1 %v17183_v26  ;;  %14210 = vmatpush3.bf16.msra.mxu0 %v17185_v19 }
0x18fb   :  { %14125 = vmatprep.subr.bf16.mxu1 %v17204_v46  ;;  %14212 = vmatprep.subr.bf16.mxu0 %v17206_v25 }
0x18fe   :  { %14127 = vmatpush3.bf16.msra.mxu1 %v17204_v46  ;;  %14214 = vmatpush3.bf16.msra.mxu0 %v17206_v25 }
0x18ff   :  { %14129 = vmatprep.subr.bf16.mxu1 %v17224_v9  ;;  %14216 = vmatprep.subr.bf16.mxu0 %v17226_v41 }
0x1902   :  { %14131 = vmatpush3.bf16.msra.mxu1 %v17224_v9  ;;  %14218 = vmatpush3.bf16.msra.mxu0 %v17226_v41 }
0x1903   :  { %14133 = vmatprep.subr.bf16.mxu1 %v17244_v63  ;;  %14220 = vmatprep.subr.bf16.mxu0 %v17246_v3 }
0x1906   :  { %14135 = vmatpush3.bf16.msra.mxu1 %v17244_v63  ;;  %14222 = vmatpush3.bf16.msra.mxu0 %v17246_v3 }
0x1907   :  { %14137 = vmatprep.subr.bf16.mxu1 %v17264_v44  ;;  %14224 = vmatprep.subr.bf16.mxu0 %v17266_v61 }
0x190a   :  { %14139 = vmatpush3.bf16.msra.mxu1 %v17264_v44  ;;  %14226 = vmatpush3.bf16.msra.mxu0 %v17266_v61 }
0x190b   :  { %14141 = vmatprep.subr.bf16.mxu1 %v17278_v22  ;;  %14227 = vmatprep.subr.bf16.mxu0 %v20798_v16 }
0x190d   :  { %12780 = vmatmul.mubr.f32.vlgmr.msra.gmra.mrb[30].mxu0 %v17287_v39 }
0x190e   :  { %14143 = vmatpush3.bf16.msra.mxu1 %v17278_v22  ;;  %12786 = vmatprep.mubr.msk.f32.mxu0 %vm15499_vm0, %v20799_v0 }
0x190f   :  { %14144 = vmatprep.subr.bf16.mxu1 %v20798_v16 }
0x1911   :  { %12698 = vmatmul.mubr.f32.vlgmr.msra.gmra.mrb[34].mxu1 %v17287_v39 }
0x1912   :  { %12704 = vmatprep.mubr.msk.f32.mxu1 %vm15499_vm0, %v20799_v0 }
0x19c0   :  { %v17297_v20 = vpop.f32.mrb[28].mxu0 }
0x19c1   :  { %20800 = vst [vmem:[#allocation20_spill] sm:$0xff] %v17297_v20  ;;  %v17299_v13 = vpop.f32.mrb[29].mxu0 }
0x19c2   :  { %20801 = vst [vmem:[#allocation21_spill] sm:$0xff] %v17299_v13 }
0x19c4   :  { %v17301_v28 = vpop.f32.mrb[32].mxu1 }
0x19c5   :  { %20802 = vst [vmem:[#allocation22_spill] sm:$0xff] %v17301_v28  ;;  %v17303_v24 = vpop.f32.mrb[33].mxu1 }
0x19c6   :  { %20803 = vst [vmem:[#allocation23_spill] sm:$0xff] %v17303_v24 }
0x19e0   :  { %v17305_v35 = vpop.f32.mrb[30].mxu0 }
0x19e1   :  { %v4688_v47 = vmul.f32 %v17305_v35, %v17305_v35  ;;  %v17309_v33 = vpop.f32.mrb[31].mxu0 }
0x19e2   :  { %v4687_v4 = vmul.f32 %v17309_v33, %v17309_v33 }
0x19e4   :  { %v17313_v62 = vpop.f32.mrb[34].mxu1  ;;  %v15179_v55 = vpack.i.bf16 %v4688_v47, %v4687_v4 }
0x19e5   :  { %v4177_v1 = vmul.f32 %v17313_v62, %v17313_v62  ;;  %v17317_v27 = vpop.f32.mrb[35].mxu1 }
0x19e6   :  { %v4176_v52 = vmul.f32 %v17317_v27, %v17317_v27  ;;  %15180 = vrot.lane.b32.xlu1 %v15179_v55, %s15501_s24 }
0x19e8   :  { %v15184_v28 = vpack.i.bf16 %v4177_v1, %v4176_v52 }
0x19ea   :  { %15185 = vrot.lane.b32.xlu0 %v15184_v28, %s15501_s24 }
0x1a58   :  { %v15181_v20 = vpop.permute.xlu1 %15180 }
0x1a59   :  { %v15183_v14 = vunpack.i.h.bf16 %v15181_v20  ;;  %v15182_v48 = vunpack.i.l.bf16 %v15181_v20  ;;  %v17334_v20 = vld [vmem:[%s20743_s3] sm:$0xf] }
0x1a5b   :  { %v4698_v7 = vsel %vm163_vm1, %v17305_v35, %v15183_v14  ;;  %v4697_v47 = vsel %vm163_vm1, %v17309_v33, %v15182_v48 }
0x1a5c   :  { %v15186_v4 = vpop.permute.xlu0 %15185  ;;  %v14228_v31 = vpack.c.bf16 %v4698_v7, %v4697_v47 }
0x1a5d   :  { %v15188_v11 = vunpack.i.h.bf16 %v15186_v4  ;;  %v15187_v2 = vunpack.i.l.bf16 %v15186_v4 }
0x1a5e   :  { %14229 = vmatpush3.bf16.msra.mxu0 %v14228_v31  ;;  %v17341_v31 = vld [vmem:[%s20744_s4] sm:$0xff] }
0x1a5f   :  { %v4187_v55 = vsel %vm163_vm1, %v17313_v62, %v15188_v11  ;;  %v4186_v28 = vsel %vm163_vm1, %v17317_v27, %v15187_v2 }
0x1a60   :  { %v14145_v1 = vpack.c.bf16 %v4187_v55, %v4186_v28 }
0x1a61   :  { %12787 = vmatmul.mubr.msk.f32.vlgmr.msra.gmra.mrb[32].mxu0 %vm166_vm2, %v17334_v20 }
0x1a62   :  { %14146 = vmatpush3.bf16.msra.mxu1 %v14145_v1  ;;  %12791 = vmatprep.mubr.msk.f32.mxu0 %vm260_vm3, %v17341_v31 }
0x1a65   :  { %12705 = vmatmul.mubr.msk.f32.vlgmr.msra.gmra.mrb[36].mxu1 %vm166_vm2, %v17334_v20 }
0x1a66   :  { %12709 = vmatprep.mubr.msk.f32.mxu1 %vm260_vm3, %v17341_v31 }
0x1b34   :  { %v4765_v7 = vpop.f32.mrb[32].mxu0 }
0x1b35   :  { %v4769_v14 = vmul.f32 0.25, %v4765_v7  ;;  %v12788_v48 = vpop.f32.mrb[33].mxu0 }
0x1b37   :  { %v4770_v2 = vmul.f32 %v4769_v14, %v4769_v14 }
0x1b38   :  { %v4254_v11 = vpop.f32.mrb[36].mxu1 }
0x1b39   :  { %v4258_v52 = vmul.f32 0.25, %v4254_v11  ;;  %v12706_v47 = vpop.f32.mrb[37].mxu1  ;;  %4772 = vrot.lane.b32.xlu1 %v4770_v2, %s15501_s24 }
0x1b3b   :  { %v4259_v4 = vmul.f32 %v4258_v52, %v4258_v52 }
0x1b3d   :  { %4261 = vrot.lane.b32.xlu0 %v4259_v4, %s15501_s24 }
0x1bab   :  { %v4773_v55 = vpop.permute.xlu1 %4772 }
0x1bac   :  { %v4775_v28 = vsub.f32 %v4769_v14, %v4773_v55 }
0x1bae   :  { %v4776_v1 = vmax.f32 %v4775_v28, 0.0 }
0x1baf   :  { %v4262_v29 = vpop.permute.xlu0 %4261 }
0x1bb0   :  { %v4777_v38 = vadd.f32 1e-05, %v4776_v1  ;;  %v4264_v51 = vsub.f32 %v4258_v52, %v4262_v29 }
0x1bb2   :  { %15283 = vrsqrt.f32 %v4777_v38  ;;  %v4265_v59 = vmax.f32 %v4264_v51, 0.0  ;;  %v17361_v51 = vld [vmem:[%s20744_s4 + $0x8] sm:$0xff] }
0x1bb4   :  { %v4266_v5 = vadd.f32 1e-05, %v4265_v59 }
0x1bb6   :  { %15285 = vrsqrt.f32 %v4266_v5 }
0x1bbc   :  { %v15284_v7 = vpop.eup %15283 }
0x1bbd   :  { %4780 = vrot.lane.b32.xlu1 %v15284_v7, %s15502_s18 }
0x1bc0   :  { %v15286_v48 = vpop.eup %15285 }
0x1bc1   :  { %4269 = vrot.lane.b32.xlu0 %v15286_v48, %s15502_s18 }
0x1c2f   :  { %v4781_v2 = vpop.permute.xlu1 %4780 }
0x1c30   :  { %v4783_v11 = vmul.f32 %v4781_v2, %v4769_v14 }
0x1c32   :  { %4785 = vrot.lane.b32.xlu1 %v4783_v11, %s15501_s24 }
0x1c33   :  { %v4270_v47 = vpop.permute.xlu0 %4269 }
0x1c34   :  { %v4272_v4 = vmul.f32 %v4270_v47, %v4258_v52 }
0x1c36   :  { %4274 = vrot.lane.b32.xlu0 %v4272_v4, %s15501_s24 }
0x1ca4   :  { %v4786_v55 = vpop.permute.xlu1 %4785 }
0x1ca5   :  { %v4788_v29 = vsel %vm163_vm1, %v4781_v2, %v4786_v55 }
0x1ca6   :  { %12789 = vmatprep.subr.msk.mxu0 %vm267_vm4, %v4788_v29 }
0x1ca7   :  { %12790 = vmatpush3.msk.msra.mxu0 %vm267_vm4, %v4788_v29 }
0x1ca8   :  { %v4275_v5 = vpop.permute.xlu0 %4274  ;;  %12792 = vmatmul.mubr.msk.f32.vlgmr.msra.gmra.mrb[34].mxu0 %vm260_vm3, %v17361_v51  ;;  %14232 = vmatprep.subr.msk.bf16.mxu0 %vm15832_vm5, %v17091_v58 }
0x1ca9   :  { %v4277_v59 = vsel %vm163_vm1, %v4270_v47, %v4275_v5 }
0x1caa   :  { %12707 = vmatprep.subr.msk.mxu1 %vm267_vm4, %v4277_v59 }
0x1cab   :  { %12708 = vmatpush3.msk.msra.mxu1 %vm267_vm4, %v4277_v59 }
0x1cac   :  { %12710 = vmatmul.mubr.msk.f32.vlgmr.msra.gmra.mrb[38].mxu1 %vm260_vm3, %v17361_v51  ;;  %14149 = vmatprep.subr.msk.bf16.mxu1 %vm15832_vm5, %v17100_v53 }
0x1cae   :  { %14235 = vmatpush3.bf16.xpose.msk.msra.mxu0 %vm15832_vm5, %v17091_v58 }
0x1caf   :  { %14238 = vmatprep.subr.msk.bf16.mxu0 %vm15832_vm5, %v17129_v34 }
0x1cb2   :  { %14152 = vmatpush3.bf16.xpose.msk.msra.mxu1 %vm15832_vm5, %v17100_v53 }
0x1cb3   :  { %14155 = vmatprep.subr.msk.bf16.mxu1 %vm15832_vm5, %v17159_v43 }
0x1cb6   :  { %14241 = vmatpush3.bf16.xpose.msk.msra.mxu0 %vm15832_vm5, %v17129_v34 }
0x1cb7   :  { %14244 = vmatprep.subr.msk.bf16.mxu0 %vm15832_vm5, %v17161_v60 }
0x1cba   :  { %14158 = vmatpush3.bf16.xpose.msk.msra.mxu1 %vm15832_vm5, %v17159_v43 }
0x1cbb   :  { %14161 = vmatprep.subr.msk.bf16.mxu1 %vm15832_vm5, %v17183_v26 }
0x1cbe   :  { %14247 = vmatpush3.bf16.xpose.msk.msra.mxu0 %vm15832_vm5, %v17161_v60 }
0x1cbf   :  { %14250 = vmatprep.subr.msk.bf16.mxu0 %vm15832_vm5, %v17185_v19 }
0x1cc2   :  { %14164 = vmatpush3.bf16.xpose.msk.msra.mxu1 %vm15832_vm5, %v17183_v26 }
0x1cc3   :  { %14167 = vmatprep.subr.msk.bf16.mxu1 %vm15832_vm5, %v17204_v46 }
0x1cc6   :  { %14253 = vmatpush3.bf16.xpose.msk.msra.mxu0 %vm15832_vm5, %v17185_v19 }
0x1cc7   :  { %14256 = vmatprep.subr.msk.bf16.mxu0 %vm15832_vm5, %v17206_v25 }
0x1cca   :  { %14170 = vmatpush3.bf16.xpose.msk.msra.mxu1 %vm15832_vm5, %v17204_v46  ;;  %v10593_v46 = vld [vmem:[%s20740_s0 + $0x580] sm:$0xff] }
0x1ccb   :  { %14173 = vmatprep.subr.msk.bf16.mxu1 %vm15832_vm5, %v17224_v9 }
0x1cce   :  { %14259 = vmatpush3.bf16.xpose.msk.msra.mxu0 %vm15832_vm5, %v17206_v25  ;;  %v10594_v25 = vld [vmem:[%s20740_s0 + $0x588] sm:$0xff] }
0x1ccf   :  { %14262 = vmatprep.subr.msk.bf16.mxu0 %vm15832_vm5, %v17226_v41 }
0x1cd2   :  { %14176 = vmatpush3.bf16.xpose.msk.msra.mxu1 %vm15832_vm5, %v17224_v9  ;;  %v17480_v9 = vpack.c.bf16 %v10594_v25, %v10593_v46 }
0x1cd3   :  { %14179 = vmatprep.subr.msk.bf16.mxu1 %vm15832_vm5, %v17244_v63 }
0x1cd6   :  { %14265 = vmatpush3.bf16.xpose.msk.msra.mxu0 %vm15832_vm5, %v17226_v41  ;;  %v10555_v41 = vld [vmem:[%s20740_s0 + $0x500] sm:$0xff] }
0x1cd7   :  { %14268 = vmatprep.subr.msk.bf16.mxu0 %vm15832_vm5, %v17246_v3 }
0x1cda   :  { %14182 = vmatpush3.bf16.xpose.msk.msra.mxu1 %vm15832_vm5, %v17244_v63  ;;  %v10556_v63 = vld [vmem:[%s20740_s0 + $0x508] sm:$0xff] }
0x1cdb   :  { %14185 = vmatprep.subr.msk.bf16.mxu1 %vm15832_vm5, %v17264_v44 }
0x1cde   :  { %14271 = vmatpush3.bf16.xpose.msk.msra.mxu0 %vm15832_vm5, %v17246_v3  ;;  %v17489_v3 = vpack.c.bf16 %v10556_v63, %v10555_v41 }
0x1cdf   :  { %14274 = vmatprep.subr.msk.bf16.mxu0 %vm15832_vm5, %v17266_v61 }
0x1ce2   :  { %14188 = vmatpush3.bf16.xpose.msk.msra.mxu1 %vm15832_vm5, %v17264_v44 }
0x1ce3   :  { %14191 = vmatprep.subr.msk.bf16.mxu1 %vm15832_vm5, %v17278_v22 }
0x1ce6   :  { %14277 = vmatpush3.bf16.xpose.msk.msra.mxu0 %vm15832_vm5, %v17266_v61 }
0x1ce7   :  { %14362 = vmatprep.subr.bf16.mxu0 %v17480_v9 }
0x1cea   :  { %14194 = vmatpush3.bf16.xpose.msk.msra.mxu1 %vm15832_vm5, %v17278_v22 }
0x1ceb   :  { %14279 = vmatprep.subr.bf16.mxu1 %v17489_v3 }
0x1d7b   :  { %v12793_v38 = vpop.f32.mrb[34].mxu0 }
0x1d7c   :  { %v4868_v58 = vmul.f32 %v12793_v38, %v17305_v35  ;;  %4873 = vrot.lane.b32.xlu0 %v12793_v38, %s15502_s18  ;;  %v4858_v53 = vpop.f32.mrb[35].mxu0 }
0x1d7d   :  { %v4867_v34 = vmul.f32 %v4858_v53, %v17309_v33  ;;  %4871 = vrot.lane.b32.xlu1 %v4858_v53, %s15502_s18 }
0x1d7f   :  { %v12711_v43 = vpop.f32.mrb[38].mxu1 }
0x1d80   :  { %v4357_v60 = vmul.f32 %v12711_v43, %v17313_v62  ;;  %v4347_v26 = vpop.f32.mrb[39].mxu1  ;;  %4362 = vrot.lane.b32.xlu0 %v12711_v43, %s15502_s18 }
0x1d81   :  { %v4356_v19 = vmul.f32 %v4347_v26, %v17317_v27  ;;  %4360 = vrot.lane.b32.xlu1 %v4347_v26, %s15502_s18 }
0x1dee   :  { %v4874_v44 = vpop.permute.xlu0 %4873 }
0x1def   :  { %v4878_v61 = vsub.f32 %v4868_v58, %v4874_v44  ;;  %v4872_v22 = vpop.permute.xlu1 %4871 }
0x1df0   :  { %v4877_v35 = vsub.f32 %v4867_v34, %v4872_v22 }
0x1df1   :  { %v4880_v33 = vmul.f32 %v4878_v61, %v15940_v12 }
0x1df2   :  { %v4879_v62 = vmul.f32 %v4877_v35, %v15938_v8  ;;  %v4363_v27 = vpop.permute.xlu0 %4362 }
0x1df3   :  { %v4882_v14 = vadd.f32 %v4880_v33, %v15942_v15  ;;  %v4367_v52 = vsub.f32 %v4357_v60, %v4363_v27  ;;  %v4361_v28 = vpop.permute.xlu1 %4360 }
0x1df4   :  { %v4881_v1 = vadd.f32 %v4879_v62, %v15944_v18  ;;  %v4366_v7 = vsub.f32 %v4356_v19, %v4361_v28 }
0x1df5   :  { %v4884_v48 = vsel %vm163_vm1, %v4882_v14, -inf  ;;  %v4369_v2 = vmul.f32 %v4367_v52, %v15940_v12 }
0x1df6   :  { %v4883_v11 = vsel %vm163_vm1, %v4881_v1, -inf  ;;  %v4368_v47 = vmul.f32 %v4366_v7, %v15938_v8 }
0x1df7   :  { %v4885_v4 = vmax.f32 %v4883_v11, %v4884_v48  ;;  %v4371_v55 = vadd.f32 %v4369_v2, %v15942_v15 }
0x1df8   :  { %v4370_v29 = vadd.f32 %v4368_v47, %v15944_v18 }
0x1df9   :  { %v4886_v5 = vrot.slane %v4885_v4, 4  ;;  %v4373_v59 = vsel %vm163_vm1, %v4371_v55, -inf }
0x1dfa   :  { %v4372_v38 = vsel %vm163_vm1, %v4370_v29, -inf }
0x1dfb   :  { %v4887_v58 = vmax.f32 %v4885_v4, %v4886_v5  ;;  %v4374_v53 = vmax.f32 %v4372_v38, %v4373_v59 }
0x1dfd   :  { %v4888_v34 = vrot.slane %v4887_v58, 2  ;;  %v4375_v43 = vrot.slane %v4374_v53, 4 }
0x1dff   :  { %v4889_v60 = vmax.f32 %v4887_v58, %v4888_v34  ;;  %v4376_v26 = vmax.f32 %v4374_v53, %v4375_v43 }
0x1e01   :  { %v4890_v19 = vrot.slane %v4889_v60, 1  ;;  %v4377_v46 = vrot.slane %v4376_v26, 2 }
0x1e03   :  { %v4891_v25 = vmax.f32 %v4889_v60, %v4890_v19  ;;  %v4378_v41 = vmax.f32 %v4376_v26, %v4377_v46 }
0x1e05   :  { %v4892_v63 = vsub.f32 %v4881_v1, %v4891_v25  ;;  %v4893_v44 = vsub.f32 %v4882_v14, %v4891_v25  ;;  %v4379_v61 = vrot.slane %v4378_v41, 1 }
0x1e07   :  { %v4894_v22 = vmul.f32 1.442695, %v4892_v63  ;;  %v4896_v35 = vmul.f32 1.442695, %v4893_v44  ;;  %v4380_v33 = vmax.f32 %v4378_v41, %v4379_v61  ;;  %v10595_v41 = vld [vmem:[%s20740_s0 + $0x590] sm:$0xff]  ;;  %v10596_v63 = vld [vmem:[%s20740_s0 + $0x598] sm:$0xff] }
0x1e09   :  { %15287 = vpow2.f32 %v4894_v22  ;;  %v4381_v62 = vsub.f32 %v4370_v29, %v4380_v33  ;;  %v4382_v27 = vsub.f32 %v4371_v55, %v4380_v33  ;;  %v10557_v33 = vld [vmem:[%s20740_s0 + $0x510] sm:$0xff] }
0x1e0a   :  { %15289 = vpow2.f32 %v4896_v35  ;;  %v17518_v35 = vpack.c.bf16 %v10596_v63, %v10595_v41  ;;  %v10566_v41 = vld [vmem:[%s20740_s0 + $0x558] sm:$0xff]  ;;  %v10605_v63 = vld [vmem:[%s20740_s0 + $0x5e0] sm:$0xff] }
0x1e0b   :  { %v4383_v52 = vmul.f32 1.442695, %v4381_v62  ;;  %v4385_v28 = vmul.f32 1.442695, %v4382_v27  ;;  %v10558_v62 = vld [vmem:[%s20740_s0 + $0x518] sm:$0xff]  ;;  %v10597_v27 = vld [vmem:[%s20740_s0 + $0x5a0] sm:$0xff] }
0x1e0d   :  { %15291 = vpow2.f32 %v4383_v52  ;;  %v10598_v52 = vld [vmem:[%s20740_s0 + $0x5a8] sm:$0xff] }
0x1e0e   :  { %15293 = vpow2.f32 %v4385_v28 }
0x1e13   :  { %v15288_v7 = vpop.eup %15287 }
0x1e14   :  { %v15290_v48 = vpop.eup %15289  ;;  %v4898_v2 = vsel %vm163_vm1, %v15288_v7, 0.0 }
0x1e15   :  { %v4899_v11 = vsel %vm163_vm1, %v15290_v48, 0.0 }
0x1e16   :  { %v4900_v1 = vadd.f32 %v4899_v11, %v4898_v2  ;;  %v17543_v2 = vpack.c.bf16 %v10558_v62, %v10557_v33  ;;  %v17545_v11 = vpack.c.bf16 %v10598_v52, %v10597_v27  ;;  %v10567_v27 = vld [vmem:[%s20740_s0 + $0x560] sm:$0xff]  ;;  %v10568_v52 = vld [vmem:[%s20740_s0 + $0x568] sm:$0xff] }
0x1e17   :  { %v15292_v14 = vpop.eup %15291 }
0x1e18   :  { %v15294_v47 = vpop.eup %15293  ;;  %v4901_v4 = vrot.slane %v4900_v1, 4  ;;  %v4387_v5 = vsel %vm163_vm1, %v15292_v14, 0.0 }
0x1e19   :  { %v4388_v29 = vsel %vm163_vm1, %v15294_v47, 0.0 }
0x1e1a   :  { %v4902_v55 = vadd.f32 %v4901_v4, %v4900_v1  ;;  %v4389_v59 = vadd.f32 %v4388_v29, %v4387_v5  ;;  %v10559_v1 = vld [vmem:[%s20740_s0 + $0x520] sm:$0xff]  ;;  %v10600_v4 = vld [vmem:[%s20740_s0 + $0x5b8] sm:$0xff] }
0x1e1c   :  { %v4390_v38 = vrot.slane %v4389_v59, 4  ;;  %v4903_v58 = vrot.slane %v4902_v55, 2 }
0x1e1e   :  { %v4391_v53 = vadd.f32 %v4390_v38, %v4389_v59  ;;  %v4904_v34 = vadd.f32 %v4903_v58, %v4902_v55  ;;  %v10561_v55 = vld [vmem:[%s20740_s0 + $0x530] sm:$0xff]  ;;  %v10562_v59 = vld [vmem:[%s20740_s0 + $0x538] sm:$0xff]  ;;  %v10601_v38 = vld [vmem:[%s20740_s0 + $0x5c0] sm:$0xff] }
0x1e1f   :  { %v10602_v58 = vld [vmem:[%s20740_s0 + $0x5c8] sm:$0xff] }
0x1e20   :  { %v4905_v43 = vrot.slane %v4904_v34, 1  ;;  %v4392_v60 = vrot.slane %v4391_v53, 2 }
0x1e22   :  { %v4906_v26 = vadd.f32 %v4905_v43, %v4904_v34  ;;  %v4393_v19 = vadd.f32 %v4392_v60, %v4391_v53  ;;  %v17588_v53 = vpack.c.bf16 %v10562_v59, %v10561_v55  ;;  %v17590_v34 = vpack.c.bf16 %v10602_v58, %v10601_v38  ;;  %v10563_v43 = vld [vmem:[%s20740_s0 + $0x540] sm:$0xff]  ;;  %v10603_v60 = vld [vmem:[%s20740_s0 + $0x5d0] sm:$0xff]  ;;  %v10570_v55 = vld [vmem:[%s20740_s0 + $0x578] sm:$0xff] }
0x1e24   :  { %15295 = vrcp.f32 %v4906_v26  ;;  %v4394_v46 = vrot.slane %v4393_v19, 1  ;;  %v10604_v26 = vld [vmem:[%s20740_s0 + $0x5d8] sm:$0xff] }
0x1e26   :  { %v4395_v25 = vadd.f32 %v4394_v46, %v4393_v19  ;;  %v17610_v46 = vpack.c.bf16 %v10604_v26, %v10603_v60 }
0x1e28   :  { %15297 = vrcp.f32 %v4395_v25  ;;  %v10565_v25 = vld [vmem:[%s20740_s0 + $0x550] sm:$0xff] }
0x1e29   :  { %v17628_v33 = vpack.c.bf16 %v10566_v41, %v10565_v25 }
0x1e2e   :  { %v15296_v44 = vpop.eup %15295 }
0x1e2f   :  { %v17514_v61 = vmul.f32 %v15296_v44, %v15288_v7  ;;  %v17516_v22 = vmul.f32 %v15296_v44, %v15290_v48  ;;  %v10606_v44 = vld [vmem:[%s20740_s0 + $0x5e8] sm:$0xff] }
0x1e30   :  { %v17630_v62 = vpack.c.bf16 %v10606_v44, %v10605_v63 }
0x1e31   :  { %20804 = vst [vmem:[#allocation24_spill] sm:$0xff] %v17516_v22  ;;  %12826 = vmatprep.mubr.msk.f32.mxu0 %vm163_vm1, %v17514_v61  ;;  %v4910_v45 = vsel %vm163_vm1, %v17514_v61, 0.0 }
0x1e32   :  { %v15298_v28 = vpop.eup %15297  ;;  %12827 = vmatmul.mubr.msk.f32.vlgmr.msra.gmra.mrb[36].mxu0 %vm163_vm1, %v17516_v22 }
0x1e33   :  { %14364 = vmatpush3.bf16.msra.mxu0 %v17480_v9  ;;  %v17537_v7 = vmul.f32 %v15298_v28, %v15292_v14  ;;  %v17539_v48 = vmul.f32 %v15298_v28, %v15294_v47  ;;  %12943 = vmatprep.mubr.f32.mxu0 %v17155_v21  ;;  %v10560_v14 = vld [vmem:[%s20740_s0 + $0x528] sm:$0xff]  ;;  %v10599_v47 = vld [vmem:[%s20740_s0 + $0x5b0] sm:$0xff] }
0x1e34   :  { %14366 = vmatprep.subr.bf16.mxu0 %v17518_v35  ;;  %v17567_v5 = vpack.c.bf16 %v10560_v14, %v10559_v1  ;;  %v17569_v29 = vpack.c.bf16 %v10600_v4, %v10599_v47  ;;  %v10607_v28 = vld [vmem:[%s20740_s0 + $0x5f0] sm:$0xff]  ;;  %v10608_v1 = vld [vmem:[%s20740_s0 + $0x5f8] sm:$0xff]  ;;  %v17648_v14 = vpack.c.bf16 %v10568_v52, %v10567_v27 }
0x1e35   :  { %20805 = vst [vmem:[#allocation25_spill] sm:$0xff] %v17539_v48  ;;  %12744 = vmatprep.mubr.msk.f32.mxu1 %vm163_vm1, %v17537_v7  ;;  %v17650_v47 = vpack.c.bf16 %v10608_v1, %v10607_v28  ;;  %v10569_v4 = vld [vmem:[%s20740_s0 + $0x570] sm:$0xff] }
0x1e36   :  { %12745 = vmatmul.mubr.msk.f32.vlgmr.msra.gmra.mrb[40].mxu1 %vm163_vm1, %v17539_v48  ;;  %v17662_v59 = vpack.c.bf16 %v10570_v55, %v10569_v4 }
0x1e37   :  { %14281 = vmatpush3.bf16.msra.mxu1 %v17489_v3  ;;  %14368 = vmatpush3.bf16.msra.mxu0 %v17518_v35 }
0x1e38   :  { %14283 = vmatprep.subr.bf16.mxu1 %v17543_v2  ;;  %14370 = vmatprep.subr.bf16.mxu0 %v17545_v11 }
0x1e39   :  { %12861 = vmatprep.mubr.f32.mxu1 %v17155_v21  ;;  %v10564_v21 = vld [vmem:[%s20740_s0 + $0x548] sm:$0xff] }
0x1e3a   :  { %v17608_v19 = vpack.c.bf16 %v10564_v21, %v10563_v43 }
0x1e3b   :  { %14285 = vmatpush3.bf16.msra.mxu1 %v17543_v2  ;;  %14372 = vmatpush3.bf16.msra.mxu0 %v17545_v11 }
0x1e3c   :  { %14287 = vmatprep.subr.bf16.mxu1 %v17567_v5  ;;  %14374 = vmatprep.subr.bf16.mxu0 %v17569_v29 }
0x1e3f   :  { %14289 = vmatpush3.bf16.msra.mxu1 %v17567_v5  ;;  %14376 = vmatpush3.bf16.msra.mxu0 %v17569_v29 }
0x1e40   :  { %14291 = vmatprep.subr.bf16.mxu1 %v17588_v53  ;;  %14378 = vmatprep.subr.bf16.mxu0 %v17590_v34 }
0x1e43   :  { %14293 = vmatpush3.bf16.msra.mxu1 %v17588_v53  ;;  %14380 = vmatpush3.bf16.msra.mxu0 %v17590_v34 }
0x1e44   :  { %14295 = vmatprep.subr.bf16.mxu1 %v17608_v19  ;;  %14382 = vmatprep.subr.bf16.mxu0 %v17610_v46 }
0x1e47   :  { %14297 = vmatpush3.bf16.msra.mxu1 %v17608_v19  ;;  %14384 = vmatpush3.bf16.msra.mxu0 %v17610_v46 }
0x1e48   :  { %14299 = vmatprep.subr.bf16.mxu1 %v17628_v33  ;;  %14386 = vmatprep.subr.bf16.mxu0 %v17630_v62 }
0x1e4b   :  { %14301 = vmatpush3.bf16.msra.mxu1 %v17628_v33  ;;  %14388 = vmatpush3.bf16.msra.mxu0 %v17630_v62 }
0x1e4c   :  { %14303 = vmatprep.subr.bf16.mxu1 %v17648_v14  ;;  %14390 = vmatprep.subr.bf16.mxu0 %v17650_v47 }
0x1e4f   :  { %14305 = vmatpush3.bf16.msra.mxu1 %v17648_v14  ;;  %14392 = vmatpush3.bf16.msra.mxu0 %v17650_v47 }
0x1e50   :  { %14307 = vmatprep.subr.bf16.mxu1 %v17662_v59  ;;  %14393 = vmatprep.subr.bf16.mxu0 %v20798_v16 }
0x1e52   :  { %12944 = vmatmul.mubr.f32.vlgmr.msra.gmra.mrb[38].mxu0 %v17287_v39 }
0x1e53   :  { %14309 = vmatpush3.bf16.msra.mxu1 %v17662_v59  ;;  %12950 = vmatprep.mubr.msk.f32.mxu0 %vm15499_vm0, %v20799_v0 }
0x1e54   :  { %14310 = vmatprep.subr.bf16.mxu1 %v20798_v16 }
0x1e56   :  { %12862 = vmatmul.mubr.f32.vlgmr.msra.gmra.mrb[42].mxu1 %v17287_v39 }
0x1e57   :  { %12868 = vmatprep.mubr.msk.f32.mxu1 %vm15499_vm0, %v20799_v0 }
0x1f05   :  { %v17676_v38 = vpop.f32.mrb[36].mxu0 }
0x1f06   :  { %20806 = vst [vmem:[#allocation26_spill] sm:$0xff] %v17676_v38  ;;  %v17678_v58 = vpop.f32.mrb[37].mxu0 }
0x1f07   :  { %20807 = vst [vmem:[#allocation27_spill] sm:$0xff] %v17678_v58 }
0x1f09   :  { %v17680_v43 = vpop.f32.mrb[40].mxu1 }
0x1f0a   :  { %20808 = vst [vmem:[#allocation28_spill] sm:$0xff] %v17680_v43  ;;  %v17682_v21 = vpop.f32.mrb[41].mxu1 }
0x1f0b   :  { %20809 = vst [vmem:[#allocation29_spill] sm:$0xff] %v17682_v21 }
0x1f25   :  { %v17684_v60 = vpop.f32.mrb[38].mxu0 }
0x1f26   :  { %v5682_v26 = vmul.f32 %v17684_v60, %v17684_v60  ;;  %v17688_v25 = vpop.f32.mrb[39].mxu0 }
0x1f27   :  { %v5681_v39 = vmul.f32 %v17688_v25, %v17688_v25 }
0x1f29   :  { %v17692_v41 = vpop.f32.mrb[42].mxu1  ;;  %v15189_v63 = vpack.i.bf16 %v5682_v26, %v5681_v39 }
0x1f2a   :  { %v5185_v44 = vmul.f32 %v17692_v41, %v17692_v41  ;;  %v17696_v27 = vpop.f32.mrb[43].mxu1 }
0x1f2b   :  { %v5184_v52 = vmul.f32 %v17696_v27, %v17696_v27  ;;  %15190 = vrot.lane.b32.xlu1 %v15189_v63, %s15501_s24 }
0x1f2d   :  { %v15194_v28 = vpack.i.bf16 %v5185_v44, %v5184_v52 }
0x1f2f   :  { %15195 = vrot.lane.b32.xlu0 %v15194_v28, %s15501_s24 }
0x1f9d   :  { %v15191_v1 = vpop.permute.xlu1 %15190 }
0x1f9e   :  { %v15193_v4 = vunpack.i.h.bf16 %v15191_v1  ;;  %v15192_v55 = vunpack.i.l.bf16 %v15191_v1 }
0x1fa0   :  { %v5692_v38 = vsel %vm163_vm1, %v17684_v60, %v15193_v4  ;;  %v5691_v26 = vsel %vm163_vm1, %v17688_v25, %v15192_v55 }
0x1fa1   :  { %v15196_v39 = vpop.permute.xlu0 %15195  ;;  %v14394_v43 = vpack.c.bf16 %v5692_v38, %v5691_v26 }
0x1fa2   :  { %v15198_v22 = vunpack.i.h.bf16 %v15196_v39  ;;  %v15197_v48 = vunpack.i.l.bf16 %v15196_v39 }
0x1fa3   :  { %14395 = vmatpush3.bf16.msra.mxu0 %v14394_v43 }
0x1fa4   :  { %v5195_v63 = vsel %vm163_vm1, %v17692_v41, %v15198_v22  ;;  %v5194_v44 = vsel %vm163_vm1, %v17696_v27, %v15197_v48 }
0x1fa5   :  { %v14311_v52 = vpack.c.bf16 %v5195_v63, %v5194_v44 }
0x1fa6   :  { %12951 = vmatmul.mubr.msk.f32.vlgmr.msra.gmra.mrb[40].mxu0 %vm166_vm2, %v17334_v20 }
0x1fa7   :  { %14312 = vmatpush3.bf16.msra.mxu1 %v14311_v52  ;;  %12955 = vmatprep.mubr.msk.f32.mxu0 %vm260_vm3, %v17341_v31 }
0x1faa   :  { %12869 = vmatmul.mubr.msk.f32.vlgmr.msra.gmra.mrb[44].mxu1 %vm166_vm2, %v17334_v20 }
0x1fab   :  { %12873 = vmatprep.mubr.msk.f32.mxu1 %vm260_vm3, %v17341_v31 }
0x2079   :  { %v5759_v38 = vpop.f32.mrb[40].mxu0 }
0x207a   :  { %v5763_v43 = vmul.f32 0.25, %v5759_v38  ;;  %v12952_v22 = vpop.f32.mrb[41].mxu0 }
0x207c   :  { %v5764_v28 = vmul.f32 %v5763_v43, %v5763_v43 }
0x207d   :  { %v5262_v1 = vpop.f32.mrb[44].mxu1 }
0x207e   :  { %v5266_v48 = vmul.f32 0.25, %v5262_v1  ;;  %v12870_v4 = vpop.f32.mrb[45].mxu1  ;;  %5766 = vrot.lane.b32.xlu1 %v5764_v28, %s15501_s24 }
0x2080   :  { %v5267_v55 = vmul.f32 %v5266_v48, %v5266_v48 }
0x2082   :  { %5269 = vrot.lane.b32.xlu0 %v5267_v55, %s15501_s24 }
0x20f0   :  { %v5767_v26 = vpop.permute.xlu1 %5766 }
0x20f1   :  { %v5769_v39 = vsub.f32 %v5763_v43, %v5767_v26 }
0x20f3   :  { %v5770_v63 = vmax.f32 %v5769_v39, 0.0 }
0x20f4   :  { %v5270_v44 = vpop.permute.xlu0 %5269 }
0x20f5   :  { %v5771_v20 = vadd.f32 1e-05, %v5770_v63  ;;  %v5272_v52 = vsub.f32 %v5266_v48, %v5270_v44 }
0x20f7   :  { %15299 = vrsqrt.f32 %v5771_v20  ;;  %v5273_v31 = vmax.f32 %v5272_v52, 0.0 }
0x20f9   :  { %v5274_v58 = vadd.f32 1e-05, %v5273_v31 }
0x20fb   :  { %15301 = vrsqrt.f32 %v5274_v58 }
0x2101   :  { %v15300_v38 = vpop.eup %15299 }
0x2102   :  { %5774 = vrot.lane.b32.xlu1 %v15300_v38, %s15502_s18 }
0x2105   :  { %v15302_v22 = vpop.eup %15301 }
0x2106   :  { %5277 = vrot.lane.b32.xlu0 %v15302_v22, %s15502_s18 }
0x2174   :  { %v5775_v28 = vpop.permute.xlu1 %5774 }
0x2175   :  { %v5777_v1 = vmul.f32 %v5775_v28, %v5763_v43 }
0x2177   :  { %5779 = vrot.lane.b32.xlu1 %v5777_v1, %s15501_s24 }
0x2178   :  { %v5278_v4 = vpop.permute.xlu0 %5277 }
0x2179   :  { %v5280_v55 = vmul.f32 %v5278_v4, %v5266_v48 }
0x217b   :  { %5282 = vrot.lane.b32.xlu0 %v5280_v55, %s15501_s24 }
0x21e9   :  { %v5780_v26 = vpop.permute.xlu1 %5779 }
0x21ea   :  { %v5782_v39 = vsel %vm163_vm1, %v5775_v28, %v5780_v26 }
0x21eb   :  { %12953 = vmatprep.subr.msk.mxu0 %vm267_vm4, %v5782_v39 }
0x21ec   :  { %12954 = vmatpush3.msk.msra.mxu0 %vm267_vm4, %v5782_v39 }
0x21ed   :  { %v5283_v58 = vpop.permute.xlu0 %5282  ;;  %12956 = vmatmul.mubr.msk.f32.vlgmr.msra.gmra.mrb[42].mxu0 %vm260_vm3, %v17361_v51  ;;  %14398 = vmatprep.subr.msk.bf16.mxu0 %vm15832_vm5, %v17480_v9 }
0x21ee   :  { %v5285_v43 = vsel %vm163_vm1, %v5278_v4, %v5283_v58 }
0x21ef   :  { %12871 = vmatprep.subr.msk.mxu1 %vm267_vm4, %v5285_v43 }
0x21f0   :  { %12872 = vmatpush3.msk.msra.mxu1 %vm267_vm4, %v5285_v43 }
0x21f1   :  { %12874 = vmatmul.mubr.msk.f32.vlgmr.msra.gmra.mrb[46].mxu1 %vm260_vm3, %v17361_v51  ;;  %14315 = vmatprep.subr.msk.bf16.mxu1 %vm15832_vm5, %v17489_v3 }
0x21f3   :  { %14401 = vmatpush3.bf16.xpose.msk.msra.mxu0 %vm15832_vm5, %v17480_v9 }
0x21f4   :  { %14404 = vmatprep.subr.msk.bf16.mxu0 %vm15832_vm5, %v17518_v35 }
0x21f7   :  { %14318 = vmatpush3.bf16.xpose.msk.msra.mxu1 %vm15832_vm5, %v17489_v3 }
0x21f8   :  { %14321 = vmatprep.subr.msk.bf16.mxu1 %vm15832_vm5, %v17543_v2 }
0x21fb   :  { %14407 = vmatpush3.bf16.xpose.msk.msra.mxu0 %vm15832_vm5, %v17518_v35 }
0x21fc   :  { %14410 = vmatprep.subr.msk.bf16.mxu0 %vm15832_vm5, %v17545_v11 }
0x21ff   :  { %14324 = vmatpush3.bf16.xpose.msk.msra.mxu1 %vm15832_vm5, %v17543_v2 }
0x2200   :  { %14327 = vmatprep.subr.msk.bf16.mxu1 %vm15832_vm5, %v17567_v5 }
0x2203   :  { %14413 = vmatpush3.bf16.xpose.msk.msra.mxu0 %vm15832_vm5, %v17545_v11 }
0x2204   :  { %14416 = vmatprep.subr.msk.bf16.mxu0 %vm15832_vm5, %v17569_v29 }
0x2207   :  { %14330 = vmatpush3.bf16.xpose.msk.msra.mxu1 %vm15832_vm5, %v17567_v5 }
0x2208   :  { %14333 = vmatprep.subr.msk.bf16.mxu1 %vm15832_vm5, %v17588_v53 }
0x220b   :  { %14419 = vmatpush3.bf16.xpose.msk.msra.mxu0 %vm15832_vm5, %v17569_v29 }
0x220c   :  { %14422 = vmatprep.subr.msk.bf16.mxu0 %vm15832_vm5, %v17590_v34 }
0x220f   :  { %14336 = vmatpush3.bf16.xpose.msk.msra.mxu1 %vm15832_vm5, %v17588_v53  ;;  %v10669_v53 = vld [vmem:[%s20740_s0 + $0x680] sm:$0xff] }
0x2210   :  { %14339 = vmatprep.subr.msk.bf16.mxu1 %vm15832_vm5, %v17608_v19 }
0x2213   :  { %14425 = vmatpush3.bf16.xpose.msk.msra.mxu0 %vm15832_vm5, %v17590_v34  ;;  %v10670_v34 = vld [vmem:[%s20740_s0 + $0x688] sm:$0xff] }
0x2214   :  { %14428 = vmatprep.subr.msk.bf16.mxu0 %vm15832_vm5, %v17610_v46 }
0x2217   :  { %14342 = vmatpush3.bf16.xpose.msk.msra.mxu1 %vm15832_vm5, %v17608_v19  ;;  %v17844_v19 = vpack.c.bf16 %v10670_v34, %v10669_v53 }
0x2218   :  { %14345 = vmatprep.subr.msk.bf16.mxu1 %vm15832_vm5, %v17628_v33 }
0x221b   :  { %14431 = vmatpush3.bf16.xpose.msk.msra.mxu0 %vm15832_vm5, %v17610_v46  ;;  %v10631_v46 = vld [vmem:[%s20740_s0 + $0x600] sm:$0xff] }
0x221c   :  { %14434 = vmatprep.subr.msk.bf16.mxu0 %vm15832_vm5, %v17630_v62 }
0x221f   :  { %14348 = vmatpush3.bf16.xpose.msk.msra.mxu1 %vm15832_vm5, %v17628_v33  ;;  %v10632_v33 = vld [vmem:[%s20740_s0 + $0x608] sm:$0xff] }
0x2220   :  { %14351 = vmatprep.subr.msk.bf16.mxu1 %vm15832_vm5, %v17648_v14 }
0x2223   :  { %14437 = vmatpush3.bf16.xpose.msk.msra.mxu0 %vm15832_vm5, %v17630_v62  ;;  %v17853_v62 = vpack.c.bf16 %v10632_v33, %v10631_v46 }
0x2224   :  { %14440 = vmatprep.subr.msk.bf16.mxu0 %vm15832_vm5, %v17650_v47 }
0x2227   :  { %14354 = vmatpush3.bf16.xpose.msk.msra.mxu1 %vm15832_vm5, %v17648_v14 }
0x2228   :  { %14357 = vmatprep.subr.msk.bf16.mxu1 %vm15832_vm5, %v17662_v59 }
0x222b   :  { %14443 = vmatpush3.bf16.xpose.msk.msra.mxu0 %vm15832_vm5, %v17650_v47 }
0x222c   :  { %14528 = vmatprep.subr.bf16.mxu0 %v17844_v19 }
0x222f   :  { %14360 = vmatpush3.bf16.xpose.msk.msra.mxu1 %vm15832_vm5, %v17662_v59 }
0x2230   :  { %14445 = vmatprep.subr.bf16.mxu1 %v17853_v62 }
0x22c0   :  { %v12957_v51 = vpop.f32.mrb[42].mxu0 }
0x22c1   :  { %v5862_v9 = vmul.f32 %v12957_v51, %v17684_v60  ;;  %5867 = vrot.lane.b32.xlu0 %v12957_v51, %s15502_s18  ;;  %v5852_v3 = vpop.f32.mrb[43].mxu0 }
0x22c2   :  { %v5861_v35 = vmul.f32 %v5852_v3, %v17688_v25  ;;  %5865 = vrot.lane.b32.xlu1 %v5852_v3, %s15502_s18 }
0x22c4   :  { %v12875_v2 = vpop.f32.mrb[46].mxu1 }
0x22c5   :  { %v5365_v11 = vmul.f32 %v12875_v2, %v17692_v41  ;;  %v5355_v5 = vpop.f32.mrb[47].mxu1  ;;  %5370 = vrot.lane.b32.xlu0 %v12875_v2, %s15502_s18 }
0x22c6   :  { %v5364_v29 = vmul.f32 %v5355_v5, %v17696_v27  ;;  %5368 = vrot.lane.b32.xlu1 %v5355_v5, %s15502_s18 }
0x2333   :  { %v5868_v14 = vpop.permute.xlu0 %5867 }
0x2334   :  { %v5872_v47 = vsub.f32 %v5862_v9, %v5868_v14  ;;  %v5866_v59 = vpop.permute.xlu1 %5865 }
0x2335   :  { %v5871_v60 = vsub.f32 %v5861_v35, %v5866_v59 }
0x2336   :  { %v5874_v25 = vmul.f32 %v5872_v47, %v15940_v12 }
0x2337   :  { %v5873_v41 = vmul.f32 %v5871_v60, %v15938_v8  ;;  %v5371_v27 = vpop.permute.xlu0 %5370 }
0x2338   :  { %v5876_v48 = vadd.f32 %v5874_v25, %v15942_v15  ;;  %v5375_v63 = vsub.f32 %v5365_v11, %v5371_v27  ;;  %v5369_v44 = vpop.permute.xlu1 %5368 }
0x2339   :  { %v5875_v20 = vadd.f32 %v5873_v41, %v15944_v18  ;;  %v5374_v52 = vsub.f32 %v5364_v29, %v5369_v44 }
0x233a   :  { %v5878_v31 = vsel %vm163_vm1, %v5876_v48, -inf  ;;  %v5377_v38 = vmul.f32 %v5375_v63, %v15940_v12 }
0x233b   :  { %v5877_v22 = vsel %vm163_vm1, %v5875_v20, -inf  ;;  %v5376_v28 = vmul.f32 %v5374_v52, %v15938_v8 }
0x233c   :  { %v5879_v1 = vmax.f32 %v5877_v22, %v5878_v31  ;;  %v5379_v4 = vadd.f32 %v5377_v38, %v15942_v15 }
0x233d   :  { %v5378_v55 = vadd.f32 %v5376_v28, %v15944_v18 }
0x233e   :  { %v5880_v26 = vrot.slane %v5879_v1, 4  ;;  %v5381_v39 = vsel %vm163_vm1, %v5379_v4, -inf }
0x233f   :  { %v5380_v58 = vsel %vm163_vm1, %v5378_v55, -inf }
0x2340   :  { %v5881_v43 = vmax.f32 %v5879_v1, %v5880_v26  ;;  %v5382_v51 = vmax.f32 %v5380_v58, %v5381_v39 }
0x2342   :  { %v5882_v9 = vrot.slane %v5881_v43, 2  ;;  %v5383_v3 = vrot.slane %v5382_v51, 4 }
0x2344   :  { %v5883_v35 = vmax.f32 %v5881_v43, %v5882_v9  ;;  %v5384_v2 = vmax.f32 %v5382_v51, %v5383_v3 }
0x2346   :  { %v5884_v11 = vrot.slane %v5883_v35, 1  ;;  %v5385_v5 = vrot.slane %v5384_v2, 2 }
0x2348   :  { %v5885_v29 = vmax.f32 %v5883_v35, %v5884_v11  ;;  %v5386_v53 = vmax.f32 %v5384_v2, %v5385_v5  ;;  %v10671_v5 = vld [vmem:[%s20740_s0 + $0x690] sm:$0xff] }
0x234a   :  { %v5886_v34 = vsub.f32 %v5875_v20, %v5885_v29  ;;  %v5887_v46 = vsub.f32 %v5876_v48, %v5885_v29  ;;  %v5387_v33 = vrot.slane %v5386_v53, 1  ;;  %v10672_v29 = vld [vmem:[%s20740_s0 + $0x698] sm:$0xff] }
0x234c   :  { %v5888_v14 = vmul.f32 1.442695, %v5886_v34  ;;  %v5890_v47 = vmul.f32 1.442695, %v5887_v46  ;;  %v5388_v59 = vmax.f32 %v5386_v53, %v5387_v33  ;;  %v17882_v33 = vpack.c.bf16 %v10672_v29, %v10671_v5  ;;  %v10642_v5 = vld [vmem:[%s20740_s0 + $0x658] sm:$0xff]  ;;  %v10681_v29 = vld [vmem:[%s20740_s0 + $0x6e0] sm:$0xff] }
0x234e   :  { %15303 = vpow2.f32 %v5888_v14  ;;  %v5389_v60 = vsub.f32 %v5378_v55, %v5388_v59  ;;  %v5390_v25 = vsub.f32 %v5379_v4, %v5388_v59  ;;  %v10633_v14 = vld [vmem:[%s20740_s0 + $0x610] sm:$0xff]  ;;  %v10673_v59 = vld [vmem:[%s20740_s0 + $0x6a0] sm:$0xff] }
0x234f   :  { %15305 = vpow2.f32 %v5890_v47  ;;  %v10634_v47 = vld [vmem:[%s20740_s0 + $0x618] sm:$0xff] }
0x2350   :  { %v5391_v41 = vmul.f32 1.442695, %v5389_v60  ;;  %v5393_v27 = vmul.f32 1.442695, %v5390_v25  ;;  %v10674_v60 = vld [vmem:[%s20740_s0 + $0x6a8] sm:$0xff] }
0x2352   :  { %15307 = vpow2.f32 %v5391_v41 }
0x2353   :  { %15309 = vpow2.f32 %v5393_v27 }
0x2358   :  { %v15304_v63 = vpop.eup %15303 }
0x2359   :  { %v15306_v44 = vpop.eup %15305  ;;  %v5892_v52 = vsel %vm163_vm1, %v15304_v63, 0.0 }
0x235a   :  { %v5893_v31 = vsel %vm163_vm1, %v15306_v44, 0.0 }
0x235b   :  { %v5894_v20 = vadd.f32 %v5893_v31, %v5892_v52  ;;  %v17914_v52 = vpack.c.bf16 %v10674_v60, %v10673_v59  ;;  %v10635_v31 = vld [vmem:[%s20740_s0 + $0x620] sm:$0xff]  ;;  %v10644_v60 = vld [vmem:[%s20740_s0 + $0x668] sm:$0xff] }
0x235c   :  { %v15308_v48 = vpop.eup %15307  ;;  %v10643_v59 = vld [vmem:[%s20740_s0 + $0x660] sm:$0xff] }
0x235d   :  { %v15310_v38 = vpop.eup %15309  ;;  %v5895_v22 = vrot.slane %v5894_v20, 4  ;;  %v5395_v28 = vsel %vm163_vm1, %v15308_v48, 0.0 }
0x235e   :  { %v5396_v1 = vsel %vm163_vm1, %v15310_v38, 0.0 }
0x235f   :  { %v5896_v4 = vadd.f32 %v5895_v22, %v5894_v20  ;;  %v5397_v55 = vadd.f32 %v5396_v1, %v5395_v28  ;;  %v10636_v20 = vld [vmem:[%s20740_s0 + $0x628] sm:$0xff]  ;;  %v10637_v1 = vld [vmem:[%s20740_s0 + $0x630] sm:$0xff] }
0x2360   :  { %v17936_v22 = vpack.c.bf16 %v10636_v20, %v10635_v31  ;;  %v10684_v31 = vld [vmem:[%s20740_s0 + $0x6f8] sm:$0xff]  ;;  %v18017_v20 = vpack.c.bf16 %v10644_v60, %v10643_v59 }
0x2361   :  { %v5398_v26 = vrot.slane %v5397_v55, 4  ;;  %v5897_v39 = vrot.slane %v5896_v4, 2 }
0x2363   :  { %v5399_v58 = vadd.f32 %v5398_v26, %v5397_v55  ;;  %v5898_v43 = vadd.f32 %v5897_v39, %v5896_v4  ;;  %v10638_v4 = vld [vmem:[%s20740_s0 + $0x638] sm:$0xff]  ;;  %v10677_v55 = vld [vmem:[%s20740_s0 + $0x6c0] sm:$0xff]  ;;  %v10678_v26 = vld [vmem:[%s20740_s0 + $0x6c8] sm:$0xff] }
0x2364   :  { %v17957_v39 = vpack.c.bf16 %v10638_v4, %v10637_v1  ;;  %v10646_v1 = vld [vmem:[%s20740_s0 + $0x678] sm:$0xff] }
0x2365   :  { %v5899_v51 = vrot.slane %v5898_v43, 1  ;;  %v5400_v9 = vrot.slane %v5399_v58, 2 }
0x2367   :  { %v5900_v3 = vadd.f32 %v5899_v51, %v5898_v43  ;;  %v5401_v35 = vadd.f32 %v5400_v9, %v5399_v58  ;;  %v17959_v58 = vpack.c.bf16 %v10678_v26, %v10677_v55  ;;  %v10639_v43 = vld [vmem:[%s20740_s0 + $0x640] sm:$0xff]  ;;  %v10640_v51 = vld [vmem:[%s20740_s0 + $0x648] sm:$0xff]  ;;  %v10679_v9 = vld [vmem:[%s20740_s0 + $0x6d0] sm:$0xff] }
0x2368   :  { %v18040_v55 = vld [vmem:[%s20741_s1 + $0x8] sm:$0xff] }
0x2369   :  { %15311 = vrcp.f32 %v5900_v3  ;;  %v5402_v2 = vrot.slane %v5401_v35, 1  ;;  %v10680_v3 = vld [vmem:[%s20740_s0 + $0x6d8] sm:$0xff] }
0x236b   :  { %v5403_v11 = vadd.f32 %v5402_v2, %v5401_v35  ;;  %v17977_v35 = vpack.c.bf16 %v10640_v51, %v10639_v43  ;;  %v17979_v2 = vpack.c.bf16 %v10680_v3, %v10679_v9 }
0x236d   :  { %15313 = vrcp.f32 %v5403_v11  ;;  %v10641_v11 = vld [vmem:[%s20740_s0 + $0x650] sm:$0xff] }
0x2373   :  { %v15312_v53 = vpop.eup %15311 }
0x2374   :  { %v17878_v34 = vmul.f32 %v15312_v53, %v15304_v63  ;;  %v17880_v46 = vmul.f32 %v15312_v53, %v15306_v44  ;;  %v17908_v63 = vld [vmem:[%s20741_s1] sm:$0xff]  ;;  %v17912_v44 = vpack.c.bf16 %v10634_v47, %v10633_v14  ;;  %v10682_v53 = vld [vmem:[%s20740_s0 + $0x6e8] sm:$0xff]  ;;  %v17997_v14 = vpack.c.bf16 %v10642_v5, %v10641_v11 }
0x2375   :  { %v17999_v47 = vpack.c.bf16 %v10682_v53, %v10681_v29 }
0x2376   :  { %20810 = vst [vmem:[#allocation30_spill] sm:$0xff] %v17880_v46  ;;  %12990 = vmatprep.mubr.msk.f32.mxu0 %vm163_vm1, %v17878_v34 }
0x2377   :  { %v15314_v25 = vpop.eup %15313  ;;  %12991 = vmatmul.mubr.msk.f32.vlgmr.msra.gmra.mrb[44].mxu0 %vm163_vm1, %v17880_v46 }
0x2378   :  { %14530 = vmatpush3.bf16.msra.mxu0 %v17844_v19  ;;  %v17901_v41 = vmul.f32 %v15314_v25, %v15308_v48  ;;  %v17903_v27 = vmul.f32 %v15314_v25, %v15310_v38  ;;  %13107 = vmatprep.mubr.f32.mxu0 %v17908_v63  ;;  %v10675_v48 = vld [vmem:[%s20740_s0 + $0x6b0] sm:$0xff]  ;;  %v10676_v38 = vld [vmem:[%s20740_s0 + $0x6b8] sm:$0xff] }
0x2379   :  { %14532 = vmatprep.subr.bf16.mxu0 %v17882_v33  ;;  %v17938_v28 = vpack.c.bf16 %v10676_v38, %v10675_v48  ;;  %v10683_v25 = vld [vmem:[%s20740_s0 + $0x6f0] sm:$0xff] }
0x237a   :  { %20811 = vst [vmem:[#allocation31_spill] sm:$0xff] %v17903_v27  ;;  %12908 = vmatprep.mubr.msk.f32.mxu1 %vm163_vm1, %v17901_v41  ;;  %v18019_v48 = vpack.c.bf16 %v10684_v31, %v10683_v25  ;;  %v10645_v38 = vld [vmem:[%s20740_s0 + $0x670] sm:$0xff] }
0x237b   :  { %12909 = vmatmul.mubr.msk.f32.vlgmr.msra.gmra.mrb[48].mxu1 %vm163_vm1, %v17903_v27  ;;  %v18031_v4 = vpack.c.bf16 %v10646_v1, %v10645_v38 }
0x237c   :  { %14447 = vmatpush3.bf16.msra.mxu1 %v17853_v62  ;;  %14534 = vmatpush3.bf16.msra.mxu0 %v17882_v33 }
0x237d   :  { %14449 = vmatprep.subr.bf16.mxu1 %v17912_v44  ;;  %14536 = vmatprep.subr.bf16.mxu0 %v17914_v52 }
0x237e   :  { %13025 = vmatprep.mubr.f32.mxu1 %v17908_v63 }
0x2380   :  { %14451 = vmatpush3.bf16.msra.mxu1 %v17912_v44  ;;  %14538 = vmatpush3.bf16.msra.mxu0 %v17914_v52 }
0x2381   :  { %14453 = vmatprep.subr.bf16.mxu1 %v17936_v22  ;;  %14540 = vmatprep.subr.bf16.mxu0 %v17938_v28 }
0x2384   :  { %14455 = vmatpush3.bf16.msra.mxu1 %v17936_v22  ;;  %14542 = vmatpush3.bf16.msra.mxu0 %v17938_v28 }
0x2385   :  { %14457 = vmatprep.subr.bf16.mxu1 %v17957_v39  ;;  %14544 = vmatprep.subr.bf16.mxu0 %v17959_v58 }
0x2388   :  { %14459 = vmatpush3.bf16.msra.mxu1 %v17957_v39  ;;  %14546 = vmatpush3.bf16.msra.mxu0 %v17959_v58 }
0x2389   :  { %14461 = vmatprep.subr.bf16.mxu1 %v17977_v35  ;;  %14548 = vmatprep.subr.bf16.mxu0 %v17979_v2 }
0x238c   :  { %14463 = vmatpush3.bf16.msra.mxu1 %v17977_v35  ;;  %14550 = vmatpush3.bf16.msra.mxu0 %v17979_v2 }
0x238d   :  { %14465 = vmatprep.subr.bf16.mxu1 %v17997_v14  ;;  %14552 = vmatprep.subr.bf16.mxu0 %v17999_v47 }
0x2390   :  { %14467 = vmatpush3.bf16.msra.mxu1 %v17997_v14  ;;  %14554 = vmatpush3.bf16.msra.mxu0 %v17999_v47 }
0x2391   :  { %14469 = vmatprep.subr.bf16.mxu1 %v18017_v20  ;;  %14556 = vmatprep.subr.bf16.mxu0 %v18019_v48 }
0x2394   :  { %14471 = vmatpush3.bf16.msra.mxu1 %v18017_v20  ;;  %14558 = vmatpush3.bf16.msra.mxu0 %v18019_v48 }
0x2395   :  { %14473 = vmatprep.subr.bf16.mxu1 %v18031_v4  ;;  %14559 = vmatprep.subr.bf16.mxu0 %v20798_v16 }
0x2397   :  { %13108 = vmatmul.mubr.f32.vlgmr.msra.gmra.mrb[46].mxu0 %v18040_v55 }
0x2398   :  { %14475 = vmatpush3.bf16.msra.mxu1 %v18031_v4  ;;  %13114 = vmatprep.mubr.msk.f32.mxu0 %vm15499_vm0, %v20799_v0 }
0x2399   :  { %14476 = vmatprep.subr.bf16.mxu1 %v20798_v16 }
0x239b   :  { %13026 = vmatmul.mubr.f32.vlgmr.msra.gmra.mrb[50].mxu1 %v18040_v55 }
0x239c   :  { %13032 = vmatprep.mubr.msk.f32.mxu1 %vm15499_vm0, %v20799_v0 }
0x244a   :  { %v18050_v26 = vpop.f32.mrb[44].mxu0 }
0x244b   :  { %20812 = vst [vmem:[#allocation32_spill] sm:$0xff] %v18050_v26  ;;  %v18052_v43 = vpop.f32.mrb[45].mxu0 }
0x244c   :  { %20813 = vst [vmem:[#allocation33_spill] sm:$0xff] %v18052_v43 }
0x244e   :  { %v18054_v51 = vpop.f32.mrb[48].mxu1 }
0x244f   :  { %20814 = vst [vmem:[#allocation34_spill] sm:$0xff] %v18054_v51  ;;  %v18056_v9 = vpop.f32.mrb[49].mxu1 }
0x2450   :  { %20815 = vst [vmem:[#allocation35_spill] sm:$0xff] %v18056_v9 }
0x246a   :  { %v18058_v3 = vpop.f32.mrb[46].mxu0 }
0x246b   :  { %v6676_v11 = vmul.f32 %v18058_v3, %v18058_v3  ;;  %v18062_v5 = vpop.f32.mrb[47].mxu0 }
0x246c   :  { %v6675_v29 = vmul.f32 %v18062_v5, %v18062_v5 }
0x246e   :  { %v18066_v53 = vpop.f32.mrb[50].mxu1  ;;  %v15199_v59 = vpack.i.bf16 %v6676_v11, %v6675_v29 }
0x246f   :  { %v6179_v60 = vmul.f32 %v18066_v53, %v18066_v53  ;;  %v18070_v25 = vpop.f32.mrb[51].mxu1 }
0x2470   :  { %v6178_v31 = vmul.f32 %v18070_v25, %v18070_v25  ;;  %15200 = vrot.lane.b32.xlu1 %v15199_v59, %s15501_s24 }
0x2472   :  { %v15204_v38 = vpack.i.bf16 %v6179_v60, %v6178_v31 }
0x2474   :  { %15205 = vrot.lane.b32.xlu0 %v15204_v38, %s15501_s24  ;;  %v18087_v38 = vld [vmem:[%s20743_s3] sm:$0xf] }
0x24e2   :  { %v15201_v1 = vpop.permute.xlu1 %15200 }
0x24e3   :  { %v15203_v26 = vunpack.i.h.bf16 %v15201_v1  ;;  %v15202_v51 = vunpack.i.l.bf16 %v15201_v1 }
0x24e5   :  { %v6686_v46 = vsel %vm163_vm1, %v18058_v3, %v15203_v26  ;;  %v6685_v11 = vsel %vm163_vm1, %v18062_v5, %v15202_v51 }
0x24e6   :  { %v15206_v29 = vpop.permute.xlu0 %15205  ;;  %v14560_v27 = vpack.c.bf16 %v6686_v46, %v6685_v11  ;;  %v18094_v46 = vld [vmem:[%s20744_s4] sm:$0xff] }
0x24e7   :  { %v15208_v43 = vunpack.i.h.bf16 %v15206_v29  ;;  %v15207_v9 = vunpack.i.l.bf16 %v15206_v29 }
0x24e8   :  { %14561 = vmatpush3.bf16.msra.mxu0 %v14560_v27 }
0x24e9   :  { %v6189_v59 = vsel %vm163_vm1, %v18066_v53, %v15208_v43  ;;  %v6188_v60 = vsel %vm163_vm1, %v18070_v25, %v15207_v9 }
0x24ea   :  { %v14477_v31 = vpack.c.bf16 %v6189_v59, %v6188_v60 }
0x24eb   :  { %13115 = vmatmul.mubr.msk.f32.vlgmr.msra.gmra.mrb[48].mxu0 %vm166_vm2, %v18087_v38 }
0x24ec   :  { %14478 = vmatpush3.bf16.msra.mxu1 %v14477_v31  ;;  %13119 = vmatprep.mubr.msk.f32.mxu0 %vm260_vm3, %v18094_v46 }
0x24ef   :  { %13033 = vmatmul.mubr.msk.f32.vlgmr.msra.gmra.mrb[52].mxu1 %vm166_vm2, %v18087_v38 }
0x24f0   :  { %13037 = vmatprep.mubr.msk.f32.mxu1 %vm260_vm3, %v18094_v46 }
0x25be   :  { %v6753_v27 = vpop.f32.mrb[48].mxu0 }
0x25bf   :  { %v6757_v26 = vmul.f32 0.25, %v6753_v27  ;;  %v13116_v43 = vpop.f32.mrb[49].mxu0 }
0x25c1   :  { %v6758_v51 = vmul.f32 %v6757_v26, %v6757_v26 }
0x25c2   :  { %v6256_v9 = vpop.f32.mrb[52].mxu1 }
0x25c3   :  { %v6260_v1 = vmul.f32 0.25, %v6256_v9  ;;  %v13034_v11 = vpop.f32.mrb[53].mxu1  ;;  %6760 = vrot.lane.b32.xlu1 %v6758_v51, %s15501_s24 }
0x25c5   :  { %v6261_v29 = vmul.f32 %v6260_v1, %v6260_v1 }
0x25c7   :  { %6263 = vrot.lane.b32.xlu0 %v6261_v29, %s15501_s24 }
0x2635   :  { %v6761_v59 = vpop.permute.xlu1 %6760 }
0x2636   :  { %v6763_v60 = vsub.f32 %v6757_v26, %v6761_v59 }
0x2638   :  { %v6764_v31 = vmax.f32 %v6763_v60, 0.0 }
0x2639   :  { %v6264_v21 = vpop.permute.xlu0 %6263 }
0x263a   :  { %v6765_v30 = vadd.f32 1e-05, %v6764_v31  ;;  %v6266_v24 = vsub.f32 %v6260_v1, %v6264_v21 }
0x263c   :  { %15315 = vrsqrt.f32 %v6765_v30  ;;  %v6267_v13 = vmax.f32 %v6266_v24, 0.0 }
0x263e   :  { %v6268_v17 = vadd.f32 1e-05, %v6267_v13  ;;  %v18114_v13 = vld [vmem:[%s20744_s4 + $0x8] sm:$0xff] }
0x2640   :  { %15317 = vrsqrt.f32 %v6268_v17 }
0x2646   :  { %v15316_v27 = vpop.eup %15315 }
0x2647   :  { %6768 = vrot.lane.b32.xlu1 %v15316_v27, %s15502_s18 }
0x264a   :  { %v15318_v43 = vpop.eup %15317 }
0x264b   :  { %6271 = vrot.lane.b32.xlu0 %v15318_v43, %s15502_s18 }
0x26b9   :  { %v6769_v51 = vpop.permute.xlu1 %6768 }
0x26ba   :  { %v6771_v9 = vmul.f32 %v6769_v51, %v6757_v26 }
0x26bc   :  { %6773 = vrot.lane.b32.xlu1 %v6771_v9, %s15501_s24 }
0x26bd   :  { %v6272_v11 = vpop.permute.xlu0 %6271 }
0x26be   :  { %v6274_v29 = vmul.f32 %v6272_v11, %v6260_v1 }
0x26c0   :  { %6276 = vrot.lane.b32.xlu0 %v6274_v29, %s15501_s24 }
0x272e   :  { %v6774_v59 = vpop.permute.xlu1 %6773 }
0x272f   :  { %v6776_v30 = vsel %vm163_vm1, %v6769_v51, %v6774_v59 }
0x2730   :  { %13117 = vmatprep.subr.msk.mxu0 %vm267_vm4, %v6776_v30 }
0x2731   :  { %13118 = vmatpush3.msk.msra.mxu0 %vm267_vm4, %v6776_v30 }
0x2732   :  { %v6277_v17 = vpop.permute.xlu0 %6276  ;;  %13120 = vmatmul.mubr.msk.f32.vlgmr.msra.gmra.mrb[50].mxu0 %vm260_vm3, %v18114_v13  ;;  %14564 = vmatprep.subr.msk.bf16.mxu0 %vm15832_vm5, %v17844_v19 }
0x2733   :  { %v6279_v24 = vsel %vm163_vm1, %v6272_v11, %v6277_v17 }
0x2734   :  { %13035 = vmatprep.subr.msk.mxu1 %vm267_vm4, %v6279_v24 }
0x2735   :  { %13036 = vmatpush3.msk.msra.mxu1 %vm267_vm4, %v6279_v24 }
0x2736   :  { %13038 = vmatmul.mubr.msk.f32.vlgmr.msra.gmra.mrb[54].mxu1 %vm260_vm3, %v18114_v13  ;;  %14481 = vmatprep.subr.msk.bf16.mxu1 %vm15832_vm5, %v17853_v62 }
0x2738   :  { %14567 = vmatpush3.bf16.xpose.msk.msra.mxu0 %vm15832_vm5, %v17844_v19 }
0x2739   :  { %14570 = vmatprep.subr.msk.bf16.mxu0 %vm15832_vm5, %v17882_v33 }
0x273c   :  { %14484 = vmatpush3.bf16.xpose.msk.msra.mxu1 %vm15832_vm5, %v17853_v62 }
0x273d   :  { %14487 = vmatprep.subr.msk.bf16.mxu1 %vm15832_vm5, %v17912_v44 }
0x2740   :  { %14573 = vmatpush3.bf16.xpose.msk.msra.mxu0 %vm15832_vm5, %v17882_v33 }
0x2741   :  { %14576 = vmatprep.subr.msk.bf16.mxu0 %vm15832_vm5, %v17914_v52 }
0x2744   :  { %14490 = vmatpush3.bf16.xpose.msk.msra.mxu1 %vm15832_vm5, %v17912_v44 }
0x2745   :  { %14493 = vmatprep.subr.msk.bf16.mxu1 %vm15832_vm5, %v17936_v22 }
0x2748   :  { %14579 = vmatpush3.bf16.xpose.msk.msra.mxu0 %vm15832_vm5, %v17914_v52 }
0x2749   :  { %14582 = vmatprep.subr.msk.bf16.mxu0 %vm15832_vm5, %v17938_v28 }
0x274c   :  { %14496 = vmatpush3.bf16.xpose.msk.msra.mxu1 %vm15832_vm5, %v17936_v22 }
0x274d   :  { %14499 = vmatprep.subr.msk.bf16.mxu1 %vm15832_vm5, %v17957_v39 }
0x2750   :  { %14585 = vmatpush3.bf16.xpose.msk.msra.mxu0 %vm15832_vm5, %v17938_v28 }
0x2751   :  { %14588 = vmatprep.subr.msk.bf16.mxu0 %vm15832_vm5, %v17959_v58 }
0x2754   :  { %14502 = vmatpush3.bf16.xpose.msk.msra.mxu1 %vm15832_vm5, %v17957_v39  ;;  %v10745_v39 = vld [vmem:[%s20740_s0 + $0x780] sm:$0xff] }
0x2755   :  { %14505 = vmatprep.subr.msk.bf16.mxu1 %vm15832_vm5, %v17977_v35 }
0x2758   :  { %14591 = vmatpush3.bf16.xpose.msk.msra.mxu0 %vm15832_vm5, %v17959_v58  ;;  %v10746_v58 = vld [vmem:[%s20740_s0 + $0x788] sm:$0xff] }
0x2759   :  { %14594 = vmatprep.subr.msk.bf16.mxu0 %vm15832_vm5, %v17979_v2 }
0x275c   :  { %14508 = vmatpush3.bf16.xpose.msk.msra.mxu1 %vm15832_vm5, %v17977_v35  ;;  %v18233_v35 = vpack.c.bf16 %v10746_v58, %v10745_v39 }
0x275d   :  { %14511 = vmatprep.subr.msk.bf16.mxu1 %vm15832_vm5, %v17997_v14 }
0x2760   :  { %14597 = vmatpush3.bf16.xpose.msk.msra.mxu0 %vm15832_vm5, %v17979_v2  ;;  %v10707_v2 = vld [vmem:[%s20740_s0 + $0x700] sm:$0xff] }
0x2761   :  { %14600 = vmatprep.subr.msk.bf16.mxu0 %vm15832_vm5, %v17999_v47 }
0x2764   :  { %14514 = vmatpush3.bf16.xpose.msk.msra.mxu1 %vm15832_vm5, %v17997_v14  ;;  %v10708_v14 = vld [vmem:[%s20740_s0 + $0x708] sm:$0xff] }
0x2765   :  { %14517 = vmatprep.subr.msk.bf16.mxu1 %vm15832_vm5, %v18017_v20 }
0x2768   :  { %14603 = vmatpush3.bf16.xpose.msk.msra.mxu0 %vm15832_vm5, %v17999_v47  ;;  %v18242_v47 = vpack.c.bf16 %v10708_v14, %v10707_v2 }
0x2769   :  { %14606 = vmatprep.subr.msk.bf16.mxu0 %vm15832_vm5, %v18019_v48 }
0x276c   :  { %14520 = vmatpush3.bf16.xpose.msk.msra.mxu1 %vm15832_vm5, %v18017_v20 }
0x276d   :  { %14523 = vmatprep.subr.msk.bf16.mxu1 %vm15832_vm5, %v18031_v4 }
0x2770   :  { %14609 = vmatpush3.bf16.xpose.msk.msra.mxu0 %vm15832_vm5, %v18019_v48 }
0x2771   :  { %14694 = vmatprep.subr.bf16.mxu0 %v18233_v35 }
0x2774   :  { %14526 = vmatpush3.bf16.xpose.msk.msra.mxu1 %vm15832_vm5, %v18031_v4 }
0x2775   :  { %14611 = vmatprep.subr.bf16.mxu1 %v18242_v47 }
0x2805   :  { %v13121_v21 = vpop.f32.mrb[50].mxu0 }
0x2806   :  { %v6856_v19 = vmul.f32 %v13121_v21, %v18058_v3  ;;  %6861 = vrot.lane.b32.xlu0 %v13121_v21, %s15502_s18  ;;  %v6846_v62 = vpop.f32.mrb[51].mxu0 }
0x2807   :  { %v6855_v33 = vmul.f32 %v6846_v62, %v18062_v5  ;;  %6859 = vrot.lane.b32.xlu1 %v6846_v62, %s15502_s18 }
0x2809   :  { %v13039_v44 = vpop.f32.mrb[54].mxu1 }
0x280a   :  { %v6359_v52 = vmul.f32 %v13039_v44, %v18066_v53  ;;  %v6349_v22 = vpop.f32.mrb[55].mxu1  ;;  %6364 = vrot.lane.b32.xlu0 %v13039_v44, %s15502_s18 }
0x280b   :  { %v6358_v28 = vmul.f32 %v6349_v22, %v18070_v25  ;;  %6362 = vrot.lane.b32.xlu1 %v6349_v22, %s15502_s18 }
0x2878   :  { %v6862_v20 = vpop.permute.xlu0 %6861 }
0x2879   :  { %v6866_v48 = vsub.f32 %v6856_v19, %v6862_v20  ;;  %v6860_v4 = vpop.permute.xlu1 %6859 }
0x287a   :  { %v6865_v3 = vsub.f32 %v6855_v33, %v6860_v4 }
0x287b   :  { %v6868_v5 = vmul.f32 %v6866_v48, %v15940_v12 }
0x287c   :  { %v6867_v53 = vmul.f32 %v6865_v3, %v15938_v8  ;;  %v6365_v25 = vpop.permute.xlu0 %6364 }
0x287d   :  { %v6870_v26 = vadd.f32 %v6868_v5, %v15942_v15  ;;  %v6369_v1 = vsub.f32 %v6359_v52, %v6365_v25  ;;  %v6363_v60 = vpop.permute.xlu1 %6362 }
0x287e   :  { %v6869_v31 = vadd.f32 %v6867_v53, %v15944_v18  ;;  %v6368_v27 = vsub.f32 %v6358_v28, %v6363_v60 }
0x287f   :  { %v6872_v43 = vsel %vm163_vm1, %v6870_v26, -inf  ;;  %v6371_v51 = vmul.f32 %v6369_v1, %v15940_v12 }
0x2880   :  { %v6871_v9 = vsel %vm163_vm1, %v6869_v31, -inf  ;;  %v6370_v11 = vmul.f32 %v6368_v27, %v15938_v8 }
0x2881   :  { %v6873_v29 = vmax.f32 %v6871_v9, %v6872_v43  ;;  %v6373_v59 = vadd.f32 %v6371_v51, %v15942_v15 }
0x2882   :  { %v6372_v30 = vadd.f32 %v6370_v11, %v15944_v18 }
0x2883   :  { %v6874_v17 = vrot.slane %v6873_v29, 4  ;;  %v6375_v24 = vsel %vm163_vm1, %v6373_v59, -inf }
0x2884   :  { %v6374_v21 = vsel %vm163_vm1, %v6372_v30, -inf }
0x2885   :  { %v6875_v19 = vmax.f32 %v6873_v29, %v6874_v17  ;;  %v6376_v62 = vmax.f32 %v6374_v21, %v6375_v24 }
0x2887   :  { %v6876_v33 = vrot.slane %v6875_v19, 2  ;;  %v6377_v44 = vrot.slane %v6376_v62, 4 }
0x2889   :  { %v6877_v52 = vmax.f32 %v6875_v19, %v6876_v33  ;;  %v6378_v22 = vmax.f32 %v6376_v62, %v6377_v44 }
0x288b   :  { %v6878_v28 = vrot.slane %v6877_v52, 1  ;;  %v6379_v39 = vrot.slane %v6378_v22, 2 }
0x288d   :  { %v6879_v58 = vmax.f32 %v6877_v52, %v6878_v28  ;;  %v6380_v2 = vmax.f32 %v6378_v22, %v6379_v39 }
0x288f   :  { %v6880_v14 = vsub.f32 %v6869_v31, %v6879_v58  ;;  %v6881_v20 = vsub.f32 %v6870_v26, %v6879_v58  ;;  %v6381_v48 = vrot.slane %v6380_v2, 1 }
0x2891   :  { %v6882_v4 = vmul.f32 1.442695, %v6880_v14  ;;  %v6884_v3 = vmul.f32 1.442695, %v6881_v20  ;;  %v6382_v5 = vmax.f32 %v6380_v2, %v6381_v48  ;;  %v10747_v2 = vld [vmem:[%s20740_s0 + $0x790] sm:$0xff]  ;;  %v10748_v14 = vld [vmem:[%s20740_s0 + $0x798] sm:$0xff] }
0x2893   :  { %15319 = vpow2.f32 %v6882_v4  ;;  %v6383_v53 = vsub.f32 %v6372_v30, %v6382_v5  ;;  %v6384_v25 = vsub.f32 %v6373_v59, %v6382_v5  ;;  %v10709_v5 = vld [vmem:[%s20740_s0 + $0x710] sm:$0xff] }
0x2894   :  { %15321 = vpow2.f32 %v6884_v3  ;;  %v18271_v3 = vpack.c.bf16 %v10748_v14, %v10747_v2  ;;  %v10718_v2 = vld [vmem:[%s20740_s0 + $0x758] sm:$0xff]  ;;  %v10757_v14 = vld [vmem:[%s20740_s0 + $0x7e0] sm:$0xff] }
0x2895   :  { %v6385_v1 = vmul.f32 1.442695, %v6383_v53  ;;  %v6387_v60 = vmul.f32 1.442695, %v6384_v25  ;;  %v10710_v53 = vld [vmem:[%s20740_s0 + $0x718] sm:$0xff]  ;;  %v10749_v25 = vld [vmem:[%s20740_s0 + $0x7a0] sm:$0xff] }
0x2897   :  { %15323 = vpow2.f32 %v6385_v1  ;;  %v10750_v1 = vld [vmem:[%s20740_s0 + $0x7a8] sm:$0xff] }
0x2898   :  { %15325 = vpow2.f32 %v6387_v60 }
0x289d   :  { %v15320_v27 = vpop.eup %15319 }
0x289e   :  { %v15322_v43 = vpop.eup %15321  ;;  %v6886_v51 = vsel %vm163_vm1, %v15320_v27, 0.0 }
0x289f   :  { %v6887_v9 = vsel %vm163_vm1, %v15322_v43, 0.0 }
0x28a0   :  { %v6888_v31 = vadd.f32 %v6887_v9, %v6886_v51  ;;  %v18296_v51 = vpack.c.bf16 %v10710_v53, %v10709_v5  ;;  %v18298_v9 = vpack.c.bf16 %v10750_v1, %v10749_v25  ;;  %v10719_v25 = vld [vmem:[%s20740_s0 + $0x760] sm:$0xff]  ;;  %v10720_v1 = vld [vmem:[%s20740_s0 + $0x768] sm:$0xff] }
0x28a1   :  { %v15324_v26 = vpop.eup %15323 }
0x28a2   :  { %v15326_v11 = vpop.eup %15325  ;;  %v6889_v29 = vrot.slane %v6888_v31, 4  ;;  %v6389_v17 = vsel %vm163_vm1, %v15324_v26, 0.0 }
0x28a3   :  { %v6390_v30 = vsel %vm163_vm1, %v15326_v11, 0.0 }
0x28a4   :  { %v6890_v59 = vadd.f32 %v6889_v29, %v6888_v31  ;;  %v6391_v24 = vadd.f32 %v6390_v30, %v6389_v17  ;;  %v10711_v31 = vld [vmem:[%s20740_s0 + $0x720] sm:$0xff]  ;;  %v10752_v29 = vld [vmem:[%s20740_s0 + $0x7b8] sm:$0xff] }
0x28a6   :  { %v6392_v21 = vrot.slane %v6391_v24, 4  ;;  %v6891_v19 = vrot.slane %v6890_v59, 2 }
0x28a8   :  { %v6393_v62 = vadd.f32 %v6392_v21, %v6391_v24  ;;  %v6892_v33 = vadd.f32 %v6891_v19, %v6890_v59  ;;  %v10713_v59 = vld [vmem:[%s20740_s0 + $0x730] sm:$0xff]  ;;  %v10714_v24 = vld [vmem:[%s20740_s0 + $0x738] sm:$0xff]  ;;  %v10753_v21 = vld [vmem:[%s20740_s0 + $0x7c0] sm:$0xff] }
0x28a9   :  { %v10754_v19 = vld [vmem:[%s20740_s0 + $0x7c8] sm:$0xff] }
0x28aa   :  { %v6893_v44 = vrot.slane %v6892_v33, 1  ;;  %v6394_v52 = vrot.slane %v6393_v62, 2 }
0x28ac   :  { %v6894_v22 = vadd.f32 %v6893_v44, %v6892_v33  ;;  %v6395_v28 = vadd.f32 %v6394_v52, %v6393_v62  ;;  %v18341_v62 = vpack.c.bf16 %v10714_v24, %v10713_v59  ;;  %v18343_v33 = vpack.c.bf16 %v10754_v19, %v10753_v21  ;;  %v10715_v44 = vld [vmem:[%s20740_s0 + $0x740] sm:$0xff]  ;;  %v10755_v52 = vld [vmem:[%s20740_s0 + $0x7d0] sm:$0xff]  ;;  %v10722_v59 = vld [vmem:[%s20740_s0 + $0x778] sm:$0xff] }
0x28ae   :  { %15327 = vrcp.f32 %v6894_v22  ;;  %v6396_v39 = vrot.slane %v6395_v28, 1  ;;  %v10756_v22 = vld [vmem:[%s20740_s0 + $0x7d8] sm:$0xff] }
0x28b0   :  { %v6397_v58 = vadd.f32 %v6396_v39, %v6395_v28  ;;  %v18363_v39 = vpack.c.bf16 %v10756_v22, %v10755_v52 }
0x28b2   :  { %15329 = vrcp.f32 %v6397_v58  ;;  %v10717_v58 = vld [vmem:[%s20740_s0 + $0x750] sm:$0xff] }
0x28b3   :  { %v18381_v5 = vpack.c.bf16 %v10718_v2, %v10717_v58 }
0x28b8   :  { %v15328_v20 = vpop.eup %15327 }
0x28b9   :  { %v18267_v48 = vmul.f32 %v15328_v20, %v15320_v27  ;;  %v18269_v4 = vmul.f32 %v15328_v20, %v15322_v43  ;;  %v10758_v20 = vld [vmem:[%s20740_s0 + $0x7e8] sm:$0xff] }
0x28ba   :  { %v18383_v53 = vpack.c.bf16 %v10758_v20, %v10757_v14 }
0x28bb   :  { %20816 = vst [vmem:[#allocation36_spill] sm:$0xff] %v18269_v4  ;;  %13154 = vmatprep.mubr.msk.f32.mxu0 %vm163_vm1, %v18267_v48 }
0x28bc   :  { %v15330_v60 = vpop.eup %15329  ;;  %13155 = vmatmul.mubr.msk.f32.vlgmr.msra.gmra.mrb[52].mxu0 %vm163_vm1, %v18269_v4 }
0x28bd   :  { %14696 = vmatpush3.bf16.msra.mxu0 %v18233_v35  ;;  %v18290_v27 = vmul.f32 %v15330_v60, %v15324_v26  ;;  %v18292_v43 = vmul.f32 %v15330_v60, %v15326_v11  ;;  %13271 = vmatprep.mubr.f32.mxu0 %v17908_v63  ;;  %v10712_v26 = vld [vmem:[%s20740_s0 + $0x728] sm:$0xff]  ;;  %v10751_v11 = vld [vmem:[%s20740_s0 + $0x7b0] sm:$0xff] }
0x28be   :  { %14698 = vmatprep.subr.bf16.mxu0 %v18271_v3  ;;  %v18320_v17 = vpack.c.bf16 %v10712_v26, %v10711_v31  ;;  %v18322_v30 = vpack.c.bf16 %v10752_v29, %v10751_v11  ;;  %v10759_v60 = vld [vmem:[%s20740_s0 + $0x7f0] sm:$0xff]  ;;  %v10760_v31 = vld [vmem:[%s20740_s0 + $0x7f8] sm:$0xff]  ;;  %v18401_v26 = vpack.c.bf16 %v10720_v1, %v10719_v25 }
0x28bf   :  { %13072 = vmatprep.mubr.msk.f32.mxu1 %vm163_vm1, %v18290_v27  ;;  %v18403_v11 = vpack.c.bf16 %v10760_v31, %v10759_v60  ;;  %v10721_v29 = vld [vmem:[%s20740_s0 + $0x770] sm:$0xff] }
0x28c0   :  { %13073 = vmatmul.mubr.msk.f32.vlgmr.msra.gmra.mrb[56].mxu1 %vm163_vm1, %v18292_v43  ;;  %v18415_v24 = vpack.c.bf16 %v10722_v59, %v10721_v29 }
0x28c1   :  { %14613 = vmatpush3.bf16.msra.mxu1 %v18242_v47  ;;  %14700 = vmatpush3.bf16.msra.mxu0 %v18271_v3 }
0x28c2   :  { %14615 = vmatprep.subr.bf16.mxu1 %v18296_v51  ;;  %14702 = vmatprep.subr.bf16.mxu0 %v18298_v9 }
0x28c3   :  { %13189 = vmatprep.mubr.f32.mxu1 %v17908_v63  ;;  %v10716_v63 = vld [vmem:[%s20740_s0 + $0x748] sm:$0xff] }
0x28c4   :  { %v18361_v28 = vpack.c.bf16 %v10716_v63, %v10715_v44 }
0x28c5   :  { %14617 = vmatpush3.bf16.msra.mxu1 %v18296_v51  ;;  %14704 = vmatpush3.bf16.msra.mxu0 %v18298_v9 }
0x28c6   :  { %14619 = vmatprep.subr.bf16.mxu1 %v18320_v17  ;;  %14706 = vmatprep.subr.bf16.mxu0 %v18322_v30 }
0x28c9   :  { %14621 = vmatpush3.bf16.msra.mxu1 %v18320_v17  ;;  %14708 = vmatpush3.bf16.msra.mxu0 %v18322_v30 }
0x28ca   :  { %14623 = vmatprep.subr.bf16.mxu1 %v18341_v62  ;;  %14710 = vmatprep.subr.bf16.mxu0 %v18343_v33 }
0x28cd   :  { %14625 = vmatpush3.bf16.msra.mxu1 %v18341_v62  ;;  %14712 = vmatpush3.bf16.msra.mxu0 %v18343_v33 }
0x28ce   :  { %14627 = vmatprep.subr.bf16.mxu1 %v18361_v28  ;;  %14714 = vmatprep.subr.bf16.mxu0 %v18363_v39 }
0x28d1   :  { %14629 = vmatpush3.bf16.msra.mxu1 %v18361_v28  ;;  %14716 = vmatpush3.bf16.msra.mxu0 %v18363_v39 }
0x28d2   :  { %14631 = vmatprep.subr.bf16.mxu1 %v18381_v5  ;;  %14718 = vmatprep.subr.bf16.mxu0 %v18383_v53 }
0x28d5   :  { %14633 = vmatpush3.bf16.msra.mxu1 %v18381_v5  ;;  %14720 = vmatpush3.bf16.msra.mxu0 %v18383_v53 }
0x28d6   :  { %14635 = vmatprep.subr.bf16.mxu1 %v18401_v26  ;;  %14722 = vmatprep.subr.bf16.mxu0 %v18403_v11 }
0x28d9   :  { %14637 = vmatpush3.bf16.msra.mxu1 %v18401_v26  ;;  %14724 = vmatpush3.bf16.msra.mxu0 %v18403_v11 }
0x28da   :  { %14639 = vmatprep.subr.bf16.mxu1 %v18415_v24  ;;  %14725 = vmatprep.subr.bf16.mxu0 %v20798_v16 }
0x28dc   :  { %13272 = vmatmul.mubr.f32.vlgmr.msra.gmra.mrb[54].mxu0 %v18040_v55 }
0x28dd   :  { %14641 = vmatpush3.bf16.msra.mxu1 %v18415_v24  ;;  %13278 = vmatprep.mubr.msk.f32.mxu0 %vm15499_vm0, %v20799_v0 }
0x28de   :  { %14642 = vmatprep.subr.bf16.mxu1 %v20798_v16 }
0x28e0   :  { %13190 = vmatmul.mubr.f32.vlgmr.msra.gmra.mrb[58].mxu1 %v18040_v55 }
0x28e1   :  { %13196 = vmatprep.mubr.msk.f32.mxu1 %vm15499_vm0, %v20799_v0 }
0x298f   :  { %v18429_v21 = vpop.f32.mrb[52].mxu0 }
0x2990   :  { %20817 = vst [vmem:[#allocation37_spill] sm:$0xff] %v18429_v21  ;;  %v18431_v19 = vpop.f32.mrb[53].mxu0 }
0x2993   :  { %v18433_v44 = vpop.f32.mrb[56].mxu1 }
0x2994   :  { %20818 = vst [vmem:[#allocation38_spill] sm:$0xff] %v18433_v44  ;;  %v18435_v63 = vpop.f32.mrb[57].mxu1 }
0x29af   :  { %v18437_v52 = vpop.f32.mrb[54].mxu0 }
0x29b0   :  { %v7670_v22 = vmul.f32 %v18437_v52, %v18437_v52  ;;  %v18441_v58 = vpop.f32.mrb[55].mxu0 }
0x29b1   :  { %v7669_v16 = vmul.f32 %v18441_v58, %v18441_v58 }
0x29b3   :  { %v18445_v55 = vpop.f32.mrb[58].mxu1  ;;  %v15209_v0 = vpack.i.bf16 %v7670_v22, %v7669_v16 }
0x29b4   :  { %v7173_v2 = vmul.f32 %v18445_v55, %v18445_v55  ;;  %v18449_v14 = vpop.f32.mrb[59].mxu1 }
0x29b5   :  { %v7172_v20 = vmul.f32 %v18449_v14, %v18449_v14  ;;  %15210 = vrot.lane.b32.xlu1 %v15209_v0, %s15501_s24 }
0x29b7   :  { %v15214_v25 = vpack.i.bf16 %v7173_v2, %v7172_v20 }
0x29b9   :  { %15215 = vrot.lane.b32.xlu0 %v15214_v25, %s15501_s24 }
0x2a27   :  { %v15211_v1 = vpop.permute.xlu1 %15210 }
0x2a28   :  { %v15213_v60 = vunpack.i.h.bf16 %v15211_v1  ;;  %v15212_v31 = vunpack.i.l.bf16 %v15211_v1 }
0x2a2a   :  { %v7680_v29 = vsel %vm163_vm1, %v18437_v52, %v15213_v60  ;;  %v7679_v59 = vsel %vm163_vm1, %v18441_v58, %v15212_v31 }
0x2a2b   :  { %v15216_v22 = vpop.permute.xlu0 %15215  ;;  %v14726_v16 = vpack.c.bf16 %v7680_v29, %v7679_v59 }
0x2a2c   :  { %v15218_v21 = vunpack.i.h.bf16 %v15216_v22  ;;  %v15217_v44 = vunpack.i.l.bf16 %v15216_v22 }
0x2a2d   :  { %14727 = vmatpush3.bf16.msra.mxu0 %v14726_v16 }
0x2a2e   :  { %v7183_v0 = vsel %vm163_vm1, %v18445_v55, %v15218_v21  ;;  %v7182_v2 = vsel %vm163_vm1, %v18449_v14, %v15217_v44 }
0x2a2f   :  { %v14643_v20 = vpack.c.bf16 %v7183_v0, %v7182_v2 }
0x2a30   :  { %13279 = vmatmul.mubr.msk.f32.vlgmr.msra.gmra.mrb[56].mxu0 %vm166_vm2, %v18087_v38 }
0x2a31   :  { %14644 = vmatpush3.bf16.msra.mxu1 %v14643_v20  ;;  %13283 = vmatprep.mubr.msk.f32.mxu0 %vm260_vm3, %v18094_v46 }
0x2a34   :  { %13197 = vmatmul.mubr.msk.f32.vlgmr.msra.gmra.mrb[60].mxu1 %vm166_vm2, %v18087_v38 }
0x2a35   :  { %13201 = vmatprep.mubr.msk.f32.mxu1 %vm260_vm3, %v18094_v46 }
0x2b03   :  { %v7747_v25 = vpop.f32.mrb[56].mxu0 }
0x2b04   :  { %v7751_v1 = vmul.f32 0.25, %v7747_v25  ;;  %v13280_v21 = vpop.f32.mrb[57].mxu0 }
0x2b06   :  { %v7752_v60 = vmul.f32 %v7751_v1, %v7751_v1 }
0x2b07   :  { %v7250_v31 = vpop.f32.mrb[60].mxu1 }
0x2b08   :  { %v7254_v44 = vmul.f32 0.25, %v7250_v31  ;;  %v13198_v29 = vpop.f32.mrb[61].mxu1  ;;  %7754 = vrot.lane.b32.xlu1 %v7752_v60, %s15501_s24 }
0x2b0a   :  { %v7255_v59 = vmul.f32 %v7254_v44, %v7254_v44 }
0x2b0c   :  { %7257 = vrot.lane.b32.xlu0 %v7255_v59, %s15501_s24 }
0x2b7a   :  { %v7755_v22 = vpop.permute.xlu1 %7754 }
0x2b7b   :  { %v7757_v16 = vsub.f32 %v7751_v1, %v7755_v22 }
0x2b7d   :  { %v7758_v0 = vmax.f32 %v7757_v16, 0.0 }
0x2b7e   :  { %v7258_v2 = vpop.permute.xlu0 %7257 }
0x2b7f   :  { %v7759_v38 = vadd.f32 1e-05, %v7758_v0  ;;  %v7260_v20 = vsub.f32 %v7254_v44, %v7258_v2 }
0x2b81   :  { %15331 = vrsqrt.f32 %v7759_v38  ;;  %v7261_v46 = vmax.f32 %v7260_v20, 0.0 }
0x2b83   :  { %v7262_v4 = vadd.f32 1e-05, %v7261_v46 }
0x2b85   :  { %15333 = vrsqrt.f32 %v7262_v4 }
0x2b8b   :  { %v15332_v25 = vpop.eup %15331 }
0x2b8c   :  { %7762 = vrot.lane.b32.xlu1 %v15332_v25, %s15502_s18 }
0x2b8f   :  { %v15334_v21 = vpop.eup %15333 }
0x2b90   :  { %7265 = vrot.lane.b32.xlu0 %v15334_v21, %s15502_s18 }
0x2bfe   :  { %v7763_v60 = vpop.permute.xlu1 %7762 }
0x2bff   :  { %v7765_v31 = vmul.f32 %v7763_v60, %v7751_v1 }
0x2c01   :  { %7767 = vrot.lane.b32.xlu1 %v7765_v31, %s15501_s24 }
0x2c02   :  { %v7266_v29 = vpop.permute.xlu0 %7265 }
0x2c03   :  { %v7268_v59 = vmul.f32 %v7266_v29, %v7254_v44 }
0x2c05   :  { %7270 = vrot.lane.b32.xlu0 %v7268_v59, %s15501_s24 }
0x2c73   :  { %v7768_v22 = vpop.permute.xlu1 %7767 }
0x2c74   :  { %v7770_v16 = vsel %vm163_vm1, %v7763_v60, %v7768_v22 }
0x2c75   :  { %13281 = vmatprep.subr.msk.mxu0 %vm267_vm4, %v7770_v16 }
0x2c76   :  { %13282 = vmatpush3.msk.msra.mxu0 %vm267_vm4, %v7770_v16 }
0x2c77   :  { %v7271_v4 = vpop.permute.xlu0 %7270  ;;  %13284 = vmatmul.mubr.msk.f32.vlgmr.msra.gmra.mrb[58].mxu0 %vm260_vm3, %v18114_v13  ;;  %14730 = vmatprep.subr.msk.bf16.mxu0 %vm15832_vm5, %v18233_v35 }
0x2c78   :  { %v7273_v1 = vsel %vm163_vm1, %v7266_v29, %v7271_v4 }
0x2c79   :  { %13199 = vmatprep.subr.msk.mxu1 %vm267_vm4, %v7273_v1 }
0x2c7a   :  { %13200 = vmatpush3.msk.msra.mxu1 %vm267_vm4, %v7273_v1 }
0x2c7b   :  { %13202 = vmatmul.mubr.msk.f32.vlgmr.msra.gmra.mrb[62].mxu1 %vm260_vm3, %v18114_v13  ;;  %14647 = vmatprep.subr.msk.bf16.mxu1 %vm15832_vm5, %v18242_v47 }
0x2c7d   :  { %14733 = vmatpush3.bf16.xpose.msk.msra.mxu0 %vm15832_vm5, %v18233_v35 }
0x2c7e   :  { %14736 = vmatprep.subr.msk.bf16.mxu0 %vm15832_vm5, %v18271_v3 }
0x2c81   :  { %14650 = vmatpush3.bf16.xpose.msk.msra.mxu1 %vm15832_vm5, %v18242_v47 }
0x2c82   :  { %14653 = vmatprep.subr.msk.bf16.mxu1 %vm15832_vm5, %v18296_v51 }
0x2c85   :  { %14739 = vmatpush3.bf16.xpose.msk.msra.mxu0 %vm15832_vm5, %v18271_v3 }
0x2c86   :  { %14742 = vmatprep.subr.msk.bf16.mxu0 %vm15832_vm5, %v18298_v9 }
0x2c89   :  { %14656 = vmatpush3.bf16.xpose.msk.msra.mxu1 %vm15832_vm5, %v18296_v51 }
0x2c8a   :  { %14659 = vmatprep.subr.msk.bf16.mxu1 %vm15832_vm5, %v18320_v17 }
0x2c8d   :  { %14745 = vmatpush3.bf16.xpose.msk.msra.mxu0 %vm15832_vm5, %v18298_v9 }
0x2c8e   :  { %14748 = vmatprep.subr.msk.bf16.mxu0 %vm15832_vm5, %v18322_v30 }
0x2c91   :  { %14662 = vmatpush3.bf16.xpose.msk.msra.mxu1 %vm15832_vm5, %v18320_v17 }
0x2c92   :  { %14665 = vmatprep.subr.msk.bf16.mxu1 %vm15832_vm5, %v18341_v62 }
0x2c95   :  { %14751 = vmatpush3.bf16.xpose.msk.msra.mxu0 %vm15832_vm5, %v18322_v30 }
0x2c96   :  { %14754 = vmatprep.subr.msk.bf16.mxu0 %vm15832_vm5, %v18343_v33 }
0x2c99   :  { %14668 = vmatpush3.bf16.xpose.msk.msra.mxu1 %vm15832_vm5, %v18341_v62  ;;  %v1417_v62 = vsel %vm163_vm1, %v16395_v56, 0.0  ;;  %v2908_v56 = vsel %vm163_vm1, %v16761_v36, 0.0  ;;  %v6401_v36 = vsel %vm163_vm1, %v18290_v27, 0.0 }
0x2c9a   :  { %14671 = vmatprep.subr.msk.bf16.mxu1 %vm15832_vm5, %v18361_v28 }
0x2c9d   :  { %14757 = vmatpush3.bf16.xpose.msk.msra.mxu0 %vm15832_vm5, %v18343_v33  ;;  %v409_v33 = vsel %vm163_vm1, %v15958_v23, 0.0  ;;  %v4399_v23 = vsel %vm163_vm1, %v17537_v7, 0.0  ;;  %v5904_v7 = vsel %vm163_vm1, %v17878_v34, 0.0 }
0x2c9e   :  { %14760 = vmatprep.subr.msk.bf16.mxu0 %vm15832_vm5, %v18363_v39 }
0x2ca1   :  { %14674 = vmatpush3.bf16.xpose.msk.msra.mxu1 %vm15832_vm5, %v18361_v28  ;;  %v2411_v28 = vsel %vm163_vm1, %v16784_v37, 0.0  ;;  %v3405_v37 = vsel %vm163_vm1, %v17148_v6, 0.0  ;;  %v6898_v6 = vsel %vm163_vm1, %v18267_v48, 0.0 }
0x2ca2   :  { %14677 = vmatprep.subr.msk.bf16.mxu1 %vm15832_vm5, %v18381_v5 }
0x2ca5   :  { %14763 = vmatpush3.bf16.xpose.msk.msra.mxu0 %vm15832_vm5, %v18363_v39  ;;  %v1914_v39 = vsel %vm163_vm1, %v16372_v49, 0.0  ;;  %v5407_v49 = vsel %vm163_vm1, %v17901_v41, 0.0 }
0x2ca6   :  { %14766 = vmatprep.subr.msk.bf16.mxu0 %vm15832_vm5, %v18383_v53 }
0x2ca9   :  { %14680 = vmatpush3.bf16.xpose.msk.msra.mxu1 %vm15832_vm5, %v18381_v5 }
0x2caa   :  { %14683 = vmatprep.subr.msk.bf16.mxu1 %vm15832_vm5, %v18401_v26 }
0x2cad   :  { %14769 = vmatpush3.bf16.xpose.msk.msra.mxu0 %vm15832_vm5, %v18383_v53 }
0x2cae   :  { %14772 = vmatprep.subr.msk.bf16.mxu0 %vm15832_vm5, %v18403_v11 }
0x2cb1   :  { %14686 = vmatpush3.bf16.xpose.msk.msra.mxu1 %vm15832_vm5, %v18401_v26 }
0x2cb2   :  { %14689 = vmatprep.subr.msk.bf16.mxu1 %vm15832_vm5, %v18415_v24 }
0x2cb5   :  { %14775 = vmatpush3.bf16.xpose.msk.msra.mxu0 %vm15832_vm5, %v18403_v11 }
0x2cb9   :  { %14692 = vmatpush3.bf16.xpose.msk.msra.mxu1 %vm15832_vm5, %v18415_v24 }
0x2d4a   :  { %v13285_v13 = vpop.f32.mrb[58].mxu0 }
0x2d4b   :  { %v7850_v35 = vmul.f32 %v13285_v13, %v18437_v52  ;;  %7855 = vrot.lane.b32.xlu0 %v13285_v13, %s15502_s18  ;;  %v7840_v47 = vpop.f32.mrb[59].mxu0 }
0x2d4c   :  { %v7849_v3 = vmul.f32 %v7840_v47, %v18441_v58  ;;  %7853 = vrot.lane.b32.xlu1 %v7840_v47, %s15502_s18 }
0x2d4e   :  { %v13203_v51 = vpop.f32.mrb[62].mxu1 }
0x2d4f   :  { %v7353_v9 = vmul.f32 %v13203_v51, %v18445_v55  ;;  %v7343_v17 = vpop.f32.mrb[63].mxu1  ;;  %7358 = vrot.lane.b32.xlu0 %v13203_v51, %s15502_s18 }
0x2d50   :  { %v7352_v30 = vmul.f32 %v7343_v17, %v18449_v14  ;;  %7356 = vrot.lane.b32.xlu1 %v7343_v17, %s15502_s18 }
0x2d6e   :  { %921 = vadd.xlane.f32.xlu0 %v920_v40 }
0x2d72   :  { %1418 = vadd.xlane.f32.xlu0 %v1417_v62 }
0x2d74   :  { %410 = vadd.xlane.f32.xlu1 %v409_v33 }
0x2d76   :  { %2412 = vadd.xlane.f32.xlu0 %v2411_v28 }
0x2d78   :  { %1915 = vadd.xlane.f32.xlu1 %v1914_v39 }
0x2d7a   :  { %3903 = vadd.xlane.f32.xlu0 %v3902_v42 }
0x2d7c   :  { %2909 = vadd.xlane.f32.xlu1 %v2908_v56 }
0x2d7e   :  { %4400 = vadd.xlane.f32.xlu0 %v4399_v23 }
0x2d80   :  { %3406 = vadd.xlane.f32.xlu1 %v3405_v37 }
0x2d82   :  { %5408 = vadd.xlane.f32.xlu0 %v5407_v49 }
0x2d84   :  { %4911 = vadd.xlane.f32.xlu1 %v4910_v45 }
0x2d86   :  { %6402 = vadd.xlane.f32.xlu0 %v6401_v36 }
0x2d88   :  { %5905 = vadd.xlane.f32.xlu1 %v5904_v7 }
0x2d8c   :  { %6899 = vadd.xlane.f32.xlu1 %v6898_v6 }
0x2dbd   :  { %v7856_v5 = vpop.permute.xlu0 %7855 }
0x2dbe   :  { %v7860_v53 = vsub.f32 %v7850_v35, %v7856_v5  ;;  %v7854_v41 = vpop.permute.xlu1 %7853 }
0x2dbf   :  { %v7859_v26 = vsub.f32 %v7849_v3, %v7854_v41 }
0x2dc0   :  { %v7862_v11 = vmul.f32 %v7860_v53, %v15940_v12 }
0x2dc1   :  { %v7861_v61 = vmul.f32 %v7859_v26, %v15938_v8  ;;  %v7359_v24 = vpop.permute.xlu0 %7358 }
0x2dc2   :  { %v7864_v27 = vadd.f32 %v7862_v11, %v15942_v15  ;;  %v7363_v52 = vsub.f32 %v7353_v9, %v7359_v24  ;;  %v7357_v58 = vpop.permute.xlu1 %7356 }
0x2dc3   :  { %v7863_v34 = vadd.f32 %v7861_v61, %v15944_v18  ;;  %v7362_v55 = vsub.f32 %v7352_v30, %v7357_v58  ;;  %v18638_v58 = vld [vmem:[%s20742_s2] sm:$0xff] }
0x2dc4   :  { %v7866_v14 = vsel %vm163_vm1, %v7864_v27, -inf  ;;  %v7365_v48 = vmul.f32 %v7363_v52, %v15940_v12 }
0x2dc5   :  { %v7865_v44 = vsel %vm163_vm1, %v7863_v34, -inf  ;;  %v7364_v0 = vmul.f32 %v7362_v55, %v15938_v8 }
0x2dc6   :  { %v7867_v2 = vmax.f32 %v7865_v44, %v7866_v14  ;;  %v7367_v38 = vadd.f32 %v7365_v48, %v15942_v15 }
0x2dc7   :  { %v7366_v20 = vadd.f32 %v7364_v0, %v15944_v18 }
0x2dc8   :  { %v7868_v46 = vrot.slane %v7867_v2, 4  ;;  %v7369_v25 = vsel %vm163_vm1, %v7367_v38, -inf }
0x2dc9   :  { %v7368_v21 = vsel %vm163_vm1, %v7366_v20, -inf }
0x2dca   :  { %v7869_v60 = vmax.f32 %v7867_v2, %v7868_v46  ;;  %v7370_v31 = vmax.f32 %v7368_v21, %v7369_v25 }
0x2dcc   :  { %v7870_v29 = vrot.slane %v7869_v60, 2  ;;  %v7371_v59 = vrot.slane %v7370_v31, 4 }
0x2dce   :  { %v7871_v22 = vmax.f32 %v7869_v60, %v7870_v29  ;;  %v7372_v12 = vmax.f32 %v7370_v31, %v7371_v59 }
0x2dd0   :  { %v7872_v16 = vrot.slane %v7871_v22, 1  ;;  %v7373_v4 = vrot.slane %v7372_v12, 2 }
0x2dd2   :  { %v7873_v1 = vmax.f32 %v7871_v22, %v7872_v16  ;;  %v7374_v8 = vmax.f32 %v7372_v12, %v7373_v4 }
0x2dd4   :  { %v7874_v13 = vsub.f32 %v7863_v34, %v7873_v1  ;;  %v7875_v35 = vsub.f32 %v7864_v27, %v7873_v1  ;;  %v7375_v15 = vrot.slane %v7374_v8, 1 }
0x2dd6   :  { %v7876_v47 = vmul.f32 1.442695, %v7874_v13  ;;  %v7878_v18 = vmul.f32 1.442695, %v7875_v35  ;;  %v7376_v3 = vmax.f32 %v7374_v8, %v7375_v15 }
0x2dd8   :  { %15335 = vpow2.f32 %v7876_v47  ;;  %v7377_v51 = vsub.f32 %v7366_v20, %v7376_v3  ;;  %v7378_v9 = vsub.f32 %v7367_v38, %v7376_v3  ;;  %v20819_v3 = vld [vmem:[#allocation16_spill] sm:$0xff] }
0x2dd9   :  { %15337 = vpow2.f32 %v7878_v18 }
0x2dda   :  { %v7379_v17 = vmul.f32 1.442695, %v7377_v51  ;;  %v7381_v30 = vmul.f32 1.442695, %v7378_v9  ;;  %v20820_v9 = vld [vmem:[#allocation21_spill] sm:$0xff] }
0x2ddc   :  { %15339 = vpow2.f32 %v7379_v17 }
0x2ddd   :  { %15341 = vpow2.f32 %v7381_v30 }
0x2de2   :  { %v15336_v40 = vpop.eup %15335 }
0x2de3   :  { %v15338_v62 = vpop.eup %15337  ;;  %v7880_v33 = vsel %vm163_vm1, %v15336_v40, 0.0 }
0x2de4   :  { %v7881_v28 = vsel %vm163_vm1, %v15338_v62, 0.0 }
0x2de5   :  { %v7882_v39 = vadd.f32 %v7881_v28, %v7880_v33 }
0x2de6   :  { %v15340_v42 = vpop.eup %15339 }
0x2de7   :  { %v15342_v56 = vpop.eup %15341  ;;  %v7883_v23 = vrot.slane %v7882_v39, 4  ;;  %v7383_v37 = vsel %vm163_vm1, %v15340_v42, 0.0 }
0x2de8   :  { %v7384_v49 = vsel %vm163_vm1, %v15342_v56, 0.0 }
0x2de9   :  { %v7884_v45 = vadd.f32 %v7883_v23, %v7882_v39  ;;  %v7385_v36 = vadd.f32 %v7384_v49, %v7383_v37  ;;  %v8771_v37 = vld [vmem:[%s20747_s7 + $0x80] sm:$0xff]  ;;  %v8772_v49 = vld [vmem:[%s20747_s7 + $0x88] sm:$0xff] }
0x2deb   :  { %v7386_v7 = vrot.slane %v7385_v36, 4  ;;  %v7885_v6 = vrot.slane %v7884_v45, 2 }
0x2ded   :  { %v7387_v5 = vadd.f32 %v7386_v7, %v7385_v36  ;;  %v7886_v53 = vadd.f32 %v7885_v6, %v7884_v45  ;;  %v8819_v45 = vld [vmem:[%s20747_s7 + $0x200] sm:$0xff]  ;;  %v14776_v36 = vpack.c.bf16 %v8772_v49, %v8771_v37  ;;  %v8820_v7 = vld [vmem:[%s20747_s7 + $0x208] sm:$0xff]  ;;  %v8841_v49 = vld [vmem:[%s20747_s7 + $0x2b0] sm:$0xff] }
0x2dee   :  { %v8755_v6 = vld [vmem:[%s20747_s7] sm:$0xff] }
0x2def   :  { %v7887_v41 = vrot.slane %v7886_v53, 1  ;;  %v7388_v26 = vrot.slane %v7387_v5, 2  ;;  %14777 = vmatprep.subr.bf16.mxu1 %v14776_v36 }
0x2df1   :  { %v7888_v11 = vadd.f32 %v7887_v41, %v7886_v53  ;;  %v7389_v61 = vadd.f32 %v7388_v26, %v7387_v5  ;;  %v8756_v5 = vld [vmem:[%s20747_s7 + $0x8] sm:$0xff]  ;;  %v20822_v41 = vld [vmem:[#allocation5_spill] sm:$0xff] }
0x2df2   :  { %v412_v26 = vsel %vm163_vm1, %v20822_v41, 0.0 }
0x2df3   :  { %15343 = vrcp.f32 %v7888_v11  ;;  %v7390_v24 = vrot.slane %v7389_v61, 1  ;;  %v14842_v11 = vpack.c.bf16 %v8820_v7, %v8819_v45  ;;  %v8842_v45 = vld [vmem:[%s20747_s7 + $0x2b8] sm:$0xff]  ;;  %v8777_v7 = vld [vmem:[%s20747_s7 + $0xb0] sm:$0xff] }
0x2df4   :  { %v14852_v36 = vpack.c.bf16 %v8842_v45, %v8841_v49 }
0x2df5   :  { %v7391_v27 = vadd.f32 %v7390_v24, %v7389_v61  ;;  %v14778_v61 = vpack.c.bf16 %v8756_v5, %v8755_v6  ;;  %v8778_v6 = vld [vmem:[%s20747_s7 + $0xb8] sm:$0xff]  ;;  %v8825_v5 = vld [vmem:[%s20747_s7 + $0x230] sm:$0xff] }
0x2df7   :  { %15345 = vrcp.f32 %v7391_v27  ;;  %v20823_v27 = vld [vmem:[#allocation7_spill] sm:$0xff] }
0x2dfb   :  { %v922_v52 = vpop.xlane.xlu0 %921 }
0x2dfc   :  { %v1055_v48 = vmul.f32 %v922_v52, %v18638_v58  ;;  %v923_v52 = vsel %vm163_vm1, %v20823_v27, 0.0  ;;  %v8826_v27 = vld [vmem:[%s20747_s7 + $0x238] sm:$0xff] }
0x2dfd   :  { %v15344_v34 = vpop.eup %15343 }
0x2dfe   :  { %v7890_v55 = vmul.f32 %v15344_v34, %v15336_v40  ;;  %v18640_v14 = vmul.f32 %v15344_v34, %v15338_v62  ;;  %v18652_v60 = vsub.f32 %v16194_v10, %v1055_v48  ;;  %v20821_v62 = vld [vmem:[#allocation23_spill] sm:$0xff]  ;;  %v8837_v34 = vld [vmem:[%s20747_s7 + $0x290] sm:$0xff] }
0x2dff   :  { %v1419_v44 = vpop.xlane.xlu0 %1418 }
0x2e00   :  { %13318 = vmatprep.mubr.msk.f32.mxu0 %vm163_vm1, %v7890_v55  ;;  %v7892_v0 = vsel %vm163_vm1, %v7890_v55, 0.0  ;;  %v1552_v38 = vmul.f32 %v1419_v44, %v18638_v58  ;;  %v1059_v1 = vmul.f32 %v18652_v60, %v18652_v60  ;;  %v8838_v55 = vld [vmem:[%s20747_s7 + $0x298] sm:$0xff]  ;;  %v8773_v44 = vld [vmem:[%s20747_s7 + $0x90] sm:$0xff] }
0x2e01   :  { %v15346_v2 = vpop.eup %15345  ;;  %13319 = vmatmul.mubr.msk.f32.vlgmr.msra.gmra.mrb[60].mxu0 %vm163_vm1, %v18640_v14  ;;  %7893 = vadd.xlane.f32.xlu0 %v7892_v0  ;;  %v411_v20 = vpop.xlane.xlu1 %410  ;;  %v14844_v48 = vpack.c.bf16 %v8838_v55, %v8837_v34  ;;  %v8774_v0 = vld [vmem:[%s20747_s7 + $0x98] sm:$0xff]  ;;  %v20830_v55 = vld [vmem:[#allocation27_spill] sm:$0xff] }
0x2e02   :  { %v544_v46 = vmul.f32 %v411_v20, %v18638_v58  ;;  %v7393_v25 = vmul.f32 %v15346_v2, %v15340_v42  ;;  %v18649_v21 = vmul.f32 %v15346_v2, %v15342_v56  ;;  %v18660_v22 = vsub.f32 %v16550_v50, %v1552_v38  ;;  %v8835_v42 = vld [vmem:[%s20747_s7 + $0x280] sm:$0xff]  ;;  %v8836_v56 = vld [vmem:[%s20747_s7 + $0x288] sm:$0xff]  ;;  %v8821_v2 = vld [vmem:[%s20747_s7 + $0x210] sm:$0xff] }
0x2e03   :  { %v2413_v31 = vpop.xlane.xlu0 %2412  ;;  %v14840_v23 = vpack.c.bf16 %v8836_v56, %v8835_v42  ;;  %v14780_v38 = vpack.c.bf16 %v8774_v0, %v8773_v44  ;;  %v8822_v20 = vld [vmem:[%s20747_s7 + $0x218] sm:$0xff] }
0x2e04   :  { %v18655_v29 = vsub.f32 %v15974_v32, %v544_v46  ;;  %13236 = vmatprep.mubr.msk.f32.mxu1 %vm163_vm1, %v7393_v25  ;;  %v7395_v59 = vsel %vm163_vm1, %v7393_v25, 0.0  ;;  %v2546_v16 = vmul.f32 %v2413_v31, %v18638_v58  ;;  %v1556_v13 = vmul.f32 %v18660_v22, %v18660_v22  ;;  %v8757_v46 = vld [vmem:[%s20747_s7 + $0x10] sm:$0xff]  ;;  %v8758_v25 = vld [vmem:[%s20747_s7 + $0x18] sm:$0xff] }
0x2e05   :  { %13237 = vmatmul.mubr.msk.f32.vlgmr.msra.gmra.mrb[64].mxu1 %vm163_vm1, %v18649_v21  ;;  %7396 = vadd.xlane.f32.xlu1 %v7395_v59  ;;  %v1916_v12 = vpop.xlane.xlu1 %1915  ;;  %v20824_v31 = vld [vmem:[#allocation10_spill] sm:$0xff] }
0x2e06   :  { %v2049_v10 = vmul.f32 %v1916_v12, %v18638_v58  ;;  %v548_v32 = vmul.f32 %v18655_v29, %v18655_v29  ;;  %v18676_v35 = vsub.f32 %v16929_v57, %v2546_v16  ;;  %14841 = vmatprep.subr.bf16.mxu0 %v14840_v23  ;;  %14779 = vmatpush3.bf16.msra.mxu1 %v14778_v61  ;;  %v1420_v59 = vsel %vm163_vm1, %v20824_v31, 0.0  ;;  %v20827_v23 = vld [vmem:[#allocation13_spill] sm:$0xff]  ;;  %v8762_v34 = vld [vmem:[%s20747_s7 + $0x38] sm:$0xff]  ;;  %v8843_v31 = vld [vmem:[%s20747_s7 + $0x2c0] sm:$0xff] }
0x2e07   :  { %v3904_v4 = vpop.xlane.xlu0 %3903  ;;  %14843 = vmatpush3.bf16.msra.mxu0 %v14842_v11  ;;  %v14846_v12 = vpack.c.bf16 %v8822_v20, %v8821_v2  ;;  %v14782_v16 = vpack.c.bf16 %v8758_v25, %v8757_v46  ;;  %14781 = vmatprep.subr.bf16.mxu1 %v14780_v38  ;;  %v2911_v37 = vsel %vm163_vm1, %v20827_v23, 0.0  ;;  %v20829_v11 = vld [vmem:[#allocation18_spill] sm:$0xff]  ;;  %v14854_v2 = vpack.c.bf16 %v8826_v27, %v8825_v5  ;;  %v20831_v46 = vld [vmem:[#allocation19_spill] sm:$0xff] }
0x2e08   :  { %v18671_v8 = vsub.f32 %v16546_v54, %v2049_v10  ;;  %550 = vadd.xlane.f32.xlu0 %v548_v32  ;;  %v4037_v15 = vmul.f32 %v3904_v4, %v18638_v58  ;;  %v2550_v57 = vmul.f32 %v18676_v35, %v18676_v35  ;;  %14845 = vmatprep.subr.bf16.mxu0 %v14844_v48  ;;  %v20825_v10 = vld [vmem:[#allocation9_spill] sm:$0xff]  ;;  %v8839_v4 = vld [vmem:[%s20747_s7 + $0x2a0] sm:$0xff]  ;;  %v3905_v61 = vsel %vm163_vm1, %v20829_v11, 0.0  ;;  %v8782_v23 = vld [vmem:[%s20747_s7 + $0xd8] sm:$0xff] }
0x2e09   :  { %1061 = vadd.xlane.f32.xlu1 %v1059_v1  ;;  %v2910_v50 = vpop.xlane.xlu1 %2909  ;;  %v1917_v32 = vsel %vm163_vm1, %v20825_v10, 0.0  ;;  %v8840_v1 = vld [vmem:[%s20747_s7 + $0x2a8] sm:$0xff]  ;;  %v3408_v25 = vsel %vm163_vm1, %v20831_v46, 0.0  ;;  %v8766_v5 = vld [vmem:[%s20747_s7 + $0x58] sm:$0xff]  ;;  %v8783_v27 = vld [vmem:[%s20747_s7 + $0xe0] sm:$0xff] }
0x2e0a   :  { %v3043_v47 = vmul.f32 %v2910_v50, %v18638_v58  ;;  %v2053_v18 = vmul.f32 %v18671_v8, %v18671_v8  ;;  %v18686_v17 = vsub.f32 %v20820_v9, %v4037_v15  ;;  %v8775_v15 = vld [vmem:[%s20747_s7 + $0xa0] sm:$0xff]  ;;  %14783 = vmatpush3.bf16.msra.mxu1 %v14782_v16  ;;  %v8780_v10 = vld [vmem:[%s20747_s7 + $0xc8] sm:$0xff] }
0x2e0b   :  { %v4401_v53 = vpop.xlane.xlu0 %4400  ;;  %14847 = vmatpush3.bf16.msra.mxu0 %v14846_v12  ;;  %v8779_v16 = vld [vmem:[%s20747_s7 + $0xc0] sm:$0xff] }
0x2e0c   :  { %v18683_v51 = vsub.f32 %v20819_v3, %v3043_v47  ;;  %1558 = vadd.xlane.f32.xlu0 %v1556_v13  ;;  %v4041_v28 = vmul.f32 %v18686_v17, %v18686_v17  ;;  %v14848_v13 = vpack.c.bf16 %v8840_v1, %v8839_v4  ;;  %v8776_v47 = vld [vmem:[%s20747_s7 + $0xa8] sm:$0xff]  ;;  %v4534_v3 = vmul.f32 %v4401_v53, %v18638_v58  ;;  %v20828_v53 = vld [vmem:[#allocation29_spill] sm:$0xff]  ;;  %v20832_v4 = vld [vmem:[#allocation35_spill] sm:$0xff] }
0x2e0d   :  { %2055 = vadd.xlane.f32.xlu1 %v2053_v18  ;;  %v3407_v54 = vpop.xlane.xlu1 %3406  ;;  %v8823_v18 = vld [vmem:[%s20747_s7 + $0x220] sm:$0xff]  ;;  %v14784_v9 = vpack.c.bf16 %v8776_v47, %v8775_v15  ;;  %v14792_v15 = vpack.c.bf16 %v8780_v10, %v8779_v16  ;;  %v8828_v47 = vld [vmem:[%s20747_s7 + $0x248] sm:$0xff]  ;;  %v8785_v16 = vld [vmem:[%s20747_s7 + $0xf0] sm:$0xff] }
0x2e0e   :  { %v3540_v30 = vmul.f32 %v3407_v54, %v18638_v58  ;;  %v3047_v40 = vmul.f32 %v18683_v51, %v18683_v51  ;;  %14849 = vmatprep.subr.bf16.mxu0 %v14848_v13  ;;  %v18802_v41 = vsub.f32 %v20828_v53, %v4534_v3  ;;  %v20833_v3 = vld [vmem:[#allocation33_spill] sm:$0xff]  ;;  %v8786_v10 = vld [vmem:[%s20747_s7 + $0xf8] sm:$0xff] }
0x2e0f   :  { %v5409_v50 = vpop.xlane.xlu0 %5408  ;;  %14785 = vmatprep.subr.bf16.mxu1 %v14784_v9 }
0x2e10   :  { %v18694_v33 = vsub.f32 %v20821_v62, %v3540_v30  ;;  %2552 = vadd.xlane.f32.xlu0 %v2550_v57  ;;  %v8824_v30 = vld [vmem:[%s20747_s7 + $0x228] sm:$0xff]  ;;  %v8759_v57 = vld [vmem:[%s20747_s7 + $0x20] sm:$0xff]  ;;  %v4538_v13 = vmul.f32 %v18802_v41, %v18802_v41 }
0x2e11   :  { %3049 = vadd.xlane.f32.xlu1 %v3047_v40  ;;  %v4912_v24 = vpop.xlane.xlu1 %4911  ;;  %v8760_v40 = vld [vmem:[%s20747_s7 + $0x28] sm:$0xff]  ;;  %v14850_v42 = vpack.c.bf16 %v8824_v30, %v8823_v18  ;;  %v8763_v18 = vld [vmem:[%s20747_s7 + $0x40] sm:$0xff] }
0x2e12   :  { %v3544_v39 = vmul.f32 %v18694_v33, %v18694_v33  ;;  %v5045_v62 = vmul.f32 %v4912_v24, %v18638_v58  ;;  %v14786_v56 = vpack.c.bf16 %v8760_v40, %v8759_v57  ;;  %v14788_v24 = vpack.c.bf16 %v8778_v6, %v8777_v7  ;;  %v8764_v40 = vld [vmem:[%s20747_s7 + $0x48] sm:$0xff]  ;;  %v8830_v7 = vld [vmem:[%s20747_s7 + $0x258] sm:$0xff]  ;;  %v8765_v6 = vld [vmem:[%s20747_s7 + $0x50] sm:$0xff] }
0x2e13   :  { %14851 = vmatpush3.bf16.msra.mxu0 %v14850_v42  ;;  %v6403_v44 = vpop.xlane.xlu0 %6402  ;;  %v14798_v11 = vpack.c.bf16 %v8766_v5, %v8765_v6 }
0x2e14   :  { %4043 = vadd.xlane.f32.xlu0 %v4041_v28  ;;  %v20826_v28 = vld [vmem:[#allocation14_spill] sm:$0xff]  ;;  %14787 = vmatpush3.bf16.msra.mxu1 %v14786_v56  ;;  %v18817_v48 = vsub.f32 %v20830_v55, %v5045_v62  ;;  %v14794_v62 = vpack.c.bf16 %v8764_v40, %v8763_v18  ;;  %v8781_v56 = vld [vmem:[%s20747_s7 + $0xd0] sm:$0xff] }
0x2e15   :  { %3546 = vadd.xlane.f32.xlu1 %v3544_v39  ;;  %v5906_v54 = vpop.xlane.xlu1 %5905  ;;  %v2414_v39 = vsel %vm163_vm1, %v20826_v28, 0.0  ;;  %14853 = vmatprep.subr.bf16.mxu0 %v14852_v36  ;;  %v8845_v28 = vld [vmem:[%s20747_s7 + $0x2d0] sm:$0xff]  ;;  %v14796_v36 = vpack.c.bf16 %v8782_v23, %v8781_v56 }
0x2e16   :  { %v6039_v0 = vmul.f32 %v5906_v54, %v18638_v58  ;;  %14789 = vmatprep.subr.bf16.mxu1 %v14788_v24  ;;  %v5049_v30 = vmul.f32 %v18817_v48, %v18817_v48  ;;  %v8848_v24 = vld [vmem:[%s20747_s7 + $0x2e8] sm:$0xff] }
0x2e17   :  { %14855 = vmatpush3.bf16.msra.mxu0 %v14854_v2  ;;  %v8767_v2 = vld [vmem:[%s20747_s7 + $0x60] sm:$0xff] }
0x2e18   :  { %413 = vadd.xlane.f32.xlu0 %v412_v26  ;;  %v5542_v26 = vmul.f32 %v5409_v50, %v18638_v58  ;;  %v6536_v50 = vmul.f32 %v6403_v44, %v18638_v58  ;;  %v18850_v54 = vsub.f32 %v20833_v3, %v6039_v0  ;;  %v8832_v0 = vld [vmem:[%s20747_s7 + $0x268] sm:$0xff]  ;;  %v8803_v3 = vld [vmem:[%s20747_s7 + $0x180] sm:$0xff] }
0x2e19   :  { %924 = vadd.xlane.f32.xlu1 %v923_v52  ;;  %v8761_v52 = vld [vmem:[%s20747_s7 + $0x30] sm:$0xff]  ;;  %v6900_v20 = vpop.xlane.xlu1 %6899 }
0x2e1a   :  { %v14790_v38 = vpack.c.bf16 %v8762_v34, %v8761_v52  ;;  %v18838_v1 = vsub.f32 %v20832_v4, %v5542_v26  ;;  %v7033_v9 = vmul.f32 %v6900_v20, %v18638_v58  ;;  %v18874_v49 = vsub.f32 %v18435_v63, %v6536_v50  ;;  %v8784_v52 = vld [vmem:[%s20747_s7 + $0xe8] sm:$0xff]  ;;  %v8831_v34 = vld [vmem:[%s20747_s7 + $0x260] sm:$0xff]  ;;  %v8834_v50 = vld [vmem:[%s20747_s7 + $0x278] sm:$0xff] }
0x2e1b   :  { %v6043_v53 = vmul.f32 %v18850_v54, %v18850_v54  ;;  %v14800_v44 = vpack.c.bf16 %v8784_v52, %v8783_v27  ;;  %v14866_v46 = vpack.c.bf16 %v8832_v0, %v8831_v34  ;;  %v14804_v4 = vpack.c.bf16 %v8786_v10, %v8785_v16 }
0x2e1c   :  { %1421 = vadd.xlane.f32.xlu0 %v1420_v59  ;;  %v8844_v59 = vld [vmem:[%s20747_s7 + $0x2c8] sm:$0xff]  ;;  %14791 = vmatpush3.bf16.msra.mxu1 %v14790_v38  ;;  %v5546_v45 = vmul.f32 %v18838_v1, %v18838_v1  ;;  %v18888_v63 = vsub.f32 %v18431_v19, %v7033_v9  ;;  %v6540_v55 = vmul.f32 %v18874_v49, %v18874_v49 }
0x2e1d   :  { %1918 = vadd.xlane.f32.xlu1 %v1917_v32  ;;  %v14856_v12 = vpack.c.bf16 %v8844_v59, %v8843_v31  ;;  %v8827_v32 = vld [vmem:[%s20747_s7 + $0x240] sm:$0xff]  ;;  %14793 = vmatprep.subr.bf16.mxu1 %v14792_v15  ;;  %v8768_v38 = vld [vmem:[%s20747_s7 + $0x68] sm:$0xff]  ;;  %v8849_v31 = vld [vmem:[%s20747_s7 + $0x2f0] sm:$0xff] }
0x2e1e   :  { %v14858_v57 = vpack.c.bf16 %v8828_v47, %v8827_v32  ;;  %v7037_v20 = vmul.f32 %v18888_v63, %v18888_v63  ;;  %v8850_v59 = vld [vmem:[%s20747_s7 + $0x2f8] sm:$0xff]  ;;  %v8833_v32 = vld [vmem:[%s20747_s7 + $0x270] sm:$0xff]  ;;  %v8804_v9 = vld [vmem:[%s20747_s7 + $0x188] sm:$0xff] }
0x2e1f   :  { %14857 = vmatprep.subr.bf16.mxu0 %v14856_v12  ;;  %v14868_v12 = vpack.c.bf16 %v8850_v59, %v8849_v31  ;;  %v8770_v15 = vld [vmem:[%s20747_s7 + $0x78] sm:$0xff]  ;;  %v14870_v47 = vpack.c.bf16 %v8834_v50, %v8833_v32 }
0x2e20   :  { %2415 = vadd.xlane.f32.xlu0 %v2414_v39  ;;  %v8846_v39 = vld [vmem:[%s20747_s7 + $0x2d8] sm:$0xff]  ;;  %14859 = vmatpush3.bf16.msra.mxu0 %v14858_v57 }
0x2e21   :  { %2912 = vadd.xlane.f32.xlu1 %v2911_v37  ;;  %v14860_v42 = vpack.c.bf16 %v8846_v39, %v8845_v28  ;;  %v8829_v37 = vld [vmem:[%s20747_s7 + $0x250] sm:$0xff]  ;;  %14795 = vmatpush3.bf16.msra.mxu1 %v14794_v62 }
0x2e22   :  { %v14862_v26 = vpack.c.bf16 %v8830_v7, %v8829_v37  ;;  %14797 = vmatprep.subr.bf16.mxu1 %v14796_v36 }
0x2e23   :  { %14861 = vmatprep.subr.bf16.mxu0 %v14860_v42 }
0x2e24   :  { %3906 = vadd.xlane.f32.xlu0 %v3905_v61  ;;  %v8847_v61 = vld [vmem:[%s20747_s7 + $0x2e0] sm:$0xff]  ;;  %14863 = vmatpush3.bf16.msra.mxu0 %v14862_v26 }
0x2e25   :  { %3409 = vadd.xlane.f32.xlu1 %v3408_v25  ;;  %v14864_v19 = vpack.c.bf16 %v8848_v24, %v8847_v61  ;;  %14799 = vmatpush3.bf16.msra.mxu1 %v14798_v11  ;;  %v14802_v25 = vpack.c.bf16 %v8768_v38, %v8767_v2 }
0x2e26   :  { %14801 = vmatprep.subr.bf16.mxu1 %v14800_v44 }
0x2e27   :  { %14865 = vmatprep.subr.bf16.mxu0 %v14864_v19 }
0x2e28   :  { %4540 = vadd.xlane.f32.xlu0 %v4538_v13  ;;  %14867 = vmatpush3.bf16.msra.mxu0 %v14866_v46  ;;  %v8769_v13 = vld [vmem:[%s20747_s7 + $0x70] sm:$0xff] }
0x2e29   :  { %5051 = vadd.xlane.f32.xlu1 %v5049_v30  ;;  %14803 = vmatpush3.bf16.msra.mxu1 %v14802_v25  ;;  %v14806_v18 = vpack.c.bf16 %v8770_v15, %v8769_v13  ;;  %v14808_v30 = vpack.c.bf16 %v8804_v9, %v8803_v3 }
0x2e2a   :  { %14869 = vmatprep.subr.bf16.mxu0 %v14868_v12  ;;  %14805 = vmatprep.subr.bf16.mxu1 %v14804_v4 }
0x2e2c   :  { %5548 = vadd.xlane.f32.xlu0 %v5546_v45  ;;  %14871 = vmatpush3.bf16.msra.mxu0 %v14870_v47 }
0x2e2d   :  { %6045 = vadd.xlane.f32.xlu1 %v6043_v53  ;;  %14807 = vmatpush3.bf16.msra.mxu1 %v14806_v18 }
0x2e2e   :  { %14809 = vmatprep.subr.bf16.mxu1 %v14808_v30 }
0x2e30   :  { %6542 = vadd.xlane.f32.xlu0 %v6540_v55 }
0x2e31   :  { %7039 = vadd.xlane.f32.xlu1 %v7037_v20 }
0x2e8e   :  { %v18950_v57 = vpop.xlane.xlu0 %7893 }
0x2e92   :  { %v18952_v40 = vpop.xlane.xlu1 %7396 }
0x2e95   :  { %v551_v62 = vpop.xlane.xlu0 %550 }
0x2e96   :  { %v554_v28 = vmax.f32 %v551_v62, 1e-24  ;;  %v1062_v39 = vpop.xlane.xlu1 %1061 }
0x2e97   :  { %v1065_v42 = vmax.f32 %v1062_v39, 1e-24 }
0x2e98   :  { %15347 = vrsqrt.f32 %v554_v28 }
0x2e99   :  { %15349 = vrsqrt.f32 %v1065_v42  ;;  %v1559_v56 = vpop.xlane.xlu0 %1558 }
0x2e9a   :  { %v1562_v23 = vmax.f32 %v1559_v56, 1e-24  ;;  %v2056_v37 = vpop.xlane.xlu1 %2055 }
0x2e9b   :  { %v2059_v45 = vmax.f32 %v2056_v37, 1e-24 }
0x2e9c   :  { %15351 = vrsqrt.f32 %v1562_v23 }
0x2e9d   :  { %15353 = vrsqrt.f32 %v2059_v45  ;;  %v2553_v36 = vpop.xlane.xlu0 %2552 }
0x2e9e   :  { %v2556_v7 = vmax.f32 %v2553_v36, 1e-24  ;;  %v3050_v6 = vpop.xlane.xlu1 %3049 }
0x2e9f   :  { %v3053_v5 = vmax.f32 %v3050_v6, 1e-24 }
0x2ea0   :  { %15355 = vrsqrt.f32 %v2556_v7 }
0x2ea1   :  { %15357 = vrsqrt.f32 %v3053_v5  ;;  %v4044_v53 = vpop.xlane.xlu0 %4043 }
0x2ea2   :  { %v15348_v26 = vpop.eup %15347  ;;  %v4047_v11 = vmax.f32 %v4044_v53, 1e-24  ;;  %v3547_v61 = vpop.xlane.xlu1 %3546 }
0x2ea3   :  { %v15350_v24 = vpop.eup %15349  ;;  %v18955_v19 = vmul.f32 %v15348_v26, %v18655_v29  ;;  %v3550_v27 = vmax.f32 %v3547_v61, 1e-24 }
0x2ea4   :  { %v18958_v52 = vmul.f32 %v15350_v24, %v18652_v60  ;;  %15359 = vrsqrt.f32 %v4047_v11 }
0x2ea5   :  { %15361 = vrsqrt.f32 %v3550_v27  ;;  %v584_v55 = vrot.slane %v18955_v19, 5  ;;  %v576_v38 = vrot.slane %v18955_v19, 1  ;;  %v582_v50 = vrot.slane %v18955_v19, 4 }
0x2ea6   :  { %v15352_v34 = vpop.eup %15351  ;;  %v10787_v44 = vrot.slane %v18958_v52, 12  ;;  %v10786_v47 = vrot.slane %v18958_v52, 11  ;;  %v1093_v37 = vrot.slane %v18958_v52, 7 }
0x2ea7   :  { %v15354_v0 = vpop.eup %15353  ;;  %v18963_v2 = vmul.f32 %v15352_v34, %v18660_v22  ;;  %v8496_v16 = vsel %vm8494_vm6, %v576_v38, %v18958_v52 }
0x2ea8   :  { %v18967_v29 = vmul.f32 %v15354_v0, %v18671_v8  ;;  %v8500_v31 = vsel %vm8494_vm6, %v584_v55, %v10787_v44  ;;  %v8499_v7 = vsel %vm8494_vm6, %v582_v50, %v10786_v47  ;;  %v8788_v50 = vld [vmem:[%s20747_s7 + $0x108] sm:$0xff] }
0x2ea9   :  { %v10799_v60 = vrot.slane %v18963_v2, 11  ;;  %v10795_v20 = vrot.slane %v18963_v2, 7 }
0x2eaa   :  { %v15356_v46 = vpop.eup %15355  ;;  %v2085_v25 = vrot.slane %v18967_v29, 5  ;;  %v10807_v8 = vrot.slane %v18967_v29, 6  ;;  %v10810_v23 = vrot.slane %v18967_v29, 9 }
0x2eab   :  { %v15358_v22 = vpop.eup %15357  ;;  %v18974_v59 = vmul.f32 %v15356_v46, %v18676_v35  ;;  %v8517_v12 = vsel %vm8511_vm7, %v8500_v31, %v10799_v60  ;;  %v8513_v4 = vsel %vm8511_vm7, %v8496_v16, %v10795_v20  ;;  %v1589_v46 = vrot.slane %v18963_v2, 6 }
0x2eac   :  { %v18981_v10 = vmul.f32 %v15358_v22, %v18683_v51  ;;  %v8138_v32 = vrot.slane %v2085_v25, 5  ;;  %v10798_v51 = vrot.slane %v18963_v2, 10  ;;  %v8530_v39 = vsel %vm8528_vm8, %v8513_v4, %v10807_v8  ;;  %v8787_v4 = vld [vmem:[%s20747_s7 + $0x100] sm:$0xff] }
0x2ead   :  { %v10822_v35 = vrot.slane %v18974_v59, 9  ;;  %v10819_v13 = vrot.slane %v18974_v59, 5  ;;  %v2581_v15 = vrot.slane %v18974_v59, 4 }
0x2eae   :  { %v15360_v18 = vpop.eup %15359  ;;  %v8534_v3 = vsel %vm8528_vm8, %v8517_v12, %v8138_v32  ;;  %v10831_v28 = vrot.slane %v18981_v10, 4  ;;  %v10833_v53 = vrot.slane %v18981_v10, 7  ;;  %v8516_v24 = vsel %vm8511_vm7, %v8499_v7, %v10798_v51 }
0x2eaf   :  { %v15362_v9 = vpop.eup %15361  ;;  %v18994_v30 = vmul.f32 %v15360_v18, %v18686_v17  ;;  %v8550_v62 = vsel %vm267_vm4, %v8534_v3, %v10822_v35  ;;  %v8546_v56 = vsel %vm267_vm4, %v8530_v39, %v10819_v13  ;;  %v8167_v36 = vrot.slane %v2581_v15, 4 }
0x2eb0   :  { %v19000_v42 = vmul.f32 %v15362_v9, %v18694_v33  ;;  %v8567_v5 = vsel %vm8561_vm9, %v8550_v62, %v18981_v10  ;;  %v8563_v11 = vsel %vm8561_vm9, %v8546_v56, %v10831_v28  ;;  %v8533_v44 = vsel %vm8528_vm8, %v8516_v24, %v10810_v23 }
0x2eb1   :  { %v10858_v45 = vrot.slane %v18994_v30, 6  ;;  %v4069_v17 = vrot.slane %v18994_v30, 1  ;;  %v10857_v55 = vrot.slane %v18994_v30, 5  ;;  %v8549_v60 = vsel %vm267_vm4, %v8533_v44, %v8167_v36 }
0x2eb2   :  { %v10846_v6 = vrot.slane %v19000_v42, 7  ;;  %v10843_v33 = vrot.slane %v19000_v42, 3  ;;  %v10845_v61 = vrot.slane %v19000_v42, 6  ;;  %v8566_v20 = vsel %vm8561_vm9, %v8549_v60, %v10833_v53 }
0x2eb3   :  { %v8254_v26 = vrot.slane %v4069_v17, 1  ;;  %v3077_v22 = vrot.slane %v18981_v10, 3  ;;  %v8495_v12 = vsel %vm8494_vm6, %v18955_v19, %v1093_v37  ;;  %v3573_v16 = vrot.slane %v19000_v42, 2 }
0x2eb4   :  { %v8584_v27 = vsel %vm8578_vm10, %v8567_v5, %v10846_v6  ;;  %v8580_v34 = vsel %vm8578_vm10, %v8563_v11, %v10843_v33  ;;  %v8583_v31 = vsel %vm8578_vm10, %v8566_v20, %v10845_v61  ;;  %v8512_v32 = vsel %vm8511_vm7, %v8495_v12, %v1589_v46 }
0x2eb5   :  { %v8601_v0 = vsel %vm8595_vm11, %v8584_v27, %v10858_v45  ;;  %v8597_v38 = vsel %vm8595_vm11, %v8580_v34, %v8254_v26  ;;  %v8600_v8 = vsel %vm8595_vm11, %v8583_v31, %v10857_v55  ;;  %v8529_v35 = vsel %vm8528_vm8, %v8512_v32, %v2085_v25 }
0x2eb6   :  { %9225 = vmatprep.mubr.f32.mxu0 %v8601_v0  ;;  %9075 = vmatprep.mubr.f32.mxu1 %v8597_v38  ;;  %v8545_v13 = vsel %vm267_vm4, %v8529_v35, %v2581_v15  ;;  %v14810_v18 = vpack.c.bf16 %v8788_v50, %v8787_v4  ;;  %v580_v3 = vrot.slane %v18955_v19, 3  ;;  %v10785_v62 = vrot.slane %v18958_v52, 10 }
0x2eb7   :  { %9226 = vmatmul.mubr.f32.vlgmr.msra.gmra.mrb[62].mxu0 %v8600_v8  ;;  %v8562_v47 = vsel %vm8561_vm9, %v8545_v13, %v3077_v22  ;;  %v10797_v28 = vrot.slane %v18963_v2, 9  ;;  %v10821_v39 = vrot.slane %v18974_v59, 7  ;;  %v8196_v25 = vrot.slane %v3077_v22, 3 }
0x2eb8   :  { %v8579_v51 = vsel %vm8578_vm10, %v8562_v47, %v3573_v16  ;;  %v8498_v15 = vsel %vm8494_vm6, %v580_v3, %v10785_v62  ;;  %v10844_v56 = vrot.slane %v19000_v42, 5  ;;  %v578_v45 = vrot.slane %v18955_v19, 2 }
0x2eb9   :  { %v8596_v9 = vsel %vm8595_vm11, %v8579_v51, %v4069_v17  ;;  %v8515_v23 = vsel %vm8511_vm7, %v8498_v15, %v10797_v28  ;;  %v10856_v36 = vrot.slane %v18994_v30, 4  ;;  %v10784_v7 = vrot.slane %v18958_v52, 9 }
0x2eba   :  { %9076 = vmatmul.mubr.f32.vlgmr.msra.gmra.mrb[66].mxu1 %v8596_v9  ;;  %v8532_v17 = vsel %vm8528_vm8, %v8515_v23, %v18967_v29  ;;  %v10808_v5 = vrot.slane %v18967_v29, 7  ;;  %v10820_v53 = vrot.slane %v18974_v59, 6  ;;  %v10832_v27 = vrot.slane %v18981_v10, 5 }
0x2ebb   :  { %14811 = vmatpush3.bf16.msra.mxu1 %v14810_v18  ;;  %v8548_v6 = vsel %vm267_vm4, %v8532_v17, %v10821_v39  ;;  %v8497_v26 = vsel %vm8494_vm6, %v578_v45, %v10784_v7  ;;  %v8225_v0 = vrot.slane %v3573_v16, 2  ;;  %v10855_v38 = vrot.slane %v18994_v30, 3  ;;  %v20834_v45 = vld [vmem:[#allocation25_spill] sm:$0xff] }
0x2ebc   :  { %v8565_v33 = vsel %vm8561_vm9, %v8548_v6, %v8196_v25  ;;  %v8514_v61 = vsel %vm8511_vm7, %v8497_v26, %v18963_v2  ;;  %v8027_v31 = vmul.f32 %v18950_v57, %v18638_v58  ;;  %v8080_v12 = vrot.slane %v1093_v37, 7  ;;  %v925_v6 = vpop.xlane.xlu1 %924 }
0x2ebd   :  { %v8582_v11 = vsel %vm8578_vm10, %v8565_v33, %v10844_v56  ;;  %v8531_v34 = vsel %vm8528_vm8, %v8514_v61, %v10808_v5  ;;  %v10800_v32 = vrot.slane %v18963_v2, 13  ;;  %v588_v16 = vrot.slane %v18955_v19, 7 }
0x2ebe   :  { %v19070_v24 = vsel %vm8595_vm11, %v8582_v11, %v10856_v36  ;;  %v8547_v55 = vsel %vm267_vm4, %v8531_v34, %v10820_v53  ;;  %v10812_v50 = vrot.slane %v18967_v29, 12  ;;  %v10824_v35 = vrot.slane %v18974_v59, 11 }
0x2ebf   :  { %v8564_v44 = vsel %vm8561_vm9, %v8547_v55, %v10832_v27  ;;  %v7530_v13 = vmul.f32 %v18952_v40, %v18638_v58  ;;  %v10836_v37 = vrot.slane %v18981_v10, 10  ;;  %v8502_v18 = vsel %vm8494_vm6, %v588_v16, %v8080_v12  ;;  %v414_v58 = vpop.xlane.xlu0 %413  ;;  %v19131_v27 = vld [vmem:[%s20742_s2 + $0x8] sm:$0xff]  ;;  %v20835_v55 = vld [vmem:[#allocation31_spill] sm:$0xff] }
0x2ec0   :  { %v8581_v60 = vsel %vm8578_vm10, %v8564_v44, %v8225_v0  ;;  %v10848_v51 = vrot.slane %v19000_v42, 9  ;;  %v8519_v9 = vsel %vm8511_vm7, %v8502_v18, %v10800_v32  ;;  %v8109_v40 = vrot.slane %v1589_v46, 6  ;;  %v20836_v0 = vld [vmem:[#allocation24_spill] sm:$0xff]  ;;  %v1919_v32 = vpop.xlane.xlu1 %1918 }
0x2ec1   :  { %v19079_v20 = vsel %vm8595_vm11, %v8581_v60, %v10855_v38  ;;  %v8536_v28 = vsel %vm8528_vm8, %v8519_v9, %v10812_v50  ;;  %v586_v25 = vrot.slane %v18955_v19, 6  ;;  %v10788_v23 = vrot.slane %v18958_v52, 13 }
0x2ec2   :  { %v8552_v39 = vsel %vm267_vm4, %v8536_v28, %v10824_v35  ;;  %v4402_v36 = vsel %vm163_vm1, %v20834_v45, 0.0  ;;  %v10823_v7 = vrot.slane %v18974_v59, 10  ;;  %v10811_v5 = vrot.slane %v18967_v29, 11  ;;  %v20837_v35 = vld [vmem:[#allocation30_spill] sm:$0xff]  ;;  %v20839_v28 = vld [vmem:[#allocation36_spill] sm:$0xff] }
0x2ec3   :  { %v8569_v56 = vsel %vm8561_vm9, %v8552_v39, %v10836_v37  ;;  %v10835_v33 = vrot.slane %v18981_v10, 9  ;;  %v8501_v53 = vsel %vm8494_vm6, %v586_v25, %v10788_v23  ;;  %v10859_v11 = vrot.slane %v18994_v30, 7  ;;  %v1422_v34 = vpop.xlane.xlu0 %1421  ;;  %v20838_v37 = vld [vmem:[#allocation6_spill] sm:$0xff]  ;;  %v20840_v39 = vld [vmem:[#allocation8_spill] sm:$0xff] }
0x2ec4   :  { %v8586_v17 = vsel %vm8578_vm10, %v8569_v56, %v10848_v51  ;;  %v8518_v26 = vsel %vm8511_vm7, %v8501_v53, %v8109_v40  ;;  %v5410_v44 = vsel %vm163_vm1, %v20835_v55, 0.0  ;;  %v4913_v38 = vsel %vm163_vm1, %v20836_v0, 0.0  ;;  %v8806_v0 = vld [vmem:[%s20747_s7 + $0x198] sm:$0xff] }
0x2ec5   :  { %v19120_v46 = vsel %vm8595_vm11, %v8586_v17, %v18994_v30  ;;  %v8535_v61 = vsel %vm8528_vm8, %v8518_v26, %v10811_v5  ;;  %v6404_v50 = vsel %vm163_vm1, %v18292_v43, 0.0  ;;  %v1553_v51 = vmul.f32 %v1422_v34, %v19131_v27  ;;  %v2913_v43 = vpop.xlane.xlu1 %2912  ;;  %v20842_v17 = vld [vmem:[#allocation11_spill] sm:$0xff]  ;;  %v20843_v5 = vld [vmem:[#allocation17_spill] sm:$0xff] }
0x2ec6   :  { %v8551_v60 = vsel %vm267_vm4, %v8535_v61, %v10823_v7  ;;  %v7895_v9 = vsel %vm163_vm1, %v18640_v14, 0.0  ;;  %v2050_v40 = vmul.f32 %v1919_v32, %v19131_v27  ;;  %v8789_v32 = vld [vmem:[%s20747_s7 + $0x110] sm:$0xff] }
0x2ec8   :  { %v19171_v7 = vsub.f32 %v20842_v17, %v2050_v40  ;;  %v8812_v17 = vld [vmem:[%s20747_s7 + $0x1c8] sm:$0xff] }
0x2ec9   :  { %v3410_v26 = vpop.xlane.xlu1 %3409 }
0x2eca   :  { %v3541_v55 = vmul.f32 %v3410_v26, %v19131_v27  ;;  %v8795_v26 = vld [vmem:[%s20747_s7 + $0x140] sm:$0xff] }
0x2ed4   :  { %v19083_v22 = vpop.f32.mrb[60].mxu0 }
0x2ed5   :  { %v8018_v8 = vpop.f32.mrb[61].mxu0 }
0x2ed6   :  { %v19088_v4 = vsub.f32 %v8018_v8, %v8027_v31  ;;  %v8568_v31 = vsel %vm8561_vm9, %v8551_v60, %v10835_v33  ;;  %v545_v8 = vmul.f32 %v414_v58, %v19131_v27  ;;  %v6901_v58 = vsel %vm163_vm1, %v20839_v28, 0.0 }
0x2ed7   :  { %v8585_v12 = vsel %vm8578_vm10, %v8568_v31, %v19000_v42 }
0x2ed8   :  { %v8031_v57 = vmul.f32 %v19088_v4, %v19088_v4  ;;  %v19097_v47 = vpop.f32.mrb[64].mxu1  ;;  %v19143_v16 = vsel %vm8595_vm11, %v8585_v12, %v10859_v11  ;;  %v19150_v18 = vsub.f32 %v20838_v37, %v545_v8  ;;  %v2054_v12 = vmul.f32 %v19171_v7, %v19171_v7 }
0x2ed9   :  { %v7521_v3 = vpop.f32.mrb[65].mxu1 }
0x2eda   :  { %v19103_v62 = vsub.f32 %v7521_v3, %v7530_v13  ;;  %8033 = vadd.xlane.f32.xlu0 %v8031_v57  ;;  %v5907_v13 = vsel %vm163_vm1, %v20837_v35, 0.0  ;;  %v2416_v57 = vpop.xlane.xlu0 %2415  ;;  %v1056_v3 = vmul.f32 %v925_v6, %v19131_v27  ;;  %v549_v45 = vmul.f32 %v19150_v18, %v19150_v18 }
0x2edb   :  { %v2547_v23 = vmul.f32 %v2416_v57, %v19131_v27  ;;  %v3044_v6 = vmul.f32 %v2913_v43, %v19131_v27  ;;  %v8808_v57 = vld [vmem:[%s20747_s7 + $0x1a8] sm:$0xff] }
0x2edc   :  { %v7534_v15 = vmul.f32 %v19103_v62, %v19103_v62  ;;  %v19160_v25 = vsub.f32 %v20840_v39, %v1056_v3  ;;  %v20846_v3 = vld [vmem:[#allocation22_spill] sm:$0xff]  ;;  %v8792_v43 = vld [vmem:[%s20747_s7 + $0x128] sm:$0xff]  ;;  %v8809_v39 = vld [vmem:[%s20747_s7 + $0x1b0] sm:$0xff] }
0x2edd   :  { %v19175_v33 = vsub.f32 %v20843_v5, %v2547_v23  ;;  %v8793_v23 = vld [vmem:[%s20747_s7 + $0x130] sm:$0xff] }
0x2ede   :  { %4403 = vadd.xlane.f32.xlu0 %v4402_v36  ;;  %7536 = vadd.xlane.f32.xlu1 %v7534_v15  ;;  %v20841_v15 = vld [vmem:[#allocation12_spill] sm:$0xff]  ;;  %v3907_v14 = vpop.xlane.xlu0 %3906  ;;  %v7398_v36 = vsel %vm163_vm1, %v18649_v21, 0.0  ;;  %v1060_v61 = vmul.f32 %v19160_v25, %v19160_v25  ;;  %v20844_v21 = vld [vmem:[#allocation15_spill] sm:$0xff] }
0x2edf   :  { %v19163_v56 = vsub.f32 %v20841_v15, %v1553_v51  ;;  %v4038_v53 = vmul.f32 %v3907_v14, %v19131_v27  ;;  %v19183_v34 = vsub.f32 %v20844_v21, %v3044_v6  ;;  %v2551_v31 = vmul.f32 %v19175_v33, %v19175_v33  ;;  %v8810_v15 = vld [vmem:[%s20747_s7 + $0x1b8] sm:$0xff] }
0x2ee0   :  { %v19212_v51 = vsub.f32 %v20846_v3, %v3541_v55  ;;  %v8794_v14 = vld [vmem:[%s20747_s7 + $0x138] sm:$0xff] }
0x2ee1   :  { %v1557_v11 = vmul.f32 %v19163_v56, %v19163_v56  ;;  %v3048_v28 = vmul.f32 %v19183_v34, %v19183_v34  ;;  %v14822_v5 = vpack.c.bf16 %v8794_v14, %v8793_v23  ;;  %v8814_v21 = vld [vmem:[%s20747_s7 + $0x1d8] sm:$0xff]  ;;  %v8884_v23 = vld [vmem:[%s20747_s7 + $0x408] sm:$0xff]  ;;  %v8867_v14 = vld [vmem:[%s20747_s7 + $0x380] sm:$0xff] }
0x2ee2   :  { %5411 = vadd.xlane.f32.xlu0 %v5410_v44  ;;  %4914 = vadd.xlane.f32.xlu1 %v4913_v38  ;;  %v8805_v44 = vld [vmem:[%s20747_s7 + $0x190] sm:$0xff]  ;;  %v20845_v38 = vld [vmem:[#allocation20_spill] sm:$0xff]  ;;  %v3545_v6 = vmul.f32 %v19212_v51, %v19212_v51 }
0x2ee3   :  { %v19193_v60 = vsub.f32 %v20845_v38, %v4038_v53  ;;  %v14812_v8 = vpack.c.bf16 %v8806_v0, %v8805_v44  ;;  %v8797_v0 = vld [vmem:[%s20747_s7 + $0x150] sm:$0xff]  ;;  %v8798_v38 = vld [vmem:[%s20747_s7 + $0x158] sm:$0xff] }
0x2ee5   :  { %14813 = vmatprep.subr.bf16.mxu1 %v14812_v8  ;;  %v8816_v8 = vld [vmem:[%s20747_s7 + $0x1e8] sm:$0xff] }
0x2ee6   :  { %6405 = vadd.xlane.f32.xlu0 %v6404_v50  ;;  %5908 = vadd.xlane.f32.xlu1 %v5907_v13  ;;  %v8790_v50 = vld [vmem:[%s20747_s7 + $0x118] sm:$0xff]  ;;  %v8807_v13 = vld [vmem:[%s20747_s7 + $0x1a0] sm:$0xff] }
0x2ee7   :  { %v14814_v35 = vpack.c.bf16 %v8790_v50, %v8789_v32  ;;  %v14816_v37 = vpack.c.bf16 %v8808_v57, %v8807_v13  ;;  %v8799_v50 = vld [vmem:[%s20747_s7 + $0x160] sm:$0xff]  ;;  %v8817_v57 = vld [vmem:[%s20747_s7 + $0x1f0] sm:$0xff] }
0x2ee9   :  { %14815 = vmatpush3.bf16.msra.mxu1 %v14814_v35  ;;  %v8800_v35 = vld [vmem:[%s20747_s7 + $0x168] sm:$0xff] }
0x2eea   :  { %7896 = vadd.xlane.f32.xlu0 %v7895_v9  ;;  %6902 = vadd.xlane.f32.xlu1 %v6901_v58  ;;  %v4042_v9 = vmul.f32 %v19193_v60, %v19193_v60  ;;  %v8791_v58 = vld [vmem:[%s20747_s7 + $0x120] sm:$0xff]  ;;  %v14834_v13 = vpack.c.bf16 %v8800_v35, %v8799_v50  ;;  %v8890_v50 = vld [vmem:[%s20747_s7 + $0x438] sm:$0xff] }
0x2eeb   :  { %14817 = vmatprep.subr.bf16.mxu1 %v14816_v37  ;;  %v14818_v40 = vpack.c.bf16 %v8792_v43, %v8791_v58  ;;  %v8818_v37 = vld [vmem:[%s20747_s7 + $0x1f8] sm:$0xff]  ;;  %v8899_v58 = vld [vmem:[%s20747_s7 + $0x480] sm:$0xff] }
0x2eec   :  { %v14836_v3 = vpack.c.bf16 %v8818_v37, %v8817_v57  ;;  %v8907_v57 = vld [vmem:[%s20747_s7 + $0x4c0] sm:$0xff]  ;;  %v8908_v37 = vld [vmem:[%s20747_s7 + $0x4c8] sm:$0xff] }
0x2eed   :  { %14819 = vmatpush3.bf16.msra.mxu1 %v14818_v40  ;;  %v8900_v40 = vld [vmem:[%s20747_s7 + $0x488] sm:$0xff] }
0x2eee   :  { %552 = vadd.xlane.f32.xlu0 %v549_v45  ;;  %7399 = vadd.xlane.f32.xlu1 %v7398_v36  ;;  %v14820_v45 = vpack.c.bf16 %v8810_v15, %v8809_v39  ;;  %v8811_v36 = vld [vmem:[%s20747_s7 + $0x1c0] sm:$0xff]  ;;  %v14904_v39 = vpack.c.bf16 %v8900_v40, %v8899_v58  ;;  %v8910_v40 = vld [vmem:[%s20747_s7 + $0x4d8] sm:$0xff] }
0x2eef   :  { %v14824_v53 = vpack.c.bf16 %v8812_v17, %v8811_v36  ;;  %v8883_v15 = vld [vmem:[%s20747_s7 + $0x400] sm:$0xff]  ;;  %v8868_v36 = vld [vmem:[%s20747_s7 + $0x388] sm:$0xff] }
0x2ef0   :  { %14821 = vmatprep.subr.bf16.mxu1 %v14820_v45  ;;  %v14906_v45 = vpack.c.bf16 %v8884_v23, %v8883_v15  ;;  %14905 = vmatprep.subr.bf16.mxu0 %v14904_v39  ;;  %v14872_v17 = vpack.c.bf16 %v8868_v36, %v8867_v14  ;;  %v8893_v15 = vld [vmem:[%s20747_s7 + $0x450] sm:$0xff]  ;;  %v8894_v23 = vld [vmem:[%s20747_s7 + $0x458] sm:$0xff]  ;;  %v8912_v14 = vld [vmem:[%s20747_s7 + $0x4e8] sm:$0xff] }
0x2ef1   :  { %14823 = vmatpush3.bf16.msra.mxu1 %v14822_v5  ;;  %v8902_v5 = vld [vmem:[%s20747_s7 + $0x498] sm:$0xff]  ;;  %v14926_v36 = vpack.c.bf16 %v8894_v23, %v8893_v15 }
0x2ef2   :  { %1560 = vadd.xlane.f32.xlu0 %v1557_v11  ;;  %1063 = vadd.xlane.f32.xlu1 %v1060_v61  ;;  %v8796_v11 = vld [vmem:[%s20747_s7 + $0x148] sm:$0xff]  ;;  %v8813_v61 = vld [vmem:[%s20747_s7 + $0x1d0] sm:$0xff] }
0x2ef3   :  { %v14826_v55 = vpack.c.bf16 %v8796_v11, %v8795_v26  ;;  %14825 = vmatprep.subr.bf16.mxu1 %v14824_v53  ;;  %v14828_v44 = vpack.c.bf16 %v8814_v21, %v8813_v61  ;;  %14907 = vmatpush3.bf16.msra.mxu0 %v14906_v45  ;;  %v8885_v53 = vld [vmem:[%s20747_s7 + $0x410] sm:$0xff]  ;;  %v8886_v26 = vld [vmem:[%s20747_s7 + $0x418] sm:$0xff]  ;;  %v8903_v21 = vld [vmem:[%s20747_s7 + $0x4a0] sm:$0xff] }
0x2ef4   :  { %v14910_v61 = vpack.c.bf16 %v8886_v26, %v8885_v53  ;;  %v8911_v45 = vld [vmem:[%s20747_s7 + $0x4e0] sm:$0xff]  ;;  %v8913_v53 = vld [vmem:[%s20747_s7 + $0x4f0] sm:$0xff]  ;;  %v8914_v26 = vld [vmem:[%s20747_s7 + $0x4f8] sm:$0xff] }
0x2ef5   :  { %14827 = vmatpush3.bf16.msra.mxu1 %v14826_v55  ;;  %v8904_v55 = vld [vmem:[%s20747_s7 + $0x4a8] sm:$0xff] }
0x2ef6   :  { %2554 = vadd.xlane.f32.xlu0 %v2551_v31  ;;  %2057 = vadd.xlane.f32.xlu1 %v2054_v12  ;;  %v14830_v31 = vpack.c.bf16 %v8798_v38, %v8797_v0  ;;  %v8815_v12 = vld [vmem:[%s20747_s7 + $0x1e0] sm:$0xff]  ;;  %v8888_v0 = vld [vmem:[%s20747_s7 + $0x428] sm:$0xff]  ;;  %v14912_v38 = vpack.c.bf16 %v8904_v55, %v8903_v21  ;;  %v8897_v21 = vld [vmem:[%s20747_s7 + $0x470] sm:$0xff] }
0x2ef7   :  { %14829 = vmatprep.subr.bf16.mxu1 %v14828_v44  ;;  %v14832_v32 = vpack.c.bf16 %v8816_v8, %v8815_v12  ;;  %v8887_v44 = vld [vmem:[%s20747_s7 + $0x420] sm:$0xff]  ;;  %v8905_v12 = vld [vmem:[%s20747_s7 + $0x4b0] sm:$0xff]  ;;  %v8906_v8 = vld [vmem:[%s20747_s7 + $0x4b8] sm:$0xff] }
0x2ef8   :  { %v14916_v35 = vpack.c.bf16 %v8906_v8, %v8905_v12  ;;  %v8898_v55 = vld [vmem:[%s20747_s7 + $0x478] sm:$0xff] }
0x2ef9   :  { %14831 = vmatpush3.bf16.msra.mxu1 %v14830_v31  ;;  %v14914_v31 = vpack.c.bf16 %v8888_v0, %v8887_v44  ;;  %v14934_v44 = vpack.c.bf16 %v8898_v55, %v8897_v21  ;;  %v4541_v0 = vpop.xlane.xlu0 %4540  ;;  %v19421_v55 = vmul.f32 %v18958_v52, %v18958_v52 }
0x2efa   :  { %4045 = vadd.xlane.f32.xlu0 %v4042_v9  ;;  %3051 = vadd.xlane.f32.xlu1 %v3048_v28  ;;  %v8801_v9 = vld [vmem:[%s20747_s7 + $0x170] sm:$0xff]  ;;  %v8802_v28 = vld [vmem:[%s20747_s7 + $0x178] sm:$0xff]  ;;  %v4544_v12 = vmax.f32 %v4541_v0, 1e-24 }
0x2efb   :  { %14833 = vmatprep.subr.bf16.mxu1 %v14832_v32  ;;  %v14838_v43 = vpack.c.bf16 %v8802_v28, %v8801_v9  ;;  %v8889_v32 = vld [vmem:[%s20747_s7 + $0x430] sm:$0xff]  ;;  %v8891_v9 = vld [vmem:[%s20747_s7 + $0x440] sm:$0xff]  ;;  %v8892_v28 = vld [vmem:[%s20747_s7 + $0x448] sm:$0xff] }
0x2efc   :  { %v14922_v58 = vpack.c.bf16 %v8892_v28, %v8891_v9  ;;  %15363 = vrsqrt.f32 %v4544_v12 }
0x2efd   :  { %14835 = vmatpush3.bf16.msra.mxu1 %v14834_v13  ;;  %v14918_v13 = vpack.c.bf16 %v8890_v50, %v8889_v32 }
0x2efe   :  { %3548 = vadd.xlane.f32.xlu1 %v3545_v6  ;;  %14837 = vmatprep.subr.bf16.mxu1 %v14836_v3  ;;  %v8901_v6 = vld [vmem:[%s20747_s7 + $0x490] sm:$0xff]  ;;  %v14920_v3 = vpack.c.bf16 %v8908_v37, %v8907_v57 }
0x2eff   :  { %v14908_v11 = vpack.c.bf16 %v8902_v5, %v8901_v6  ;;  %v8895_v6 = vld [vmem:[%s20747_s7 + $0x460] sm:$0xff]  ;;  %v8896_v5 = vld [vmem:[%s20747_s7 + $0x468] sm:$0xff] }
0x2f01   :  { %14839 = vmatpush3.bf16.msra.mxu1 %v14838_v43  ;;  %14909 = vmatprep.subr.bf16.mxu0 %v14908_v11  ;;  %v8909_v43 = vld [vmem:[%s20747_s7 + $0x4d0] sm:$0xff]  ;;  %v14930_v11 = vpack.c.bf16 %v8896_v5, %v8895_v6 }
0x2f02   :  { %14873 = vmatprep.subr.bf16.mxu1 %v14872_v17  ;;  %14911 = vmatpush3.bf16.msra.mxu0 %v14910_v61  ;;  %v14924_v39 = vpack.c.bf16 %v8910_v40, %v8909_v43  ;;  %v14928_v17 = vpack.c.bf16 %v8912_v14, %v8911_v45  ;;  %v14932_v61 = vpack.c.bf16 %v8914_v26, %v8913_v53 }
0x2f03   :  { %14913 = vmatprep.subr.bf16.mxu0 %v14912_v38  ;;  %v5052_v38 = vpop.xlane.xlu1 %5051  ;;  %v19411_v53 = vmul.f32 %v18955_v19, %v18955_v19 }
0x2f04   :  { %v5055_v32 = vmax.f32 %v5052_v38, 1e-24 }
0x2f06   :  { %14915 = vmatpush3.bf16.msra.mxu0 %v14914_v31  ;;  %v5549_v31 = vpop.xlane.xlu0 %5548  ;;  %15365 = vrsqrt.f32 %v5055_v32  ;;  %v15364_v9 = vpop.eup %15363 }
0x2f07   :  { %14917 = vmatprep.subr.bf16.mxu0 %v14916_v35  ;;  %v6046_v8 = vpop.xlane.xlu1 %6045  ;;  %v5552_v50 = vmax.f32 %v5549_v31, 1e-24  ;;  %v19389_v40 = vmul.f32 %v15364_v9, %v18802_v41 }
0x2f08   :  { %v6049_v35 = vmax.f32 %v6046_v8, 1e-24 }
0x2f09   :  { %15367 = vrsqrt.f32 %v5552_v50  ;;  %v4566_v45 = vrot.slane %v19389_v40, 1  ;;  %v4572_v5 = vrot.slane %v19389_v40, 4 }
0x2f0a   :  { %14919 = vmatpush3.bf16.msra.mxu0 %v14918_v13  ;;  %v6543_v13 = vpop.xlane.xlu0 %6542  ;;  %15369 = vrsqrt.f32 %v6049_v35  ;;  %v4568_v35 = vrot.slane %v19389_v40, 2 }
0x2f0b   :  { %14921 = vmatprep.subr.bf16.mxu0 %v14920_v3  ;;  %v6546_v57 = vmax.f32 %v6543_v13, 1e-24  ;;  %v7040_v37 = vpop.xlane.xlu1 %7039 }
0x2f0c   :  { %v7043_v3 = vmax.f32 %v7040_v37, 1e-24 }
0x2f0d   :  { %15371 = vrsqrt.f32 %v6546_v57 }
0x2f0e   :  { %14923 = vmatpush3.bf16.msra.mxu0 %v14922_v58  ;;  %15373 = vrsqrt.f32 %v7043_v3 }
0x2f0f   :  { %14925 = vmatprep.subr.bf16.mxu0 %v14924_v39 }
0x2f10   :  { %v15366_v28 = vpop.eup %15365 }
0x2f11   :  { %v19392_v39 = vmul.f32 %v15366_v28, %v18817_v48 }
0x2f12   :  { %14927 = vmatpush3.bf16.msra.mxu0 %v14926_v36  ;;  %v4574_v36 = vrot.slane %v19389_v40, 5 }
0x2f13   :  { %14929 = vmatprep.subr.bf16.mxu0 %v14928_v17  ;;  %v15368_v58 = vpop.eup %15367  ;;  %v10871_v17 = vrot.slane %v19392_v39, 12  ;;  %v5083_v6 = vrot.slane %v19392_v39, 7  ;;  %v10868_v13 = vrot.slane %v19392_v39, 9  ;;  %v10869_v9 = vrot.slane %v19392_v39, 10 }
0x2f14   :  { %v15370_v43 = vpop.eup %15369  ;;  %v19395_v15 = vmul.f32 %v15368_v58, %v18838_v1  ;;  %v10870_v1 = vrot.slane %v19392_v39, 11 }
0x2f15   :  { %v19398_v23 = vmul.f32 %v15370_v43, %v18850_v54  ;;  %v8617_v0 = vsel %vm8494_vm6, %v4574_v36, %v10871_v17  ;;  %v8612_v19 = vsel %vm8494_vm6, %v19389_v40, %v5083_v6 }
0x2f16   :  { %14931 = vmatpush3.bf16.msra.mxu0 %v14930_v11  ;;  %v10879_v41 = vrot.slane %v19395_v15, 7  ;;  %v20773_v48 = vrot.slane %v19395_v15, 6  ;;  %v10883_v21 = vrot.slane %v19395_v15, 11  ;;  %v10882_v52 = vrot.slane %v19395_v15, 10 }
0x2f17   :  { %14933 = vmatprep.subr.bf16.mxu0 %v14932_v61  ;;  %v15372_v14 = vpop.eup %15371  ;;  %v6075_v54 = vrot.slane %v19398_v23, 5  ;;  %v8613_v61 = vsel %vm8494_vm6, %v4566_v45, %v19392_v39  ;;  %v8616_v12 = vsel %vm8494_vm6, %v4572_v5, %v10870_v1  ;;  %v10881_v43 = vrot.slane %v19395_v15, 9 }
0x2f18   :  { %v15374_v26 = vpop.eup %15373  ;;  %v19414_v11 = vmul.f32 %v15372_v14, %v18874_v49  ;;  %v4570_v49 = vrot.slane %v19389_v40, 3  ;;  %v8629_v38 = vsel %vm8511_vm7, %v8613_v61, %v10879_v41  ;;  %v8628_v31 = vsel %vm8511_vm7, %v8612_v19, %v20773_v48 }
0x2f19   :  { %v19437_v8 = vmul.f32 %v15374_v26, %v18888_v63  ;;  %v8348_v50 = vrot.slane %v6075_v54, 5  ;;  %v8633_v37 = vsel %vm8511_vm7, %v8617_v0, %v10883_v21  ;;  %v8644_v58 = vsel %vm8528_vm8, %v8628_v31, %v6075_v54 }
0x2f1a   :  { %14935 = vmatpush3.bf16.msra.mxu0 %v14934_v44  ;;  %v10891_v44 = vrot.slane %v19398_v23, 6  ;;  %v6571_v3 = vrot.slane %v19414_v11, 4  ;;  %v10894_v63 = vrot.slane %v19398_v23, 9  ;;  %v10903_v45 = vrot.slane %v19414_v11, 5 }
0x2f1b   :  { %v10906_v14 = vrot.slane %v19414_v11, 9  ;;  %v8632_v36 = vsel %vm8511_vm7, %v8616_v12, %v10882_v52  ;;  %v10915_v5 = vrot.slane %v19437_v8, 4  ;;  %v8649_v1 = vsel %vm8528_vm8, %v8633_v37, %v8348_v50  ;;  %v20847_v12 = vld [vmem:[#allocation28_spill] sm:$0xff] }
0x2f1c   :  { %v8645_v28 = vsel %vm8528_vm8, %v8629_v38, %v10891_v44  ;;  %v7067_v26 = vrot.slane %v19437_v8, 3  ;;  %v8614_v54 = vsel %vm8494_vm6, %v4568_v35, %v10868_v13  ;;  %v8377_v44 = vrot.slane %v6571_v3, 4 }
0x2f1d   :  { %v8615_v0 = vsel %vm8494_vm6, %v4570_v49, %v10869_v9  ;;  %v10917_v19 = vrot.slane %v19437_v8, 7  ;;  %v10905_v38 = vrot.slane %v19414_v11, 7  ;;  %v10892_v52 = vrot.slane %v19398_v23, 7 }
0x2f1e   :  { %v8631_v31 = vsel %vm8511_vm7, %v8615_v0, %v10881_v43  ;;  %v10904_v50 = vrot.slane %v19414_v11, 6  ;;  %v8630_v35 = vsel %vm8511_vm7, %v8614_v54, %v19395_v15  ;;  %v8661_v49 = vsel %vm267_vm4, %v8645_v28, %v10903_v45 }
0x2f1f   :  { %v8665_v37 = vsel %vm267_vm4, %v8649_v1, %v10906_v14  ;;  %v8660_v9 = vsel %vm267_vm4, %v8644_v58, %v6571_v3  ;;  %v8648_v43 = vsel %vm8528_vm8, %v8632_v36, %v10894_v63  ;;  %v8406_v54 = vrot.slane %v7067_v26, 3  ;;  %v20848_v3 = vld [vmem:[#allocation34_spill] sm:$0xff] }
0x2f20   :  { %v8647_v0 = vsel %vm8528_vm8, %v8631_v31, %v19398_v23  ;;  %v10916_v28 = vrot.slane %v19437_v8, 5  ;;  %v8646_v45 = vsel %vm8528_vm8, %v8630_v35, %v10892_v52  ;;  %v20849_v63 = vld [vmem:[#allocation26_spill] sm:$0xff]  ;;  %v8681_v31 = vsel %vm8561_vm9, %v8665_v37, %v19437_v8 }
0x2f21   :  { %v8663_v36 = vsel %vm267_vm4, %v8647_v0, %v10905_v38  ;;  %v8662_v1 = vsel %vm267_vm4, %v8646_v45, %v10904_v50  ;;  %v8676_v52 = vsel %vm8561_vm9, %v8660_v9, %v7067_v26  ;;  %v20850_v37 = vld [vmem:[#allocation38_spill] sm:$0xff]  ;;  %v4578_v45 = vrot.slane %v19389_v40, 7 }
0x2f22   :  { %v19506_v26 = vsel %vm8561_vm9, %v8662_v1, %v10916_v28  ;;  %v19529_v28 = vmul.f32 %v18967_v29, %v18967_v29  ;;  %v8290_v29 = vrot.slane %v5083_v6, 7 }
0x2f67   :  { %v8034_v32 = vpop.xlane.xlu0 %8033 }
0x2f68   :  { %v8037_v57 = vmax.f32 %v8034_v32, 1e-24 }
0x2f6a   :  { %15375 = vrsqrt.f32 %v8037_v57 }
0x2f6b   :  { %v4404_v17 = vpop.xlane.xlu0 %4403  ;;  %v7537_v41 = vpop.xlane.xlu1 %7536 }
0x2f6c   :  { %v4535_v61 = vmul.f32 %v4404_v17, %v19131_v27  ;;  %v7540_v21 = vmax.f32 %v7537_v41, 1e-24 }
0x2f6e   :  { %v19462_v32 = vsub.f32 %v20847_v12, %v4535_v61  ;;  %15377 = vrsqrt.f32 %v7540_v21  ;;  %v8664_v21 = vsel %vm267_vm4, %v8648_v43, %v8377_v44 }
0x2f6f   :  { %v5412_v13 = vpop.xlane.xlu0 %5411  ;;  %v4915_v57 = vpop.xlane.xlu1 %4914  ;;  %v8680_v35 = vsel %vm8561_vm9, %v8664_v21, %v10917_v19  ;;  %v19510_v19 = vmul.f32 %v18963_v2, %v18963_v2  ;;  %v19525_v2 = vmul.f32 %v19392_v39, %v19392_v39 }
0x2f70   :  { %v5543_v17 = vmul.f32 %v5412_v13, %v19131_v27  ;;  %v5046_v41 = vmul.f32 %v4915_v57, %v19131_v27  ;;  %v4539_v61 = vmul.f32 %v19462_v32, %v19462_v32  ;;  %v8677_v13 = vsel %vm8561_vm9, %v8661_v49, %v10915_v5 }
0x2f71   :  { %v19503_v49 = vsel %vm8561_vm9, %v8663_v36, %v8406_v54 }
0x2f72   :  { %v19481_v58 = vsub.f32 %v20848_v3, %v5543_v17  ;;  %v19484_v14 = vsub.f32 %v20849_v63, %v5046_v41  ;;  %4542 = vadd.xlane.f32.xlu0 %v4539_v61  ;;  %v20852_v41 = vld [vmem:[#allocation32_spill] sm:$0xff] }
0x2f73   :  { %v6406_v44 = vpop.xlane.xlu0 %6405  ;;  %v5909_v12 = vpop.xlane.xlu1 %5908 }
0x2f74   :  { %v15376_v57 = vpop.eup %15375  ;;  %v6537_v43 = vmul.f32 %v6406_v44, %v19131_v27  ;;  %v6040_v17 = vmul.f32 %v5909_v12, %v19131_v27  ;;  %v5547_v38 = vmul.f32 %v19481_v58, %v19481_v58  ;;  %v5050_v50 = vmul.f32 %v19484_v14, %v19484_v14 }
0x2f75   :  { %v19500_v5 = vmul.f32 %v15376_v57, %v19088_v4  ;;  %v19520_v4 = vmul.f32 %v19389_v40, %v19389_v40 }
0x2f76   :  { %v19513_v9 = vsub.f32 %v20850_v37, %v6537_v43  ;;  %v19516_v61 = vsub.f32 %v20852_v41, %v6040_v17  ;;  %5550 = vadd.xlane.f32.xlu0 %v5547_v38  ;;  %5053 = vadd.xlane.f32.xlu1 %v5050_v50  ;;  %v20854_v38 = vld [vmem:[#allocation37_spill] sm:$0xff] }
0x2f77   :  { %v7897_v21 = vpop.xlane.xlu0 %7896  ;;  %v6903_v54 = vpop.xlane.xlu1 %6902  ;;  %v8059_v0 = vrot.slane %v19500_v5, 1  ;;  %v10942_v57 = vrot.slane %v19500_v5, 6  ;;  %v10941_v41 = vrot.slane %v19500_v5, 5 }
0x2f78   :  { %20851 = vst [vmem:[#allocation16_spill] sm:$0xff] %v19513_v9  ;;  %20853 = vst [vmem:[#allocation21_spill] sm:$0xff] %v19516_v61  ;;  %v15378_v3 = vpop.eup %15377  ;;  %v8028_v63 = vmul.f32 %v7897_v21, %v19131_v27  ;;  %v7034_v36 = vmul.f32 %v6903_v54, %v19131_v27  ;;  %v6541_v1 = vmul.f32 %v19513_v9, %v19513_v9 }
0x2f79   :  { %v6044_v44 = vmul.f32 %v19516_v61, %v19516_v61  ;;  %v19539_v12 = vmul.f32 %v15378_v3, %v19103_v62  ;;  %v8464_v37 = vrot.slane %v8059_v0, 1 }
0x2f7a   :  { %v19546_v17 = vsub.f32 %v19083_v22, %v8028_v63  ;;  %v19549_v50 = vsub.f32 %v20854_v38, %v7034_v36  ;;  %6544 = vadd.xlane.f32.xlu0 %v6541_v1 }
0x2f7b   :  { %6047 = vadd.xlane.f32.xlu1 %v6044_v44  ;;  %v553_v62 = vpop.xlane.xlu0 %552  ;;  %v7400_v21 = vpop.xlane.xlu1 %7399  ;;  %v10927_v54 = vrot.slane %v19539_v12, 3  ;;  %v10930_v3 = vrot.slane %v19539_v12, 7  ;;  %v7563_v6 = vrot.slane %v19539_v12, 2  ;;  %v10929_v43 = vrot.slane %v19539_v12, 6 }
0x2f7c   :  { %v555_v22 = vmax.f32 %v553_v62, 1e-24  ;;  %v7531_v63 = vmul.f32 %v7400_v21, %v19131_v27  ;;  %v8032_v36 = vmul.f32 %v19546_v17, %v19546_v17  ;;  %v7038_v1 = vmul.f32 %v19549_v50, %v19549_v50  ;;  %v8870_v21 = vld [vmem:[%s20747_s7 + $0x398] sm:$0xff] }
0x2f7d   :  { %v8693_v44 = vsel %vm8578_vm10, %v8677_v13, %v10927_v54  ;;  %v8697_v38 = vsel %vm8578_vm10, %v8681_v31, %v10930_v3  ;;  %v8692_v48 = vsel %vm8578_vm10, %v8676_v52, %v7563_v6  ;;  %v8696_v61 = vsel %vm8578_vm10, %v8680_v35, %v10929_v43  ;;  %v8851_v13 = vld [vmem:[%s20747_s7 + $0x300] sm:$0xff]  ;;  %v8852_v31 = vld [vmem:[%s20747_s7 + $0x308] sm:$0xff] }
0x2f7e   :  { %15379 = vrsqrt.f32 %v555_v22  ;;  %v19566_v9 = vsub.f32 %v19097_v47, %v7531_v63  ;;  %8035 = vadd.xlane.f32.xlu0 %v8032_v36  ;;  %v8709_v27 = vsel %vm8595_vm11, %v8693_v44, %v8464_v37  ;;  %v8713_v62 = vsel %vm8595_vm11, %v8697_v38, %v10942_v57  ;;  %v8869_v57 = vld [vmem:[%s20747_s7 + $0x390] sm:$0xff]  ;;  %v8872_v44 = vld [vmem:[%s20747_s7 + $0x3a8] sm:$0xff] }
0x2f7f   :  { %7041 = vadd.xlane.f32.xlu1 %v7038_v1  ;;  %v1561_v52 = vpop.xlane.xlu0 %1560  ;;  %9080 = vmatprep.mubr.f32.mxu1 %v8709_v27  ;;  %v1064_v35 = vpop.xlane.xlu1 %1063  ;;  %v8708_v47 = vsel %vm8595_vm11, %v8692_v48, %v8059_v0  ;;  %v8712_v43 = vsel %vm8595_vm11, %v8696_v61, %v10941_v41  ;;  %v10928_v37 = vrot.slane %v19539_v12, 5  ;;  %v8619_v54 = vsel %vm8494_vm6, %v4578_v45, %v8290_v29 }
0x2f80   :  { %9230 = vmatprep.mubr.f32.mxu0 %v8713_v62  ;;  %v1563_v3 = vmax.f32 %v1561_v52, 1e-24  ;;  %v1066_v22 = vmax.f32 %v1064_v35, 1e-24  ;;  %9081 = vmatmul.mubr.f32.gmra.mrb[68].mxu1 %v8708_v47  ;;  %v7535_v48 = vmul.f32 %v19566_v9, %v19566_v9  ;;  %v8435_v61 = vrot.slane %v7563_v6, 2  ;;  %v8853_v6 = vld [vmem:[%s20747_s7 + $0x310] sm:$0xff] }
0x2f81   :  { %9231 = vmatmul.mubr.f32.gmra.mrb[64].mxu0 %v8712_v43  ;;  %9150 = vmatprep.mubr.f32.mxu1 %v19070_v24  ;;  %v14874_v0 = vpack.c.bf16 %v8852_v31, %v8851_v13  ;;  %v8695_v41 = vsel %vm8578_vm10, %v19503_v49, %v10928_v37  ;;  %v4576_v63 = vrot.slane %v19389_v40, 6  ;;  %v10872_v36 = vrot.slane %v19392_v39, 13  ;;  %v8854_v24 = vld [vmem:[%s20747_s7 + $0x318] sm:$0xff] }
0x2f82   :  { %15381 = vrsqrt.f32 %v1563_v3  ;;  %562 = vadd.xlane.f32.xlu0 %v19411_v53  ;;  %v10940_v45 = vrot.slane %v19500_v5, 4  ;;  %v14876_v29 = vpack.c.bf16 %v8870_v21, %v8869_v57  ;;  %v20855_v49 = vrot.slane %v19395_v15, 6  ;;  %v8871_v53 = vld [vmem:[%s20747_s7 + $0x3a0] sm:$0xff] }
0x2f83   :  { %7538 = vadd.xlane.f32.xlu1 %v7535_v48  ;;  %15383 = vrsqrt.f32 %v1066_v22  ;;  %v2555_v39 = vpop.xlane.xlu0 %2554  ;;  %v2058_v1 = vpop.xlane.xlu1 %2057  ;;  %v10896_v38 = vrot.slane %v19398_v23, 12  ;;  %v10908_v27 = vrot.slane %v19414_v11, 11  ;;  %v20856_v62 = vrot.slane %v19395_v15, 13 }
0x2f84   :  { %v8319_v40 = vrot.slane %v20855_v49, 6  ;;  %v2557_v31 = vmax.f32 %v2555_v39, 1e-24  ;;  %v2060_v52 = vmax.f32 %v2058_v1, 1e-24  ;;  %9151 = vmatmul.mubr.f32.vlgmr.msra.gmra.mrb[70].mxu1 %v19079_v20  ;;  %v8711_v35 = vsel %vm8595_vm11, %v8695_v41, %v10940_v45 }
0x2f85   :  { %v8635_v13 = vsel %vm8511_vm7, %v8619_v54, %v20856_v62  ;;  %v8694_v47 = vsel %vm8578_vm10, %v19506_v26, %v8435_v61  ;;  %14875 = vmatpush3.bf16.msra.mxu1 %v14874_v0  ;;  %9155 = vmatprep.mubr.f32.mxu1 %v8711_v35  ;;  %v10939_v43 = vrot.slane %v19500_v5, 3  ;;  %v14878_v37 = vpack.c.bf16 %v8854_v24, %v8853_v6  ;;  %v8855_v26 = vld [vmem:[%s20747_s7 + $0x320] sm:$0xff]  ;;  %v8856_v54 = vld [vmem:[%s20747_s7 + $0x328] sm:$0xff]  ;;  %v8874_v0 = vld [vmem:[%s20747_s7 + $0x3b8] sm:$0xff] }
0x2f86   :  { %v19621_v57 = vmul.f32 %v19395_v15, %v19395_v15  ;;  %v8618_v21 = vsel %vm8494_vm6, %v4576_v63, %v10872_v36  ;;  %15385 = vrsqrt.f32 %v2557_v31  ;;  %1073 = vadd.xlane.f32.xlu0 %v19421_v55  ;;  %14877 = vmatprep.subr.bf16.mxu1 %v14876_v29  ;;  %v14880_v20 = vpack.c.bf16 %v8872_v44, %v8871_v53  ;;  %v8873_v55 = vld [vmem:[%s20747_s7 + $0x3b0] sm:$0xff]  ;;  %v19680_v35 = vld [vmem:[%s20747_s7 + $0x340] sm:$0xff] }
0x2f87   :  { %v10920_v3 = vrot.slane %v19437_v8, 10  ;;  %v8634_v15 = vsel %vm8511_vm7, %v8618_v21, %v8319_v40  ;;  %15387 = vrsqrt.f32 %v2060_v52  ;;  %v4046_v22 = vpop.xlane.xlu0 %4045  ;;  %v3052_v48 = vpop.xlane.xlu1 %3051  ;;  %v8710_v61 = vsel %vm8595_vm11, %v8694_v47, %v10939_v43  ;;  %v8857_v53 = vld [vmem:[%s20747_s7 + $0x330] sm:$0xff]  ;;  %v8860_v47 = vld [vmem:[%s20747_s7 + $0x348] sm:$0xff] }
0x2f88   :  { %v8651_v41 = vsel %vm8528_vm8, %v8635_v13, %v10896_v38  ;;  %v10895_v63 = vrot.slane %v19398_v23, 11  ;;  %v15380_v36 = vpop.eup %15379  ;;  %v4048_v45 = vmax.f32 %v4046_v22, 1e-24  ;;  %v3054_v29 = vmax.f32 %v3052_v48, 1e-24  ;;  %9156 = vmatmul.mubr.f32.gmra.mrb[72].mxu1 %v8710_v61  ;;  %v19724_v61 = vld [vmem:[%s20747_s7 + $0x358] sm:$0xff] }
0x2f89   :  { %v8667_v6 = vsel %vm267_vm4, %v8651_v41, %v10908_v27  ;;  %v10907_v24 = vrot.slane %v19414_v11, 10  ;;  %v19645_v49 = vmul.f32 %v15380_v36, %v19150_v18  ;;  %14879 = vmatpush3.bf16.msra.mxu1 %v14878_v37  ;;  %9300 = vmatprep.mubr.f32.mxu1 %v19120_v46  ;;  %v14882_v40 = vpack.c.bf16 %v8856_v54, %v8855_v26  ;;  %v8858_v18 = vld [vmem:[%s20747_s7 + $0x338] sm:$0xff]  ;;  %v8875_v27 = vld [vmem:[%s20747_s7 + $0x3c0] sm:$0xff] }
0x2f8a   :  { %v8650_v39 = vsel %vm8528_vm8, %v8634_v15, %v10895_v63  ;;  %15389 = vrsqrt.f32 %v4048_v45  ;;  %1570 = vadd.xlane.f32.xlu0 %v19510_v19  ;;  %14881 = vmatprep.subr.bf16.mxu1 %v14880_v20  ;;  %v14884_v1 = vpack.c.bf16 %v8874_v0, %v8873_v55  ;;  %v19658_v44 = vmul.f32 %v18974_v59, %v18974_v59  ;;  %v11745_v31 = vpop.f32.mrb[62].mxu0  ;;  %v19699_v15 = vld [vmem:[%s20747_s7 + $0x3d0] sm:$0xff]  ;;  %v19729_v55 = vld [vmem:[%s20747_s7 + $0x3e0] sm:$0xff] }
0x2f8b   :  { %v19662_v46 = vmul.f32 %v19398_v23, %v19398_v23  ;;  %15391 = vrsqrt.f32 %v3054_v29  ;;  %v3549_v19 = vpop.xlane.xlu1 %3548  ;;  %v561_v38 = vmul.f32 %v19645_v49, %v19645_v49  ;;  %v19671_v62 = vmul.f32 %v18981_v10, %v18981_v10  ;;  %v8876_v23 = vld [vmem:[%s20747_s7 + $0x3c8] sm:$0xff]  ;;  %v11746_v26 = vpop.f32.mrb[63].mxu0 }
0x2f8c   :  { %v10919_v59 = vrot.slane %v19437_v8, 9  ;;  %v15382_v13 = vpop.eup %15381  ;;  %v3551_v52 = vmax.f32 %v3549_v19, 1e-24  ;;  %v19686_v10 = vsel %vm8561_vm9, %v8667_v6, %v10920_v3  ;;  %v8666_v43 = vsel %vm267_vm4, %v8650_v39, %v10907_v24  ;;  %v19704_v3 = vld [vmem:[%s20747_s7 + $0x3d8] sm:$0xff] }
0x2f8d   :  { %v19691_v37 = vmul.f32 %v19414_v11, %v19414_v11  ;;  %v15384_v21 = vpop.eup %15383  ;;  %v19694_v20 = vmul.f32 %v15382_v13, %v19163_v56  ;;  %14883 = vmatpush3.bf16.msra.mxu1 %v14882_v40  ;;  %564 = vadd.xlane.f32.xlu1 %v561_v38  ;;  %v14886_v54 = vpack.c.bf16 %v8858_v18, %v8857_v53  ;;  %v19709_v11 = vld [vmem:[%s20747_s7 + $0x350] sm:$0xff]  ;;  %v595_v63 = vrot.slane %v19645_v49, 3  ;;  %v11669_v40 = vpop.f32.mrb[66].mxu1  ;;  %v19759_v18 = vld [vmem:[%s20747_s7 + $0x360] sm:$0xff]  ;;  %v19772_v13 = vld [vmem:[%s20747_s7 + $0x368] sm:$0xff] }
0x2f8e   :  { %v19713_v56 = vmul.f32 %v19000_v42, %v19000_v42  ;;  %v19716_v22 = vmul.f32 %v15384_v21, %v19160_v25  ;;  %v19718_v48 = vadd.f32 %v11746_v26, %v11745_v31  ;;  %15393 = vrsqrt.f32 %v3551_v52  ;;  %4552 = vadd.xlane.f32.xlu0 %v19520_v4  ;;  %14885 = vmatprep.subr.bf16.mxu1 %v14884_v1  ;;  %v19734_v42 = vld [vmem:[%s20747_s7 + $0x3e8] sm:$0xff]  ;;  %v19777_v31 = vld [vmem:[%s20747_s7 + $0x3f0] sm:$0xff] }
0x2f8f   :  { %v19738_v25 = vmul.f32 %v19437_v8, %v19437_v8  ;;  %v14888_v4 = vpack.c.bf16 %v8876_v23, %v8875_v27  ;;  %v14890_v0 = vpack.c.bf16 %v8860_v47, %v19680_v35  ;;  %v19742_v41 = vsel %vm8561_vm9, %v8666_v43, %v10919_v59  ;;  %v11670_v59 = vpop.f32.mrb[67].mxu1 }
0x2f90   :  { %v15386_v36 = vpop.eup %15385  ;;  %v1072_v45 = vmul.f32 %v19716_v22, %v19716_v22  ;;  %v20778_v29 = vrot.slane %v19716_v22, 7  ;;  %v10791_v6 = vrot.slane %v19716_v22, 10  ;;  %v10803_v24 = vrot.slane %v19694_v20, 9 }
0x2f91   :  { %v15388_v8 = vpop.eup %15387  ;;  %14887 = vmatpush3.bf16.msra.mxu1 %v14886_v54  ;;  %v14892_v39 = vpack.c.bf16 %v19704_v3, %v19699_v15  ;;  %v14894_v1 = vpack.c.bf16 %v19724_v61, %v19709_v11  ;;  %v14896_v53 = vpack.c.bf16 %v19734_v42, %v19729_v55  ;;  %v591_v19 = vrot.slane %v19645_v49, 1  ;;  %v19810_v42 = vld [vmem:[%s20747_s7 + $0x370] sm:$0xff] }
0x2f92   :  { %v19763_v38 = vmul.f32 %v15386_v36, %v19175_v33  ;;  %v19766_v27 = vmul.f32 %v15388_v8, %v19171_v7  ;;  %1075 = vadd.xlane.f32.xlu1 %v1072_v45  ;;  %5063 = vadd.xlane.f32.xlu0 %v19525_v2  ;;  %v19782_v33 = vld [vmem:[%s20747_s7 + $0x3f8] sm:$0xff]  ;;  %v10801_v7 = vrot.slane %v19694_v20, 7  ;;  %v8506_v52 = vsel %vm8494_vm6, %v595_v63, %v10791_v6  ;;  %v19838_v8 = vld [vmem:[%s20747_s7 + $0x500] sm:$0xff] }
0x2f93   :  { %v19786_v2 = vadd.f32 %v11670_v59, %v11669_v40  ;;  %14889 = vmatprep.subr.bf16.mxu1 %v14888_v4  ;;  %v1569_v23 = vmul.f32 %v19694_v20, %v19694_v20  ;;  %v8504_v35 = vsel %vm8494_vm6, %v591_v19, %v19716_v22  ;;  %v20776_v47 = vrot.slane %v19694_v20, 6  ;;  %v19815_v4 = vld [vmem:[%s20747_s7 + $0x378] sm:$0xff] }
0x2f94   :  { %v15390_v43 = vpop.eup %15389  ;;  %v10813_v21 = vrot.slane %v19766_v27, 6  ;;  %v20779_v26 = vrot.slane %v19766_v27, 5  ;;  %v8503_v54 = vsel %vm8494_vm6, %v19645_v49, %v20778_v29  ;;  %v8523_v15 = vsel %vm8511_vm7, %v8506_v52, %v10803_v24  ;;  %v19833_v24 = vld [vmem:[%s20747_s7 + $0x588] sm:$0xff]  ;;  %v19857_v19 = vld [vmem:[%s20747_s7 + $0x598] sm:$0xff] }
0x2f95   :  { %v15392_v3 = vpop.eup %15391  ;;  %v19801_v11 = vmul.f32 %v15390_v43, %v19193_v60  ;;  %14891 = vmatpush3.bf16.msra.mxu1 %v14890_v0  ;;  %v14898_v61 = vpack.c.bf16 %v19772_v13, %v19759_v18  ;;  %v14900_v55 = vpack.c.bf16 %v19782_v33, %v19777_v31  ;;  %v19820_v60 = vld [vmem:[%s20747_s7 + $0x580] sm:$0xff]  ;;  %v10932_v0 = vrot.slane %v19539_v12, 9  ;;  %v19852_v18 = vld [vmem:[%s20747_s7 + $0x590] sm:$0xff] }
0x2f96   :  { %v19824_v63 = vmul.f32 %v15392_v3, %v19183_v34  ;;  %1572 = vadd.xlane.f32.xlu1 %v1569_v23  ;;  %2067 = vadd.xlane.f32.xlu0 %v19529_v28  ;;  %v10825_v36 = vrot.slane %v19763_v38, 5  ;;  %v8521_v45 = vsel %vm8511_vm7, %v8504_v35, %v10801_v7  ;;  %v20777_v6 = vrot.slane %v19763_v38, 4  ;;  %v19843_v34 = vld [vmem:[%s20747_s7 + $0x508] sm:$0xff]  ;;  %v8963_v3 = vld [vmem:[%s20747_s7 + $0x680] sm:$0xff] }
0x2f97   :  { %14893 = vmatprep.subr.bf16.mxu1 %v14892_v39  ;;  %v8538_v28 = vsel %vm8528_vm8, %v8521_v45, %v10813_v21  ;;  %v8520_v40 = vsel %vm8511_vm7, %v8503_v54, %v20776_v47  ;;  %v10827_v59 = vrot.slane %v19763_v38, 7  ;;  %v8540_v39 = vsel %vm8528_vm8, %v8523_v15, %v19766_v27  ;;  %v8964_v45 = vld [vmem:[%s20747_s7 + $0x688] sm:$0xff] }
0x2f98   :  { %v15394_v13 = vpop.eup %15393  ;;  %v4077_v7 = vrot.slane %v19801_v11, 1  ;;  %v10837_v52 = vrot.slane %v19824_v63, 4  ;;  %v3085_v23 = vrot.slane %v19824_v63, 3  ;;  %v8537_v35 = vsel %vm8528_vm8, %v8520_v40, %v20779_v26  ;;  %v19914_v40 = vld [vmem:[%s20747_s7 + $0x5a0] sm:$0xff]  ;;  %v8965_v26 = vld [vmem:[%s20747_s7 + $0x690] sm:$0xff] }
0x2f99   :  { %v19869_v43 = vmul.f32 %v15394_v13, %v19212_v51  ;;  %14895 = vmatpush3.bf16.msra.mxu1 %v14894_v1  ;;  %v14902_v21 = vpack.c.bf16 %v19815_v4, %v19810_v42  ;;  %v14936_v54 = vpack.c.bf16 %v19833_v24, %v19820_v60  ;;  %v8554_v51 = vsel %vm267_vm4, %v8538_v28, %v10825_v36  ;;  %v19892_v4 = vld [vmem:[%s20747_s7 + $0x510] sm:$0xff]  ;;  %v8947_v24 = vld [vmem:[%s20747_s7 + $0x600] sm:$0xff]  ;;  %v19908_v36 = vld [vmem:[%s20747_s7 + $0x518] sm:$0xff] }
0x2f9a   :  { %5560 = vadd.xlane.f32.xlu0 %v19621_v57  ;;  %14897 = vmatprep.subr.bf16.mxu1 %v14896_v53  ;;  %v8699_v1 = vsel %vm8578_vm10, %v19686_v10, %v10932_v0  ;;  %v8203_v60 = vrot.slane %v3085_v23, 3  ;;  %v8948_v57 = vld [vmem:[%s20747_s7 + $0x608] sm:$0xff]  ;;  %v8553_v0 = vsel %vm267_vm4, %v8537_v35, %v20777_v6  ;;  %v8556_v28 = vsel %vm267_vm4, %v8540_v39, %v10827_v59  ;;  %v19926_v42 = vld [vmem:[%s20747_s7 + $0x520] sm:$0xff]  ;;  %v19936_v39 = vld [vmem:[%s20747_s7 + $0x5b0] sm:$0xff] }
0x2f9b   :  { %v10849_v53 = vrot.slane %v19869_v43, 3  ;;  %v20780_v10 = vrot.slane %v19869_v43, 2  ;;  %v19919_v13 = vld [vmem:[%s20747_s7 + $0x5a8] sm:$0xff]  ;;  %v8261_v47 = vrot.slane %v4077_v7, 1  ;;  %v8571_v35 = vsel %vm8561_vm9, %v8554_v51, %v10837_v52 }
0x2f9c   :  { %v8570_v6 = vsel %vm8561_vm9, %v8553_v0, %v3085_v23  ;;  %v19931_v59 = vld [vmem:[%s20747_s7 + $0x528] sm:$0xff]  ;;  %v14968_v15 = vpack.c.bf16 %v8964_v45, %v8963_v3  ;;  %v10850_v51 = vrot.slane %v19869_v43, 5  ;;  %v19946_v0 = vld [vmem:[%s20747_s7 + $0x5b8] sm:$0xff]  ;;  %v14970_v29 = vpack.c.bf16 %v8948_v57, %v8947_v24 }
0x2f9d   :  { %14899 = vmatpush3.bf16.msra.mxu1 %v14898_v61  ;;  %v8588_v52 = vsel %vm8578_vm10, %v8571_v35, %v10849_v53  ;;  %v8587_v23 = vsel %vm8578_vm10, %v8570_v6, %v20780_v10  ;;  %v8966_v61 = vld [vmem:[%s20747_s7 + $0x698] sm:$0xff]  ;;  %v8573_v45 = vsel %vm8561_vm9, %v8556_v28, %v8203_v60  ;;  %v8698_v24 = vsel %vm8578_vm10, %v19742_v41, %v19539_v12  ;;  %v8949_v41 = vld [vmem:[%s20747_s7 + $0x610] sm:$0xff]  ;;  %v8967_v53 = vld [vmem:[%s20747_s7 + $0x6a0] sm:$0xff] }
0x2f9e   :  { %2564 = vadd.xlane.f32.xlu0 %v19658_v44  ;;  %14901 = vmatprep.subr.bf16.mxu1 %v14900_v55  ;;  %v8605_v6 = vsel %vm8595_vm11, %v8588_v52, %v8261_v47  ;;  %v8604_v3 = vsel %vm8595_vm11, %v8587_v23, %v4077_v7  ;;  %v14942_v57 = vpack.c.bf16 %v19908_v36, %v19892_v4  ;;  %v10943_v31 = vrot.slane %v19500_v5, 7  ;;  %v8950_v7 = vld [vmem:[%s20747_s7 + $0x618] sm:$0xff]  ;;  %v19991_v28 = vld [vmem:[%s20747_s7 + $0x620] sm:$0xff]  ;;  %v8952_v52 = vld [vmem:[%s20747_s7 + $0x628] sm:$0xff] }
0x2f9f   :  { %9375 = vmatprep.mubr.f32.mxu0 %v8605_v6  ;;  %14969 = vmatprep.subr.bf16.mxu0 %v14968_v15  ;;  %v14972_v55 = vpack.c.bf16 %v8966_v61, %v8965_v26  ;;  %v8715_v15 = vsel %vm8595_vm11, %v8699_v1, %v19500_v5  ;;  %v8590_v60 = vsel %vm8578_vm10, %v8573_v45, %v10850_v51  ;;  %v8968_v26 = vld [vmem:[%s20747_s7 + $0x6a8] sm:$0xff]  ;;  %v10793_v1 = vrot.slane %v19716_v22, 12  ;;  %v20004_v23 = vld [vmem:[%s20747_s7 + $0x6b0] sm:$0xff]  ;;  %v8970_v51 = vld [vmem:[%s20747_s7 + $0x6b8] sm:$0xff] }
0x2fa0   :  { %9376 = vmatmul.mubr.f32.vlgmr.msra.gmra.mrb[66].mxu0 %v8604_v3  ;;  %v10862_v35 = vrot.slane %v19801_v11, 4  ;;  %v14974_v61 = vpack.c.bf16 %v8950_v7, %v8949_v41  ;;  %v20857_v6 = vrot.slane %v19766_v27, 5  ;;  %v20858_v45 = vrot.slane %v19716_v22, 7  ;;  %v8939_v36 = vld [vmem:[%s20747_s7 + $0x5c0] sm:$0xff] }
0x2fa1   :  { %14903 = vmatpush3.bf16.msra.mxu1 %v14902_v21  ;;  %14971 = vmatpush3.bf16.msra.mxu0 %v14970_v29  ;;  %v599_v21 = vrot.slane %v19645_v49, 5  ;;  %v8714_v29 = vsel %vm8595_vm11, %v8698_v24, %v10943_v31  ;;  %v597_v31 = vrot.slane %v19645_v49, 4  ;;  %v14976_v47 = vpack.c.bf16 %v8968_v26, %v8967_v53 }
0x2fa2   :  { %6057 = vadd.xlane.f32.xlu0 %v19662_v46  ;;  %14937 = vmatprep.subr.bf16.mxu1 %v14936_v54  ;;  %v10805_v46 = vrot.slane %v19694_v20, 11  ;;  %v603_v54 = vrot.slane %v19645_v49, 7  ;;  %v8145_v3 = vrot.slane %v20857_v6, 5  ;;  %v8087_v24 = vrot.slane %v20858_v45, 7 }
0x2fa3   :  { %14973 = vmatprep.subr.bf16.mxu0 %v14972_v55  ;;  %v8607_v10 = vsel %vm8595_vm11, %v8590_v60, %v10862_v35  ;;  %v10828_v33 = vrot.slane %v19763_v38, 9  ;;  %v10852_v44 = vrot.slane %v19869_v43, 7  ;;  %v20859_v55 = vpack.c.bf16 %v19843_v34, %v19838_v8  ;;  %v20039_v8 = vld [vmem:[%s20747_s7 + $0x638] sm:$0xff] }
0x2fa4   :  { %9301 = vmatmul.mubr.f32.vlgmr.msra.gmra.mrb[74].mxu1 %v19143_v16  ;;  %v14978_v41 = vpack.c.bf16 %v8952_v52, %v19991_v28  ;;  %v14980_v7 = vpack.c.bf16 %v8970_v51, %v20004_v23  ;;  %v10864_v6 = vrot.slane %v19801_v11, 6  ;;  %v8508_v16 = vsel %vm8494_vm6, %v599_v21, %v10793_v1 }
0x2fa5   :  { %9305 = vmatprep.mubr.f32.mxu1 %v8715_v15  ;;  %14939 = vmatpush3.bf16.msra.mxu1 %v20859_v55  ;;  %v20860_v60 = vpack.c.bf16 %v19857_v19, %v19852_v18  ;;  %v20034_v15 = vld [vmem:[%s20747_s7 + $0x630] sm:$0xff]  ;;  %v8525_v34 = vsel %vm8511_vm7, %v8508_v16, %v10805_v46  ;;  %v10806_v53 = vrot.slane %v19694_v20, 13  ;;  %v10830_v26 = vrot.slane %v19763_v38, 11  ;;  %v8971_v18 = vld [vmem:[%s20747_s7 + $0x6c0] sm:$0xff]  ;;  %v8972_v19 = vld [vmem:[%s20747_s7 + $0x6c8] sm:$0xff] }
0x2fa6   :  { %3061 = vadd.xlane.f32.xlu0 %v19671_v62  ;;  %v10818_v62 = vrot.slane %v19766_v27, 12  ;;  %14975 = vmatpush3.bf16.msra.mxu0 %v14974_v61  ;;  %v8542_v28 = vsel %vm8528_vm8, %v8525_v34, %v8145_v3  ;;  %v10842_v21 = vrot.slane %v19824_v63, 10  ;;  %v8510_v1 = vsel %vm8494_vm6, %v603_v54, %v8087_v24  ;;  %v8921_v54 = vld [vmem:[%s20747_s7 + $0x530] sm:$0xff] }
0x2fa7   :  { %14941 = vmatprep.subr.bf16.mxu1 %v20860_v60  ;;  %v10792_v35 = vrot.slane %v19716_v22, 11  ;;  %14977 = vmatprep.subr.bf16.mxu0 %v14976_v47  ;;  %v8558_v52 = vsel %vm267_vm4, %v8542_v28, %v10828_v33  ;;  %v10854_v23 = vrot.slane %v19869_v43, 9  ;;  %v8527_v51 = vsel %vm8511_vm7, %v8510_v1, %v10806_v53  ;;  %v8924_v28 = vld [vmem:[%s20747_s7 + $0x548] sm:$0xff] }
0x2fa8   :  { %9306 = vmatmul.mubr.f32.gmra.mrb[76].mxu1 %v8714_v29  ;;  %v10804_v46 = vrot.slane %v19694_v20, 10  ;;  %v14982_v47 = vpack.c.bf16 %v20039_v8, %v20034_v15  ;;  %v8575_v33 = vsel %vm8561_vm9, %v8558_v52, %v19824_v63  ;;  %v8544_v29 = vsel %vm8528_vm8, %v8527_v51, %v10818_v62  ;;  %v8956_v15 = vld [vmem:[%s20747_s7 + $0x648] sm:$0xff]  ;;  %v8973_v62 = vld [vmem:[%s20747_s7 + $0x6d0] sm:$0xff] }
0x2fa9   :  { %14943 = vmatpush3.bf16.msra.mxu1 %v14942_v57  ;;  %9450 = vmatprep.mubr.f32.mxu1 %v8607_v10  ;;  %v10816_v61 = vrot.slane %v19766_v27, 9  ;;  %v20861_v4 = vpack.c.bf16 %v19919_v13, %v19914_v40  ;;  %v8922_v10 = vld [vmem:[%s20747_s7 + $0x538] sm:$0xff]  ;;  %v8940_v57 = vld [vmem:[%s20747_s7 + $0x5c8] sm:$0xff]  ;;  %v14984_v3 = vpack.c.bf16 %v8972_v19, %v8971_v18  ;;  %v8592_v45 = vsel %vm8578_vm10, %v8575_v33, %v10852_v44  ;;  %v8955_v44 = vld [vmem:[%s20747_s7 + $0x640] sm:$0xff] }
0x2faa   :  { %6554 = vadd.xlane.f32.xlu0 %v19691_v37  ;;  %v8560_v37 = vsel %vm267_vm4, %v8544_v29, %v10830_v26  ;;  %v20862_v40 = vrot.slane %v19763_v38, 4  ;;  %14979 = vmatpush3.bf16.msra.mxu0 %v14978_v41  ;;  %v20089_v24 = vsel %vm8595_vm11, %v8592_v45, %v10864_v6  ;;  %v10839_v16 = vrot.slane %v19824_v63, 7  ;;  %v8974_v26 = vld [vmem:[%s20747_s7 + $0x6d8] sm:$0xff]  ;;  %v8957_v29 = vld [vmem:[%s20747_s7 + $0x650] sm:$0xff] }
0x2fab   :  { %14945 = vmatprep.subr.bf16.mxu1 %v20861_v4  ;;  %v8577_v55 = vsel %vm8561_vm9, %v8560_v37, %v10842_v21  ;;  %v8507_v60 = vsel %vm8494_vm6, %v597_v31, %v10792_v35  ;;  %14981 = vmatprep.subr.bf16.mxu0 %v14980_v7  ;;  %v10851_v6 = vrot.slane %v19869_v43, 6  ;;  %v10794_v34 = vrot.slane %v19716_v22, 13 }
0x2fac   :  { %v8174_v13 = vrot.slane %v20862_v40, 4  ;;  %v8594_v41 = vsel %vm8578_vm10, %v8577_v55, %v10854_v23  ;;  %v8524_v8 = vsel %vm8511_vm7, %v8507_v60, %v10804_v46  ;;  %v20863_v31 = vpack.c.bf16 %v19931_v59, %v19926_v42  ;;  %v8923_v59 = vld [vmem:[%s20747_s7 + $0x540] sm:$0xff]  ;;  %v8926_v55 = vld [vmem:[%s20747_s7 + $0x558] sm:$0xff] }
0x2fad   :  { %v14950_v7 = vpack.c.bf16 %v8922_v10, %v8921_v54  ;;  %v14952_v53 = vpack.c.bf16 %v8940_v57, %v8939_v36  ;;  %v20115_v18 = vsel %vm8595_vm11, %v8594_v41, %v19801_v11  ;;  %v8541_v19 = vsel %vm8528_vm8, %v8524_v8, %v10816_v61  ;;  %v8958_v61 = vld [vmem:[%s20747_s7 + $0x658] sm:$0xff]  ;;  %v8975_v57 = vld [vmem:[%s20747_s7 + $0x6e0] sm:$0xff] }
0x2fae   :  { %14947 = vmatpush3.bf16.msra.mxu1 %v20863_v31  ;;  %3558 = vadd.xlane.f32.xlu0 %v19713_v56  ;;  %v20864_v42 = vpack.c.bf16 %v19946_v0, %v19936_v39  ;;  %v8557_v21 = vsel %vm267_vm4, %v8541_v19, %v8174_v13  ;;  %v601_v1 = vrot.slane %v19645_v49, 6  ;;  %v20865_v35 = vrot.slane %v19694_v20, 6  ;;  %v8941_v39 = vld [vmem:[%s20747_s7 + $0x5d0] sm:$0xff]  ;;  %v8942_v0 = vld [vmem:[%s20747_s7 + $0x5d8] sm:$0xff]  ;;  %v8943_v60 = vld [vmem:[%s20747_s7 + $0x5e0] sm:$0xff] }
0x2faf   :  { %v10817_v56 = vrot.slane %v19766_v27, 11  ;;  %14983 = vmatpush3.bf16.msra.mxu0 %v14982_v47  ;;  %v14986_v23 = vpack.c.bf16 %v8956_v15, %v8955_v44  ;;  %v10863_v51 = vrot.slane %v19801_v11, 5  ;;  %v8574_v46 = vsel %vm8561_vm9, %v8557_v21, %v10839_v16  ;;  %v8925_v13 = vld [vmem:[%s20747_s7 + $0x550] sm:$0xff]  ;;  %v8960_v31 = vld [vmem:[%s20747_s7 + $0x668] sm:$0xff] }
0x2fb0   :  { %14949 = vmatprep.subr.bf16.mxu1 %v20864_v42  ;;  %v8116_v52 = vrot.slane %v20865_v35, 6  ;;  %v10829_v54 = vrot.slane %v19763_v38, 10  ;;  %14985 = vmatprep.subr.bf16.mxu0 %v14984_v3  ;;  %v14988_v33 = vpack.c.bf16 %v8974_v26, %v8973_v62  ;;  %v8591_v4 = vsel %vm8578_vm10, %v8574_v46, %v10851_v6  ;;  %v8976_v3 = vld [vmem:[%s20747_s7 + $0x6e8] sm:$0xff]  ;;  %v8978_v26 = vld [vmem:[%s20747_s7 + $0x6f8] sm:$0xff]  ;;  %v8945_v21 = vld [vmem:[%s20747_s7 + $0x5f0] sm:$0xff] }
0x2fb1   :  { %v10841_v47 = vrot.slane %v19824_v63, 9  ;;  %v8509_v10 = vsel %vm8494_vm6, %v601_v1, %v10794_v34  ;;  %v14954_v36 = vpack.c.bf16 %v8924_v28, %v8923_v59  ;;  %v20158_v45 = vsel %vm8595_vm11, %v8591_v4, %v10863_v51  ;;  %v8959_v34 = vld [vmem:[%s20747_s7 + $0x660] sm:$0xff]  ;;  %v8946_v1 = vld [vmem:[%s20747_s7 + $0x5f8] sm:$0xff] }
0x2fb2   :  { %14951 = vmatpush3.bf16.msra.mxu1 %v14950_v7  ;;  %v8526_v37 = vsel %vm8511_vm7, %v8509_v10, %v8116_v52  ;;  %7051 = vadd.xlane.f32.xlu0 %v19738_v25  ;;  %v14956_v40 = vpack.c.bf16 %v8942_v0, %v8941_v39  ;;  %v8944_v25 = vld [vmem:[%s20747_s7 + $0x5e8] sm:$0xff]  ;;  %v10790_v44 = vrot.slane %v19716_v22, 9  ;;  %v14990_v15 = vpack.c.bf16 %v8958_v61, %v8957_v29  ;;  %v8927_v59 = vld [vmem:[%s20747_s7 + $0x560] sm:$0xff]  ;;  %v8962_v51 = vld [vmem:[%s20747_s7 + $0x678] sm:$0xff] }
0x2fb3   :  { %14953 = vmatprep.subr.bf16.mxu1 %v14952_v53  ;;  %v8543_v16 = vsel %vm8528_vm8, %v8526_v37, %v10817_v56  ;;  %14987 = vmatpush3.bf16.msra.mxu0 %v14986_v23  ;;  %v4053_v6 = vmul.f32 %v18994_v30, %v18994_v30  ;;  %v14992_v8 = vpack.c.bf16 %v8976_v3, %v8975_v57  ;;  %v10865_v7 = vrot.slane %v19801_v11, 7  ;;  %v8977_v30 = vld [vmem:[%s20747_s7 + $0x6f0] sm:$0xff]  ;;  %v8995_v10 = vld [vmem:[%s20747_s7 + $0x780] sm:$0xff] }
0x2fb4   :  { %v8559_v41 = vsel %vm267_vm4, %v8543_v16, %v10829_v54  ;;  %14989 = vmatprep.subr.bf16.mxu0 %v14988_v33  ;;  %v14958_v53 = vpack.c.bf16 %v8926_v55, %v8925_v13  ;;  %v593_v62 = vrot.slane %v19645_v49, 2  ;;  %v14960_v42 = vpack.c.bf16 %v8944_v25, %v8943_v60  ;;  %v8928_v49 = vld [vmem:[%s20747_s7 + $0x568] sm:$0xff]  ;;  %v8961_v23 = vld [vmem:[%s20747_s7 + $0x670] sm:$0xff]  ;;  %v8979_v16 = vld [vmem:[%s20747_s7 + $0x700] sm:$0xff] }
0x2fb5   :  { %v8576_v22 = vsel %vm8561_vm9, %v8559_v41, %v10841_v47  ;;  %v10814_v35 = vrot.slane %v19766_v27, 7  ;;  %v14994_v56 = vpack.c.bf16 %v8960_v31, %v8959_v34  ;;  %v7546_v39 = vmul.f32 %v19539_v12, %v19539_v12  ;;  %v8929_v33 = vld [vmem:[%s20747_s7 + $0x570] sm:$0xff]  ;;  %v8930_v12 = vld [vmem:[%s20747_s7 + $0x578] sm:$0xff]  ;;  %v8980_v60 = vld [vmem:[%s20747_s7 + $0x708] sm:$0xff] }
0x2fb6   :  { %14955 = vmatpush3.bf16.msra.mxu1 %v14954_v36  ;;  %v8593_v19 = vsel %vm8578_vm10, %v8576_v22, %v19869_v43  ;;  %4055 = vadd.xlane.f32.xlu0 %v4053_v6  ;;  %v8505_v52 = vsel %vm8494_vm6, %v593_v62, %v10790_v44  ;;  %v14996_v0 = vpack.c.bf16 %v8978_v26, %v8977_v30  ;;  %v10826_v29 = vrot.slane %v19763_v38, 6  ;;  %v8996_v36 = vld [vmem:[%s20747_s7 + $0x788] sm:$0xff]  ;;  %v8997_v25 = vld [vmem:[%s20747_s7 + $0x790] sm:$0xff]  ;;  %v8998_v44 = vld [vmem:[%s20747_s7 + $0x798] sm:$0xff] }
0x2fb7   :  { %14957 = vmatprep.subr.bf16.mxu1 %v14956_v40  ;;  %v20203_v28 = vsel %vm8595_vm11, %v8593_v19, %v10865_v7  ;;  %14991 = vmatpush3.bf16.msra.mxu0 %v14990_v15  ;;  %v14962_v46 = vpack.c.bf16 %v8928_v49, %v8927_v59  ;;  %v14964_v54 = vpack.c.bf16 %v8946_v1, %v8945_v21  ;;  %v10838_v4 = vrot.slane %v19824_v63, 5  ;;  %v8981_v34 = vld [vmem:[%s20747_s7 + $0x710] sm:$0xff]  ;;  %v8982_v31 = vld [vmem:[%s20747_s7 + $0x718] sm:$0xff]  ;;  %v8999_v22 = vld [vmem:[%s20747_s7 + $0x7a0] sm:$0xff] }
0x2fb8   :  { %14993 = vmatprep.subr.bf16.mxu0 %v14992_v8  ;;  %v8522_v61 = vsel %vm8511_vm7, %v8505_v52, %v19694_v20  ;;  %v14998_v57 = vpack.c.bf16 %v8962_v51, %v8961_v23  ;;  %v8043_v3 = vmul.f32 %v19500_v5, %v19500_v5  ;;  %v20866_v37 = vrot.slane %v19869_v43, 2  ;;  %v8983_v26 = vld [vmem:[%s20747_s7 + $0x720] sm:$0xff]  ;;  %v8984_v19 = vld [vmem:[%s20747_s7 + $0x728] sm:$0xff]  ;;  %v9002_v59 = vld [vmem:[%s20747_s7 + $0x7b8] sm:$0xff] }
0x2fb9   :  { %v8539_v47 = vsel %vm8528_vm8, %v8522_v61, %v10814_v35  ;;  %v14966_v40 = vpack.c.bf16 %v8930_v12, %v8929_v33  ;;  %v15000_v55 = vpack.c.bf16 %v8996_v36, %v8995_v10  ;;  %v10861_v41 = vrot.slane %v19801_v11, 3  ;;  %v8985_v1 = vld [vmem:[%s20747_s7 + $0x730] sm:$0xff]  ;;  %v8986_v35 = vld [vmem:[%s20747_s7 + $0x738] sm:$0xff]  ;;  %v9003_v52 = vld [vmem:[%s20747_s7 + $0x7c0] sm:$0xff] }
0x2fba   :  { %14959 = vmatpush3.bf16.msra.mxu1 %v14958_v53  ;;  %7548 = vadd.xlane.f32.xlu0 %v7546_v39  ;;  %v8232_v20 = vrot.slane %v20866_v37, 2  ;;  %v8555_v13 = vsel %vm267_vm4, %v8539_v47, %v10826_v29  ;;  %v15002_v6 = vpack.c.bf16 %v8980_v60, %v8979_v16  ;;  %v15004_v8 = vpack.c.bf16 %v8998_v44, %v8997_v25  ;;  %v9000_v53 = vld [vmem:[%s20747_s7 + $0x7a8] sm:$0xff]  ;;  %v8987_v23 = vld [vmem:[%s20747_s7 + $0x740] sm:$0xff]  ;;  %v8989_v29 = vld [vmem:[%s20747_s7 + $0x750] sm:$0xff] }
0x2fbb   :  { %14961 = vmatprep.subr.bf16.mxu1 %v14960_v42  ;;  %14995 = vmatpush3.bf16.msra.mxu0 %v14994_v56  ;;  %v8572_v5 = vsel %vm8561_vm9, %v8555_v13, %v10838_v4  ;;  %v15006_v62 = vpack.c.bf16 %v8982_v31, %v8981_v34  ;;  %v15008_v30 = vpack.c.bf16 %v9000_v53, %v8999_v22  ;;  %v9001_v42 = vld [vmem:[%s20747_s7 + $0x7b0] sm:$0xff]  ;;  %v9004_v56 = vld [vmem:[%s20747_s7 + $0x7c8] sm:$0xff]  ;;  %v8990_v61 = vld [vmem:[%s20747_s7 + $0x758] sm:$0xff] }
0x2fbc   :  { %14997 = vmatprep.subr.bf16.mxu0 %v14996_v0  ;;  %v8589_v15 = vsel %vm8578_vm10, %v8572_v5, %v8232_v20  ;;  %v15010_v49 = vpack.c.bf16 %v8984_v19, %v8983_v26  ;;  %v15012_v21 = vpack.c.bf16 %v9002_v59, %v9001_v42  ;;  %v15014_v39 = vpack.c.bf16 %v8986_v35, %v8985_v1  ;;  %v8988_v51 = vld [vmem:[%s20747_s7 + $0x748] sm:$0xff]  ;;  %v9007_v4 = vld [vmem:[%s20747_s7 + $0x7e0] sm:$0xff]  ;;  %v9009_v37 = vld [vmem:[%s20747_s7 + $0x7f0] sm:$0xff] }
0x2fbd   :  { %v8606_v7 = vsel %vm8595_vm11, %v8589_v15, %v10861_v41  ;;  %v15016_v0 = vpack.c.bf16 %v9004_v56, %v9003_v52  ;;  %v15018_v33 = vpack.c.bf16 %v8988_v51, %v8987_v23  ;;  %v9008_v47 = vld [vmem:[%s20747_s7 + $0x7e8] sm:$0xff]  ;;  %v15022_v10 = vpack.c.bf16 %v8990_v61, %v8989_v29  ;;  %v9010_v20 = vld [vmem:[%s20747_s7 + $0x7f8] sm:$0xff] }
0x2fbe   :  { %14963 = vmatpush3.bf16.msra.mxu1 %v14962_v46  ;;  %8045 = vadd.xlane.f32.xlu0 %v8043_v3  ;;  %v9005_v46 = vld [vmem:[%s20747_s7 + $0x7d0] sm:$0xff]  ;;  %v15024_v36 = vpack.c.bf16 %v9008_v47, %v9007_v4  ;;  %v8992_v3 = vld [vmem:[%s20747_s7 + $0x768] sm:$0xff]  ;;  %v15028_v13 = vpack.c.bf16 %v9010_v20, %v9009_v37  ;;  %v8994_v16 = vld [vmem:[%s20747_s7 + $0x778] sm:$0xff] }
0x2fbf   :  { %14965 = vmatprep.subr.bf16.mxu1 %v14964_v54  ;;  %14999 = vmatpush3.bf16.msra.mxu0 %v14998_v57  ;;  %v9006_v54 = vld [vmem:[%s20747_s7 + $0x7d8] sm:$0xff]  ;;  %v8991_v57 = vld [vmem:[%s20747_s7 + $0x760] sm:$0xff] }
0x2fc0   :  { %v15020_v12 = vpack.c.bf16 %v9006_v54, %v9005_v46  ;;  %v20867_v54 = vld [vmem:[#allocation16_spill] sm:$0xff] }
0x2fc2   :  { %14967 = vmatpush3.bf16.msra.mxu1 %v14966_v40  ;;  %v15026_v40 = vpack.c.bf16 %v8992_v3, %v8991_v57 }
0x2fc3   :  { %15001 = vmatprep.subr.bf16.mxu1 %v15000_v55  ;;  %v8993_v55 = vld [vmem:[%s20747_s7 + $0x770] sm:$0xff] }
0x2fc4   :  { %v15030_v60 = vpack.c.bf16 %v8994_v16, %v8993_v55 }
0x2fc5   :  { %9451 = vmatmul.mubr.f32.vlgmr.msra.gmra.mrb[78].mxu1 %v8606_v7 }
0x2fc6   :  { %15003 = vmatpush3.bf16.msra.mxu1 %v15002_v6 }
0x2fc7   :  { %15005 = vmatprep.subr.bf16.mxu1 %v15004_v8 }
0x2fca   :  { %15007 = vmatpush3.bf16.msra.mxu1 %v15006_v62 }
0x2fcb   :  { %15009 = vmatprep.subr.bf16.mxu1 %v15008_v30 }
0x2fce   :  { %15011 = vmatpush3.bf16.msra.mxu1 %v15010_v49 }
0x2fcf   :  { %15013 = vmatprep.subr.bf16.mxu1 %v15012_v21 }
0x2fd2   :  { %15015 = vmatpush3.bf16.msra.mxu1 %v15014_v39 }
0x2fd3   :  { %15017 = vmatprep.subr.bf16.mxu1 %v15016_v0 }
0x2fd6   :  { %15019 = vmatpush3.bf16.msra.mxu1 %v15018_v33 }
0x2fd7   :  { %15021 = vmatprep.subr.bf16.mxu1 %v15020_v12  ;;  %v20868_v12 = vld [vmem:[#allocation21_spill] sm:$0xff] }
0x2fda   :  { %15023 = vmatpush3.bf16.msra.mxu1 %v15022_v10  ;;  %v2066_v10 = vmul.f32 %v19766_v27, %v19766_v27 }
0x2fdb   :  { %15025 = vmatprep.subr.bf16.mxu1 %v15024_v36  ;;  %v2563_v36 = vmul.f32 %v19763_v38, %v19763_v38 }
0x2fde   :  { %15027 = vmatpush3.bf16.msra.mxu1 %v15026_v40 }
0x2fdf   :  { %15029 = vmatprep.subr.bf16.mxu1 %v15028_v13 }
0x2fe2   :  { %15031 = vmatpush3.bf16.msra.mxu1 %v15030_v60 }
0x2fff   :  { %v4543_v5 = vpop.xlane.xlu0 %4542 }
0x3000   :  { %v4545_v25 = vmax.f32 %v4543_v5, 1e-24 }
0x3002   :  { %15395 = vrsqrt.f32 %v4545_v25 }
0x3003   :  { %v5551_v44 = vpop.xlane.xlu0 %5550  ;;  %v5054_v15 = vpop.xlane.xlu1 %5053 }
0x3004   :  { %v5553_v41 = vmax.f32 %v5551_v44, 1e-24  ;;  %v5056_v6 = vmax.f32 %v5054_v15, 1e-24 }
0x3006   :  { %15397 = vrsqrt.f32 %v5553_v41 }
0x3007   :  { %15399 = vrsqrt.f32 %v5056_v6  ;;  %v6545_v8 = vpop.xlane.xlu0 %6544 }
0x3008   :  { %v6048_v34 = vpop.xlane.xlu1 %6047  ;;  %v6547_v31 = vmax.f32 %v6545_v8, 1e-24 }
0x3009   :  { %v6050_v7 = vmax.f32 %v6048_v34, 1e-24 }
0x300a   :  { %15401 = vrsqrt.f32 %v6547_v31 }
0x300b   :  { %15403 = vrsqrt.f32 %v6050_v7  ;;  %v8036_v22 = vpop.xlane.xlu0 %8035 }
0x300c   :  { %v7042_v53 = vpop.xlane.xlu1 %7041  ;;  %v15396_v62 = vpop.eup %15395  ;;  %v8038_v30 = vmax.f32 %v8036_v22, 1e-24 }
0x300d   :  { %v7044_v26 = vmax.f32 %v7042_v53, 1e-24  ;;  %v20338_v19 = vmul.f32 %v15396_v62, %v19462_v32 }
0x300e   :  { %15405 = vrsqrt.f32 %v8038_v30 }
0x300f   :  { %15407 = vrsqrt.f32 %v7044_v26  ;;  %v4551_v59 = vmul.f32 %v20338_v19, %v20338_v19  ;;  %v4581_v32 = vrot.slane %v20338_v19, 1  ;;  %v4585_v23 = vrot.slane %v20338_v19, 3 }
0x3010   :  { %v7539_v42 = vpop.xlane.xlu1 %7538  ;;  %v15398_v49 = vpop.eup %15397  ;;  %v4583_v27 = vrot.slane %v20338_v19, 2 }
0x3011   :  { %v7541_v21 = vmax.f32 %v7539_v42, 1e-24  ;;  %v15400_v1 = vpop.eup %15399  ;;  %v20343_v35 = vmul.f32 %v15398_v49, %v19481_v58  ;;  %4554 = vadd.xlane.f32.xlu1 %v4551_v59 }
0x3012   :  { %v20346_v52 = vmul.f32 %v15400_v1, %v19484_v14 }
0x3013   :  { %15409 = vrsqrt.f32 %v7541_v21  ;;  %v10887_v56 = vrot.slane %v20343_v35, 9  ;;  %v10885_v14 = vrot.slane %v20343_v35, 7  ;;  %v5587_v47 = vrot.slane %v20343_v35, 6 }
0x3014   :  { %v15402_v39 = vpop.eup %15401  ;;  %v5062_v0 = vmul.f32 %v20346_v52, %v20346_v52  ;;  %v10875_v51 = vrot.slane %v20346_v52, 10  ;;  %v5091_v58 = vrot.slane %v20346_v52, 7  ;;  %v8621_v61 = vsel %vm8494_vm6, %v4581_v32, %v20346_v52 }
0x3015   :  { %v15404_v46 = vpop.eup %15403  ;;  %v20356_v33 = vmul.f32 %v15402_v39, %v20867_v54  ;;  %v5559_v20 = vmul.f32 %v20343_v35, %v20343_v35  ;;  %v8637_v60 = vsel %vm8511_vm7, %v8621_v61, %v10885_v14  ;;  %v10874_v8 = vrot.slane %v20346_v52, 9 }
0x3016   :  { %v20360_v29 = vmul.f32 %v15404_v46, %v20868_v12  ;;  %5065 = vadd.xlane.f32.xlu1 %v5062_v0  ;;  %v8623_v4 = vsel %vm8494_vm6, %v4585_v23, %v10875_v51  ;;  %v8620_v3 = vsel %vm8494_vm6, %v20338_v19, %v5091_v58  ;;  %v10877_v34 = vrot.slane %v20346_v52, 12 }
0x3017   :  { %v8639_v57 = vsel %vm8511_vm7, %v8623_v4, %v10887_v56  ;;  %v10909_v16 = vrot.slane %v20356_v33, 5  ;;  %v10911_v5 = vrot.slane %v20356_v33, 7  ;;  %v6579_v15 = vrot.slane %v20356_v33, 4 }
0x3018   :  { %v15406_v37 = vpop.eup %15405  ;;  %v10897_v40 = vrot.slane %v20360_v29, 6  ;;  %v6083_v13 = vrot.slane %v20360_v29, 5  ;;  %v8655_v44 = vsel %vm8528_vm8, %v8639_v57, %v20360_v29  ;;  %v10889_v53 = vrot.slane %v20343_v35, 11 }
0x3019   :  { %v15408_v55 = vpop.eup %15407  ;;  %v20381_v38 = vmul.f32 %v15406_v37, %v19546_v17  ;;  %v8636_v17 = vsel %vm8511_vm7, %v8620_v3, %v5587_v47  ;;  %v8671_v30 = vsel %vm267_vm4, %v8655_v44, %v10911_v5  ;;  %v10898_v26 = vrot.slane %v20360_v29, 7 }
0x301a   :  { %v20387_v25 = vmul.f32 %v15408_v55, %v19549_v50  ;;  %2069 = vadd.xlane.f32.xlu1 %v2066_v10  ;;  %v8653_v41 = vsel %vm8528_vm8, %v8637_v60, %v10897_v40  ;;  %v8652_v6 = vsel %vm8528_vm8, %v8636_v17, %v6083_v13  ;;  %v10910_v42 = vrot.slane %v20356_v33, 6 }
0x301b   :  { %v8067_v31 = vrot.slane %v20381_v38, 1  ;;  %v8669_v59 = vsel %vm267_vm4, %v8653_v41, %v10909_v16  ;;  %v10946_v21 = vrot.slane %v20381_v38, 4  ;;  %v8668_v1 = vsel %vm267_vm4, %v8652_v6, %v6579_v15 }
0x301c   :  { %v10921_v7 = vrot.slane %v20387_v25, 4  ;;  %v7075_v22 = vrot.slane %v20387_v25, 3  ;;  %v8622_v39 = vsel %vm8494_vm6, %v4583_v27, %v10874_v8  ;;  %v10922_v61 = vrot.slane %v20387_v25, 5 }
0x301d   :  { %v15410_v50 = vpop.eup %15409  ;;  %v8471_v0 = vrot.slane %v8067_v31, 1  ;;  %v8638_v3 = vsel %vm8511_vm7, %v8622_v39, %v20343_v35  ;;  %v4589_v40 = vrot.slane %v20338_v19, 5  ;;  %v8355_v27 = vrot.slane %v6083_v13, 5 }
0x301e   :  { %v20404_v62 = vmul.f32 %v15410_v50, %v19566_v9  ;;  %5562 = vadd.xlane.f32.xlu1 %v5559_v20  ;;  %v8413_v49 = vrot.slane %v7075_v22, 3  ;;  %v8685_v23 = vsel %vm8561_vm9, %v8669_v59, %v10921_v7  ;;  %v8684_v46 = vsel %vm8561_vm9, %v8668_v1, %v7075_v22 }
0x301f   :  { %v8654_v20 = vsel %vm8528_vm8, %v8638_v3, %v10898_v26  ;;  %v10945_v16 = vrot.slane %v20381_v38, 3  ;;  %v8625_v5 = vsel %vm8494_vm6, %v4589_v40, %v10877_v34  ;;  %v10912_v17 = vrot.slane %v20356_v33, 9 }
0x3020   :  { %v10933_v32 = vrot.slane %v20404_v62, 3  ;;  %v10934_v9 = vrot.slane %v20404_v62, 5  ;;  %v7571_v56 = vrot.slane %v20404_v62, 2  ;;  %v8687_v51 = vsel %vm8561_vm9, %v8671_v30, %v8413_v49 }
0x3021   :  { %v8670_v55 = vsel %vm267_vm4, %v8654_v20, %v10910_v42  ;;  %v10936_v13 = vrot.slane %v20404_v62, 7  ;;  %v8641_v41 = vsel %vm8511_vm7, %v8625_v5, %v10889_v53  ;;  %v8297_v50 = vrot.slane %v5091_v58, 7 }
0x3022   :  { %v8701_v54 = vsel %vm8578_vm10, %v8685_v23, %v10933_v32  ;;  %v8703_v14 = vsel %vm8578_vm10, %v8687_v51, %v10934_v9  ;;  %v8700_v12 = vsel %vm8578_vm10, %v8684_v46, %v7571_v56  ;;  %2566 = vadd.xlane.f32.xlu1 %v2563_v36  ;;  %v8442_v37 = vrot.slane %v7571_v56, 2 }
0x3023   :  { %v8717_v4 = vsel %vm8595_vm11, %v8701_v54, %v8471_v0  ;;  %v8719_v10 = vsel %vm8595_vm11, %v8703_v14, %v10946_v21  ;;  %v8716_v57 = vsel %vm8595_vm11, %v8700_v12, %v8067_v31  ;;  %v6056_v36 = vmul.f32 %v20360_v29, %v20360_v29 }
0x3024   :  { %9380 = vmatprep.mubr.f32.mxu0 %v8717_v4  ;;  %9455 = vmatprep.mubr.f32.mxu1 %v8719_v10  ;;  %v8686_v60 = vsel %vm8561_vm9, %v8670_v55, %v10922_v61  ;;  %v8657_v8 = vsel %vm8528_vm8, %v8641_v41, %v8355_v27  ;;  %v10948_v31 = vrot.slane %v20381_v38, 6  ;;  %v4593_v22 = vrot.slane %v20338_v19, 7 }
0x3025   :  { %9381 = vmatmul.mubr.f32.gmra.mrb[68].mxu0 %v8716_v57  ;;  %v8702_v44 = vsel %vm8578_vm10, %v8686_v60, %v8442_v37  ;;  %v8673_v34 = vsel %vm267_vm4, %v8657_v8, %v10912_v17  ;;  %v10902_v53 = vrot.slane %v20360_v29, 12  ;;  %v10938_v42 = vrot.slane %v20404_v62, 9 }
0x3026   :  { %9525 = vmatprep.mubr.f32.mxu0 %v20089_v24  ;;  %6059 = vadd.xlane.f32.xlu1 %v6056_v36  ;;  %v8718_v6 = vsel %vm8595_vm11, %v8702_v44, %v10945_v16  ;;  %v3060_v24 = vmul.f32 %v19824_v63, %v19824_v63  ;;  %v8689_v7 = vsel %vm8561_vm9, %v8673_v34, %v20387_v25  ;;  %v10914_v63 = vrot.slane %v20356_v33, 11 }
0x3027   :  { %9456 = vmatmul.mubr.f32.gmra.mrb[80].mxu1 %v8718_v6  ;;  %v8705_v58 = vsel %vm8578_vm10, %v8689_v7, %v10936_v13  ;;  %v8627_v26 = vsel %vm8494_vm6, %v4593_v22, %v8297_v50  ;;  %v10876_v49 = vrot.slane %v20346_v52, 11  ;;  %v4587_v1 = vrot.slane %v20338_v19, 4 }
0x3028   :  { %9600 = vmatprep.mubr.f32.mxu1 %v20115_v18  ;;  %v8721_v30 = vsel %vm8595_vm11, %v8705_v58, %v10948_v31  ;;  %v10926_v18 = vrot.slane %v20387_v25, 10  ;;  %v10888_v32 = vrot.slane %v20343_v35, 10  ;;  %v10900_v9 = vrot.slane %v20360_v29, 9 }
0x3029   :  { %9526 = vmatmul.mubr.f32.vlgmr.msra.gmra.mrb[70].mxu0 %v20158_v45  ;;  %v10890_v45 = vrot.slane %v20343_v35, 13  ;;  %v8384_v39 = vrot.slane %v6579_v15, 4  ;;  %v10923_v0 = vrot.slane %v20387_v25, 7  ;;  %v8624_v23 = vsel %vm8494_vm6, %v4587_v1, %v10876_v49  ;;  %v563_v49 = vpop.xlane.xlu0 %562 }
0x302a   :  { %3063 = vadd.xlane.f32.xlu1 %v3060_v24  ;;  %9530 = vmatprep.mubr.f32.mxu0 %v8721_v30  ;;  %v10935_v46 = vrot.slane %v20404_v62, 6  ;;  %v8640_v54 = vsel %vm8511_vm7, %v8624_v23, %v10888_v32  ;;  %v6553_v15 = vmul.f32 %v20356_v33, %v20356_v33  ;;  %v10878_v61 = vrot.slane %v20346_v52, 13  ;;  %v8738_v23 = vld [vmem:[%s20749_s9] sm:$0xff] }
0x302b   :  { %9601 = vmatmul.mubr.f32.vlgmr.msra.gmra.mrb[82].mxu1 %v20203_v28  ;;  %v8643_v59 = vsel %vm8511_vm7, %v8627_v26, %v10890_v45  ;;  %v8656_v12 = vsel %vm8528_vm8, %v8640_v54, %v10900_v9  ;;  %v4591_v10 = vrot.slane %v20338_v19, 6  ;;  %v8326_v57 = vrot.slane %v5587_v47, 6 }
0x302c   :  { %v8659_v21 = vsel %vm8528_vm8, %v8643_v59, %v10902_v53  ;;  %v8672_v4 = vsel %vm267_vm4, %v8656_v12, %v8384_v39  ;;  %v10901_v3 = vrot.slane %v20360_v29, 11  ;;  %v10947_v37 = vrot.slane %v20381_v38, 5 }
0x302d   :  { %v8675_v56 = vsel %vm267_vm4, %v8659_v21, %v10914_v63  ;;  %v8688_v20 = vsel %vm8561_vm9, %v8672_v4, %v10923_v0  ;;  %v10913_v40 = vrot.slane %v20356_v33, 10  ;;  %v10925_v52 = vrot.slane %v20387_v25, 9  ;;  %v1074_v39 = vpop.xlane.xlu0 %1073  ;;  %v8743_v4 = vld [vmem:[%s20749_s9 + $0x28] sm:$0xff] }
0x302e   :  { %v8691_v28 = vsel %vm8561_vm9, %v8675_v56, %v10926_v18  ;;  %6556 = vadd.xlane.f32.xlu1 %v6553_v15  ;;  %v8704_v27 = vsel %vm8578_vm10, %v8688_v20, %v10935_v46  ;;  %v8626_v36 = vsel %vm8494_vm6, %v4591_v10, %v10878_v61  ;;  %v3557_v29 = vmul.f32 %v19869_v43, %v19869_v43  ;;  %v8740_v46 = vld [vmem:[%s20749_s9 + $0x10] sm:$0xff]  ;;  %v8742_v61 = vld [vmem:[%s20749_s9 + $0x20] sm:$0xff] }
0x302f   :  { %v8707_v51 = vsel %vm8578_vm10, %v8691_v28, %v10938_v42  ;;  %v8720_v19 = vsel %vm8595_vm11, %v8704_v27, %v10947_v37  ;;  %v8642_v35 = vsel %vm8511_vm7, %v8626_v36, %v8326_v57  ;;  %v10949_v33 = vrot.slane %v20381_v38, 7  ;;  %v8745_v37 = vld [vmem:[%s20749_s9 + $0x38] sm:$0xff] }
0x3030   :  { %v8723_v14 = vsel %vm8595_vm11, %v8707_v51, %v20381_v38  ;;  %9531 = vmatmul.mubr.f32.gmra.mrb[72].mxu0 %v8720_v19  ;;  %v8658_v47 = vsel %vm8528_vm8, %v8642_v35, %v10901_v3  ;;  %v7050_v5 = vmul.f32 %v20387_v25, %v20387_v25  ;;  %v4054_v43 = vmul.f32 %v19801_v11, %v19801_v11  ;;  %v8739_v51 = vld [vmem:[%s20749_s9 + $0x8] sm:$0xff]  ;;  %v8744_v3 = vld [vmem:[%s20749_s9 + $0x30] sm:$0xff]  ;;  %v8746_v35 = vld [vmem:[%s20749_s9 + $0x40] sm:$0xff] }
0x3031   :  { %9605 = vmatprep.mubr.f32.mxu1 %v8723_v14  ;;  %v8674_v55 = vsel %vm267_vm4, %v8658_v47, %v10913_v40  ;;  %v7547_v17 = vmul.f32 %v20404_v62, %v20404_v62  ;;  %v8044_v13 = vmul.f32 %v20381_v38, %v20381_v38  ;;  %v1571_v28 = vpop.xlane.xlu0 %1570  ;;  %v20531_v54 = vpack.c.bf16 %v8739_v51, %v8738_v23  ;;  %v8741_v14 = vld [vmem:[%s20749_s9 + $0x18] sm:$0xff] }
0x3032   :  { %3560 = vadd.xlane.f32.xlu1 %v3557_v29  ;;  %v8690_v16 = vsel %vm8561_vm9, %v8674_v55, %v10925_v52  ;;  %v20536_v15 = vpack.c.bf16 %v8741_v14, %v8740_v46  ;;  %v20547_v57 = vpack.c.bf16 %v8743_v4, %v8742_v61  ;;  %v20557_v36 = vpack.c.bf16 %v8745_v37, %v8744_v3  ;;  %v8747_v29 = vld [vmem:[%s20749_s9 + $0x48] sm:$0xff] }
0x3033   :  { %v8706_v60 = vsel %vm8578_vm10, %v8690_v16, %v20404_v62  ;;  %15033 = vmatprep.subr.bf16.mxu0 %v20531_v54  ;;  %v20569_v55 = vpack.c.bf16 %v8747_v29, %v8746_v35 }
0x3034   :  { %v8722_v44 = vsel %vm8595_vm11, %v8706_v60, %v10949_v33  ;;  %15035 = vmatpush3.bf16.msra.mxu0 %v20531_v54  ;;  %v8748_v60 = vld [vmem:[%s20749_s9 + $0x50] sm:$0xff] }
0x3035   :  { %9606 = vmatmul.mubr.f32.gmra.mrb[84].mxu1 %v8722_v44  ;;  %v20520_v0 = vpop.xlane.xlu0 %4552  ;;  %15037 = vmatprep.subr.bf16.mxu0 %v20536_v15 }
0x3036   :  { %7053 = vadd.xlane.f32.xlu1 %v7050_v5  ;;  %v8749_v5 = vld [vmem:[%s20749_s9 + $0x58] sm:$0xff] }
0x3037   :  { %v20579_v44 = vpack.c.bf16 %v8749_v5, %v8748_v60 }
0x3038   :  { %15039 = vmatpush3.bf16.msra.mxu0 %v20536_v15 }
0x3039   :  { %v5064_v12 = vpop.xlane.xlu0 %5063  ;;  %15041 = vmatprep.subr.bf16.mxu0 %v20547_v57 }
0x303a   :  { %4057 = vadd.xlane.f32.xlu1 %v4054_v43 }
0x303c   :  { %15043 = vmatpush3.bf16.msra.mxu0 %v20547_v57 }
0x303d   :  { %v2068_v40 = vpop.xlane.xlu0 %2067  ;;  %15045 = vmatprep.subr.bf16.mxu0 %v20557_v36 }
0x303e   :  { %7550 = vadd.xlane.f32.xlu1 %v7547_v17 }
0x3040   :  { %15047 = vmatpush3.bf16.msra.mxu0 %v20557_v36 }
0x3041   :  { %v5561_v33 = vpop.xlane.xlu0 %5560  ;;  %15049 = vmatprep.subr.bf16.mxu0 %v20569_v55 }
0x3042   :  { %8047 = vadd.xlane.f32.xlu1 %v8044_v13 }
0x3044   :  { %15051 = vmatpush3.bf16.msra.mxu0 %v20569_v55 }
0x3045   :  { %v2565_v17 = vpop.xlane.xlu0 %2564  ;;  %15053 = vmatprep.subr.bf16.mxu0 %v20579_v44 }
0x3048   :  { %15055 = vmatpush3.bf16.msra.mxu0 %v20579_v44 }
0x3053   :  { %v11672_v41 = vpop.f32.mrb[68].mxu1 }
0x3054   :  { %v11748_v6 = vpop.f32.mrb[64].mxu0  ;;  %v11673_v8 = vpop.f32.mrb[69].mxu1 }
0x3055   :  { %v11749_v25 = vpop.f32.mrb[65].mxu0  ;;  %v11674_v50 = vadd.f32 %v11673_v8, %v11672_v41  ;;  %v6058_v41 = vpop.xlane.xlu0 %6057 }
0x3056   :  { %v11750_v24 = vadd.f32 %v11749_v25, %v11748_v6 }
0x3057   :  { %v11707_v34 = vpop.f32.mrb[70].mxu1 }
0x3058   :  { %v11708_v31 = vpop.f32.mrb[71].mxu1 }
0x3059   :  { %v11709_v7 = vadd.f32 %v11708_v31, %v11707_v34 }
0x305b   :  { %v9153_v11 = vadd.f32 %v11709_v7, %v19786_v2  ;;  %v11710_v22 = vpop.f32.mrb[72].mxu1 }
0x305c   :  { %v11711_v53 = vpop.f32.mrb[73].mxu1 }
0x305d   :  { %v11712_v58 = vadd.f32 %v11711_v53, %v11710_v22  ;;  %v9228_v62 = vadd.f32 %v19718_v48, %v9153_v11  ;;  %v565_v48 = vpop.xlane.xlu1 %564 }
0x305e   :  { %v566_v8 = vadd.f32 %v565_v48, %v563_v49 }
0x305f   :  { %v9158_v45 = vadd.f32 %v11712_v58, %v11674_v50 }
0x3060   :  { %v567_v31 = vrot.slane %v566_v8, 4 }
0x3061   :  { %v9233_v63 = vadd.f32 %v11750_v24, %v9158_v45  ;;  %v1076_v10 = vpop.xlane.xlu1 %1075  ;;  %v3062_v24 = vpop.xlane.xlu0 %3061 }
0x3062   :  { %v1077_v50 = vadd.f32 %v1076_v10, %v1074_v39 }
0x3064   :  { %v1078_v11 = vrot.slane %v1077_v50, 4 }
0x3065   :  { %v1573_v19 = vpop.xlane.xlu1 %1572  ;;  %v6555_v53 = vpop.xlane.xlu0 %6554 }
0x3066   :  { %v1574_v34 = vadd.f32 %v1573_v19, %v1571_v28 }
0x3068   :  { %v1575_v22 = vrot.slane %v1574_v34, 4 }
0x3073   :  { %v11821_v38 = vpop.f32.mrb[66].mxu0 }
0x3074   :  { %v11822_v30 = vpop.f32.mrb[67].mxu0 }
0x3075   :  { %v11823_v18 = vadd.f32 %v11822_v30, %v11821_v38 }
0x3077   :  { %v11783_v26 = vpop.f32.mrb[74].mxu1 }
0x3078   :  { %v11784_v42 = vpop.f32.mrb[75].mxu1 }
0x3079   :  { %v11785_v59 = vadd.f32 %v11784_v42, %v11783_v26 }
0x307b   :  { %v9303_v21 = vadd.f32 %v11785_v59, %v9228_v62  ;;  %v11786_v1 = vpop.f32.mrb[76].mxu1  ;;  %v568_v62 = vadd.f32 %v567_v31, %v566_v8 }
0x307c   :  { %v11787_v32 = vpop.f32.mrb[77].mxu1 }
0x307d   :  { %v11788_v9 = vadd.f32 %v11787_v32, %v11786_v1  ;;  %v9378_v56 = vadd.f32 %v11823_v18, %v9303_v21  ;;  %v1576_v18 = vadd.f32 %v1575_v22, %v1574_v34  ;;  %v569_v59 = vrot.slane %v568_v62, 2  ;;  %v3559_v21 = vpop.xlane.xlu0 %3558 }
0x307f   :  { %v20518_v2 = vadd.f32 %v11788_v9, %v9233_v63  ;;  %v1079_v63 = vadd.f32 %v1078_v11, %v1077_v50  ;;  %v570_v23 = vadd.f32 %v569_v59, %v568_v62 }
0x3081   :  { %v1080_v49 = vrot.slane %v1079_v63, 2  ;;  %v7052_v37 = vpop.xlane.xlu0 %7051 }
0x3083   :  { %v1081_v46 = vadd.f32 %v1080_v49, %v1079_v63 }
0x3085   :  { %v1082_v19 = vrot.slane %v1081_v46, 1 }
0x3087   :  { %v1083_v50 = vadd.f32 %v1082_v19, %v1081_v46 }
0x3089   :  { %v1084_v59 = vmax.f32 %v1083_v50, 1e-24 }
0x3098   :  { %v11859_v20 = vpop.f32.mrb[78].mxu1 }
0x3099   :  { %v11860_v27 = vpop.f32.mrb[79].mxu1 }
0x309a   :  { %v11861_v52 = vadd.f32 %v11860_v27, %v11859_v20 }
0x309c   :  { %v20565_v47 = vadd.f32 %v11861_v52, %v9378_v56  ;;  %v1577_v56 = vrot.slane %v1576_v18, 2 }
0x309e   :  { %v4555_v16 = vpop.xlane.xlu1 %4554 }
0x309f   :  { %v4556_v26 = vadd.f32 %v4555_v16, %v20520_v0  ;;  %v1578_v0 = vadd.f32 %v1577_v56, %v1576_v18 }
0x30a1   :  { %v4557_v39 = vrot.slane %v4556_v26, 4 }
0x30a3   :  { %v5066_v43 = vpop.xlane.xlu1 %5065  ;;  %v4558_v20 = vadd.f32 %v4557_v39, %v4556_v26 }
0x30a4   :  { %v5067_v1 = vadd.f32 %v5066_v43, %v5064_v12  ;;  %v571_v12 = vrot.slane %v570_v23, 1  ;;  %v1579_v43 = vrot.slane %v1578_v0, 1 }
0x30a6   :  { %v5068_v14 = vrot.slane %v5067_v1, 4  ;;  %v1580_v62 = vadd.f32 %v1579_v43, %v1578_v0 }
0x30a7   :  { %v2070_v13 = vpop.xlane.xlu1 %2069 }
0x30a8   :  { %v2071_v58 = vadd.f32 %v2070_v13, %v2068_v40  ;;  %v5069_v35 = vadd.f32 %v5068_v14, %v5067_v1 }
0x30aa   :  { %v2072_v42 = vrot.slane %v2071_v58, 4  ;;  %v5070_v34 = vrot.slane %v5069_v35, 2 }
0x30ab   :  { %v5563_v6 = vpop.xlane.xlu1 %5562 }
0x30ac   :  { %v2073_v28 = vadd.f32 %v2072_v42, %v2071_v58  ;;  %v5564_v48 = vadd.f32 %v5563_v6, %v5561_v33  ;;  %v572_v6 = vadd.f32 %v571_v12, %v570_v23  ;;  %v5071_v49 = vadd.f32 %v5070_v34, %v5069_v35 }
0x30ae   :  { %v2074_v40 = vrot.slane %v2073_v28, 2  ;;  %v5565_v27 = vrot.slane %v5564_v48, 4  ;;  %v5072_v0 = vrot.slane %v5071_v49, 1 }
0x30af   :  { %v2567_v25 = vpop.xlane.xlu1 %2566 }
0x30b0   :  { %v2568_v38 = vadd.f32 %v2567_v25, %v2565_v17  ;;  %v4559_v17 = vrot.slane %v4558_v20, 2  ;;  %v2075_v13 = vadd.f32 %v2074_v40, %v2073_v28 }
0x30b2   :  { %v2569_v32 = vrot.slane %v2568_v38, 4  ;;  %v2076_v63 = vrot.slane %v2075_v13, 1 }
0x30b3   :  { %v6060_v7 = vpop.xlane.xlu1 %6059 }
0x30b4   :  { %v6061_v51 = vadd.f32 %v6060_v7, %v6058_v41  ;;  %v2570_v61 = vadd.f32 %v2569_v32, %v2568_v38  ;;  %v5566_v41 = vadd.f32 %v5565_v27, %v5564_v48  ;;  %v1581_v48 = vmax.f32 %v1580_v62, 1e-24 }
0x30b5   :  { %v2077_v46 = vadd.f32 %v2076_v63, %v2075_v13 }
0x30b6   :  { %v6062_v52 = vrot.slane %v6061_v51, 4  ;;  %v2571_v29 = vrot.slane %v2570_v61, 2  ;;  %v5567_v38 = vrot.slane %v5566_v41, 2 }
0x30b7   :  { %v3064_v45 = vpop.xlane.xlu1 %3063 }
0x30b8   :  { %v3065_v30 = vadd.f32 %v3064_v45, %v3062_v24  ;;  %v6063_v8 = vadd.f32 %v6062_v52, %v6061_v51  ;;  %v4056_v24 = vpop.xlane.xlu0 %4055  ;;  %v2572_v31 = vadd.f32 %v2571_v29, %v2570_v61  ;;  %v4560_v45 = vadd.f32 %v4559_v17, %v4558_v20 }
0x30b9   :  { %v5568_v14 = vadd.f32 %v5567_v38, %v5566_v41  ;;  %v5073_v17 = vadd.f32 %v5072_v0, %v5071_v49 }
0x30ba   :  { %v3066_v9 = vrot.slane %v3065_v30, 4  ;;  %v6064_v18 = vrot.slane %v6063_v8, 2  ;;  %v4561_v51 = vrot.slane %v4560_v45, 1 }
0x30bb   :  { %v6557_v4 = vpop.xlane.xlu1 %6556  ;;  %v5569_v35 = vrot.slane %v5568_v14, 1 }
0x30bc   :  { %v3067_v10 = vadd.f32 %v3066_v9, %v3065_v30  ;;  %v6558_v3 = vadd.f32 %v6557_v4, %v6555_v53  ;;  %v573_v30 = vmax.f32 %v572_v6, 1e-24  ;;  %v7549_v23 = vpop.xlane.xlu0 %7548  ;;  %v6065_v61 = vadd.f32 %v6064_v18, %v6063_v8 }
0x30bd   :  { %v4562_v19 = vadd.f32 %v4561_v51, %v4560_v45  ;;  %v5074_v45 = vmax.f32 %v5073_v17, 1e-24  ;;  %v8751_v17 = vld [vmem:[%s20749_s9 + $0x68] sm:$0xff] }
0x30be   :  { %v6559_v16 = vrot.slane %v6558_v3, 4  ;;  %v3068_v60 = vrot.slane %v3067_v10, 2  ;;  %15411 = vrsqrt.f32 %v573_v30 }
0x30bf   :  { %v3561_v33 = vpop.xlane.xlu1 %3560  ;;  %15413 = vrsqrt.f32 %v1084_v59 }
0x30c0   :  { %v3562_v5 = vadd.f32 %v3561_v33, %v3559_v21  ;;  %v6560_v7 = vadd.f32 %v6559_v16, %v6558_v3  ;;  %v3069_v22 = vadd.f32 %v3068_v60, %v3067_v10  ;;  %v2573_v21 = vrot.slane %v2572_v31, 1  ;;  %v8046_v43 = vpop.xlane.xlu0 %8045 }
0x30c1   :  { %15415 = vrsqrt.f32 %v1581_v48  ;;  %v2078_v33 = vmax.f32 %v2077_v46, 1e-24  ;;  %v6066_v60 = vrot.slane %v6065_v61, 1 }
0x30c2   :  { %v3563_v25 = vrot.slane %v3562_v5, 4  ;;  %v6561_v1 = vrot.slane %v6560_v7, 2  ;;  %v3070_v9 = vrot.slane %v3069_v22, 1 }
0x30c3   :  { %v7054_v11 = vpop.xlane.xlu1 %7053  ;;  %15417 = vrsqrt.f32 %v2078_v33 }
0x30c4   :  { %v3564_v53 = vadd.f32 %v3563_v25, %v3562_v5  ;;  %v7055_v58 = vadd.f32 %v7054_v11, %v7052_v37  ;;  %v2574_v37 = vadd.f32 %v2573_v21, %v2572_v31  ;;  %v6562_v20 = vadd.f32 %v6561_v1, %v6560_v7 }
0x30c5   :  { %v3071_v27 = vadd.f32 %v3070_v9, %v3069_v22  ;;  %v4563_v31 = vmax.f32 %v4562_v19, 1e-24  ;;  %v5570_v7 = vadd.f32 %v5569_v35, %v5568_v14 }
0x30c6   :  { %v3565_v26 = vrot.slane %v3564_v53, 2  ;;  %v7056_v42 = vrot.slane %v7055_v58, 4  ;;  %v2575_v13 = vmax.f32 %v2574_v37, 1e-24  ;;  %v6563_v41 = vrot.slane %v6562_v20, 1 }
0x30c7   :  { %v4058_v32 = vpop.xlane.xlu1 %4057  ;;  %v3072_v25 = vmax.f32 %v3071_v27, 1e-24  ;;  %v5571_v59 = vmax.f32 %v5570_v7, 1e-24 }
0x30c8   :  { %v3566_v56 = vadd.f32 %v3565_v26, %v3564_v53  ;;  %v7057_v39 = vadd.f32 %v7056_v42, %v7055_v58  ;;  %v4059_v28 = vadd.f32 %v4058_v32, %v4056_v24  ;;  %v6067_v53 = vadd.f32 %v6066_v60, %v6065_v61  ;;  %v15412_v42 = vpop.eup %15411 }
0x30c9   :  { %15419 = vrsqrt.f32 %v2575_v13  ;;  %v6564_v63 = vadd.f32 %v6563_v41, %v6562_v20  ;;  %v15414_v21 = vpop.eup %15413 }
0x30ca   :  { %v3567_v4 = vrot.slane %v3566_v56, 1  ;;  %v7058_v10 = vrot.slane %v7057_v39, 2  ;;  %v4060_v3 = vrot.slane %v4059_v28, 4  ;;  %15421 = vrsqrt.f32 %v3072_v25 }
0x30cb   :  { %v7551_v40 = vpop.xlane.xlu1 %7550  ;;  %v6068_v1 = vmax.f32 %v6067_v53, 1e-24 }
0x30cc   :  { %v7059_v12 = vadd.f32 %v7058_v10, %v7057_v39  ;;  %v4061_v52 = vadd.f32 %v4060_v3, %v4059_v28  ;;  %v3568_v29 = vadd.f32 %v3567_v4, %v3566_v56  ;;  %v7552_v16 = vadd.f32 %v7551_v40, %v7549_v23  ;;  %v15416_v28 = vpop.eup %15415 }
0x30cd   :  { %v6565_v56 = vmax.f32 %v6564_v63, 1e-24  ;;  %v15418_v61 = vpop.eup %15417  ;;  %v8724_v3 = vsel %vm8494_vm6, %v15412_v42, %v15414_v21 }
0x30ce   :  { %v4062_v5 = vrot.slane %v4061_v52, 2  ;;  %v7553_v6 = vrot.slane %v7552_v16, 4  ;;  %v7060_v50 = vrot.slane %v7059_v12, 1  ;;  %v3569_v11 = vmax.f32 %v3568_v29, 1e-24 }
0x30cf   :  { %v8048_v8 = vpop.xlane.xlu1 %8047  ;;  %v8725_v20 = vsel %vm8511_vm7, %v8724_v3, %v15416_v28 }
0x30d0   :  { %v4063_v24 = vadd.f32 %v4062_v5, %v4061_v52  ;;  %v8049_v34 = vadd.f32 %v8048_v8, %v8046_v43  ;;  %v7554_v22 = vadd.f32 %v7553_v6, %v7552_v16  ;;  %v7061_v30 = vadd.f32 %v7060_v50, %v7059_v12  ;;  %v8750_v43 = vld [vmem:[%s20749_s9 + $0x60] sm:$0xff]  ;;  %v8752_v50 = vld [vmem:[%s20749_s9 + $0x70] sm:$0xff] }
0x30d1   :  { %15423 = vrsqrt.f32 %v3569_v11  ;;  %v8726_v27 = vsel %vm8528_vm8, %v8725_v20, %v15418_v61  ;;  %v20599_v6 = vpack.c.bf16 %v8751_v17, %v8750_v43 }
0x30d2   :  { %v4064_v58 = vrot.slane %v4063_v24, 1  ;;  %v8050_v62 = vrot.slane %v8049_v34, 4  ;;  %v7555_v38 = vrot.slane %v7554_v22, 2  ;;  %15425 = vrsqrt.f32 %v4563_v31 }
0x30d3   :  { %15427 = vrsqrt.f32 %v5074_v45  ;;  %v7062_v48 = vmax.f32 %v7061_v30, 1e-24  ;;  %v15420_v10 = vpop.eup %15419  ;;  %15057 = vmatprep.subr.bf16.mxu0 %v20599_v6 }
0x30d4   :  { %v4065_v18 = vadd.f32 %v4064_v58, %v4063_v24  ;;  %v8051_v26 = vadd.f32 %v8050_v62, %v8049_v34  ;;  %v7556_v49 = vadd.f32 %v7555_v38, %v7554_v22  ;;  %v15422_v0 = vpop.eup %15421  ;;  %v8727_v52 = vsel %vm267_vm4, %v8726_v27, %v15420_v10  ;;  %v8753_v24 = vld [vmem:[%s20749_s9 + $0x78] sm:$0xff]  ;;  %15059 = vmatpush3.bf16.msra.mxu0 %v20599_v6 }
0x30d5   :  { %v8728_v35 = vsel %vm8561_vm9, %v8727_v52, %v15422_v0  ;;  %v15060_v7 = vpack.c.bf16 %v8753_v24, %v8752_v50 }
0x30d6   :  { %v4066_v32 = vmax.f32 %v4065_v18, 1e-24  ;;  %v8052_v9 = vrot.slane %v8051_v26, 2  ;;  %v7557_v39 = vrot.slane %v7556_v49, 1 }
0x30d7   :  { %15061 = vmatprep.subr.bf16.mxu0 %v15060_v7 }
0x30d8   :  { %15429 = vrsqrt.f32 %v4066_v32  ;;  %v8053_v23 = vadd.f32 %v8052_v9, %v8051_v26  ;;  %v7558_v51 = vadd.f32 %v7557_v39, %v7556_v49  ;;  %15063 = vmatpush3.bf16.msra.mxu0 %v15060_v7 }
0x30d9   :  { %15431 = vrsqrt.f32 %v5571_v59  ;;  %15097 = vmatprep.subr.bf16.mxu0 %v20531_v54 }
0x30da   :  { %15433 = vrsqrt.f32 %v6068_v1  ;;  %v8054_v46 = vrot.slane %v8053_v23, 1  ;;  %v7559_v14 = vmax.f32 %v7558_v51, 1e-24 }
0x30db   :  { %15435 = vrsqrt.f32 %v6565_v56  ;;  %v15424_v40 = vpop.eup %15423 }
0x30dc   :  { %15437 = vrsqrt.f32 %v7062_v48  ;;  %v8055_v4 = vadd.f32 %v8054_v46, %v8053_v23  ;;  %v15426_v12 = vpop.eup %15425  ;;  %v8729_v16 = vsel %vm8578_vm10, %v8728_v35, %v15424_v40 }
0x30dd   :  { %15439 = vrsqrt.f32 %v7559_v14  ;;  %v15428_v19 = vpop.eup %15427 }
0x30de   :  { %v8056_v37 = vmax.f32 %v8055_v4, 1e-24  ;;  %v8731_v41 = vsel %vm8494_vm6, %v15426_v12, %v15428_v19 }
0x30e0   :  { %15441 = vrsqrt.f32 %v8056_v37 }
0x30e2   :  { %v15430_v29 = vpop.eup %15429 }
0x30e3   :  { %v15432_v33 = vpop.eup %15431  ;;  %v8730_v60 = vsel %vm8595_vm11, %v8729_v16, %v15430_v29 }
0x30e4   :  { %v15434_v5 = vpop.eup %15433  ;;  %9613 = vperm.xlu0 %15142, %v8730_v60   ;;  %v8732_v25 = vsel %vm8511_vm7, %v8731_v41, %v15432_v33  ;;  %v9848_v41 = vld [vmem:[%s20748_s8 + $0x10] sm:$0xff] }
0x30e5   :  { %v15436_v13 = vpop.eup %15435  ;;  %v8733_v31 = vsel %vm8528_vm8, %v8732_v25, %v15434_v5 }
0x30e6   :  { %v15438_v8 = vpop.eup %15437  ;;  %v8734_v11 = vsel %vm267_vm4, %v8733_v31, %v15436_v13  ;;  %v9850_v31 = vld [vmem:[%s20748_s8 + $0x20] sm:$0xff] }
0x30e7   :  { %v15440_v34 = vpop.eup %15439  ;;  %v8735_v22 = vsel %vm8561_vm9, %v8734_v11, %v15438_v8 }
0x30e8   :  { %v8736_v58 = vsel %vm8578_vm10, %v8735_v22, %v15440_v34  ;;  %v9852_v22 = vld [vmem:[%s20748_s8 + $0x30] sm:$0xff] }
0x30ea   :  { %v15442_v53 = vpop.eup %15441 }
0x30eb   :  { %v8737_v62 = vsel %vm8595_vm11, %v8736_v58, %v15442_v53  ;;  %v9853_v53 = vld [vmem:[%s20748_s8 + $0x38] sm:$0xff] }
0x30ec   :  { %9618 = vperm.xlu1 %15143, %v8737_v62   ;;  %v15076_v58 = vpack.c.bf16 %v9853_v53, %v9852_v22  ;;  %v9854_v62 = vld [vmem:[%s20748_s8 + $0x40] sm:$0xff] }
0x30f8   :  { %v11824_v45 = vpop.f32.mrb[68].mxu0 }
0x30f9   :  { %v11825_v63 = vpop.f32.mrb[69].mxu0 }
0x30fa   :  { %v11826_v38 = vadd.f32 %v11825_v63, %v11824_v45  ;;  %v11862_v18 = vpop.f32.mrb[80].mxu1  ;;  %v9855_v45 = vld [vmem:[%s20748_s8 + $0x48] sm:$0xff] }
0x30fb   :  { %v11863_v42 = vpop.f32.mrb[81].mxu1  ;;  %v15080_v63 = vpack.c.bf16 %v9855_v45, %v9854_v62 }
0x30fc   :  { %v9383_v30 = vadd.f32 %v11826_v38, %v20518_v2  ;;  %v11897_v26 = vpop.f32.mrb[70].mxu0  ;;  %v11864_v49 = vadd.f32 %v11863_v42, %v11862_v18  ;;  %v9856_v38 = vld [vmem:[%s20748_s8 + $0x50] sm:$0xff]  ;;  %v9859_v42 = vld [vmem:[%s20748_s8 + $0x68] sm:$0xff] }
0x30fd   :  { %v11898_v59 = vpop.f32.mrb[71].mxu0 }
0x30fe   :  { %v11899_v21 = vadd.f32 %v11898_v59, %v11897_v26  ;;  %v9458_v1 = vadd.f32 %v11864_v49, %v9383_v30  ;;  %v11935_v9 = vpop.f32.mrb[82].mxu1  ;;  %v9857_v30 = vld [vmem:[%s20748_s8 + $0x58] sm:$0xff]  ;;  %v9858_v26 = vld [vmem:[%s20748_s8 + $0x60] sm:$0xff]  ;;  %v9860_v59 = vld [vmem:[%s20748_s8 + $0x70] sm:$0xff] }
0x30ff   :  { %v11936_v56 = vpop.f32.mrb[83].mxu1  ;;  %v15084_v18 = vpack.c.bf16 %v9857_v30, %v9856_v38  ;;  %v15088_v49 = vpack.c.bf16 %v9859_v42, %v9858_v26 }
0x3100   :  { %v9528_v32 = vadd.f32 %v11899_v21, %v20565_v47  ;;  %v11937_v39 = vadd.f32 %v11936_v56, %v11935_v9  ;;  %v9861_v21 = vld [vmem:[%s20748_s8 + $0x78] sm:$0xff] }
0x3102   :  { %v9603_v28 = vadd.f32 %v11937_v39, %v9528_v32 }
0x3103   :  { %v11900_v48 = vpop.f32.mrb[72].mxu0 }
0x3104   :  { %v11901_v23 = vpop.f32.mrb[73].mxu0 }
0x3105   :  { %v11902_v51 = vadd.f32 %v11901_v23, %v11900_v48 }
0x3107   :  { %v9533_v46 = vadd.f32 %v11902_v51, %v9458_v1  ;;  %v15092_v1 = vpack.c.bf16 %v9861_v21, %v9860_v59 }
0x3108   :  { %v11938_v14 = vpop.f32.mrb[84].mxu1 }
0x3109   :  { %v11939_v61 = vpop.f32.mrb[85].mxu1 }
0x310a   :  { %v11940_v2 = vadd.f32 %v11939_v61, %v11938_v14  ;;  %v10956_v14 = vld [vmem:[%s20752_s12] ss:$0 sm:$0xff] }
0x310c   :  { %v9608_v4 = vadd.f32 %v11940_v2, %v9533_v46 }
0x3163   :  { %v9614_v10 = vpop.permute.xlu0 %9613 }
0x3164   :  { %v20618_v3 = vmul.f32 %v9614_v10, %v9603_v28  ;;  %v10955_v28 = vld [vmem:[%s20751_s11] ss:$0 sm:$0xff] }
0x3166   :  { %13353 = vmatprep.mubr.f32.mxu0 %v20618_v3  ;;  %v9625_v47 = vmul.f32 %v20618_v3, %v20618_v3 }
0x316b   :  { %v9619_v0 = vpop.permute.xlu1 %9618 }
0x316c   :  { %v20621_v37 = vmul.f32 %v9619_v0, %v9608_v4 }
0x316e   :  { %13354 = vmatmul.mubr.f32.vlgmr.msra.gmra.mrb[74].mxu0 %v20621_v37  ;;  %v9626_v20 = vmul.f32 %v20621_v37, %v20621_v37 }
0x316f   :  { %13356 = vmatprep.mubr.f32.mxu0 %v9625_v47  ;;  %15099 = vmatpush3.bf16.msra.mxu0 %v20531_v54  ;;  %v20644_v54 = vld [vmem:[%s20750_s10] sm:$0xff] }
0x3170   :  { %15101 = vmatprep.subr.bf16.mxu0 %v20536_v15  ;;  %13359 = vmatprep.subr.mxu1 %v20644_v54 }
0x3171   :  { %13360 = vmatpush3.msra.mxu1 %v20644_v54 }
0x3172   :  { %13357 = vmatmul.mubr.f32.gmra.mrb[76].mxu0 %v9626_v20 }
0x3173   :  { %15103 = vmatpush3.bf16.msra.mxu0 %v20536_v15  ;;  %v9846_v15 = vld [vmem:[%s20748_s8] sm:$0xff] }
0x3174   :  { %15105 = vmatprep.subr.bf16.mxu0 %v20547_v57 }
0x3177   :  { %15107 = vmatpush3.bf16.msra.mxu0 %v20547_v57  ;;  %v9847_v57 = vld [vmem:[%s20748_s8 + $0x8] sm:$0xff] }
0x3178   :  { %15109 = vmatprep.subr.bf16.mxu0 %v20557_v36 }
0x317b   :  { %15111 = vmatpush3.bf16.msra.mxu0 %v20557_v36  ;;  %v15064_v36 = vpack.c.bf16 %v9847_v57, %v9846_v15 }
0x317c   :  { %15113 = vmatprep.subr.bf16.mxu0 %v20569_v55 }
0x317d   :  { %15065 = vmatprep.subr.bf16.mxu1 %v15064_v36 }
0x317f   :  { %15115 = vmatpush3.bf16.msra.mxu0 %v20569_v55 }
0x3180   :  { %15117 = vmatprep.subr.bf16.mxu0 %v20579_v44 }
0x3183   :  { %15119 = vmatpush3.bf16.msra.mxu0 %v20579_v44 }
0x3184   :  { %15121 = vmatprep.subr.bf16.mxu0 %v20599_v6 }
0x3187   :  { %15123 = vmatpush3.bf16.msra.mxu0 %v20599_v6  ;;  %v9849_v6 = vld [vmem:[%s20748_s8 + $0x18] sm:$0xff] }
0x3188   :  { %15125 = vmatprep.subr.bf16.mxu0 %v15060_v7  ;;  %v15068_v24 = vpack.c.bf16 %v9849_v6, %v9848_v41 }
0x318b   :  { %15127 = vmatpush3.bf16.msra.mxu0 %v15060_v7  ;;  %v9851_v7 = vld [vmem:[%s20748_s8 + $0x28] sm:$0xff] }
0x318c   :  { %v15072_v11 = vpack.c.bf16 %v9851_v7, %v9850_v31  ;;  %v10962_v31 = vld [vmem:[%s20754_s14] ss:$0 sm:$0xff] }
0x3241   :  { %v13355_v55 = vpop.f32.mrb[74].mxu0 }
0x3242   :  { %v9713_v44 = vmul.f32 0.0625, %v13355_v55  ;;  %v9693_v40 = vpop.f32.mrb[75].mxu0 }
0x3243   :  { %v9712_v27 = vmul.f32 0.0625, %v9693_v40 }
0x3244   :  { %v9717_v52 = vmul.f32 %v9713_v44, %v9713_v44 }
0x3245   :  { %v13358_v12 = vpop.f32.mrb[76].mxu0  ;;  %v9716_v29 = vmul.f32 %v9712_v27, %v9712_v27 }
0x3246   :  { %v9715_v19 = vmul.f32 0.0625, %v13358_v12  ;;  %v9703_v35 = vpop.f32.mrb[77].mxu0 }
0x3247   :  { %v9714_v16 = vmul.f32 0.0625, %v9703_v35 }
0x3248   :  { %v9719_v33 = vsub.f32 %v9715_v19, %v9717_v52 }
0x3249   :  { %v9718_v60 = vsub.f32 %v9714_v16, %v9716_v29 }
0x324a   :  { %v9721_v5 = vmax.f32 %v9719_v33, 0.0 }
0x324b   :  { %v9720_v43 = vmax.f32 %v9718_v60, 0.0 }
0x324c   :  { %v9723_v17 = vadd.f32 1e-05, %v9721_v5 }
0x324d   :  { %v9722_v13 = vadd.f32 1e-05, %v9720_v43 }
0x324e   :  { %15443 = vrsqrt.f32 %v9723_v17 }
0x324f   :  { %15445 = vrsqrt.f32 %v9722_v13 }
0x3258   :  { %v15444_v8 = vpop.eup %15443 }
0x3259   :  { %v15446_v25 = vpop.eup %15445  ;;  %v9727_v50 = vmul.f32 %v15444_v8, %v9713_v44 }
0x325a   :  { %13361 = vmatprep.mubr.msk.f32.mxu1 %vm9728_vm12, %v15446_v25  ;;  %v9726_v34 = vmul.f32 %v15446_v25, %v9712_v27  ;;  %v10961_v25 = vld [vmem:[%s20753_s13] ss:$0 sm:$0xff]  ;;  %s15504_s13 = smov [#allocation2]  }
0x325b   :  { %13362 = vmatmul.mubr.msk.f32.vlgmr.msra.gmra.mrb[86].mxu1 %vm9728_vm12, %v15444_v8  ;;  %s10180_s2 = sshll.u32 %s15504_s13, 4  ;;  %s10181_s2 = int_to_ptr.vmem [resolvable:$true] %s10180_s2 }
0x325c   :  { %13364 = vmatprep.mubr.msk.f32.mxu1 %vm9728_vm12, %v9726_v34  ;;  %15067 = vmatpush3.bf16.msra.mxu1 %v15064_v36  ;;  %s15474_s14 = scalar_lea.vmem %s10181_s2, 256  ;;  %p15479_p1 = scmp.lt.s32.totalorder %s10181_s2, %s10181_s2 }
0x325d   :  { %15069 = vmatprep.subr.bf16.mxu1 %v15068_v24  ;;  %p15475_p0 = scmp.ne.s32.totalorder %s10181_s2, %s15474_s14  ;;  %p15480_p2 = scmp.lt.s32.totalorder %s15474_s14, %s15474_s14 }
0x325f   :  { %13365 = vmatmul.mubr.msk.f32.gmra.mrb[88].mxu1 %vm9728_vm12, %v9727_v50  ;;  %p15481_p3 = por %p15480_p2, %p15479_p1 }
0x3260   :  { %15071 = vmatpush3.bf16.msra.mxu1 %v15068_v24 }
0x3261   :  { %15073 = vmatprep.subr.bf16.mxu1 %v15072_v11  ;;  %p15482_p4 = pnand %p15481_p3, %p15475_p0 }
0x3264   :  { %15075 = vmatpush3.bf16.msra.mxu1 %v15072_v11 }
0x3265   :  { %15077 = vmatprep.subr.bf16.mxu1 %v15076_v58 }
0x3268   :  { %15079 = vmatpush3.bf16.msra.mxu1 %v15076_v58 }
0x3269   :  { %15081 = vmatprep.subr.bf16.mxu1 %v15080_v63 }
0x326c   :  { %15083 = vmatpush3.bf16.msra.mxu1 %v15080_v63 }
0x326d   :  { %15085 = vmatprep.subr.bf16.mxu1 %v15084_v18 }
0x3270   :  { %15087 = vmatpush3.bf16.msra.mxu1 %v15084_v18 }
0x3271   :  { %15089 = vmatprep.subr.bf16.mxu1 %v15088_v49 }
0x3274   :  { %15091 = vmatpush3.bf16.msra.mxu1 %v15088_v49 }
0x3275   :  { %15093 = vmatprep.subr.bf16.mxu1 %v15092_v1 }
0x3278   :  { %15095 = vmatpush3.bf16.msra.mxu1 %v15092_v1 }
0x3279   :  { %13440 = vmatprep.subr.mxu1 %v20644_v54 }
0x332e   :  { %v13363_v32 = vpop.f32.mrb[86].mxu1 }
0x332f   :  { %v9807_v9 = vpop.f32.mrb[87].mxu1  ;;  %v9827_v56 = vmul.f32 %v13363_v32, %v20621_v37 }
0x3330   :  { %v9826_v39 = vmul.f32 %v9807_v9, %v20618_v3 }
0x3332   :  { %v13366_v48 = vpop.f32.mrb[88].mxu1 }
0x3333   :  { %v9829_v23 = vsub.f32 %v9827_v56, %v13366_v48  ;;  %v9817_v51 = vpop.f32.mrb[89].mxu1 }
0x3334   :  { %v9828_v46 = vsub.f32 %v9826_v39, %v9817_v51 }
0x3335   :  { %v9837_v61 = vmul.f32 %v10955_v28, %v9829_v23 }
0x3336   :  { %v9836_v2 = vmul.f32 %v10955_v28, %v9828_v46 }
0x3337   :  { %v20711_v10 = vadd.f32 %v10956_v14, %v9837_v61 }
0x3338   :  { %v20709_v4 = vadd.f32 %v10956_v14, %v9836_v2 }
0x333a   :  { %13399 = vmatprep.mubr.f32.mxu1 %v20709_v4 }
0x333b   :  { %13400 = vmatmul.mubr.f32.vlgmr.msra.gmra.mrb[90].mxu1 %v20711_v10 }
0x333c   :  { %13441 = vmatpush3.msra.mxu1 %v20644_v54 }
0x340e   :  { %v13401_v3 = vpop.f32.mrb[90].mxu1 }
0x340f   :  { %v9928_v0 = vpop.f32.mrb[91].mxu1  ;;  %v9940_v47 = vmul.f32 %v13401_v3, %v13401_v3 }
0x3410   :  { %v9939_v37 = vmul.f32 %v9928_v0, %v9928_v0  ;;  %13434 = vmatprep.mubr.f32.mxu0 %v9928_v0 }
0x3411   :  { %13435 = vmatmul.mubr.f32.vlgmr.msra.gmra.mrb[78].mxu0 %v13401_v3 }
0x3412   :  { %13437 = vmatprep.mubr.f32.mxu0 %v9939_v37 }
0x3415   :  { %13438 = vmatmul.mubr.f32.gmra.mrb[80].mxu0 %v9940_v47 }
0x34e4   :  { %v13436_v20 = vpop.f32.mrb[78].mxu0 }
0x34e5   :  { %v10027_v15 = vmul.f32 0.0625, %v13436_v20  ;;  %v10007_v57 = vpop.f32.mrb[79].mxu0 }
0x34e6   :  { %v10026_v36 = vmul.f32 0.0625, %v10007_v57 }
0x34e7   :  { %v10031_v44 = vmul.f32 %v10027_v15, %v10027_v15 }
0x34e8   :  { %v13439_v55 = vpop.f32.mrb[80].mxu0  ;;  %v10030_v12 = vmul.f32 %v10026_v36, %v10026_v36 }
0x34e9   :  { %v10029_v40 = vmul.f32 0.0625, %v13439_v55  ;;  %v10017_v27 = vpop.f32.mrb[81].mxu0 }
0x34ea   :  { %v10028_v52 = vmul.f32 0.0625, %v10017_v27 }
0x34eb   :  { %v10033_v19 = vsub.f32 %v10029_v40, %v10031_v44 }
0x34ec   :  { %v10032_v54 = vsub.f32 %v10028_v52, %v10030_v12 }
0x34ed   :  { %v10035_v35 = vmax.f32 %v10033_v19, 0.0 }
0x34ee   :  { %v10034_v29 = vmax.f32 %v10032_v54, 0.0 }
0x34ef   :  { %v10037_v16 = vadd.f32 1e-05, %v10035_v35 }
0x34f0   :  { %v10036_v33 = vadd.f32 1e-05, %v10034_v29 }
0x34f1   :  { %15447 = vrsqrt.f32 %v10037_v16 }
0x34f2   :  { %15449 = vrsqrt.f32 %v10036_v33 }
0x34fb   :  { %v15448_v60 = vpop.eup %15447 }
0x34fc   :  { %v15450_v5 = vpop.eup %15449  ;;  %v10041_v43 = vmul.f32 %v15448_v60, %v10027_v15 }
0x34fd   :  { %13442 = vmatprep.mubr.msk.f32.mxu1 %vm9728_vm12, %v15450_v5  ;;  %v10040_v17 = vmul.f32 %v15450_v5, %v10026_v36 }
0x34fe   :  { %13443 = vmatmul.mubr.msk.f32.vlgmr.msra.gmra.mrb[92].mxu1 %vm9728_vm12, %v15448_v60 }
0x34ff   :  { %13445 = vmatprep.mubr.msk.f32.mxu1 %vm9728_vm12, %v10040_v17 }
0x3502   :  { %13446 = vmatmul.mubr.msk.f32.gmra.mrb[94].mxu1 %vm9728_vm12, %v10041_v43 }
0x35d1   :  { %v13444_v13 = vpop.f32.mrb[92].mxu1 }
0x35d2   :  { %v10140_v41 = vmul.f32 %v13444_v13, %v13401_v3  ;;  %v10120_v6 = vpop.f32.mrb[93].mxu1 }
0x35d3   :  { %v10139_v8 = vmul.f32 %v10120_v6, %v9928_v0 }
0x35d5   :  { %v13447_v50 = vpop.f32.mrb[94].mxu1 }
0x35d6   :  { %v10142_v24 = vsub.f32 %v10140_v41, %v13447_v50  ;;  %v10130_v34 = vpop.f32.mrb[95].mxu1 }
0x35d7   :  { %v10141_v7 = vsub.f32 %v10139_v8, %v10130_v34 }
0x35d8   :  { %v10150_v11 = vmul.f32 %v10961_v25, %v10142_v24 }
0x35d9   :  { %v10149_v22 = vmul.f32 %v10961_v25, %v10141_v7 }
0x35da   :  { %v10158_v53 = vadd.f32 %v10962_v31, %v10150_v11 }
0x35db   :  { %v10157_v58 = vadd.f32 %v10962_v31, %v10149_v22 }
0x35dc   :  { %v10964_v62 = vmul.f32 -1.442695, %v10158_v53 }
0x35dd   :  { %v10963_v45 = vmul.f32 -1.442695, %v10157_v58 }
0x35de   :  { %15451 = vpow2.f32 %v10964_v62 }
0x35df   :  { %15453 = vpow2.f32 %v10963_v45 }
0x35e8   :  { %v15452_v63 = vpop.eup %15451 }
0x35e9   :  { %v15454_v38 = vpop.eup %15453  ;;  %v10166_v30 = vadd.f32 1.0, %v15452_v63 }
0x35ea   :  { %v10165_v18 = vadd.f32 1.0, %v15454_v38 }
0x35eb   :  { %15455 = vrcp.f32 %v10166_v30 }
0x35ec   :  { %15457 = vrcp.f32 %v10165_v18 }
0x35f5   :  { %v15456_v26 = vpop.eup %15455 }
0x35f6   :  { %v15458_v42 = vpop.eup %15457  ;;  %v10172_v59 = vmul.f32 %v15456_v26, %v20711_v10 }
0x35f7   :  { %v10171_v49 = vmul.f32 %v15458_v42, %v20709_v4 }
0x35f8   :  { %10174 = vst [vmem:[#allocation2 + $0x8] sm:$0xff] %v10172_v59 }
0x35f9   :  { %10173 = vst [vmem:[#allocation2] sm:$0xff] %v10171_v49 }
0x35fa   :  { %15485 = shalt.err (!%p15482_p4)
}
0x35fb   :  { %s15486_s26 = scalar_lea.hbm %s20755_s15, 256 }
0x35fc   :  { %p15487_p5 = scmp.ne.s32.totalorder %s20755_s15, %s15486_s26  ;;  %p15490_p6 = scmp.lt.u32.totalorder %s15486_s26, %s20755_s15 }
0x35fe   :  { %p15492_p7 = pnand %p15490_p6, %p15487_p5 }
0x3600   :  { %15495 = shalt.err (!%p15492_p7)
}
0x3601   :  { %s15505_s5 = smov 128   ;;  %s15506_s0 = smov 8  }
0x3602   :  { %10186 = dma.vmem_to_hbm [thread:$0]  %s10181_s2, 256, %s20755_s15, [#allocation3], %s15505_s5, %s15505_s5, %s15506_s0  }
0x3603   :  { %15496 = dma.done.wait [#allocation3], 256  }
0x3604   :  { %15497 = vsyncadd [#allocation3], 4294967040 }
0x3605   :  { %10190 = vsyncpa [#allocation3], 1 }

</bundles_post_ra>
